<compile_context>
chip_gen: v5e
topology: v5e:2x2
jax: 0.10.0
libtpu: 0.0.40
codegen_flags: <defaults>
</compile_context>

<pallas_src>
import functools

import jax
import jax.numpy as jnp
from jax.experimental import pallas as pl
from jax.experimental.pallas import tpu as pltpu

EPS = 1e-5   # PyTorch BatchNorm2d default eps


# ---------------------------------------------------------------------------
# Fused BottleneckCSP kernel.  One grid step == one batch image.
# Layout: flat zero-padded pixels as rows, channels as lanes.
#   row p = lead + r*(W+2) + s  for padded pixel (r, s); interior: 1<=r<=H, 1<=s<=W
# ---------------------------------------------------------------------------
def _csp_kernel(n_blocks, add_res, q0, q, taps,
                xpad_ref, mask_ref,
                w_cv1_ref, b_cv1_ref,
                w_m1_ref, b_m1_ref, w_m2_ref, b_m2_ref,
                w_cv3_ref, b_cv3_ref, w_cv2_ref, b_cv2_ref,
                w_cv4a_ref, w_cv4b_ref, b_cv4_ref,
                o_ref, y_scr):
    f32 = jnp.float32
    xpad = xpad_ref[...]                         # (P, c1) padded image, zero ring
    mask = mask_ref[...]                         # (P, 1)  1.0 on interior pixels

    # cv1: 1x1 conv + folded BN + SiLU; re-zero the padding ring.
    y0 = jnp.dot(xpad, w_cv1_ref[...], preferred_element_type=f32) + b_cv1_ref[...]
    y_scr[...] = (y0 * jax.nn.sigmoid(y0)) * mask

    # Bottleneck chain, fully resident in VMEM.
    for blk in range(n_blocks):
        ypad = y_scr[...]                        # (P, c_), zero ring (invariant)
        h = jnp.dot(ypad, w_m1_ref[blk], preferred_element_type=f32) + b_m1_ref[blk]
        h = (h * jax.nn.sigmoid(h)) * mask       # zero ring -> 3x3 sees zero padding

        # 3x3 conv = 9 shifted contiguous-row-slice matmuls, plain (c_, c_) taps.
        acc = jnp.dot(h[q0 + taps[0]: q0 + taps[0] + q, :], w_m2_ref[blk * 9],
                      preferred_element_type=f32) + b_m2_ref[blk]
        for t in range(1, 9):
            off = taps[t]
            acc = acc + jnp.dot(h[q0 + off: q0 + off + q, :], w_m2_ref[blk * 9 + t],
                                preferred_element_type=f32)
        h2 = acc * jax.nn.sigmoid(acc)           # SiLU
        if add_res:
            h2 = h2 + ypad[q0: q0 + q, :]        # shortcut
        # Write back the interior slab; ring / alignment rows stay zero.
        y_scr[pl.ds(q0, q), :] = h2 * mask[q0: q0 + q, :]

    # Tail: cv3 / cv2 (BN(cat) folded), LeakyReLU(0.1), cv4 (+BN) + SiLU.
    # (Computed on the padding rows too; the wrapper crops them away.)
    y = y_scr[...]
    a1 = jnp.dot(y, w_cv3_ref[...], preferred_element_type=f32) + b_cv3_ref[...]
    a2 = jnp.dot(xpad, w_cv2_ref[...], preferred_element_type=f32) + b_cv2_ref[...]
    a1 = jnp.where(a1 > 0, a1, 0.1 * a1)
    a2 = jnp.where(a2 > 0, a2, 0.1 * a2)
    z = (jnp.dot(a1, w_cv4a_ref[...], preferred_element_type=f32)
         + jnp.dot(a2, w_cv4b_ref[...], preferred_element_type=f32)
         + b_cv4_ref[...])
    o_ref[...] = (z * jax.nn.sigmoid(z)).astype(o_ref.dtype)


# ---------------------------------------------------------------------------
# Wrapper (jit-able): lay out the padded image and call the fused kernel.
# ---------------------------------------------------------------------------
def bottleneck_csp_pallas(x_nchw, p, n, shortcut=True):
    B, c1, H, W = x_nchw.shape
    c_ = p["w_cv1"].shape[1]
    c2 = p["w_cv4a"].shape[1]
    Wp = W + 2
    nat = (H + 2) * Wp                            # rows of the padded image
    lead = (-(Wp + 1)) % 8                        # align first interior row to 8
    P = ((lead + nat + 2 + 7) // 8) * 8           # +2: headroom for the widest tap
    q0 = lead + Wp + 1                            # flat row of padded pixel (1, 1)
    q = H * Wp                                    # row slab covering all interiors
    taps = tuple((dh - 1) * Wp + (dw - 1) for dh in range(3) for dw in range(3))

    # Zero-pad spatially (autopad k//2 = 1), flatten pixels into rows.
    xh = jnp.transpose(x_nchw, (0, 2, 3, 1))                       # NHWC
    xp = jnp.pad(xh, ((0, 0), (1, 1), (1, 1), (0, 0))).reshape(B, nat, c1)
    xp = jnp.pad(xp, ((0, 0), (lead, P - lead - nat), (0, 0))).reshape(B * P, c1)

    # 0/1 interior mask over flat padded rows (shape-only; constant-folded by jit).
    rr = (jnp.arange(P) - lead) // Wp
    ss = (jnp.arange(P) - lead) % Wp
    mask = ((rr >= 1) & (rr <= H) & (ss >= 1) & (ss <= W)
            ).astype(jnp.float32).reshape(P, 1)

    kernel = functools.partial(_csp_kernel, n, shortcut, q0, q, taps)
    out = pl.pallas_call(
        kernel,
        out_shape=jax.ShapeDtypeStruct((B * P, c2), x_nchw.dtype),
        grid=(B,),
        in_specs=[
            pl.BlockSpec((P, c1), lambda b: (b, 0)),            # xpad
            pl.BlockSpec((P, 1), lambda b: (0, 0)),             # interior mask
            pl.BlockSpec((c1, c_), lambda b: (0, 0)),           # w_cv1
            pl.BlockSpec((1, c_), lambda b: (0, 0)),            # b_cv1
            pl.BlockSpec((n, c_, c_), lambda b: (0, 0, 0)),     # w_m1
            pl.BlockSpec((n, 1, c_), lambda b: (0, 0, 0)),      # b_m1
            pl.BlockSpec((9 * n, c_, c_), lambda b: (0, 0, 0)),  # w_m2 (9 taps/block)
            pl.BlockSpec((n, 1, c_), lambda b: (0, 0, 0)),      # b_m2
            pl.BlockSpec((c_, c_), lambda b: (0, 0)),           # w_cv3
            pl.BlockSpec((1, c_), lambda b: (0, 0)),            # b_cv3
            pl.BlockSpec((c1, c_), lambda b: (0, 0)),           # w_cv2
            pl.BlockSpec((1, c_), lambda b: (0, 0)),            # b_cv2
            pl.BlockSpec((c_, c2), lambda b: (0, 0)),           # w_cv4a
            pl.BlockSpec((c_, c2), lambda b: (0, 0)),           # w_cv4b
            pl.BlockSpec((1, c2), lambda b: (0, 0)),            # b_cv4
        ],
        out_specs=pl.BlockSpec((P, c2), lambda b: (b, 0)),
        scratch_shapes=[pltpu.VMEM((P, c_), jnp.float32)],
        compiler_params=pltpu.CompilerParams(
            dimension_semantics=("parallel",),
            vmem_limit_bytes=32 * 1024 * 1024),
    )(xp, mask, p["w_cv1"], p["b_cv1"], p["w_m1"], p["b_m1"], p["w_m2"], p["b_m2"],
      p["w_cv3"], p["b_cv3"], p["w_cv2"], p["b_cv2"],
      p["w_cv4a"], p["w_cv4b"], p["b_cv4"])

    out = out.reshape(B, P, c2)[:, lead:lead + nat, :].reshape(B, H + 2, Wp, c2)
    return jnp.transpose(out[:, 1:H + 1, 1:W + 1, :], (0, 3, 1, 2))


# ---------------------------------------------------------------------------
# Parameter setup (deterministic, synthetic) and host-side BN folding (once).
# ---------------------------------------------------------------------------
def _bn_init(key, c):
    k1, k2, k3, k4 = jax.random.split(key, 4)
    gamma = jax.random.uniform(k1, (c,), minval=0.5, maxval=1.5)
    beta = jax.random.normal(k2, (c,)) * 0.1
    mean = jax.random.normal(k3, (c,)) * 0.1
    var = jax.random.uniform(k4, (c,), minval=0.5, maxval=1.5)
    return gamma, beta, mean, var


def _fold_bn(bn):
    gamma, beta, mean, var = bn
    scale = gamma / jnp.sqrt(var + EPS)
    return scale, beta - mean * scale


def init_raw_params(key, c1, c2, n=1, e=0.5):
    c_ = int(c2 * e)
    ks = iter(jax.random.split(key, 12 + 4 * n))
    raw = {
        "cv1_w": jax.random.normal(next(ks), (c_, c1, 1, 1)) * 0.1,
        "cv1_bn": _bn_init(next(ks), c_),
        "cv2_w": jax.random.normal(next(ks), (c_, c1, 1, 1)) * 0.1,
        "cv3_w": jax.random.normal(next(ks), (c_, c_, 1, 1)) * 0.1,
        "cv4_w": jax.random.normal(next(ks), (c2, 2 * c_, 1, 1)) * 0.1,
        "cv4_bn": _bn_init(next(ks), c2),
        "bn_cat": _bn_init(next(ks), 2 * c_),
        "m": [],
    }
    for _ in range(n):
        raw["m"].append({
            "w1": jax.random.normal(next(ks), (c_, c_, 1, 1)) * 0.1,
            "bn1": _bn_init(next(ks), c_),
            "w2": jax.random.normal(next(ks), (c_, c_, 3, 3)) * 0.1,
            "bn2": _bn_init(next(ks), c_),
        })
    return raw


def prepare_params(raw):
    """Fold BN into conv weights.  Called ONCE, outside jit (no W dependence)."""
    c_ = raw["cv1_w"].shape[0]
    p = {}
    s, b = _fold_bn(raw["cv1_bn"])
    p["w_cv1"] = raw["cv1_w"][:, :, 0, 0].T * s[None, :]
    p["b_cv1"] = b.reshape(1, -1)

    w1, b1, w2, b2 = [], [], [], []
    for blk in raw["m"]:
        sA, bA = _fold_bn(blk["bn1"])
        w1.append(blk["w1"][:, :, 0, 0].T * sA[None, :])
        b1.append(bA.reshape(1, -1))
        sB, bB = _fold_bn(blk["bn2"])
        for dh in range(3):
            for dw in range(3):
                w2.append(blk["w2"][:, :, dh, dw].T * sB[None, :])
        b2.append(bB.reshape(1, -1))
    p["w_m1"] = jnp.stack(w1)            # (n, c_, c_)
    p["b_m1"] = jnp.stack(b1)            # (n, 1, c_)
    p["w_m2"] = jnp.stack(w2)            # (9n, c_, c_), tap order (dh, dw)
    p["b_m2"] = jnp.stack(b2)            # (n, 1, c_)

    sc, bc = _fold_bn(raw["bn_cat"])
    s4, b4 = _fold_bn(raw["cv4_bn"])
    p["w_cv3"] = raw["cv3_w"][:, :, 0, 0].T * sc[None, :c_]
    p["b_cv3"] = bc[:c_].reshape(1, -1)
    p["w_cv2"] = raw["cv2_w"][:, :, 0, 0].T * sc[None, c_:]
    p["b_cv2"] = bc[c_:].reshape(1, -1)
    w4 = raw["cv4_w"][:, :, 0, 0]        # (c2, 2c_)
    p["w_cv4a"] = w4[:, :c_].T * s4[None, :]
    p["w_cv4b"] = w4[:, c_:].T * s4[None, :]
    p["b_cv4"] = b4.reshape(1, -1)
    return p


# ---------------------------------------------------------------------------
# Pure-JAX reference (NCHW, lax.conv) for correctness checking.
# ---------------------------------------------------------------------------
def bottleneck_csp_ref(x, raw, shortcut=True):
    def conv(v, w):
        k = w.shape[-1]
        return jax.lax.conv_general_dilated(
            v, w, (1, 1), [(k // 2, k // 2)] * 2,
            dimension_numbers=("NCHW", "OIHW", "NCHW"),
            precision=jax.lax.Precision.HIGHEST)

    def bn(v, pp):
        g, b, m, var = pp
        return (v - m[None, :, None, None]) * (g / jnp.sqrt(var + EPS))[None, :, None, None] \
            + b[None, :, None, None]

    silu = lambda v: v * jax.nn.sigmoid(v)
    leaky = lambda v: jnp.where(v > 0, v, 0.1 * v)

    y = silu(bn(conv(x, raw["cv1_w"]), raw["cv1_bn"]))
    for blk in raw["m"]:
        h = silu(bn(conv(y, blk["w1"]), blk["bn1"]))
        h = silu(bn(conv(h, blk["w2"]), blk["bn2"]))
        y = y + h if shortcut else h
    y1 = conv(y, raw["cv3_w"])
    y2 = conv(x, raw["cv2_w"])
    ya = leaky(bn(jnp.concatenate([y1, y2], axis=1), raw["bn_cat"]))
    return silu(bn(conv(ya, raw["cv4_w"]), raw["cv4_bn"]))


# ---------------------------------------------------------------------------
if __name__ == "__main__":
    key = jax.random.PRNGKey(0)
    kx, kp = jax.random.split(key)

    B, c1, c2, H, W = 2, 8, 8, 16, 16
    n, shortcut = 1, True

    x = jax.random.normal(kx, (B, c1, H, W), dtype=jnp.float32)
    raw = init_raw_params(kp, c1, c2, n=n, e=0.5)
    params = prepare_params(raw)            # BN folding done once, outside jit

    fwd = jax.jit(functools.partial(bottleneck_csp_pallas, n=n, shortcut=shortcut))
    out = jax.block_until_ready(fwd(x, params))

    ref = jax.block_until_ready(bottleneck_csp_ref(x, raw, shortcut=shortcut))

    assert out.shape == (B, c2, H, W), out.shape
    # Tolerance loosened vs. f32-HIGHEST: kernel dots use default MXU precision.
    err = jnp.max(jnp.abs(out - ref))
    assert jnp.allclose(out, ref, atol=2e-2, rtol=2e-2), f"max abs err {err}"

    print("KERNEL_OK")
</pallas_src>

<mosaic_0001>
module attributes {stable_mosaic.version = 11 : i64} {
  func.func @_csp_kernel(%arg0: i32, %arg1: memref<336x8xf32, #tpu.memory_space<vmem>>, %arg2: memref<336x1xf32, #tpu.memory_space<vmem>>, %arg3: memref<8x4xf32, #tpu.memory_space<vmem>>, %arg4: memref<1x4xf32, #tpu.memory_space<vmem>>, %arg5: memref<1x4x4xf32, #tpu.memory_space<vmem>>, %arg6: memref<1x1x4xf32, #tpu.memory_space<vmem>>, %arg7: memref<9x4x4xf32, #tpu.memory_space<vmem>>, %arg8: memref<1x1x4xf32, #tpu.memory_space<vmem>>, %arg9: memref<4x4xf32, #tpu.memory_space<vmem>>, %arg10: memref<1x4xf32, #tpu.memory_space<vmem>>, %arg11: memref<8x4xf32, #tpu.memory_space<vmem>>, %arg12: memref<1x4xf32, #tpu.memory_space<vmem>>, %arg13: memref<4x8xf32, #tpu.memory_space<vmem>>, %arg14: memref<4x8xf32, #tpu.memory_space<vmem>>, %arg15: memref<1x8xf32, #tpu.memory_space<vmem>>, %arg16: memref<336x8xf32, #tpu.memory_space<vmem>>, %arg17: memref<336x4xf32, #tpu.memory_space<vmem>>) attributes {dimension_semantics = [#tpu.dimension_semantics<parallel>], iteration_bounds = array<i64: 2>, scalar_prefetch = 0 : i64, scratch_operands = 1 : i64, tpu.core_type = #tpu.core_type<tc>, window_params = [{transform_indices = @transform_0, window_bounds = array<i64: 336, 8>}, {pipeline_mode = #tpu.pipeline_mode<synchronous>, transform_indices = @transform_1, window_bounds = array<i64: 336, 1>}, {pipeline_mode = #tpu.pipeline_mode<synchronous>, transform_indices = @transform_2, window_bounds = array<i64: 8, 4>}, {pipeline_mode = #tpu.pipeline_mode<synchronous>, transform_indices = @transform_3, window_bounds = array<i64: 1, 4>}, {pipeline_mode = #tpu.pipeline_mode<synchronous>, transform_indices = @transform_4, window_bounds = array<i64: 1, 4, 4>}, {pipeline_mode = #tpu.pipeline_mode<synchronous>, transform_indices = @transform_5, window_bounds = array<i64: 1, 1, 4>}, {pipeline_mode = #tpu.pipeline_mode<synchronous>, transform_indices = @transform_6, window_bounds = array<i64: 9, 4, 4>}, {pipeline_mode = #tpu.pipeline_mode<synchronous>, transform_indices = @transform_7, window_bounds = array<i64: 1, 1, 4>}, {pipeline_mode = #tpu.pipeline_mode<synchronous>, transform_indices = @transform_8, window_bounds = array<i64: 4, 4>}, {pipeline_mode = #tpu.pipeline_mode<synchronous>, transform_indices = @transform_9, window_bounds = array<i64: 1, 4>}, {pipeline_mode = #tpu.pipeline_mode<synchronous>, transform_indices = @transform_10, window_bounds = array<i64: 8, 4>}, {pipeline_mode = #tpu.pipeline_mode<synchronous>, transform_indices = @transform_11, window_bounds = array<i64: 1, 4>}, {pipeline_mode = #tpu.pipeline_mode<synchronous>, transform_indices = @transform_12, window_bounds = array<i64: 4, 8>}, {pipeline_mode = #tpu.pipeline_mode<synchronous>, transform_indices = @transform_13, window_bounds = array<i64: 4, 8>}, {pipeline_mode = #tpu.pipeline_mode<synchronous>, transform_indices = @transform_14, window_bounds = array<i64: 1, 8>}, {transform_indices = @transform_15, window_bounds = array<i64: 336, 8>}]} {
    %c0 = arith.constant 0 : index
    %c0_0 = arith.constant 0 : index
    %0 = vector.load %arg1[%c0, %c0_0] : memref<336x8xf32, #tpu.memory_space<vmem>>, vector<336x8xf32>
    %c0_1 = arith.constant 0 : index
    %c0_2 = arith.constant 0 : index
    %1 = vector.load %arg2[%c0_1, %c0_2] : memref<336x1xf32, #tpu.memory_space<vmem>>, vector<336x1xf32>
    %c0_3 = arith.constant 0 : index
    %c0_4 = arith.constant 0 : index
    %2 = vector.load %arg3[%c0_3, %c0_4] : memref<8x4xf32, #tpu.memory_space<vmem>>, vector<8x4xf32>
    %cst = arith.constant dense<0.000000e+00> : vector<336x4xf32>
    %3 = tpu.matmul %0, %2, %cst {dimension_numbers = #tpu.dot_dimension_numbers<[1], [0], [0], [1], [0, 0, 1, 1], [], []>} : vector<336x8xf32>, vector<8x4xf32>, vector<336x4xf32> -> vector<336x4xf32>
    %c0_5 = arith.constant 0 : index
    %c0_6 = arith.constant 0 : index
    %4 = vector.load %arg4[%c0_5, %c0_6] : memref<1x4xf32, #tpu.memory_space<vmem>>, vector<1x4xf32>
    %5 = vector.broadcast %4 : vector<1x4xf32> to vector<336x4xf32>
    %6 = arith.addf %3, %5 : vector<336x4xf32>
    %7 = arith.negf %6 : vector<336x4xf32>
    %8 = math.exp %7 : vector<336x4xf32>
    %cst_7 = arith.constant 1.000000e+00 : f32
    %9 = vector.broadcast %cst_7 : f32 to vector<336x4xf32>
    %10 = arith.addf %9, %8 : vector<336x4xf32>
    %11 = arith.divf %9, %10 : vector<336x4xf32>
    %12 = arith.mulf %6, %11 : vector<336x4xf32>
    %13 = vector.broadcast %1 : vector<336x1xf32> to vector<336x4xf32>
    %14 = arith.mulf %12, %13 : vector<336x4xf32>
    %c0_8 = arith.constant 0 : index
    %c0_9 = arith.constant 0 : index
    %15 = vector.load %arg17[%c0_8, %c0_9] : memref<336x4xf32, #tpu.memory_space<vmem>>, vector<336x4xf32>
    tpu.vector_store %arg17[%c0_8, %c0_9], %14 {strides = array<i32>} : memref<336x4xf32, #tpu.memory_space<vmem>>, vector<336x4xf32>,
    %c0_10 = arith.constant 0 : index
    %c0_11 = arith.constant 0 : index
    %16 = vector.load %arg17[%c0_10, %c0_11] : memref<336x4xf32, #tpu.memory_space<vmem>>, vector<336x4xf32>
    %c0_12 = arith.constant 0 : index
    %c0_13 = arith.constant 0 : index
    %c0_14 = arith.constant 0 : index
    %17 = vector.load %arg5[%c0_12, %c0_13, %c0_14] : memref<1x4x4xf32, #tpu.memory_space<vmem>>, vector<1x4x4xf32>
    %18 = vector.shape_cast %17 : vector<1x4x4xf32> to vector<4x4xf32>
    %cst_15 = arith.constant dense<0.000000e+00> : vector<336x4xf32>
    %19 = tpu.matmul %16, %18, %cst_15 {dimension_numbers = #tpu.dot_dimension_numbers<[1], [0], [0], [1], [0, 0, 1, 1], [], []>} : vector<336x4xf32>, vector<4x4xf32>, vector<336x4xf32> -> vector<336x4xf32>
    %c0_16 = arith.constant 0 : index
    %c0_17 = arith.constant 0 : index
    %c0_18 = arith.constant 0 : index
    %20 = vector.load %arg6[%c0_16, %c0_17, %c0_18] : memref<1x1x4xf32, #tpu.memory_space<vmem>>, vector<1x1x4xf32>
    %21 = vector.shape_cast %20 : vector<1x1x4xf32> to vector<1x4xf32>
    %22 = vector.broadcast %21 : vector<1x4xf32> to vector<336x4xf32>
    %23 = arith.addf %19, %22 : vector<336x4xf32>
    %24 = arith.negf %23 : vector<336x4xf32>
    %25 = math.exp %24 : vector<336x4xf32>
    %cst_19 = arith.constant 1.000000e+00 : f32
    %26 = vector.broadcast %cst_19 : f32 to vector<336x4xf32>
    %27 = arith.addf %26, %25 : vector<336x4xf32>
    %28 = arith.divf %26, %27 : vector<336x4xf32>
    %29 = arith.mulf %23, %28 : vector<336x4xf32>
    %30 = vector.broadcast %1 : vector<336x1xf32> to vector<336x4xf32>
    %31 = arith.mulf %29, %30 : vector<336x4xf32>
    %32 = vector.extract_strided_slice %31 {offsets = [5, 0], sizes = [288, 4], strides = [1, 1]} : vector<336x4xf32> to vector<288x4xf32>
    %c0_20 = arith.constant 0 : index
    %c0_21 = arith.constant 0 : index
    %c0_22 = arith.constant 0 : index
    %33 = vector.load %arg7[%c0_20, %c0_21, %c0_22] : memref<9x4x4xf32, #tpu.memory_space<vmem>>, vector<1x4x4xf32>
    %34 = vector.shape_cast %33 : vector<1x4x4xf32> to vector<4x4xf32>
    %cst_23 = arith.constant dense<0.000000e+00> : vector<288x4xf32>
    %35 = tpu.matmul %32, %34, %cst_23 {dimension_numbers = #tpu.dot_dimension_numbers<[1], [0], [0], [1], [0, 0, 1, 1], [], []>} : vector<288x4xf32>, vector<4x4xf32>, vector<288x4xf32> -> vector<288x4xf32>
    %c0_24 = arith.constant 0 : index
    %c0_25 = arith.constant 0 : index
    %c0_26 = arith.constant 0 : index
    %36 = vector.load %arg8[%c0_24, %c0_25, %c0_26] : memref<1x1x4xf32, #tpu.memory_space<vmem>>, vector<1x1x4xf32>
    %37 = vector.shape_cast %36 : vector<1x1x4xf32> to vector<1x4xf32>
    %38 = vector.broadcast %37 : vector<1x4xf32> to vector<288x4xf32>
    %39 = arith.addf %35, %38 : vector<288x4xf32>
    %40 = vector.extract_strided_slice %31 {offsets = [6, 0], sizes = [288, 4], strides = [1, 1]} : vector<336x4xf32> to vector<288x4xf32>
    %c1 = arith.constant 1 : index
    %c0_27 = arith.constant 0 : index
    %c0_28 = arith.constant 0 : index
    %41 = vector.load %arg7[%c1, %c0_27, %c0_28] : memref<9x4x4xf32, #tpu.memory_space<vmem>>, vector<1x4x4xf32>
    %42 = vector.shape_cast %41 : vector<1x4x4xf32> to vector<4x4xf32>
    %cst_29 = arith.constant dense<0.000000e+00> : vector<288x4xf32>
    %43 = tpu.matmul %40, %42, %cst_29 {dimension_numbers = #tpu.dot_dimension_numbers<[1], [0], [0], [1], [0, 0, 1, 1], [], []>} : vector<288x4xf32>, vector<4x4xf32>, vector<288x4xf32> -> vector<288x4xf32>
    %44 = arith.addf %39, %43 : vector<288x4xf32>
    %45 = vector.extract_strided_slice %31 {offsets = [7, 0], sizes = [288, 4], strides = [1, 1]} : vector<336x4xf32> to vector<288x4xf32>
    %c2 = arith.constant 2 : index
    %c0_30 = arith.constant 0 : index
    %c0_31 = arith.constant 0 : index
    %46 = vector.load %arg7[%c2, %c0_30, %c0_31] : memref<9x4x4xf32, #tpu.memory_space<vmem>>, vector<1x4x4xf32>
    %47 = vector.shape_cast %46 : vector<1x4x4xf32> to vector<4x4xf32>
    %cst_32 = arith.constant dense<0.000000e+00> : vector<288x4xf32>
    %48 = tpu.matmul %45, %47, %cst_32 {dimension_numbers = #tpu.dot_dimension_numbers<[1], [0], [0], [1], [0, 0, 1, 1], [], []>} : vector<288x4xf32>, vector<4x4xf32>, vector<288x4xf32> -> vector<288x4xf32>
    %49 = arith.addf %44, %48 : vector<288x4xf32>
    %50 = vector.extract_strided_slice %31 {offsets = [23, 0], sizes = [288, 4], strides = [1, 1]} : vector<336x4xf32> to vector<288x4xf32>
    %c3 = arith.constant 3 : index
    %c0_33 = arith.constant 0 : index
    %c0_34 = arith.constant 0 : index
    %51 = vector.load %arg7[%c3, %c0_33, %c0_34] : memref<9x4x4xf32, #tpu.memory_space<vmem>>, vector<1x4x4xf32>
    %52 = vector.shape_cast %51 : vector<1x4x4xf32> to vector<4x4xf32>
    %cst_35 = arith.constant dense<0.000000e+00> : vector<288x4xf32>
    %53 = tpu.matmul %50, %52, %cst_35 {dimension_numbers = #tpu.dot_dimension_numbers<[1], [0], [0], [1], [0, 0, 1, 1], [], []>} : vector<288x4xf32>, vector<4x4xf32>, vector<288x4xf32> -> vector<288x4xf32>
    %54 = arith.addf %49, %53 : vector<288x4xf32>
    %55 = vector.extract_strided_slice %31 {offsets = [24, 0], sizes = [288, 4], strides = [1, 1]} : vector<336x4xf32> to vector<288x4xf32>
    %c4 = arith.constant 4 : index
    %c0_36 = arith.constant 0 : index
    %c0_37 = arith.constant 0 : index
    %56 = vector.load %arg7[%c4, %c0_36, %c0_37] : memref<9x4x4xf32, #tpu.memory_space<vmem>>, vector<1x4x4xf32>
    %57 = vector.shape_cast %56 : vector<1x4x4xf32> to vector<4x4xf32>
    %cst_38 = arith.constant dense<0.000000e+00> : vector<288x4xf32>
    %58 = tpu.matmul %55, %57, %cst_38 {dimension_numbers = #tpu.dot_dimension_numbers<[1], [0], [0], [1], [0, 0, 1, 1], [], []>} : vector<288x4xf32>, vector<4x4xf32>, vector<288x4xf32> -> vector<288x4xf32>
    %59 = arith.addf %54, %58 : vector<288x4xf32>
    %60 = vector.extract_strided_slice %31 {offsets = [25, 0], sizes = [288, 4], strides = [1, 1]} : vector<336x4xf32> to vector<288x4xf32>
    %c5 = arith.constant 5 : index
    %c0_39 = arith.constant 0 : index
    %c0_40 = arith.constant 0 : index
    %61 = vector.load %arg7[%c5, %c0_39, %c0_40] : memref<9x4x4xf32, #tpu.memory_space<vmem>>, vector<1x4x4xf32>
    %62 = vector.shape_cast %61 : vector<1x4x4xf32> to vector<4x4xf32>
    %cst_41 = arith.constant dense<0.000000e+00> : vector<288x4xf32>
    %63 = tpu.matmul %60, %62, %cst_41 {dimension_numbers = #tpu.dot_dimension_numbers<[1], [0], [0], [1], [0, 0, 1, 1], [], []>} : vector<288x4xf32>, vector<4x4xf32>, vector<288x4xf32> -> vector<288x4xf32>
    %64 = arith.addf %59, %63 : vector<288x4xf32>
    %65 = vector.extract_strided_slice %31 {offsets = [41, 0], sizes = [288, 4], strides = [1, 1]} : vector<336x4xf32> to vector<288x4xf32>
    %c6 = arith.constant 6 : index
    %c0_42 = arith.constant 0 : index
    %c0_43 = arith.constant 0 : index
    %66 = vector.load %arg7[%c6, %c0_42, %c0_43] : memref<9x4x4xf32, #tpu.memory_space<vmem>>, vector<1x4x4xf32>
    %67 = vector.shape_cast %66 : vector<1x4x4xf32> to vector<4x4xf32>
    %cst_44 = arith.constant dense<0.000000e+00> : vector<288x4xf32>
    %68 = tpu.matmul %65, %67, %cst_44 {dimension_numbers = #tpu.dot_dimension_numbers<[1], [0], [0], [1], [0, 0, 1, 1], [], []>} : vector<288x4xf32>, vector<4x4xf32>, vector<288x4xf32> -> vector<288x4xf32>
    %69 = arith.addf %64, %68 : vector<288x4xf32>
    %70 = vector.extract_strided_slice %31 {offsets = [42, 0], sizes = [288, 4], strides = [1, 1]} : vector<336x4xf32> to vector<288x4xf32>
    %c7 = arith.constant 7 : index
    %c0_45 = arith.constant 0 : index
    %c0_46 = arith.constant 0 : index
    %71 = vector.load %arg7[%c7, %c0_45, %c0_46] : memref<9x4x4xf32, #tpu.memory_space<vmem>>, vector<1x4x4xf32>
    %72 = vector.shape_cast %71 : vector<1x4x4xf32> to vector<4x4xf32>
    %cst_47 = arith.constant dense<0.000000e+00> : vector<288x4xf32>
    %73 = tpu.matmul %70, %72, %cst_47 {dimension_numbers = #tpu.dot_dimension_numbers<[1], [0], [0], [1], [0, 0, 1, 1], [], []>} : vector<288x4xf32>, vector<4x4xf32>, vector<288x4xf32> -> vector<288x4xf32>
    %74 = arith.addf %69, %73 : vector<288x4xf32>
    %75 = vector.extract_strided_slice %31 {offsets = [43, 0], sizes = [288, 4], strides = [1, 1]} : vector<336x4xf32> to vector<288x4xf32>
    %c8 = arith.constant 8 : index
    %c0_48 = arith.constant 0 : index
    %c0_49 = arith.constant 0 : index
    %76 = vector.load %arg7[%c8, %c0_48, %c0_49] : memref<9x4x4xf32, #tpu.memory_space<vmem>>, vector<1x4x4xf32>
    %77 = vector.shape_cast %76 : vector<1x4x4xf32> to vector<4x4xf32>
    %cst_50 = arith.constant dense<0.000000e+00> : vector<288x4xf32>
    %78 = tpu.matmul %75, %77, %cst_50 {dimension_numbers = #tpu.dot_dimension_numbers<[1], [0], [0], [1], [0, 0, 1, 1], [], []>} : vector<288x4xf32>, vector<4x4xf32>, vector<288x4xf32> -> vector<288x4xf32>
    %79 = arith.addf %74, %78 : vector<288x4xf32>
    %80 = arith.negf %79 : vector<288x4xf32>
    %81 = math.exp %80 : vector<288x4xf32>
    %cst_51 = arith.constant 1.000000e+00 : f32
    %82 = vector.broadcast %cst_51 : f32 to vector<288x4xf32>
    %83 = arith.addf %82, %81 : vector<288x4xf32>
    %84 = arith.divf %82, %83 : vector<288x4xf32>
    %85 = arith.mulf %79, %84 : vector<288x4xf32>
    %86 = vector.extract_strided_slice %16 {offsets = [24, 0], sizes = [288, 4], strides = [1, 1]} : vector<336x4xf32> to vector<288x4xf32>
    %87 = arith.addf %85, %86 : vector<288x4xf32>
    %88 = vector.extract_strided_slice %1 {offsets = [24, 0], sizes = [288, 1], strides = [1, 1]} : vector<336x1xf32> to vector<288x1xf32>
    %89 = vector.broadcast %88 : vector<288x1xf32> to vector<288x4xf32>
    %90 = arith.mulf %87, %89 : vector<288x4xf32>
    %c24 = arith.constant 24 : index
    %c0_52 = arith.constant 0 : index
    %91 = vector.load %arg17[%c24, %c0_52] : memref<336x4xf32, #tpu.memory_space<vmem>>, vector<288x4xf32>
    tpu.vector_store %arg17[%c24, %c0_52], %90 {strides = array<i32>} : memref<336x4xf32, #tpu.memory_space<vmem>>, vector<288x4xf32>,
    %c0_53 = arith.constant 0 : index
    %c0_54 = arith.constant 0 : index
    %92 = vector.load %arg17[%c0_53, %c0_54] : memref<336x4xf32, #tpu.memory_space<vmem>>, vector<336x4xf32>
    %c0_55 = arith.constant 0 : index
    %c0_56 = arith.constant 0 : index
    %93 = vector.load %arg9[%c0_55, %c0_56] : memref<4x4xf32, #tpu.memory_space<vmem>>, vector<4x4xf32>
    %cst_57 = arith.constant dense<0.000000e+00> : vector<336x4xf32>
    %94 = tpu.matmul %92, %93, %cst_57 {dimension_numbers = #tpu.dot_dimension_numbers<[1], [0], [0], [1], [0, 0, 1, 1], [], []>} : vector<336x4xf32>, vector<4x4xf32>, vector<336x4xf32> -> vector<336x4xf32>
    %c0_58 = arith.constant 0 : index
    %c0_59 = arith.constant 0 : index
    %95 = vector.load %arg10[%c0_58, %c0_59] : memref<1x4xf32, #tpu.memory_space<vmem>>, vector<1x4xf32>
    %96 = vector.broadcast %95 : vector<1x4xf32> to vector<336x4xf32>
    %97 = arith.addf %94, %96 : vector<336x4xf32>
    %c0_60 = arith.constant 0 : index
    %c0_61 = arith.constant 0 : index
    %98 = vector.load %arg11[%c0_60, %c0_61] : memref<8x4xf32, #tpu.memory_space<vmem>>, vector<8x4xf32>
    %cst_62 = arith.constant dense<0.000000e+00> : vector<336x4xf32>
    %99 = tpu.matmul %0, %98, %cst_62 {dimension_numbers = #tpu.dot_dimension_numbers<[1], [0], [0], [1], [0, 0, 1, 1], [], []>} : vector<336x8xf32>, vector<8x4xf32>, vector<336x4xf32> -> vector<336x4xf32>
    %c0_63 = arith.constant 0 : index
    %c0_64 = arith.constant 0 : index
    %100 = vector.load %arg12[%c0_63, %c0_64] : memref<1x4xf32, #tpu.memory_space<vmem>>, vector<1x4xf32>
    %101 = vector.broadcast %100 : vector<1x4xf32> to vector<336x4xf32>
    %102 = arith.addf %99, %101 : vector<336x4xf32>
    %cst_65 = arith.constant 0.000000e+00 : f32
    %103 = vector.broadcast %cst_65 : f32 to vector<336x4xf32>
    %104 = arith.cmpf ogt, %97, %103 : vector<336x4xf32>
    %cst_66 = arith.constant 1.000000e-01 : f32
    %105 = vector.broadcast %cst_66 : f32 to vector<336x4xf32>
    %106 = arith.mulf %105, %97 : vector<336x4xf32>
    %107 = arith.select %104, %97, %106 : vector<336x4xi1>, vector<336x4xf32>
    %cst_67 = arith.constant 0.000000e+00 : f32
    %108 = vector.broadcast %cst_67 : f32 to vector<336x4xf32>
    %109 = arith.cmpf ogt, %102, %108 : vector<336x4xf32>
    %cst_68 = arith.constant 1.000000e-01 : f32
    %110 = vector.broadcast %cst_68 : f32 to vector<336x4xf32>
    %111 = arith.mulf %110, %102 : vector<336x4xf32>
    %112 = arith.select %109, %102, %111 : vector<336x4xi1>, vector<336x4xf32>
    %c0_69 = arith.constant 0 : index
    %c0_70 = arith.constant 0 : index
    %113 = vector.load %arg13[%c0_69, %c0_70] : memref<4x8xf32, #tpu.memory_space<vmem>>, vector<4x8xf32>
    %cst_71 = arith.constant dense<0.000000e+00> : vector<336x8xf32>
    %114 = tpu.matmul %107, %113, %cst_71 {dimension_numbers = #tpu.dot_dimension_numbers<[1], [0], [0], [1], [0, 0, 1, 1], [], []>} : vector<336x4xf32>, vector<4x8xf32>, vector<336x8xf32> -> vector<336x8xf32>
    %c0_72 = arith.constant 0 : index
    %c0_73 = arith.constant 0 : index
    %115 = vector.load %arg14[%c0_72, %c0_73] : memref<4x8xf32, #tpu.memory_space<vmem>>, vector<4x8xf32>
    %cst_74 = arith.constant dense<0.000000e+00> : vector<336x8xf32>
    %116 = tpu.matmul %112, %115, %cst_74 {dimension_numbers = #tpu.dot_dimension_numbers<[1], [0], [0], [1], [0, 0, 1, 1], [], []>} : vector<336x4xf32>, vector<4x8xf32>, vector<336x8xf32> -> vector<336x8xf32>
    %117 = arith.addf %114, %116 : vector<336x8xf32>
    %c0_75 = arith.constant 0 : index
    %c0_76 = arith.constant 0 : index
    %118 = vector.load %arg15[%c0_75, %c0_76] : memref<1x8xf32, #tpu.memory_space<vmem>>, vector<1x8xf32>
    %119 = vector.broadcast %118 : vector<1x8xf32> to vector<336x8xf32>
    %120 = arith.addf %117, %119 : vector<336x8xf32>
    %121 = arith.negf %120 : vector<336x8xf32>
    %122 = math.exp %121 : vector<336x8xf32>
    %cst_77 = arith.constant 1.000000e+00 : f32
    %123 = vector.broadcast %cst_77 : f32 to vector<336x8xf32>
    %124 = arith.addf %123, %122 : vector<336x8xf32>
    %125 = arith.divf %123, %124 : vector<336x8xf32>
    %126 = arith.mulf %120, %125 : vector<336x8xf32>
    %c0_78 = arith.constant 0 : index
    %c0_79 = arith.constant 0 : index
    %127 = vector.load %arg16[%c0_78, %c0_79] : memref<336x8xf32, #tpu.memory_space<vmem>>, vector<336x8xf32>
    tpu.vector_store %arg16[%c0_78, %c0_79], %126 {strides = array<i32>} : memref<336x8xf32, #tpu.memory_space<vmem>>, vector<336x8xf32>,
    return
  }
  func.func @transform_0(%arg0: i32) -> (i32, i32) {
    %c0_i32 = arith.constant 0 : i32
    %c0_i32_0 = arith.constant 0 : i32
    return %arg0, %c0_i32 : i32, i32
  }
  func.func @transform_1(%arg0: i32) -> (i32, i32) {
    %c0_i32 = arith.constant 0 : i32
    %c0_i32_0 = arith.constant 0 : i32
    %c0_i32_1 = arith.constant 0 : i32
    return %c0_i32, %c0_i32_0 : i32, i32
  }
  func.func @transform_2(%arg0: i32) -> (i32, i32) {
    %c0_i32 = arith.constant 0 : i32
    %c0_i32_0 = arith.constant 0 : i32
    %c0_i32_1 = arith.constant 0 : i32
    return %c0_i32, %c0_i32_0 : i32, i32
  }
  func.func @transform_3(%arg0: i32) -> (i32, i32) {
    %c0_i32 = arith.constant 0 : i32
    %c0_i32_0 = arith.constant 0 : i32
    %c0_i32_1 = arith.constant 0 : i32
    return %c0_i32, %c0_i32_0 : i32, i32
  }
  func.func @transform_4(%arg0: i32) -> (i32, i32, i32) {
    %c0_i32 = arith.constant 0 : i32
    %c0_i32_0 = arith.constant 0 : i32
    %c0_i32_1 = arith.constant 0 : i32
    %c0_i32_2 = arith.constant 0 : i32
    return %c0_i32, %c0_i32_0, %c0_i32_1 : i32, i32, i32
  }
  func.func @transform_5(%arg0: i32) -> (i32, i32, i32) {
    %c0_i32 = arith.constant 0 : i32
    %c0_i32_0 = arith.constant 0 : i32
    %c0_i32_1 = arith.constant 0 : i32
    %c0_i32_2 = arith.constant 0 : i32
    return %c0_i32, %c0_i32_0, %c0_i32_1 : i32, i32, i32
  }
  func.func @transform_6(%arg0: i32) -> (i32, i32, i32) {
    %c0_i32 = arith.constant 0 : i32
    %c0_i32_0 = arith.constant 0 : i32
    %c0_i32_1 = arith.constant 0 : i32
    %c0_i32_2 = arith.constant 0 : i32
    return %c0_i32, %c0_i32_0, %c0_i32_1 : i32, i32, i32
  }
  func.func @transform_7(%arg0: i32) -> (i32, i32, i32) {
    %c0_i32 = arith.constant 0 : i32
    %c0_i32_0 = arith.constant 0 : i32
    %c0_i32_1 = arith.constant 0 : i32
    %c0_i32_2 = arith.constant 0 : i32
    return %c0_i32, %c0_i32_0, %c0_i32_1 : i32, i32, i32
  }
  func.func @transform_8(%arg0: i32) -> (i32, i32) {
    %c0_i32 = arith.constant 0 : i32
    %c0_i32_0 = arith.constant 0 : i32
    %c0_i32_1 = arith.constant 0 : i32
    return %c0_i32, %c0_i32_0 : i32, i32
  }
  func.func @transform_9(%arg0: i32) -> (i32, i32) {
    %c0_i32 = arith.constant 0 : i32
    %c0_i32_0 = arith.constant 0 : i32
    %c0_i32_1 = arith.constant 0 : i32
    return %c0_i32, %c0_i32_0 : i32, i32
  }
  func.func @transform_10(%arg0: i32) -> (i32, i32) {
    %c0_i32 = arith.constant 0 : i32
    %c0_i32_0 = arith.constant 0 : i32
    %c0_i32_1 = arith.constant 0 : i32
    return %c0_i32, %c0_i32_0 : i32, i32
  }
  func.func @transform_11(%arg0: i32) -> (i32, i32) {
    %c0_i32 = arith.constant 0 : i32
    %c0_i32_0 = arith.constant 0 : i32
    %c0_i32_1 = arith.constant 0 : i32
    return %c0_i32, %c0_i32_0 : i32, i32
  }
  func.func @transform_12(%arg0: i32) -> (i32, i32) {
    %c0_i32 = arith.constant 0 : i32
    %c0_i32_0 = arith.constant 0 : i32
    %c0_i32_1 = arith.constant 0 : i32
    return %c0_i32, %c0_i32_0 : i32, i32
  }
  func.func @transform_13(%arg0: i32) -> (i32, i32) {
    %c0_i32 = arith.constant 0 : i32
    %c0_i32_0 = arith.constant 0 : i32
    %c0_i32_1 = arith.constant 0 : i32
    return %c0_i32, %c0_i32_0 : i32, i32
  }
  func.func @transform_14(%arg0: i32) -> (i32, i32) {
    %c0_i32 = arith.constant 0 : i32
    %c0_i32_0 = arith.constant 0 : i32
    %c0_i32_1 = arith.constant 0 : i32
    return %c0_i32, %c0_i32_0 : i32, i32
  }
  func.func @transform_15(%arg0: i32) -> (i32, i32) {
    %c0_i32 = arith.constant 0 : i32
    %c0_i32_0 = arith.constant 0 : i32
    return %arg0, %c0_i32 : i32, i32
  }
}

</mosaic_0001>

<bundles_post_ra>
// kernel: bottleneck_csp_pallas.1
= control target key start
LH: loop header
LB: loop body
LE: loop exit
PB: predicated region body
PF: predicated region fallthrough
CT: control target
= control target key end

     0   :  { %s10355_s18 = smov 0   ;;  %s16280_s0 = inlined_call_operand.vmem [shape: f32[672,8], index: 0, kind: input, shape index: {}]   ;;  %s16281_s1 = inlined_call_operand.vmem [shape: f32[336,1], index: 1, kind: input, shape index: {}]   ;;  %s16282_s2 = inlined_call_operand.vmem [shape: f32[8,4], index: 2, kind: input, shape index: {}]   ;;  %s16283_s3 = inlined_call_operand.vmem [shape: f32[1,4], index: 3, kind: input, shape index: {}]   ;;  %s16284_s4 = inlined_call_operand.vmem [shape: f32[1,4,4], index: 4, kind: input, shape index: {}]   ;;  %s16285_s5 = inlined_call_operand.vmem [shape: f32[1,1,4], index: 5, kind: input, shape index: {}]   ;;  %s16286_s6 = inlined_call_operand.vmem [shape: f32[9,4,4], index: 6, kind: input, shape index: {}]   ;;  %s16287_s7 = inlined_call_operand.vmem [shape: f32[1,1,4], index: 7, kind: input, shape index: {}]   ;;  %s16288_s8 = inlined_call_operand.vmem [shape: f32[4,4], index: 8, kind: input, shape index: {}]   ;;  %s16289_s9 = inlined_call_operand.vmem [shape: f32[1,4], index: 9, kind: input, shape index: {}]   ;;  %s16290_s10 = inlined_call_operand.vmem [shape: f32[8,4], index: 10, kind: input, shape index: {}]   ;;  %s16291_s11 = inlined_call_operand.vmem [shape: f32[1,4], index: 11, kind: input, shape index: {}]   ;;  %s16292_s12 = inlined_call_operand.vmem [shape: f32[4,8], index: 12, kind: input, shape index: {}]   ;;  %s16293_s13 = inlined_call_operand.vmem [shape: f32[4,8], index: 13, kind: input, shape index: {}]   ;;  %s16294_s14 = inlined_call_operand.vmem [shape: f32[1,8], index: 14, kind: input, shape index: {}]   ;;  %s16295_s15 = inlined_call_operand.vmem [shape: f32[672,8], index: 15, kind: output, shape index: {}]  }
   0x1 LB: > { %s8738_s19 = sadd.s32 4294967295, %s10272_s18   ;;  %p8742_p0 = scmp.ge.s32.totalorder %s10272_s18, 1  ;;  %s10272_s18 = sphi %s10355_s18, %s25_s18  }
   0x2   : > { %p438_p1 = scmp.lt.s32.totalorder %s10272_s18, 3 }
   0x4   : > { %p439_p2 = pnand %p8742_p0, %p438_p1 }
   0x6   : > { %442 = sbr.rel (%p439_p2) target bundleno = 1937 (0x791), region = 80 }
   0xb   : > { %v542_v0 = vld [vmem:[%s16281_s1 + $0x10] sm:$0xff]  ;;  %v540_v1 = vld [vmem:[%s16281_s1] sm:$0xff]  ;;  %s486_s24 = smul.u32 42, %s8738_s19  ;;  %v10274_v2 = vmov 0   ;;  %vm16338_vm0 = vcmask 64512   ;;  %v543_v5 = vld [vmem:[%s16281_s1 + $0x18] sm:$0xff] }
   0xc   : > { %9519 = vset.pattern.permute.xlu1 %v10274_v2  ;;  %9518 = vset.pattern.permute.xlu0 %v10274_v2  ;;  %v544_v3 = vld [vmem:[%s16281_s1 + $0x20] sm:$0xff]  ;;  %v541_v6 = vld [vmem:[%s16281_s1 + $0x8] sm:$0xff]  ;;  %v547_v12 = vld [vmem:[%s16281_s1 + $0x38] sm:$0xff]  ;;  %vm2165_vm1 = vcmask 1043456   ;;  %vm1949_vm4 = vcmask 31744  }
   0xd   : > { %v582_v4 = vld [vmem:[%s16282_s2] sm:$0xff]  ;;  %1709 = vperm.xlu1 %9519, %v542_v0   ;;  %1699 = vperm.xlu0 %9518, %v540_v1   ;;  %p487_p3 = scmp.lt.s32.totalorder %s486_s24, 83  ;;  %v545_v9 = vld [vmem:[%s16281_s1 + $0x28] sm:$0xff]  ;;  %v546_v13 = vld [vmem:[%s16281_s1 + $0x30] sm:$0xff] }
   0xe   : > { %9520 = vset.pattern.permute.xlu2 %v10274_v2  ;;  %729 = vmatpush.msra.mxu0 %v582_v4  ;;  %v548_v14 = vld [vmem:[%s16281_s1 + $0x40] sm:$0xff]  ;;  %v550_v17 = vld [vmem:[%s16281_s1 + $0x50] sm:$0xff]  ;;  %v549_v18 = vld [vmem:[%s16281_s1 + $0x48] sm:$0xff] }
   0xf   : > { %1719 = vperm.xlu2 %9520, %v544_v3   ;;  %9506 = vmatpush.msra.mxu1 %v582_v4  ;;  %s17319_s24 = smov (!%p487_p3, %s486_s24), 83  ;;  %v551_v19 = vld [vmem:[%s16281_s1 + $0x58] sm:$0xff]  ;;  %v553_v22 = vld [vmem:[%s16281_s1 + $0x68] sm:$0xff]  ;;  %v552_v23 = vld [vmem:[%s16281_s1 + $0x60] sm:$0xff] }
  0x10   : > { %s8743_s29 = sshll.u32 %s17319_s24, 3  ;;  %v554_v24 = vld [vmem:[%s16281_s1 + $0x70] sm:$0xff]  ;;  %v556_v27 = vld [vmem:[%s16281_s1 + $0x80] sm:$0xff]  ;;  %v555_v28 = vld [vmem:[%s16281_s1 + $0x78] sm:$0xff] }
  0x11   : > { %s10386_s20 = scalar_lea.vmem %s16280_s0, %s8743_s29  ;;  %v557_v29 = vld [vmem:[%s16281_s1 + $0x88] sm:$0xff]  ;;  %v559_v32 = vld [vmem:[%s16281_s1 + $0x98] sm:$0xff]  ;;  %v558_v33 = vld [vmem:[%s16281_s1 + $0x90] sm:$0xff]  ;;  %s15737_s22 = scalar_lea.vmem %s16295_s15, %s8743_s29 }
  0x12   : > { %v498_v7 = vld [vmem:[%s10386_s20] sm:$0xff]  ;;  %v528_v8 = vld [vmem:[%s10386_s20 + $0xf0] sm:$0xff]  ;;  %v499_v10 = vld [vmem:[%s10386_s20 + $0x8] sm:$0xff] }
  0x13   : > { %8745 = vmatmul.msk.f32.vlgmr.msra.gmra.mxu0 %vm16338_vm0, %v498_v7  ;;  %8775 = vmatmul.msk.f32.vlgmr.msra.gmra.mxu1 %vm16338_vm0, %v528_v8  ;;  %v529_v11 = vld [vmem:[%s10386_s20 + $0xf8] sm:$0xff]  ;;  %v500_v15 = vld [vmem:[%s10386_s20 + $0x10] sm:$0xff]  ;;  %v530_v16 = vld [vmem:[%s10386_s20 + $0x100] sm:$0xff] }
  0x14   : > { %v501_v20 = vld [vmem:[%s10386_s20 + $0x18] sm:$0xff]  ;;  %v531_v21 = vld [vmem:[%s10386_s20 + $0x108] sm:$0xff]  ;;  %v502_v25 = vld [vmem:[%s10386_s20 + $0x20] sm:$0xff] }
  0x15   : > { %1714 = vperm.xlu1 %9519, %v543_v5   ;;  %1704 = vperm.xlu0 %9518, %v541_v6   ;;  %v532_v26 = vld [vmem:[%s10386_s20 + $0x110] sm:$0xff]  ;;  %v503_v30 = vld [vmem:[%s10386_s20 + $0x28] sm:$0xff]  ;;  %v533_v31 = vld [vmem:[%s10386_s20 + $0x118] sm:$0xff] }
  0x16   : > { %v560_v34 = vld [vmem:[%s16281_s1 + $0xa0] sm:$0xff]  ;;  %v504_v36 = vld [vmem:[%s10386_s20 + $0x30] sm:$0xff]  ;;  %v561_v39 = vld [vmem:[%s16281_s1 + $0xa8] sm:$0xff] }
  0x17   : > { %1724 = vperm.xlu2 %9520, %v545_v9   ;;  %v2034_v35 = vld [vmem:[%s16284_s4] sm:$0xf]  ;;  %v562_v38 = vld [vmem:[%s16281_s1 + $0xb0] sm:$0xff]  ;;  %v563_v40 = vld [vmem:[%s16281_s1 + $0xb8] sm:$0xff] }
  0x18   : > { %8829 = vmatpush.msk.msrb.mxu1 %vm2165_vm1, %v2034_v35  ;;  %v534_v37 = vld [vmem:[%s10386_s20 + $0x120] sm:$0xff]  ;;  %v505_v41 = vld [vmem:[%s10386_s20 + $0x38] sm:$0xff]  ;;  %v535_v42 = vld [vmem:[%s10386_s20 + $0x128] sm:$0xff] }
  0x19   : > { %v565_v43 = vld [vmem:[%s16281_s1 + $0xc8] sm:$0xff]  ;;  %v564_v44 = vld [vmem:[%s16281_s1 + $0xc0] sm:$0xff]  ;;  %v566_v45 = vld [vmem:[%s16281_s1 + $0xd0] sm:$0xff] }
  0x1a   : > { %v506_v46 = vld [vmem:[%s10386_s20 + $0x40] sm:$0xff]  ;;  %v536_v47 = vld [vmem:[%s10386_s20 + $0x130] sm:$0xff]  ;;  %v567_v49 = vld [vmem:[%s16281_s1 + $0xd8] sm:$0xff] }
  0x1b   : > { %8746 = vmatmul.msk.f32.gmra.mxu0 %vm16338_vm0, %v499_v10  ;;  %8776 = vmatmul.msk.f32.gmra.mxu1 %vm16338_vm0, %v529_v11  ;;  %v568_v48 = vld [vmem:[%s16281_s1 + $0xe0] sm:$0xff]  ;;  %v569_v50 = vld [vmem:[%s16281_s1 + $0xe8] sm:$0xff]  ;;  %v537_v52 = vld [vmem:[%s10386_s20 + $0x138] sm:$0xff] }
  0x1c   : > { %v507_v51 = vld [vmem:[%s10386_s20 + $0x48] sm:$0xff]  ;;  %v571_v53 = vld [vmem:[%s16281_s1 + $0xf8] sm:$0xff]  ;;  %v570_v54 = vld [vmem:[%s16281_s1 + $0xf0] sm:$0xff] }
  0x1d   : > { %1734 = vperm.xlu1 %9519, %v547_v12   ;;  %1729 = vperm.xlu0 %9518, %v546_v13   ;;  %v572_v55 = vld [vmem:[%s16281_s1 + $0x100] sm:$0xff]  ;;  %v508_v56 = vld [vmem:[%s10386_s20 + $0x50] sm:$0xff]  ;;  %v573_v59 = vld [vmem:[%s16281_s1 + $0x108] sm:$0xff] }
  0x1e   : > { %v538_v57 = vld [vmem:[%s10386_s20 + $0x140] sm:$0xff]  ;;  %v574_v58 = vld [vmem:[%s16281_s1 + $0x110] sm:$0xff]  ;;  %v575_v60 = vld [vmem:[%s16281_s1 + $0x118] sm:$0xff] }
  0x1f   : > { %1739 = vperm.xlu2 %9520, %v548_v14   ;;  %v509_v62 = vld [vmem:[%s10386_s20 + $0x58] sm:$0xff]  ;;  %v539_v63 = vld [vmem:[%s10386_s20 + $0x148] sm:$0xff]  ;;  %v576_v1 = vld [vmem:[%s16281_s1 + $0x120] sm:$0xff] }
  0x20   : > { %v577_v0 = vld [vmem:[%s16281_s1 + $0x128] sm:$0xff]  ;;  %v578_v2 = vld [vmem:[%s16281_s1 + $0x130] sm:$0xff]  ;;  %v510_v4 = vld [vmem:[%s10386_s20 + $0x60] sm:$0xff] }
  0x21   : > { %v580_v5 = vld [vmem:[%s16281_s1 + $0x140] sm:$0xff]  ;;  %v579_v6 = vld [vmem:[%s16281_s1 + $0x138] sm:$0xff]  ;;  %v581_v7 = vld [vmem:[%s16281_s1 + $0x148] sm:$0xff] }
  0x22   : > { %v511_v9 = vld [vmem:[%s10386_s20 + $0x68] sm:$0xff]  ;;  %v512_v13 = vld [vmem:[%s10386_s20 + $0x70] sm:$0xff] }
  0x23   : > { %8747 = vmatmul.msk.f32.gmra.mxu0 %vm16338_vm0, %v500_v15  ;;  %8777 = vmatmul.msk.f32.gmra.mxu1 %vm16338_vm0, %v530_v16  ;;  %v513_v16 = vld [vmem:[%s10386_s20 + $0x78] sm:$0xff] }
  0x25   : > { %1749 = vperm.xlu1 %9519, %v550_v17   ;;  %1744 = vperm.xlu0 %9518, %v549_v18   ;;  %v10583_v18 = vld [vmem:[%s16283_s3] ss:$0 sm:$0xff] }
  0x27   : > { %1754 = vperm.xlu2 %9520, %v551_v19  }
  0x2b   : > { %8748 = vmatmul.msk.f32.gmra.mxu0 %vm16338_vm0, %v501_v20  ;;  %8778 = vmatmul.msk.f32.gmra.mxu1 %vm16338_vm0, %v531_v21 }
  0x2d   : > { %1764 = vperm.xlu1 %9519, %v553_v22   ;;  %1759 = vperm.xlu0 %9518, %v552_v23   ;;  %v514_v22 = vld [vmem:[%s10386_s20 + $0x80] sm:$0xff] }
  0x2f   : > { %1769 = vperm.xlu2 %9520, %v554_v24  }
  0x33   : > { %8749 = vmatmul.msk.f32.gmra.mxu0 %vm16338_vm0, %v502_v25  ;;  %8779 = vmatmul.msk.f32.gmra.mxu1 %vm16338_vm0, %v532_v26 }
  0x35   : > { %1779 = vperm.xlu1 %9519, %v556_v27   ;;  %1774 = vperm.xlu0 %9518, %v555_v28  }
  0x37   : > { %1784 = vperm.xlu2 %9520, %v557_v29  }
  0x3b   : > { %8750 = vmatmul.msk.f32.gmra.mxu0 %vm16338_vm0, %v503_v30  ;;  %8780 = vmatmul.msk.f32.gmra.mxu1 %vm16338_vm0, %v533_v31 }
  0x3d   : > { %1794 = vperm.xlu1 %9519, %v559_v32   ;;  %1789 = vperm.xlu0 %9518, %v558_v33   ;;  %v515_v32 = vld [vmem:[%s10386_s20 + $0x88] sm:$0xff] }
  0x3f   : > { %1799 = vperm.xlu2 %9520, %v560_v34  }
  0x43   : > { %8751 = vmatmul.msk.f32.gmra.mxu0 %vm16338_vm0, %v504_v36  ;;  %8781 = vmatmul.msk.f32.gmra.mxu1 %vm16338_vm0, %v534_v37 }
  0x45   : > { %1809 = vperm.xlu1 %9519, %v562_v38   ;;  %1804 = vperm.xlu0 %9518, %v561_v39  }
  0x47   : > { %1814 = vperm.xlu2 %9520, %v563_v40  }
  0x4b   : > { %8752 = vmatmul.msk.f32.gmra.mxu0 %vm16338_vm0, %v505_v41  ;;  %8782 = vmatmul.msk.f32.gmra.mxu1 %vm16338_vm0, %v535_v42 }
  0x4d   : > { %1824 = vperm.xlu1 %9519, %v565_v43   ;;  %1819 = vperm.xlu0 %9518, %v564_v44  }
  0x4f   : > { %1829 = vperm.xlu2 %9520, %v566_v45  }
  0x53   : > { %8753 = vmatmul.msk.f32.gmra.mxu0 %vm16338_vm0, %v506_v46  ;;  %8783 = vmatmul.msk.f32.gmra.mxu1 %vm16338_vm0, %v536_v47  ;;  %v516_v46 = vld [vmem:[%s10386_s20 + $0x90] sm:$0xff] }
  0x55   : > { %1839 = vperm.xlu1 %9519, %v568_v48   ;;  %1834 = vperm.xlu0 %9518, %v567_v49  }
  0x57   : > { %1844 = vperm.xlu2 %9520, %v569_v50  }
  0x5b   : > { %8754 = vmatmul.msk.f32.gmra.mxu0 %vm16338_vm0, %v507_v51  ;;  %8784 = vmatmul.msk.f32.gmra.mxu1 %vm16338_vm0, %v537_v52 }
  0x5d   : > { %1854 = vperm.xlu1 %9519, %v571_v53   ;;  %1849 = vperm.xlu0 %9518, %v570_v54  }
  0x5f   : > { %1859 = vperm.xlu2 %9520, %v572_v55  }
  0x63   : > { %8755 = vmatmul.msk.f32.gmra.mxu0 %vm16338_vm0, %v508_v56  ;;  %8785 = vmatmul.msk.f32.gmra.mxu1 %vm16338_vm0, %v538_v57 }
  0x65   : > { %1869 = vperm.xlu1 %9519, %v574_v58   ;;  %1864 = vperm.xlu0 %9518, %v573_v59  }
  0x67   : > { %1874 = vperm.xlu2 %9520, %v575_v60  }
  0x69   : > { %v10532_v61 = vpop.permute.xlu2 %1719 }
  0x6a   : > { %16444 = vst [vmem:[#allocation3_spill] sm:$0xff] %v10532_v61 }
  0x6b   : > { %8756 = vmatmul.msk.f32.gmra.mxu0 %vm16338_vm0, %v509_v62  ;;  %8786 = vmatmul.msk.f32.gmra.mxu1 %vm16338_vm0, %v539_v63 }
  0x6d   : > { %1884 = vperm.xlu1 %9519, %v577_v0   ;;  %1879 = vperm.xlu0 %9518, %v576_v1  }
  0x6f   : > { %1889 = vperm.xlu2 %9520, %v578_v2  }
  0x71   : > { %v10547_v3 = vpop.permute.xlu2 %1724 }
  0x72   : > { %16445 = vst [vmem:[#allocation4_spill] sm:$0xff] %v10547_v3 }
  0x73   : > { %8757 = vmatmul.msk.f32.gmra.mxu0 %vm16338_vm0, %v510_v4 }
  0x75   : > { %1899 = vperm.xlu1 %9519, %v580_v5   ;;  %1894 = vperm.xlu0 %9518, %v579_v6  }
  0x77   : > { %1904 = vperm.xlu2 %9520, %v581_v7   ;;  %v517_v7 = vld [vmem:[%s10386_s20 + $0x98] sm:$0xff] }
  0x79   : > { %v10560_v8 = vpop.permute.xlu2 %1739 }
  0x7a   : > { %16446 = vst [vmem:[#allocation5_spill] sm:$0xff] %v10560_v8 }
  0x7b   : > { %8758 = vmatmul.msk.f32.gmra.mxu0 %vm16338_vm0, %v511_v9 }
  0x7f   : > { %v10564_v10 = vpop.permute.xlu1 %1709  ;;  %v10566_v11 = vpop.permute.xlu0 %1699 }
  0x80   : > { %16447 = vst [vmem:[#allocation6_spill] sm:$0xff] %v10564_v10 }
  0x81   : > { %16448 = vst [vmem:[#allocation7_spill] sm:$0xff] %v10566_v11  ;;  %v10568_v12 = vpop.permute.xlu2 %1754 }
  0x82   : > { %16449 = vst [vmem:[#allocation8_spill] sm:$0xff] %v10568_v12 }
  0x83   : > { %8759 = vmatmul.msk.f32.gmra.mxu0 %vm16338_vm0, %v512_v13 }
  0x87   : > { %v10572_v14 = vpop.permute.xlu1 %1714  ;;  %v10574_v15 = vpop.permute.xlu0 %1704 }
  0x88   : > { %16450 = vst [vmem:[#allocation9_spill] sm:$0xff] %v10572_v14 }
  0x89   : > { %16451 = vst [vmem:[#allocation10_spill] sm:$0xff] %v10574_v15  ;;  %v10577_v17 = vpop.permute.xlu2 %1769 }
  0x8a   : > { %16452 = vst [vmem:[#allocation11_spill] sm:$0xff] %v10577_v17 }
  0x8b   : > { %8760 = vmatmul.msk.f32.gmra.mxu0 %vm16338_vm0, %v513_v16 }
  0x8f   : > { %v10585_v19 = vpop.permute.xlu1 %1734  ;;  %v10587_v20 = vpop.permute.xlu0 %1729 }
  0x90   : > { %16453 = vst [vmem:[#allocation12_spill] sm:$0xff] %v10585_v19  ;;  %v731_v21 = vpop.f32.mrf.mxu0  ;;  %v821_v24 = vpop.f32.mrf.mxu1 }
  0x91   : > { %16454 = vst [vmem:[#allocation13_spill] sm:$0xff] %v10587_v20  ;;  %v10591_v23 = vadd.f32 %v10583_v18, %v731_v21  ;;  %v10594_v25 = vadd.f32 %v10583_v18, %v821_v24  ;;  %v10596_v26 = vpop.permute.xlu2 %1784 }
  0x92   : > { %16455 = vst [vmem:[#allocation14_spill] sm:$0xff] %v10596_v26 }
  0x93   : > { %v8787_v27 = vmul.f32 -1.442695, %v10591_v23  ;;  %8761 = vmatmul.msk.f32.gmra.mxu0 %vm16338_vm0, %v514_v22  ;;  %v8817_v28 = vmul.f32 -1.442695, %v10594_v25 }
  0x95   : > { %9527 = vpow2.f32 %v8787_v27 }
  0x96   : > { %9529 = vpow2.f32 %v8817_v28 }
  0x97   : > { %v10601_v29 = vpop.permute.xlu1 %1749  ;;  %v10603_v30 = vpop.permute.xlu0 %1744 }
  0x98   : > { %16456 = vst [vmem:[#allocation15_spill] sm:$0xff] %v10601_v29  ;;  %v734_v31 = vpop.f32.mrf.mxu0  ;;  %v824_v34 = vpop.f32.mrf.mxu1 }
  0x99   : > { %16457 = vst [vmem:[#allocation16_spill] sm:$0xff] %v10603_v30  ;;  %v10607_v33 = vadd.f32 %v10583_v18, %v734_v31  ;;  %v10610_v35 = vadd.f32 %v10583_v18, %v824_v34  ;;  %v10617_v42 = vpop.permute.xlu2 %1799 }
  0x9a   : > { %16458 = vst [vmem:[#allocation17_spill] sm:$0xff] %v10617_v42 }
  0x9b   : > { %v9528_v36 = vpop.eup %9527  ;;  %v8788_v37 = vmul.f32 -1.442695, %v10607_v33  ;;  %8762 = vmatmul.msk.f32.gmra.mxu0 %vm16338_vm0, %v515_v32  ;;  %v8818_v40 = vmul.f32 -1.442695, %v10610_v35 }
  0x9c   : > { %v9530_v38 = vpop.eup %9529  ;;  %v983_v39 = vadd.f32 1.0, %v9528_v36 }
  0x9d   : > { %v10615_v41 = vadd.f32 1.0, %v9530_v38  ;;  %9531 = vpow2.f32 %v8788_v37 }
  0x9e   : > { %9533 = vrcp.f32 %v983_v39  ;;  %v1034_v63 = vand.u32 2147483647, %v983_v39  ;;  %v1036_v0 = vand.u32 2147483648, %v983_v39  ;;  %vm1030_vm3 = vweird.f32 %v983_v39 }
  0x9f   : > { %v10619_v43 = vpop.permute.xlu1 %1764  ;;  %v10621_v44 = vpop.permute.xlu0 %1759  ;;  %9535 = vrcp.f32 %v10615_v41  ;;  %v1484_v4 = vand.u32 2147483647, %v10615_v41  ;;  %v1486_v13 = vand.u32 2147483648, %v10615_v41  ;;  %vm1480_vm5 = vweird.f32 %v10615_v41 }
  0xa0   : > { %16459 = vst [vmem:[#allocation18_spill] sm:$0xff] %v10619_v43  ;;  %9537 = vpow2.f32 %v8818_v40  ;;  %v737_v45 = vpop.f32.mrf.mxu0  ;;  %v827_v48 = vpop.f32.mrf.mxu1  ;;  %vm1035_vm6 = vcmp.eq.f32.partialorder %v1034_v63, 8.507059e+37  ;;  %v1037_v27 = vor.u32 1.1754944e-38, %v1036_v0 }
  0xa1   : > { %16460 = vst [vmem:[#allocation19_spill] sm:$0xff] %v10621_v44  ;;  %v10626_v47 = vadd.f32 %v10583_v18, %v737_v45  ;;  %v10629_v49 = vadd.f32 %v10583_v18, %v827_v48  ;;  %v10648_v5 = vpop.permute.xlu2 %1814  ;;  %vm10661_vm9 = vcmp.eq.f32.partialorder %v1484_v4, 8.507059e+37  ;;  %v1487_v38 = vor.u32 1.1754944e-38, %v1486_v13  ;;  %v518_v4 = vld [vmem:[%s10386_s20 + $0xa0] sm:$0xff] }
  0xa2   : > { %16463 = vst [vmem:[#allocation22_spill] sm:$0xff] %v10648_v5 }
  0xa3   : > { %v9532_v50 = vpop.eup %9531  ;;  %v8789_v51 = vmul.f32 -1.442695, %v10626_v47  ;;  %8763 = vmatmul.msk.f32.gmra.mxu0 %vm16338_vm0, %v516_v46  ;;  %v8819_v54 = vmul.f32 -1.442695, %v10629_v49 }
  0xa4   : > { %v9534_v52 = vpop.eup %9533  ;;  %v10633_v53 = vadd.f32 1.0, %v9532_v50 }
  0xa5   : > { %v10636_v55 = vpop.eup %9535  ;;  %v1026_v56 = vmul.f32 %v9534_v52, %v983_v39  ;;  %9539 = vpow2.f32 %v8789_v51  ;;  %vm1031_vm2 = vweird.f32 %v9534_v52 }
  0xa6   : > { %v9538_v57 = vpop.eup %9537  ;;  %v1476_v58 = vmul.f32 %v10636_v55, %v10615_v41  ;;  %9541 = vrcp.f32 %v10633_v53  ;;  %vm1032_vm7 = vmor %vm1030_vm3, %vm1031_vm2  ;;  %vm1481_vm8 = vweird.f32 %v10636_v55  ;;  %v1049_v34 = vand.u32 2147483647, %v10633_v53 }
  0xa7   : > { %v10641_v59 = vpop.permute.xlu1 %1779  ;;  %v10643_v60 = vpop.permute.xlu0 %1774  ;;  %v1027_v62 = vsub.f32 1.0, %v1026_v56  ;;  %v10645_v1 = vadd.f32 1.0, %v9538_v57  ;;  %9543 = vpow2.f32 %v8819_v54  ;;  %vm10686_vm10 = vmor %vm1480_vm5, %vm1481_vm8  ;;  %vm1045_vm11 = vweird.f32 %v10633_v53 }
  0xa8   : > { %16461 = vst [vmem:[#allocation20_spill] sm:$0xff] %v10641_v59  ;;  %v1477_v2 = vsub.f32 1.0, %v1476_v58  ;;  %v740_v6 = vpop.f32.mrf.mxu0  ;;  %v830_v16 = vpop.f32.mrf.mxu1  ;;  %vm10692_vm12 = vcmp.eq.f32.partialorder %v1049_v34, 8.507059e+37 }
  0xa9   : > { %16462 = vst [vmem:[#allocation21_spill] sm:$0xff] %v10643_v60  ;;  %v1028_v9 = vmul.f32 %v9534_v52, %v1027_v62  ;;  %9545 = vrcp.f32 %v10645_v1  ;;  %v10656_v28 = vadd.f32 %v10583_v18, %v740_v6  ;;  %v10670_v40 = vadd.f32 %v10583_v18, %v830_v16 }
  0xaa   : > { %v1478_v21 = vmul.f32 %v10636_v55, %v1477_v2  ;;  %v1051_v62 = vand.u32 2147483648, %v10633_v53  ;;  %v1499_v0 = vand.u32 2147483647, %v10645_v1  ;;  %v1501_v41 = vand.u32 2147483648, %v10645_v1 }
  0xab   : > { %v9540_v22 = vpop.eup %9539  ;;  %v1029_v24 = vadd.f32 %v9534_v52, %v1028_v9  ;;  %8764 = vmatmul.msk.f32.gmra.mxu0 %vm16338_vm0, %v517_v7  ;;  %v8790_v50 = vmul.f32 -1.442695, %v10656_v28  ;;  %vm1495_vm14 = vweird.f32 %v10645_v1 }
  0xac   : > { %v9542_v31 = vpop.eup %9541  ;;  %v10666_v36 = vadd.f32 1.0, %v9540_v22  ;;  %v1479_v48 = vadd.f32 %v10636_v55, %v1478_v21  ;;  %v10707_v22 = vpop.permute.xlu2 %1829  ;;  %v1052_v34 = vor.u32 1.1754944e-38, %v1051_v62  ;;  %vm10726_vm2 = vcmp.eq.f32.partialorder %v1499_v0, 8.507059e+37 }
  0xad   : > { %v1033_v37 = vsel %vm1032_vm7, %v9534_v52, %v1029_v24  ;;  %v1041_v39 = vmul.f32 %v9542_v31, %v10633_v53  ;;  %v9544_v45 = vpop.eup %9543  ;;  %vm1046_vm13 = vweird.f32 %v9542_v31  ;;  %16472 = vst [vmem:[#allocation25_spill] sm:$0xff] %v10707_v22  ;;  %v8820_v24 = vmul.f32 -1.442695, %v10670_v40 }
  0xae   : > { %v1038_v46 = vsel %vm1035_vm6, %v1037_v27, %v1033_v37  ;;  %9547 = vrcp.f32 %v10666_v36  ;;  %v10702_v9 = vadd.f32 1.0, %v9544_v45  ;;  %v1483_v16 = vsel %vm10686_vm10, %v10636_v55, %v1479_v48  ;;  %vm1047_vm15 = vmor %vm1045_vm11, %vm1046_vm13 }
  0xaf   : > { %v10675_v51 = vpop.permute.xlu1 %1794  ;;  %v10677_v54 = vpop.permute.xlu0 %1789  ;;  %v1655_v56 = vmul.f32 %v1038_v46, %v10591_v23  ;;  %v1042_v58 = vsub.f32 1.0, %v1041_v39  ;;  %9549 = vpow2.f32 %v8790_v50  ;;  %v10717_v55 = vor.u32 1.1754944e-38, %v1501_v41 }
  0xb0   : > { %16466 = vst [vmem:[#allocation23_spill] sm:$0xff] %v10675_v51  ;;  %v10679_v52 = vpop.eup %9545  ;;  %v743_v2 = vpop.f32.mrf.mxu0  ;;  %9551 = vrcp.f32 %v10702_v9  ;;  %v1064_v39 = vand.u32 2147483647, %v10666_v36  ;;  %v1488_v46 = vsel %vm10661_vm9, %v1487_v38, %v1483_v16  ;;  %vm1060_vm3 = vweird.f32 %v10666_v36 }
  0xb1   : > { %16467 = vst [vmem:[#allocation24_spill] sm:$0xff] %v10677_v54  ;;  %v1491_v23 = vmul.f32 %v10679_v52, %v10645_v1  ;;  %v1907_v6 = vmul.f32 %v10566_v11, %v1655_v56  ;;  %v1043_v7 = vmul.f32 %v9542_v31, %v1042_v58  ;;  %v833_v13 = vpop.f32.mrf.mxu1  ;;  %9553 = vpow2.f32 %v8820_v24 }
  0xb2   : > { %v10721_v45 = vadd.f32 %v10583_v18, %v743_v2  ;;  %v1066_v58 = vand.u32 2147483648, %v10666_v36  ;;  %vm1496_vm5 = vweird.f32 %v10679_v52  ;;  %v10746_v41 = vmul.f32 %v1488_v46, %v10594_v25 }
  0xb3   : > { %v1492_v21 = vsub.f32 1.0, %v1491_v23  ;;  %1950 = vst.msk [vmem:[#allocation2] sm:$0xff] %vm1949_vm4, %v1907_v6  ;;  %v1044_v27 = vadd.f32 %v9542_v31, %v1043_v7  ;;  %8765 = vmatmul.msk.f32.gmra.mxu0 %vm16338_vm0, %v518_v4  ;;  %v10741_v23 = vadd.f32 %v10583_v18, %v833_v13  ;;  %vm10748_vm7 = vcmp.eq.f32.partialorder %v1064_v39, 8.507059e+37  ;;  %vm10763_vm8 = vmor %vm1495_vm14, %vm1496_vm5 }
  0xb4   : > { %v9548_v37 = vpop.eup %9547  ;;  %v8791_v32 = vmul.f32 -1.442695, %v10721_v45  ;;  %vm1510_vm9 = vweird.f32 %v10702_v9  ;;  %v1516_v1 = vand.u32 2147483648, %v10702_v9 }
  0xb5   : > { %v1048_v48 = vsel %vm1047_vm15, %v9542_v31, %v1044_v27  ;;  %v1493_v50 = vmul.f32 %v10679_v52, %v1492_v21  ;;  %v1056_v53 = vmul.f32 %v9548_v37, %v10666_v36  ;;  %v9550_v63 = vpop.eup %9549  ;;  %vm1061_vm6 = vweird.f32 %v9548_v37 }
  0xb6   : > { %v1053_v57 = vsel %vm10692_vm12, %v1052_v34, %v1048_v48  ;;  %9555 = vpow2.f32 %v8791_v32  ;;  %v10753_v6 = vpop.eup %9551  ;;  %v10757_v21 = vadd.f32 1.0, %v9550_v63  ;;  %v1067_v34 = vor.u32 1.1754944e-38, %v1066_v58  ;;  %vm1062_vm10 = vmor %vm1060_vm3, %vm1061_vm6  ;;  %v10783_v32 = vpop.permute.xlu2 %1844 }
  0xb7   : > { %v10736_v38 = vpop.permute.xlu1 %1809  ;;  %v1656_v31 = vmul.f32 %v1053_v57, %v10607_v33  ;;  %v1057_v62 = vsub.f32 1.0, %v1056_v53  ;;  %v10743_v0 = vpop.permute.xlu0 %1804  ;;  %v519_v33 = vld [vmem:[%s10386_s20 + $0xa8] sm:$0xff]  ;;  %v1494_v13 = vadd.f32 %v10679_v52, %v1493_v50  ;;  %v1506_v39 = vmul.f32 %v10753_v6, %v10702_v9  ;;  %16481 = vst [vmem:[#allocation28_spill] sm:$0xff] %v10783_v32 }
  0xb8   : > { %16475 = vst [vmem:[#allocation26_spill] sm:$0xff] %v10736_v38  ;;  %v746_v4 = vpop.f32.mrf.mxu0  ;;  %v9554_v25 = vpop.eup %9553  ;;  %v8821_v46 = vmul.f32 -1.442695, %v10741_v23  ;;  %v1514_v53 = vand.u32 2147483647, %v10702_v9  ;;  %9557 = vrcp.f32 %v10757_v21  ;;  %vm1511_vm11 = vweird.f32 %v10753_v6 }
  0xb9   : > { %16476 = vst [vmem:[#allocation27_spill] sm:$0xff] %v10743_v0  ;;  %v1908_v7 = vmul.f32 %v10574_v15, %v1656_v31  ;;  %v1058_v16 = vmul.f32 %v9548_v37, %v1057_v62  ;;  %v836_v24 = vpop.f32.mrf.mxu1  ;;  %v1507_v57 = vsub.f32 1.0, %v1506_v39  ;;  %v10781_v58 = vadd.f32 1.0, %v9554_v25  ;;  %vm10800_vm12 = vmor %vm1510_vm9, %vm1511_vm11  ;;  %v521_v15 = vld [vmem:[%s10386_s20 + $0xb8] sm:$0xff] }
  0xba   : > { %v1992_v48 = vld [vmem:[#allocation2] sm:$0xff]  ;;  %9559 = vpow2.f32 %v8821_v46  ;;  %v1498_v31 = vsel %vm10763_vm8, %v10679_v52, %v1494_v13  ;;  %v1081_v63 = vand.u32 2147483648, %v10757_v21  ;;  %v1079_v25 = vand.u32 2147483647, %v10757_v21 }
  0xbb   : > { %1951 = vst.msk [vmem:[#allocation2 + $0x8] sm:$0xff] %vm1949_vm4, %v1908_v7  ;;  %v1059_v50 = vadd.f32 %v9548_v37, %v1058_v16  ;;  %8766 = vmatmul.msk.f32.gmra.mxu0 %vm16338_vm0, %v519_v33  ;;  %8830 = vmatmul.msk.f32.vlgmr.msrb.gmra.mxu1 %vm1949_vm4, %v1992_v48  ;;  %v10790_v33 = vadd.f32 %v10583_v18, %v746_v4  ;;  %9561 = vrcp.f32 %v10781_v58  ;;  %vm10804_vm13 = vcmp.eq.f32.partialorder %v1514_v53, 8.507059e+37  ;;  %v520_v48 = vld [vmem:[%s10386_s20 + $0xb0] sm:$0xff] }
  0xbc   : > { %v9556_v36 = vpop.eup %9555  ;;  %v1508_v16 = vmul.f32 %v10753_v6, %v1507_v57  ;;  %v1517_v2 = vor.u32 1.1754944e-38, %v1516_v1  ;;  %v10809_v4 = vadd.f32 %v10583_v18, %v836_v24  ;;  %v10814_v13 = vsel %vm10726_vm2, %v10717_v55, %v1498_v31 }
  0xbd   : > { %v1063_v62 = vsel %vm1062_vm10, %v9548_v37, %v1059_v50  ;;  %v10817_v9 = vadd.f32 1.0, %v9556_v36  ;;  %vm1075_vm14 = vweird.f32 %v10757_v21  ;;  %v1082_v24 = vor.u32 1.1754944e-38, %v1081_v63 }
  0xbe   : > { %v1068_v7 = vsel %vm10748_vm7, %v1067_v34, %v1063_v62  ;;  %v8792_v34 = vmul.f32 -1.442695, %v10790_v33  ;;  %v9558_v50 = vpop.eup %9557  ;;  %v1529_v56 = vand.u32 2147483647, %v10781_v58  ;;  %vm10832_vm15 = vcmp.eq.f32.partialorder %v1079_v25, 8.507059e+37 }
  0xbf   : > { %v1657_v27 = vmul.f32 %v1068_v7, %v10626_v47  ;;  %v1509_v47 = vadd.f32 %v10753_v6, %v1508_v16  ;;  %v10820_v39 = vpop.permute.xlu1 %1824  ;;  %v10826_v55 = vpop.permute.xlu0 %1819  ;;  %v1071_v62 = vmul.f32 %v9558_v50, %v10757_v21  ;;  %v1531_v7 = vand.u32 2147483648, %v10781_v58 }
  0xc0   : > { %16486 = vst [vmem:[#allocation29_spill] sm:$0xff] %v10820_v39  ;;  %v749_v46 = vpop.f32.mrf.mxu0  ;;  %v9560_v57 = vpop.eup %9559  ;;  %9563 = vrcp.f32 %v10817_v9  ;;  %vm1525_vm2 = vweird.f32 %v10781_v58  ;;  %vm10855_vm3 = vcmp.eq.f32.partialorder %v1529_v56, 8.507059e+37  ;;  %vm1076_vm5 = vweird.f32 %v9558_v50 }
  0xc1   : > { %v1909_v53 = vmul.f32 %v10564_v10, %v1657_v27  ;;  %16487 = vst [vmem:[#allocation30_spill] sm:$0xff] %v10826_v55  ;;  %v839_v1 = vpop.f32.mrf.mxu1  ;;  %v1513_v31 = vsel %vm10800_vm12, %v10753_v6, %v1509_v47  ;;  %v8822_v6 = vmul.f32 -1.442695, %v10809_v4  ;;  %v10844_v27 = vadd.f32 %v10583_v18, %v749_v46  ;;  %v10848_v25 = vpop.eup %9561  ;;  %vm1077_vm8 = vmor %vm1075_vm14, %vm1076_vm5 }
  0xc2   : > { %v1993_v63 = vld [vmem:[#allocation2 + $0x8] sm:$0xff]  ;;  %v1518_v16 = vsel %vm10804_vm13, %v1517_v2, %v1513_v31  ;;  %v1072_v47 = vsub.f32 1.0, %v1071_v62  ;;  %9565 = vpow2.f32 %v8792_v34  ;;  %v1521_v37 = vmul.f32 %v10848_v25, %v10781_v58 }
  0xc3   : > { %1952 = vst.msk [vmem:[#allocation2 + $0x10] sm:$0xff] %vm1949_vm4, %v1909_v53  ;;  %8767 = vmatmul.msk.f32.gmra.mxu0 %vm16338_vm0, %v520_v48  ;;  %8831 = vmatmul.msk.f32.gmra.mxu1 %vm1949_vm4, %v1993_v63  ;;  %v1687_v52 = vmul.f32 %v1518_v16, %v10629_v49  ;;  %v10851_v53 = vadd.f32 1.0, %v9560_v57  ;;  %v1094_v46 = vand.u32 2147483647, %v10817_v9  ;;  %v1096_v48 = vand.u32 2147483648, %v10817_v9  ;;  %v10862_v49 = vpop.permute.xlu2 %1859 }
  0xc4   : > { %v1073_v31 = vmul.f32 %v9558_v50, %v1072_v47  ;;  %v1532_v63 = vor.u32 1.1754944e-38, %v1531_v7  ;;  %16492 = vst [vmem:[#allocation31_spill] sm:$0xff] %v10862_v49  ;;  %v1522_v34 = vsub.f32 1.0, %v1521_v37  ;;  %vm1526_vm6 = vweird.f32 %v10848_v25 }
  0xc5   : > { %9567 = vrcp.f32 %v10851_v53  ;;  %v1939_v56 = vmul.f32 %v10862_v49, %v1687_v52  ;;  %vm1090_vm7 = vweird.f32 %v10817_v9  ;;  %v8793_v16 = vmul.f32 -1.442695, %v10844_v27  ;;  %vm10889_vm10 = vmor %vm1525_vm2, %vm1526_vm6 }
  0xc6   : > { %9569 = vpow2.f32 %v8822_v6  ;;  %v10866_v57 = vpop.eup %9563  ;;  %v1074_v62 = vadd.f32 %v9558_v50, %v1073_v31  ;;  %v10871_v47 = vadd.f32 %v10583_v18, %v839_v1  ;;  %v1523_v37 = vmul.f32 %v10848_v25, %v1522_v34 }
  0xc7   : > { %v1086_v6 = vmul.f32 %v10866_v57, %v10817_v9  ;;  %vm10880_vm9 = vcmp.eq.f32.partialorder %v1094_v46, 8.507059e+37  ;;  %v1097_v31 = vor.u32 1.1754944e-38, %v1096_v48  ;;  %1982 = vst.msk [vmem:[#allocation2 + $0x100] sm:$0xff] %vm1949_vm4, %v1939_v56  ;;  %9571 = vpow2.f32 %v8793_v16  ;;  %v10902_v58 = vpop.permute.xlu1 %1839  ;;  %v10904_v32 = vpop.permute.xlu0 %1834 }
  0xc8   : > { %v752_v7 = vpop.f32.mrf.mxu0  ;;  %v9566_v49 = vpop.eup %9565  ;;  %v1078_v11 = vsel %vm1077_vm8, %v9558_v50, %v1074_v62  ;;  %v8823_v46 = vmul.f32 -1.442695, %v10871_v47  ;;  %v1524_v50 = vadd.f32 %v10848_v25, %v1523_v37  ;;  %16497 = vst [vmem:[#allocation32_spill] sm:$0xff] %v10902_v58  ;;  %vm1091_vm11 = vweird.f32 %v10866_v57 }
  0xc9   : > { %v842_v1 = vpop.f32.mrf.mxu1  ;;  %v10895_v34 = vadd.f32 %v10583_v18, %v752_v7  ;;  %v1083_v56 = vsel %vm10832_vm15, %v1082_v24, %v1078_v11  ;;  %v1087_v62 = vsub.f32 1.0, %v1086_v6  ;;  %v10900_v10 = vadd.f32 1.0, %v9566_v49  ;;  %16498 = vst [vmem:[#allocation33_spill] sm:$0xff] %v10904_v32  ;;  %vm1092_vm14 = vmor %vm1090_vm7, %vm1091_vm11 }
  0xca   : > { %v1994_v48 = vld [vmem:[#allocation2 + $0x10] sm:$0xff]  ;;  %v1658_v7 = vmul.f32 %v1083_v56, %v10656_v28  ;;  %vm1540_vm12 = vweird.f32 %v10851_v53  ;;  %v1528_v36 = vsel %vm10889_vm10, %v10848_v25, %v1524_v50  ;;  %9573 = vpow2.f32 %v8823_v46 }
  0xcb   : > { %8768 = vmatmul.msk.f32.gmra.mxu0 %vm16338_vm0, %v521_v15  ;;  %8832 = vmatmul.msk.f32.gmra.mxu1 %vm1949_vm4, %v1994_v48  ;;  %v10908_v16 = vpop.eup %9567  ;;  %v8794_v11 = vmul.f32 -1.442695, %v10895_v34  ;;  %v1088_v49 = vmul.f32 %v10866_v57, %v1087_v62  ;;  %v1544_v28 = vand.u32 2147483647, %v10851_v53  ;;  %v1546_v6 = vand.u32 2147483648, %v10851_v53 }
  0xcc   : > { %v9570_v24 = vpop.eup %9569  ;;  %v1536_v15 = vmul.f32 %v10908_v16, %v10851_v53  ;;  %v1910_v37 = vmul.f32 %v10572_v14, %v1658_v7  ;;  %9575 = vrcp.f32 %v10900_v10  ;;  %vm1541_vm13 = vweird.f32 %v10908_v16 }
  0xcd   : > { %v1089_v48 = vadd.f32 %v10866_v57, %v1088_v49  ;;  %v10927_v25 = vadd.f32 %v10583_v18, %v842_v1  ;;  %v9572_v21 = vpop.eup %9571  ;;  %v1533_v46 = vsel %vm10855_vm3, %v1532_v63, %v1528_v36  ;;  %v1111_v50 = vand.u32 2147483648, %v10900_v10  ;;  %v522_v1 = vld [vmem:[%s10386_s20 + $0xc0] sm:$0xff]  ;;  %vm10957_vm15 = vmor %vm1540_vm12, %vm1541_vm13 }
  0xce   : > { %v1537_v56 = vsub.f32 1.0, %v1536_v15  ;;  %1953 = vst.msk [vmem:[#allocation2 + $0x18] sm:$0xff] %vm1949_vm4, %v1910_v37  ;;  %v10937_v62 = vadd.f32 1.0, %v9570_v24  ;;  %9577 = vpow2.f32 %v8794_v11  ;;  %v1109_v2 = vand.u32 2147483647, %v10900_v10  ;;  %v523_v11 = vld [vmem:[%s10386_s20 + $0xc8] sm:$0xff] }
  0xcf   : > { %v1093_v49 = vsel %vm1092_vm14, %v10866_v57, %v1089_v48  ;;  %v10945_v63 = vadd.f32 1.0, %v9572_v21  ;;  %v1686_v9 = vmul.f32 %v10814_v13, %v10610_v35  ;;  %vm10961_vm2 = vcmp.eq.f32.partialorder %v1544_v28, 8.507059e+37 }
  0xd0   : > { %v10939_v7 = vpop.f32.mrf.mxu0  ;;  %v1538_v15 = vmul.f32 %v10908_v16, %v1537_v56  ;;  %v1098_v24 = vsel %vm10880_vm9, %v1097_v31, %v1093_v49  ;;  %9579 = vrcp.f32 %v10937_v62  ;;  %v9574_v37 = vpop.eup %9573  ;;  %v1547_v52 = vor.u32 1.1754944e-38, %v1546_v6 }
  0xd1   : > { %v10947_v36 = vpop.f32.mrf.mxu1  ;;  %v1659_v35 = vmul.f32 %v1098_v24, %v10721_v45  ;;  %vm1105_vm3 = vweird.f32 %v10900_v10  ;;  %v10971_v31 = vmul.f32 %v1533_v46, %v10670_v40  ;;  %v1112_v28 = vor.u32 1.1754944e-38, %v1111_v50  ;;  %v10985_v46 = vpop.permute.xlu1 %1854 }
  0xd2   : > { %v1539_v13 = vadd.f32 %v10908_v16, %v1538_v15  ;;  %v9576_v53 = vpop.eup %9575  ;;  %9581 = vrcp.f32 %v10945_v63  ;;  %v8824_v48 = vmul.f32 -1.442695, %v10927_v25  ;;  %vm10980_vm5 = vcmp.eq.f32.partialorder %v1109_v2, 8.507059e+37  ;;  %16505 = vst [vmem:[#allocation34_spill] sm:$0xff] %v10985_v46  ;;  %v10987_v50 = vpop.permute.xlu0 %1849 }
  0xd3   : > { %8769 = vmatmul.msk.f32.gmra.mxu0 %vm16338_vm0, %v522_v1  ;;  %v1911_v56 = vmul.f32 %v10532_v61, %v1659_v35  ;;  %v1101_v6 = vmul.f32 %v9576_v53, %v10900_v10  ;;  %v1559_v40 = vand.u32 2147483647, %v10937_v62  ;;  %16506 = vst [vmem:[#allocation35_spill] sm:$0xff] %v10987_v50  ;;  %vm1555_vm6 = vweird.f32 %v10937_v62 }
  0xd4   : > { %v1543_v45 = vsel %vm10957_vm15, %v10908_v16, %v1539_v13  ;;  %v9578_v1 = vpop.eup %9577  ;;  %v1561_v49 = vand.u32 2147483648, %v10937_v62  ;;  %v1124_v16 = vand.u32 2147483647, %v10945_v63  ;;  %v1126_v15 = vand.u32 2147483648, %v10945_v63 }
  0xd5   : > { %1954 = vst.msk [vmem:[#allocation2 + $0x20] sm:$0xff] %vm1949_vm4, %v1911_v56  ;;  %v1548_v2 = vsel %vm10961_vm2, %v1547_v52, %v1543_v45  ;;  %v1102_v24 = vsub.f32 1.0, %v1101_v6  ;;  %vm1106_vm7 = vweird.f32 %v9576_v53  ;;  %v10996_v57 = vadd.f32 1.0, %v9574_v37  ;;  %v1995_v35 = vld [vmem:[#allocation2 + $0x18] sm:$0xff]  ;;  %v11104_v45 = vpop.permute.xlu2 %1874 }
  0xd6   : > { %v10998_v13 = vpop.eup %9579  ;;  %v11000_v58 = vadd.f32 1.0, %v9578_v1  ;;  %9583 = vpow2.f32 %v8824_v48  ;;  %v1938_v32 = vmul.f32 %v10985_v46, %v1686_v9  ;;  %v1937_v22 = vmul.f32 %v10987_v50, %v10746_v41  ;;  %8833 = vmatmul.msk.f32.gmra.mxu1 %vm1949_vm4, %v1995_v35  ;;  %vm1107_vm12 = vmor %vm1105_vm3, %vm1106_vm7  ;;  %16518 = vst [vmem:[#allocation37_spill] sm:$0xff] %v11104_v45 }
  0xd7   : > { %v1103_v52 = vmul.f32 %v9576_v53, %v1102_v24  ;;  %v1551_v37 = vmul.f32 %v10998_v13, %v10937_v62  ;;  %vm11011_vm8 = vcmp.eq.f32.partialorder %v1559_v40, 8.507059e+37  ;;  %vm1120_vm9 = vweird.f32 %v10945_v63 }
  0xd8   : > { %v11006_v56 = vpop.f32.mrf.mxu0  ;;  %9585 = vrcp.f32 %v10996_v57  ;;  %v11017_v9 = vpop.eup %9581  ;;  %v1562_v41 = vor.u32 1.1754944e-38, %v1561_v49  ;;  %v1574_v48 = vand.u32 2147483647, %v10996_v57  ;;  %v1576_v6 = vand.u32 2147483648, %v10996_v57  ;;  %1981 = vst.msk [vmem:[#allocation2 + $0xf8] sm:$0xff] %vm1949_vm4, %v1938_v32 }
  0xd9   : > { %9587 = vrcp.f32 %v11000_v58  ;;  %v1104_v1 = vadd.f32 %v9576_v53, %v1103_v52  ;;  %v1552_v40 = vsub.f32 1.0, %v1551_v37  ;;  %vm1556_vm10 = vweird.f32 %v10998_v13  ;;  %1980 = vst.msk [vmem:[#allocation2 + $0xf0] sm:$0xff] %vm1949_vm4, %v1937_v22  ;;  %v11031_v49 = vpop.f32.mrf.mxu1 }
  0xda   : > { %v1116_v24 = vmul.f32 %v11017_v9, %v10945_v63  ;;  %vm11026_vm11 = vcmp.eq.f32.partialorder %v1124_v16, 8.507059e+37  ;;  %v11035_v46 = vmul.f32 %v1548_v2, %v10741_v23  ;;  %vm1121_vm13 = vweird.f32 %v11017_v9  ;;  %vm11050_vm15 = vmor %vm1555_vm6, %vm1556_vm10 }
  0xdb   : > { %8770 = vmatmul.msk.f32.gmra.mxu0 %vm16338_vm0, %v523_v11  ;;  %v1127_v32 = vor.u32 1.1754944e-38, %v1126_v15  ;;  %vm1570_vm14 = vweird.f32 %v10996_v57  ;;  %v1108_v16 = vsel %vm1107_vm12, %v9576_v53, %v1104_v1  ;;  %v1553_v52 = vmul.f32 %v10998_v13, %v1552_v40  ;;  %vm1122_vm6 = vmor %vm1120_vm9, %vm1121_vm13 }
  0xdc   : > { %v1117_v22 = vsub.f32 1.0, %v1116_v24  ;;  %v1139_v37 = vand.u32 2147483647, %v11000_v58  ;;  %v9584_v50 = vpop.eup %9583  ;;  %v1113_v23 = vsel %vm10980_vm5, %v1112_v28, %v1108_v16  ;;  %vm11054_vm2 = vcmp.eq.f32.partialorder %v1574_v48, 8.507059e+37  ;;  %v1996_v28 = vld [vmem:[#allocation2 + $0x20] sm:$0xff] }
  0xdd   : > { %v11058_v53 = vor.u32 1.1754944e-38, %v1576_v6  ;;  %v11062_v2 = vadd.f32 %v10583_v18, %v10939_v7  ;;  %v1660_v11 = vmul.f32 %v1113_v23, %v10790_v33  ;;  %v1554_v62 = vadd.f32 %v10998_v13, %v1553_v52  ;;  %v524_v52 = vld [vmem:[%s10386_s20 + $0xd0] sm:$0xff] }
  0xde   : > { %v9586_v21 = vpop.eup %9585  ;;  %v1118_v1 = vmul.f32 %v11017_v9, %v1117_v22  ;;  %vm1135_vm3 = vweird.f32 %v11000_v58  ;;  %v1141_v48 = vand.u32 2147483648, %v11000_v58  ;;  %v11070_v24 = vadd.f32 1.0, %v9584_v50  ;;  %8834 = vmatmul.msk.f32.gmra.mxu1 %vm1949_vm4, %v1996_v28 }
  0xdf   : > { %v9588_v40 = vpop.eup %9587  ;;  %v1566_v6 = vmul.f32 %v9586_v21, %v10996_v57  ;;  %v8795_v7 = vmul.f32 -1.442695, %v11062_v2  ;;  %v11075_v16 = vadd.f32 %v10583_v18, %v10947_v36  ;;  %v1912_v22 = vmul.f32 %v10547_v3, %v1660_v11  ;;  %v11091_v36 = vpop.permute.xlu0 %1864 }
  0xe0   : > { %v11078_v33 = vpop.f32.mrf.mxu0  ;;  %v1558_v23 = vsel %vm11050_vm15, %v10998_v13, %v1554_v62  ;;  %v1119_v50 = vadd.f32 %v11017_v9, %v1118_v1  ;;  %v1131_v61 = vmul.f32 %v9588_v40, %v11000_v58  ;;  %vm11087_vm5 = vcmp.eq.f32.partialorder %v1139_v37, 8.507059e+37  ;;  %16517 = vst [vmem:[#allocation36_spill] sm:$0xff] %v11091_v36  ;;  %v11109_v1 = vpop.permute.xlu1 %1869 }
  0xe1   : > { %v1563_v28 = vsel %vm11011_vm8, %v1562_v41, %v1558_v23  ;;  %v1567_v10 = vsub.f32 1.0, %v1566_v6  ;;  %vm1571_vm7 = vweird.f32 %v9586_v21  ;;  %9589 = vrcp.f32 %v11070_v24  ;;  %1955 = vst.msk [vmem:[#allocation2 + $0x28] sm:$0xff] %vm1949_vm4, %v1912_v22  ;;  %v851_v35 = vpop.f32.mrf.mxu1 }
  0xe2   : > { %v1690_v13 = vmul.f32 %v1563_v28, %v10809_v4  ;;  %v1123_v37 = vsel %vm1122_vm6, %v11017_v9, %v1119_v50  ;;  %v1132_v11 = vsub.f32 1.0, %v1131_v61  ;;  %v1142_v62 = vor.u32 1.1754944e-38, %v1141_v48  ;;  %16519 = vst [vmem:[#allocation38_spill] sm:$0xff] %v11109_v1  ;;  %vm11116_vm10 = vmor %vm1570_vm14, %vm1571_vm7 }
  0xe3   : > { %8771 = vmatmul.msk.f32.gmra.mxu0 %vm16338_vm0, %v524_v52  ;;  %v1128_v63 = vsel %vm11026_vm11, %v1127_v32, %v1123_v37  ;;  %v1568_v41 = vmul.f32 %v9586_v21, %v1567_v10  ;;  %vm1136_vm8 = vweird.f32 %v9588_v40  ;;  %vm1585_vm9 = vweird.f32 %v11070_v24  ;;  %v525_v37 = vld [vmem:[%s10386_s20 + $0xd8] sm:$0xff] }
  0xe4   : > { %v1942_v6 = vmul.f32 %v11104_v45, %v1690_v13  ;;  %v1661_v4 = vmul.f32 %v1128_v63, %v10844_v27  ;;  %v1133_v9 = vmul.f32 %v9588_v40, %v1132_v11  ;;  %9591 = vpow2.f32 %v8795_v7  ;;  %vm1137_vm11 = vmor %vm1135_vm3, %vm1136_vm8 }
  0xe5   : > { %v1569_v32 = vadd.f32 %v9586_v21, %v1568_v41  ;;  %v1589_v48 = vand.u32 2147483647, %v11070_v24  ;;  %v1591_v52 = vand.u32 2147483648, %v11070_v24  ;;  %v8825_v22 = vmul.f32 -1.442695, %v11075_v16 }
  0xe6   : > { %1985 = vst.msk [vmem:[#allocation2 + $0x118] sm:$0xff] %vm1949_vm4, %v1942_v6  ;;  %v1913_v27 = vmul.f32 %v10587_v20, %v1661_v4  ;;  %v1134_v57 = vadd.f32 %v9588_v40, %v1133_v9  ;;  %v1941_v23 = vmul.f32 %v11109_v1, %v11035_v46  ;;  %v1940_v7 = vmul.f32 %v11091_v36, %v10971_v31  ;;  %v11311_v36 = vpop.permute.xlu2 %1889 }
  0xe7   : > { %v9590_v50 = vpop.eup %9589  ;;  %v1573_v28 = vsel %vm11116_vm10, %v9586_v21, %v1569_v32  ;;  %9593 = vpow2.f32 %v8825_v22  ;;  %v11136_v10 = vadd.f32 %v10583_v18, %v11006_v56  ;;  %v11140_v13 = vadd.f32 %v10583_v18, %v11031_v49  ;;  %16540 = vst [vmem:[#allocation41_spill] sm:$0xff] %v11311_v36 }
  0xe8   : > { %v764_v46 = vpop.f32.mrf.mxu0  ;;  %1956 = vst.msk [vmem:[#allocation2 + $0x30] sm:$0xff] %vm1949_vm4, %v1913_v27  ;;  %v1578_v31 = vsel %vm11054_vm2, %v11058_v53, %v1573_v28  ;;  %v1138_v21 = vsel %vm1137_vm11, %v9588_v40, %v1134_v57  ;;  %v1581_v58 = vmul.f32 %v9590_v50, %v11070_v24  ;;  %vm1586_vm12 = vweird.f32 %v9590_v50  ;;  %v1997_v41 = vld [vmem:[#allocation2 + $0x28] sm:$0xff]  ;;  %v11156_v40 = vpop.permute.xlu0 %1879 }
  0xe9   : > { %v1691_v11 = vmul.f32 %v1578_v31, %v10871_v47  ;;  %v1143_v56 = vsel %vm11087_vm5, %v1142_v62, %v1138_v21  ;;  %1984 = vst.msk [vmem:[#allocation2 + $0x110] sm:$0xff] %vm1949_vm4, %v1941_v23  ;;  %v8796_v49 = vmul.f32 -1.442695, %v11136_v10  ;;  %v8826_v63 = vmul.f32 -1.442695, %v11140_v13  ;;  %8835 = vmatmul.msk.f32.gmra.mxu1 %vm1949_vm4, %v1997_v41  ;;  %vm11178_vm13 = vmor %vm1585_vm9, %vm1586_vm12  ;;  %v526_v21 = vld [vmem:[%s10386_s20 + $0xe0] sm:$0xff] }
  0xea   : > { %v9592_v6 = vpop.eup %9591  ;;  %v1662_v15 = vmul.f32 %v1143_v56, %v10895_v34  ;;  %v1582_v53 = vsub.f32 1.0, %v1581_v58  ;;  %1983 = vst.msk [vmem:[#allocation2 + $0x108] sm:$0xff] %vm1949_vm4, %v1940_v7  ;;  %v11160_v47 = vadd.f32 %v10583_v18, %v11078_v33  ;;  %v11163_v39 = vadd.f32 %v10583_v18, %v851_v35  ;;  %v854_v7 = vpop.f32.mrf.mxu1 }
  0xeb   : > { %16522 = vst [vmem:[#allocation39_spill] sm:$0xff] %v11156_v40  ;;  %v11166_v62 = vadd.f32 1.0, %v9592_v6  ;;  %9595 = vpow2.f32 %v8796_v49  ;;  %v1943_v4 = vmul.f32 %v11156_v40, %v1691_v11  ;;  %v11170_v34 = vadd.f32 %v10583_v18, %v764_v46  ;;  %8772 = vmatmul.msk.f32.gmra.mxu0 %vm16338_vm0, %v525_v37 }
  0xec   : > { %v1914_v61 = vmul.f32 %v10585_v19, %v1662_v15  ;;  %v1583_v9 = vmul.f32 %v9590_v50, %v1582_v53  ;;  %9597 = vpow2.f32 %v8826_v63  ;;  %v8797_v33 = vmul.f32 -1.442695, %v11160_v47 }
  0xed   : > { %v9594_v35 = vpop.eup %9593  ;;  %vm11182_vm14 = vcmp.eq.f32.partialorder %v1589_v48, 8.507059e+37  ;;  %v1592_v27 = vor.u32 1.1754944e-38, %v1591_v52  ;;  %9599 = vrcp.f32 %v11166_v62  ;;  %1986 = vst.msk [vmem:[#allocation2 + $0x120] sm:$0xff] %vm1949_vm4, %v1943_v4  ;;  %v8827_v24 = vmul.f32 -1.442695, %v11163_v39 }
  0xee   : > { %1957 = vst.msk [vmem:[#allocation2 + $0x38] sm:$0xff] %vm1949_vm4, %v1914_v61  ;;  %v1584_v57 = vadd.f32 %v9590_v50, %v1583_v9  ;;  %v11189_v23 = vadd.f32 1.0, %v9594_v35  ;;  %9601 = vpow2.f32 %v8797_v33  ;;  %v8798_v48 = vmul.f32 -1.442695, %v11170_v34  ;;  %v11220_v61 = vpop.permute.xlu1 %1884 }
  0xef   : > { %v1998_v28 = vld [vmem:[#allocation2 + $0x30] sm:$0xff]  ;;  %v1154_v31 = vand.u32 2147483647, %v11166_v62  ;;  %v1156_v11 = vand.u32 2147483648, %v11166_v62  ;;  %v11202_v56 = vadd.f32 %v10583_v18, %v854_v7  ;;  %vm1150_vm15 = vweird.f32 %v11166_v62  ;;  %16529 = vst [vmem:[#allocation40_spill] sm:$0xff] %v11220_v61 }
  0xf0   : > { %v767_v46 = vpop.f32.mrf.mxu0  ;;  %v1588_v52 = vsel %vm11178_vm13, %v9590_v50, %v1584_v57  ;;  %9603 = vrcp.f32 %v11189_v23  ;;  %v1604_v50 = vand.u32 2147483647, %v11189_v23  ;;  %v1606_v15 = vand.u32 2147483648, %v11189_v23 }
  0xf1   : > { %v9596_v58 = vpop.eup %9595  ;;  %v1593_v37 = vsel %vm11182_vm14, %v1592_v27, %v1588_v52  ;;  %9605 = vpow2.f32 %v8827_v24  ;;  %8836 = vmatmul.msk.f32.gmra.mxu1 %vm1949_vm4, %v1998_v28  ;;  %vm11215_vm2 = vcmp.eq.f32.partialorder %v1154_v31, 8.507059e+37  ;;  %v1157_v9 = vor.u32 1.1754944e-38, %v1156_v11  ;;  %v527_v11 = vld [vmem:[%s10386_s20 + $0xe8] sm:$0xff] }
  0xf2   : > { %v9598_v49 = vpop.eup %9597  ;;  %v1692_v63 = vmul.f32 %v1593_v37, %v10927_v25  ;;  %v11206_v41 = vadd.f32 1.0, %v9596_v58  ;;  %9607 = vpow2.f32 %v8798_v48  ;;  %v8828_v35 = vmul.f32 -1.442695, %v11202_v56 }
  0xf3   : > { %v9600_v6 = vpop.eup %9599  ;;  %v11210_v53 = vadd.f32 1.0, %v9598_v49  ;;  %8773 = vmatmul.msk.f32.gmra.mxu0 %vm16338_vm0, %v526_v21  ;;  %vm1600_vm3 = vweird.f32 %v11189_v23  ;;  %vm11228_vm5 = vcmp.eq.f32.partialorder %v1604_v50, 8.507059e+37  ;;  %v1607_v48 = vor.u32 1.1754944e-38, %v1606_v15 }
  0xf4   : > { %v9602_v4 = vpop.eup %9601  ;;  %v1146_v18 = vmul.f32 %v9600_v6, %v11166_v62  ;;  %9609 = vrcp.f32 %v11206_v41  ;;  %v1944_v33 = vmul.f32 %v11220_v61, %v1692_v63  ;;  %vm1151_vm6 = vweird.f32 %v9600_v6 }
  0xf5   : > { %9611 = vrcp.f32 %v11210_v53  ;;  %v11232_v57 = vadd.f32 1.0, %v9602_v4  ;;  %v1169_v28 = vand.u32 2147483647, %v11206_v41  ;;  %v1999_v52 = vld [vmem:[#allocation2 + $0x38] sm:$0xff]  ;;  %v1171_v58 = vand.u32 2147483648, %v11206_v41  ;;  %vm1152_vm10 = vmor %vm1150_vm15, %vm1151_vm6 }
  0xf6   : > { %v11225_v32 = vpop.eup %9603  ;;  %v1147_v22 = vsub.f32 1.0, %v1146_v18  ;;  %1987 = vst.msk [vmem:[#allocation2 + $0x128] sm:$0xff] %vm1949_vm4, %v1944_v33  ;;  %v1619_v37 = vand.u32 2147483647, %v11210_v53  ;;  %vm1165_vm8 = vweird.f32 %v11206_v41  ;;  %vm1615_vm9 = vweird.f32 %v11210_v53  ;;  %v11252_v18 = vld [vmem:[%s16283_s3] ss:$0 sm:$0xff] }
  0xf7   : > { %v9606_v24 = vpop.eup %9605  ;;  %v1596_v7 = vmul.f32 %v11225_v32, %v11189_v23  ;;  %9613 = vrcp.f32 %v11232_v57  ;;  %vm1601_vm7 = vweird.f32 %v11225_v32  ;;  %v11255_v33 = vadd.f32 %v11252_v18, %v767_v46 }
  0xf8   : > { %v11238_v31 = vpop.f32.mrf.mxu0  ;;  %v1148_v21 = vmul.f32 %v9600_v6, %v1147_v22  ;;  %v9608_v49 = vpop.eup %9607  ;;  %v11245_v50 = vadd.f32 1.0, %v9606_v24  ;;  %9615 = vpow2.f32 %v8828_v35  ;;  %vm11265_vm11 = vcmp.eq.f32.partialorder %v1169_v28, 8.507059e+37  ;;  %vm11276_vm12 = vmor %vm1600_vm3, %vm1601_vm7 }
  0xf9   : > { %v1597_v63 = vsub.f32 1.0, %v1596_v7  ;;  %8837 = vmatmul.msk.f32.gmra.mxu1 %vm1949_vm4, %v1999_v52  ;;  %v1186_v46 = vand.u32 2147483648, %v11232_v57  ;;  %vm11281_vm13 = vcmp.eq.f32.partialorder %v1619_v37, 8.507059e+37  ;;  %vm1180_vm14 = vweird.f32 %v11232_v57 }
  0xfa   : > { %v9610_v15 = vpop.eup %9609  ;;  %v1149_v4 = vadd.f32 %v9600_v6, %v1148_v21  ;;  %v1184_v21 = vand.u32 2147483647, %v11232_v57  ;;  %9617 = vrcp.f32 %v11245_v50  ;;  %v1621_v23 = vand.u32 2147483648, %v11210_v53 }
  0xfb   : > { %v11258_v22 = vpop.eup %9611  ;;  %v1598_v35 = vmul.f32 %v11225_v32, %v1597_v63  ;;  %v1161_v24 = vmul.f32 %v9610_v15, %v11206_v41  ;;  %8774 = vmatmul.msk.f32.gmra.mxu0 %vm16338_vm0, %v527_v11  ;;  %v1172_v63 = vor.u32 1.1754944e-38, %v1171_v58  ;;  %vm1166_vm15 = vweird.f32 %v9610_v15 }
  0xfc   : > { %v1153_v52 = vsel %vm1152_vm10, %v9600_v6, %v1149_v4  ;;  %v1611_v58 = vmul.f32 %v11258_v22, %v11210_v53  ;;  %v11293_v37 = vadd.f32 1.0, %v9608_v49  ;;  %vm1616_vm3 = vweird.f32 %v11258_v22  ;;  %vm1167_vm6 = vmor %vm1165_vm8, %vm1166_vm15 }
  0xfd   : > { %v1158_v61 = vsel %vm11215_vm2, %v1157_v9, %v1153_v52  ;;  %v1599_v6 = vadd.f32 %v11225_v32, %v1598_v35  ;;  %v1162_v11 = vsub.f32 1.0, %v1161_v24  ;;  %v9614_v4 = vpop.eup %9613  ;;  %vm11299_vm2 = vcmp.eq.f32.partialorder %v1184_v21, 8.507059e+37 }
  0xfe   : > { %v1663_v40 = vmul.f32 %v1158_v61, %v11062_v2  ;;  %v9616_v45 = vpop.eup %9615  ;;  %v1176_v35 = vmul.f32 %v9614_v4, %v11232_v57  ;;  %v1187_v52 = vor.u32 1.1754944e-38, %v1186_v46  ;;  %v1612_v1 = vsub.f32 1.0, %v1611_v58 }
  0xff   : > { %v1603_v25 = vsel %vm11276_vm12, %v11225_v32, %v1599_v6  ;;  %v1163_v9 = vmul.f32 %v9610_v15, %v1162_v11  ;;  %v1636_v21 = vand.u32 2147483648, %v11245_v50  ;;  %vm1181_vm7 = vweird.f32 %v9614_v4 }
 0x100   : > { %v11303_v2 = vpop.f32.mrf.mxu0  ;;  %v1915_v61 = vmul.f32 %v10560_v8, %v1663_v40  ;;  %v1608_v49 = vsel %vm11228_vm5, %v1607_v48, %v1603_v25  ;;  %v1177_v6 = vsub.f32 1.0, %v1176_v35  ;;  %v9618_v11 = vpop.eup %9617  ;;  %v1613_v40 = vmul.f32 %v11258_v22, %v1612_v1  ;;  %vm11325_vm5 = vmor %vm1615_vm9, %vm1616_vm3 }
 0x101   : > { %v1693_v32 = vmul.f32 %v1608_v49, %v11075_v16  ;;  %v1164_v62 = vadd.f32 %v9610_v15, %v1163_v9  ;;  %v1622_v27 = vor.u32 1.1754944e-38, %v1621_v23  ;;  %9619 = vrcp.f32 %v11293_v37  ;;  %vm1182_vm9 = vmor %vm1180_vm14, %vm1181_vm7 }
 0x102   : > { %1958 = vst.msk [vmem:[#allocation2 + $0x40] sm:$0xff] %vm1949_vm4, %v1915_v61  ;;  %v1178_v46 = vmul.f32 %v9614_v4, %v1177_v6  ;;  %v1626_v58 = vmul.f32 %v9618_v11, %v11245_v50  ;;  %vm1630_vm8 = vweird.f32 %v11245_v50  ;;  %v1634_v41 = vand.u32 2147483647, %v11245_v50 }
 0x103   : > { %v1945_v16 = vmul.f32 %v11311_v36, %v1693_v32  ;;  %v1168_v48 = vsel %vm1167_vm6, %v9610_v15, %v1164_v62  ;;  %v1614_v15 = vadd.f32 %v11258_v22, %v1613_v40  ;;  %vm1631_vm10 = vweird.f32 %v9618_v11 }
 0x104   : > { %v1173_v1 = vsel %vm11265_vm11, %v1172_v63, %v1168_v48  ;;  %v1179_v9 = vadd.f32 %v9614_v4, %v1178_v46  ;;  %v1627_v35 = vsub.f32 1.0, %v1626_v58  ;;  %v1637_v53 = vor.u32 1.1754944e-38, %v1636_v21  ;;  %vm11352_vm11 = vmor %vm1630_vm8, %vm1631_vm10 }
 0x105   : > { %1988 = vst.msk [vmem:[#allocation2 + $0x130] sm:$0xff] %vm1949_vm4, %v1945_v16  ;;  %v1664_v23 = vmul.f32 %v1173_v1, %v11136_v10  ;;  %v1618_v7 = vsel %vm11325_vm5, %v11258_v22, %v1614_v15  ;;  %v11342_v63 = vadd.f32 1.0, %v9616_v45  ;;  %v8799_v61 = vmul.f32 -1.442695, %v11255_v33 }
 0x106   : > { %v1183_v32 = vsel %vm1182_vm9, %v9614_v4, %v1179_v9  ;;  %v1628_v10 = vmul.f32 %v9618_v11, %v1627_v35  ;;  %v1623_v62 = vsel %vm11281_vm13, %v1622_v27, %v1618_v7  ;;  %v11360_v4 = vadd.f32 %v11252_v18, %v11238_v31 }
 0x107   : > { %v1916_v49 = vmul.f32 %v10603_v30, %v1664_v23  ;;  %v9620_v40 = vpop.eup %9619  ;;  %v1188_v57 = vsel %vm11299_vm2, %v1187_v52, %v1183_v32  ;;  %v1694_v45 = vmul.f32 %v1623_v62, %v11140_v13  ;;  %9621 = vrcp.f32 %v11342_v63  ;;  %v11364_v52 = vpop.permute.xlu0 %1894 }
 0x108   : > { %v776_v6 = vpop.f32.mrf.mxu0  ;;  %v1665_v28 = vmul.f32 %v1188_v57, %v11160_v47  ;;  %v1629_v24 = vadd.f32 %v9618_v11, %v1628_v10  ;;  %vm1635_vm12 = vcmp.eq.f32.partialorder %v1634_v41, 8.507059e+37  ;;  %16545 = vst [vmem:[#allocation42_spill] sm:$0xff] %v11364_v52  ;;  %v1191_v50 = vmul.f32 %v9620_v40, %v11293_v37  ;;  %v11385_v23 = vpop.permute.xlu1 %1899 }
 0x109   : > { %1959 = vst.msk [vmem:[#allocation2 + $0x48] sm:$0xff] %vm1949_vm4, %v1916_v49  ;;  %v2000_v21 = vld [vmem:[#allocation2 + $0x40] sm:$0xff]  ;;  %v1946_v27 = vmul.f32 %v11364_v52, %v1694_v45  ;;  %v1199_v13 = vand.u32 2147483647, %v11293_v37  ;;  %v1201_v16 = vand.u32 2147483648, %v11293_v37  ;;  %9623 = vpow2.f32 %v8799_v61 }
 0x10a   : > { %8838 = vmatmul.msk.f32.gmra.mxu1 %vm1949_vm4, %v2000_v21  ;;  %v1917_v31 = vmul.f32 %v10601_v29, %v1665_v28  ;;  %v1633_v47 = vsel %vm11352_vm11, %v9618_v11, %v1629_v24  ;;  %v1192_v48 = vsub.f32 1.0, %v1191_v50  ;;  %vm1196_vm13 = vweird.f32 %v9620_v40  ;;  %16546 = vst [vmem:[#allocation43_spill] sm:$0xff] %v11385_v23 }
 0x10b   : > { %v1638_v46 = vsel %vm1635_vm12, %v1637_v53, %v1633_v47  ;;  %1989 = vst.msk [vmem:[#allocation2 + $0x138] sm:$0xff] %vm1949_vm4, %v1946_v27  ;;  %v8800_v58 = vmul.f32 -1.442695, %v11360_v4  ;;  %v11380_v41 = vadd.f32 %v11252_v18, %v11303_v2  ;;  %v11383_v15 = vadd.f32 %v11252_v18, %v776_v6 }
 0x10c   : > { %1960 = vst.msk [vmem:[#allocation2 + $0x50] sm:$0xff] %vm1949_vm4, %v1917_v31  ;;  %v1695_v25 = vmul.f32 %v1638_v46, %v11163_v39  ;;  %v1193_v1 = vmul.f32 %v9620_v40, %v1192_v48  ;;  %vm1195_vm14 = vweird.f32 %v11293_v37  ;;  %vm11388_vm15 = vcmp.eq.f32.partialorder %v1199_v13, 8.507059e+37 }
 0x10d   : > { %v9622_v11 = vpop.eup %9621  ;;  %v1202_v35 = vor.u32 1.1754944e-38, %v1201_v16  ;;  %9625 = vpow2.f32 %v8800_v58  ;;  %vm1645_vm2 = vweird.f32 %v11342_v63  ;;  %vm1197_vm3 = vmor %vm1195_vm14, %vm1196_vm13  ;;  %v1651_v61 = vand.u32 2147483648, %v11342_v63 }
 0x10e   : > { %v1947_v39 = vmul.f32 %v11385_v23, %v1695_v25  ;;  %v1194_v53 = vadd.f32 %v9620_v40, %v1193_v1  ;;  %v1641_v2 = vmul.f32 %v9622_v11, %v11342_v63  ;;  %v8801_v37 = vmul.f32 -1.442695, %v11380_v41 }
 0x10f   : > { %v8802_v32 = vmul.f32 -1.442695, %v11383_v15  ;;  %v9624_v62 = vpop.eup %9623  ;;  %vm1646_vm6 = vweird.f32 %v9622_v11  ;;  %v1649_v22 = vand.u32 2147483647, %v11342_v63 }
 0x110   : > { %v779_v7 = vpop.f32.mrf.mxu0  ;;  %v2001_v49 = vld [vmem:[#allocation2 + $0x48] sm:$0xff]  ;;  %1990 = vst.msk [vmem:[#allocation2 + $0x140] sm:$0xff] %vm1949_vm4, %v1947_v39  ;;  %v1198_v6 = vsel %vm1197_vm3, %v9620_v40, %v1194_v53  ;;  %v1642_v57 = vsub.f32 1.0, %v1641_v2  ;;  %v11406_v28 = vadd.f32 1.0, %v9624_v62  ;;  %9627 = vpow2.f32 %v8801_v37  ;;  %vm1647_vm7 = vmor %vm1645_vm2, %vm1646_vm6  ;;  %v11425_v39 = vpop.permute.xlu2 %1904 }
 0x111   : > { %v11400_v10 = vadd.f32 %v11252_v18, %v779_v7  ;;  %v1203_v45 = vsel %vm11388_vm15, %v1202_v35, %v1198_v6  ;;  %9629 = vpow2.f32 %v8802_v32  ;;  %v1652_v40 = vor.u32 1.1754944e-38, %v1651_v61  ;;  %16549 = vst [vmem:[#allocation44_spill] sm:$0xff] %v11425_v39 }
 0x112   : > { %8839 = vmatmul.msk.f32.gmra.mxu1 %vm1949_vm4, %v2001_v49  ;;  %v1666_v50 = vmul.f32 %v1203_v45, %v11170_v34  ;;  %v1643_v21 = vmul.f32 %v9622_v11, %v1642_v57  ;;  %9631 = vrcp.f32 %v11406_v28  ;;  %vm1650_vm5 = vcmp.eq.f32.partialorder %v1649_v22, 8.507059e+37 }
 0x113   : > { %v8803_v24 = vmul.f32 -1.442695, %v11400_v10  ;;  %v9626_v27 = vpop.eup %9625  ;;  %v2002_v34 = vld [vmem:[#allocation2 + $0x50] sm:$0xff]  ;;  %v1214_v53 = vand.u32 2147483647, %v11406_v28  ;;  %vm1210_vm8 = vweird.f32 %v11406_v28 }
 0x114   : > { %v1918_v13 = vmul.f32 %v10568_v12, %v1666_v50  ;;  %v1644_v16 = vadd.f32 %v9622_v11, %v1643_v21  ;;  %v11415_v31 = vadd.f32 1.0, %v9626_v27 }
 0x115   : > { %9633 = vpow2.f32 %v8803_v24  ;;  %vm11441_vm10 = vcmp.eq.f32.partialorder %v1214_v53, 8.507059e+37 }
 0x116   : > { %1961 = vst.msk [vmem:[#allocation2 + $0x58] sm:$0xff] %vm1949_vm4, %v1918_v13  ;;  %v1648_v47 = vsel %vm1647_vm7, %v9622_v11, %v1644_v16  ;;  %9635 = vrcp.f32 %v11415_v31  ;;  %v9628_v46 = vpop.eup %9627  ;;  %v1216_v11 = vand.u32 2147483648, %v11406_v28  ;;  %v1229_v37 = vand.u32 2147483647, %v11415_v31 }
 0x117   : > { %v1653_v63 = vsel %vm1650_vm5, %v1652_v40, %v1648_v47  ;;  %v9630_v25 = vpop.eup %9629  ;;  %v11423_v9 = vadd.f32 1.0, %v9628_v46  ;;  %v1231_v49 = vand.u32 2147483648, %v11415_v31  ;;  %vm1225_vm9 = vweird.f32 %v11415_v31 }
 0x118   : > { %v782_v48 = vpop.f32.mrf.mxu0  ;;  %v1696_v1 = vmul.f32 %v1653_v63, %v11202_v56  ;;  %v9632_v35 = vpop.eup %9631  ;;  %v11429_v2 = vadd.f32 1.0, %v9630_v25  ;;  %v1217_v22 = vor.u32 1.1754944e-38, %v1216_v11  ;;  %vm11447_vm12 = vcmp.eq.f32.partialorder %v1229_v37, 8.507059e+37 }
 0x119   : > { %v11420_v58 = vadd.f32 %v11252_v18, %v782_v48  ;;  %v1206_v61 = vmul.f32 %v9632_v35, %v11406_v28  ;;  %9637 = vrcp.f32 %v11423_v9  ;;  %vm1211_vm11 = vweird.f32 %v9632_v35 }
 0x11a   : > { %8840 = vmatmul.msk.f32.gmra.mxu1 %vm1949_vm4, %v2002_v34  ;;  %v1948_v7 = vmul.f32 %v11425_v39, %v1696_v1  ;;  %9639 = vrcp.f32 %v11429_v2  ;;  %v1232_v16 = vor.u32 1.1754944e-38, %v1231_v49  ;;  %vm1240_vm13 = vweird.f32 %v11423_v9  ;;  %vm1212_vm14 = vmor %vm1210_vm8, %vm1211_vm11 }
 0x11b   : > { %v9634_v56 = vpop.eup %9633  ;;  %v8804_v32 = vmul.f32 -1.442695, %v11420_v58  ;;  %v1207_v6 = vsub.f32 1.0, %v1206_v61  ;;  %v1244_v48 = vand.u32 2147483647, %v11423_v9  ;;  %v1246_v46 = vand.u32 2147483648, %v11423_v9 }
 0x11c   : > { %v9636_v62 = vpop.eup %9635  ;;  %1991 = vst.msk [vmem:[#allocation2 + $0x148] sm:$0xff] %vm1949_vm4, %v1948_v7  ;;  %v11451_v21 = vadd.f32 1.0, %v9634_v56  ;;  %vm1255_vm2 = vweird.f32 %v11429_v2  ;;  %v1259_v61 = vand.u32 2147483647, %v11429_v2  ;;  %v1261_v49 = vand.u32 2147483648, %v11429_v2 }
 0x11d   : > { %v1221_v45 = vmul.f32 %v9636_v62, %v11415_v31  ;;  %v1208_v24 = vmul.f32 %v9632_v35, %v1207_v6  ;;  %v2003_v27 = vld [vmem:[#allocation2 + $0x58] sm:$0xff]  ;;  %9641 = vpow2.f32 %v8804_v32  ;;  %vm1226_vm15 = vweird.f32 %v9636_v62 }
 0x11e   : > { %9643 = vrcp.f32 %v11451_v21  ;;  %vm1227_vm3 = vmor %vm1225_vm9, %vm1226_vm15  ;;  %vm11474_vm7 = vcmp.eq.f32.partialorder %v1244_v48, 8.507059e+37  ;;  %v1262_v50 = vor.u32 1.1754944e-38, %v1261_v49 }
 0x11f   : > { %v1222_v13 = vsub.f32 1.0, %v1221_v45  ;;  %v9638_v47 = vpop.eup %9637  ;;  %v1209_v34 = vadd.f32 %v9632_v35, %v1208_v24 }
 0x120   : > { %v785_v40 = vpop.f32.mrf.mxu0  ;;  %v9640_v63 = vpop.eup %9639  ;;  %v1236_v1 = vmul.f32 %v9638_v47, %v11423_v9  ;;  %vm1241_vm6 = vweird.f32 %v9638_v47 }
 0x121   : > { %v1223_v25 = vmul.f32 %v9636_v62, %v1222_v13  ;;  %v11463_v53 = vadd.f32 %v11252_v18, %v785_v40  ;;  %v1213_v11 = vsel %vm1212_vm14, %v9632_v35, %v1209_v34  ;;  %v1251_v7 = vmul.f32 %v9640_v63, %v11429_v2  ;;  %vm1242_vm8 = vmor %vm1240_vm13, %vm1241_vm6 }
 0x122   : > { %8841 = vmatmul.msk.f32.gmra.mxu1 %vm1949_vm4, %v2003_v27  ;;  %v1218_v28 = vsel %vm11441_vm10, %v1217_v22, %v1213_v11  ;;  %v1237_v56 = vsub.f32 1.0, %v1236_v1  ;;  %vm1256_vm5 = vweird.f32 %v9640_v63  ;;  %v1247_v1 = vor.u32 1.1754944e-38, %v1246_v46 }
 0x123   : > { %v1224_v37 = vadd.f32 %v9636_v62, %v1223_v25  ;;  %v1667_v32 = vmul.f32 %v1218_v28, %v11255_v33  ;;  %v1252_v6 = vsub.f32 1.0, %v1251_v7  ;;  %v9642_v45 = vpop.eup %9641  ;;  %v8805_v57 = vmul.f32 -1.442695, %v11463_v53  ;;  %vm1257_vm9 = vmor %vm1255_vm2, %vm1256_vm5 }
 0x124   : > { %v1238_v27 = vmul.f32 %v9638_v47, %v1237_v56  ;;  %v9644_v22 = vpop.eup %9643  ;;  %v11482_v13 = vadd.f32 1.0, %v9642_v45  ;;  %vm1260_vm10 = vcmp.eq.f32.partialorder %v1259_v61, 8.507059e+37  ;;  %v1274_v46 = vand.u32 2147483647, %v11451_v21 }
 0x125   : > { %v1228_v24 = vsel %vm1227_vm3, %v9636_v62, %v1224_v37  ;;  %v1919_v40 = vmul.f32 %v10621_v44, %v1667_v32  ;;  %v1253_v31 = vmul.f32 %v9640_v63, %v1252_v6  ;;  %v1266_v62 = vmul.f32 %v9644_v22, %v11451_v21 }
 0x126   : > { %v1233_v33 = vsel %vm11447_vm12, %v1232_v16, %v1228_v24  ;;  %v1239_v25 = vadd.f32 %v9638_v47, %v1238_v27  ;;  %9645 = vrcp.f32 %v11482_v13  ;;  %v1276_v37 = vand.u32 2147483648, %v11451_v21 }
 0x127   : > { %v1668_v48 = vmul.f32 %v1233_v33, %v11360_v4  ;;  %1962 = vst.msk [vmem:[#allocation2 + $0x60] sm:$0xff] %vm1949_vm4, %v1919_v40  ;;  %v1254_v11 = vadd.f32 %v9640_v63, %v1253_v31  ;;  %v1267_v4 = vsub.f32 1.0, %v1266_v62  ;;  %9647 = vpow2.f32 %v8805_v57 }
 0x128   : > { %v788_v34 = vpop.f32.mrf.mxu0  ;;  %v1243_v7 = vsel %vm1242_vm8, %v9638_v47, %v1239_v25  ;;  %vm1271_vm11 = vweird.f32 %v9644_v22  ;;  %vm1270_vm12 = vweird.f32 %v11451_v21  ;;  %v1277_v45 = vor.u32 1.1754944e-38, %v1276_v37 }
 0x129   : > { %v1920_v16 = vmul.f32 %v10619_v43, %v1668_v48  ;;  %v1248_v28 = vsel %vm11474_vm7, %v1247_v1, %v1243_v7  ;;  %v1258_v9 = vsel %vm1257_vm9, %v9640_v63, %v1254_v11  ;;  %v1268_v47 = vmul.f32 %v9644_v22, %v1267_v4  ;;  %vm1272_vm13 = vmor %vm1270_vm12, %vm1271_vm11 }
 0x12a   : > { %v1669_v61 = vmul.f32 %v1248_v28, %v11380_v41  ;;  %v1263_v56 = vsel %vm1260_vm10, %v1262_v50, %v1258_v9  ;;  %v11503_v49 = vadd.f32 %v11252_v18, %v788_v34  ;;  %vm1275_vm14 = vcmp.eq.f32.partialorder %v1274_v46, 8.507059e+37 }
 0x12b   : > { %1963 = vst.msk [vmem:[#allocation2 + $0x68] sm:$0xff] %vm1949_vm4, %v1920_v16  ;;  %v1670_v2 = vmul.f32 %v1263_v56, %v11383_v15  ;;  %v1269_v35 = vadd.f32 %v9644_v22, %v1268_v47  ;;  %v1289_v25 = vand.u32 2147483647, %v11482_v13  ;;  %v1291_v1 = vand.u32 2147483648, %v11482_v13 }
 0x12c   : > { %v1921_v32 = vmul.f32 %v10577_v17, %v1669_v61  ;;  %v9646_v63 = vpop.eup %9645  ;;  %v8806_v41 = vmul.f32 -1.442695, %v11503_v49  ;;  %vm1285_vm2 = vweird.f32 %v11482_v13 }
 0x12d   : > { %v1922_v6 = vmul.f32 %v10643_v60, %v1670_v2  ;;  %v1273_v27 = vsel %vm1272_vm13, %v9644_v22, %v1269_v35  ;;  %v1281_v15 = vmul.f32 %v9646_v63, %v11482_v13  ;;  %v9648_v33 = vpop.eup %9647  ;;  %vm1286_vm15 = vweird.f32 %v9646_v63 }
 0x12e   : > { %1964 = vst.msk [vmem:[#allocation2 + $0x70] sm:$0xff] %vm1949_vm4, %v1921_v32  ;;  %v2004_v57 = vld [vmem:[#allocation2 + $0x60] sm:$0xff]  ;;  %v1278_v21 = vsel %vm1275_vm14, %v1277_v45, %v1273_v27  ;;  %9649 = vpow2.f32 %v8806_v41  ;;  %v1001_v48 = vadd.f32 1.0, %v9648_v33  ;;  %vm1287_vm3 = vmor %vm1285_vm2, %vm1286_vm15  ;;  %v1292_v7 = vor.u32 1.1754944e-38, %v1291_v1 }
 0x12f   : > { %1965 = vst.msk [vmem:[#allocation2 + $0x78] sm:$0xff] %vm1949_vm4, %v1922_v6  ;;  %8842 = vmatmul.msk.f32.gmra.mxu1 %vm1949_vm4, %v2004_v57  ;;  %v1671_v31 = vmul.f32 %v1278_v21, %v11400_v10  ;;  %v1282_v34 = vsub.f32 1.0, %v1281_v15  ;;  %vm1290_vm6 = vcmp.eq.f32.partialorder %v1289_v25, 8.507059e+37 }
 0x130   : > { %v791_v24 = vpop.f32.mrf.mxu0  ;;  %9651 = vrcp.f32 %v1001_v48  ;;  %v1306_v45 = vand.u32 2147483648, %v1001_v48  ;;  %vm1300_vm5 = vweird.f32 %v1001_v48 }
 0x131   : > { %v11512_v40 = vadd.f32 %v11252_v18, %v791_v24  ;;  %v1923_v62 = vmul.f32 %v10641_v59, %v1671_v31  ;;  %v1283_v11 = vmul.f32 %v9646_v63, %v1282_v34 }
 0x132   : > { %v2005_v10 = vld [vmem:[#allocation2 + $0x68] sm:$0xff]  ;;  %v1307_v34 = vor.u32 1.1754944e-38, %v1306_v45 }
 0x133   : > { %v8807_v22 = vmul.f32 -1.442695, %v11512_v40  ;;  %1966 = vst.msk [vmem:[#allocation2 + $0x80] sm:$0xff] %vm1949_vm4, %v1923_v62  ;;  %v1284_v50 = vadd.f32 %v9646_v63, %v1283_v11 }
 0x134   : > { %v9650_v16 = vpop.eup %9649 }
 0x135   : > { %9653 = vpow2.f32 %v8807_v22  ;;  %v1288_v28 = vsel %vm1287_vm3, %v9646_v63, %v1284_v50  ;;  %v1002_v9 = vadd.f32 1.0, %v9650_v16  ;;  %v2006_v41 = vld [vmem:[#allocation2 + $0x70] sm:$0xff]  ;;  %v11543_v22 = vld [vmem:[%s16285_s5] ss:$0 sm:$0xff] }
 0x136   : > { %v1293_v61 = vsel %vm1290_vm6, %v1292_v7, %v1288_v28  ;;  %v9652_v56 = vpop.eup %9651 }
 0x137   : > { %8843 = vmatmul.msk.f32.gmra.mxu1 %vm1949_vm4, %v2005_v10  ;;  %v1672_v47 = vmul.f32 %v1293_v61, %v11420_v58  ;;  %9655 = vrcp.f32 %v1002_v9  ;;  %v1296_v2 = vmul.f32 %v9652_v56, %v1001_v48  ;;  %vm1301_vm7 = vweird.f32 %v9652_v56 }
 0x138   : > { %v794_v4 = vpop.f32.mrf.mxu0  ;;  %v2186_v46 = vpop.f32.mrf.mxu1  ;;  %v1304_v58 = vand.u32 2147483647, %v1001_v48  ;;  %vm1302_vm8 = vmor %vm1300_vm5, %vm1301_vm7  ;;  %v1319_v50 = vand.u32 2147483647, %v1002_v9  ;;  %v1321_v48 = vand.u32 2147483648, %v1002_v9  ;;  %vm1315_vm11 = vweird.f32 %v1002_v9 }
 0x139   : > { %v11524_v37 = vadd.f32 %v11252_v18, %v794_v4  ;;  %v1924_v35 = vmul.f32 %v10596_v26, %v1672_v47  ;;  %v1297_v63 = vsub.f32 1.0, %v1296_v2  ;;  %v2007_v47 = vld [vmem:[#allocation2 + $0x78] sm:$0xff] }
 0x13a   : > { %vm1305_vm10 = vcmp.eq.f32.partialorder %v1304_v58, 8.507059e+37  ;;  %vm1320_vm13 = vcmp.eq.f32.partialorder %v1319_v50, 8.507059e+37 }
 0x13b   : > { %v9654_v13 = vpop.eup %9653  ;;  %v8808_v32 = vmul.f32 -1.442695, %v11524_v37  ;;  %1967 = vst.msk [vmem:[#allocation2 + $0x88] sm:$0xff] %vm1949_vm4, %v1924_v35  ;;  %v1298_v24 = vmul.f32 %v9652_v56, %v1297_v63  ;;  %v1322_v63 = vor.u32 1.1754944e-38, %v1321_v48 }
 0x13c   : > { %v11530_v6 = vadd.f32 1.0, %v9654_v13 }
 0x13d   : > { %9657 = vpow2.f32 %v8808_v32  ;;  %v9656_v57 = vpop.eup %9655  ;;  %v1299_v21 = vadd.f32 %v9652_v56, %v1298_v24 }
 0x13e   : > { %9659 = vrcp.f32 %v11530_v6  ;;  %v1311_v31 = vmul.f32 %v9656_v57, %v1002_v9  ;;  %vm1316_vm9 = vweird.f32 %v9656_v57  ;;  %vm1330_vm15 = vweird.f32 %v11530_v6 }
 0x13f   : > { %8844 = vmatmul.msk.f32.gmra.mxu1 %vm1949_vm4, %v2006_v41  ;;  %v1303_v62 = vsel %vm1302_vm8, %v9652_v56, %v1299_v21  ;;  %v11552_v56 = vadd.f32 %v11543_v22, %v2186_v46  ;;  %vm1317_vm12 = vmor %vm1315_vm11, %vm1316_vm9  ;;  %v1334_v46 = vand.u32 2147483647, %v11530_v6 }
 0x140   : > { %v797_v27 = vpop.f32.mrf.mxu0  ;;  %v11534_v15 = vpop.f32.mrf.mxu1  ;;  %v1312_v11 = vsub.f32 1.0, %v1311_v31  ;;  %v1308_v16 = vsel %vm1305_vm10, %v1307_v34, %v1303_v62 }
 0x141   : > { %v11537_v33 = vadd.f32 %v11252_v18, %v797_v27  ;;  %v1673_v4 = vmul.f32 %v1308_v16, %v11463_v53  ;;  %v1336_v53 = vand.u32 2147483648, %v11530_v6  ;;  %v8872_v62 = vmul.f32 -1.442695, %v11552_v56 }
 0x142   : > { %v1313_v28 = vmul.f32 %v9656_v57, %v1312_v11  ;;  %vm1335_vm3 = vcmp.eq.f32.partialorder %v1334_v46, 8.507059e+37  ;;  %v11590_v46 = vadd.f32 %v11543_v22, %v11534_v15 }
 0x143   : > { %v8809_v25 = vmul.f32 -1.442695, %v11537_v33  ;;  %v9658_v1 = vpop.eup %9657  ;;  %v1925_v13 = vmul.f32 %v10677_v54, %v1673_v4  ;;  %v2008_v4 = vld [vmem:[#allocation2 + $0x80] sm:$0xff] }
 0x144   : > { %v9660_v10 = vpop.eup %9659  ;;  %v11546_v7 = vadd.f32 1.0, %v9658_v1  ;;  %v1314_v2 = vadd.f32 %v9656_v57, %v1313_v28  ;;  %v8873_v15 = vmul.f32 -1.442695, %v11590_v46 }
 0x145   : > { %9661 = vpow2.f32 %v8809_v25  ;;  %v1326_v61 = vmul.f32 %v9660_v10, %v11530_v6  ;;  %1968 = vst.msk [vmem:[#allocation2 + $0x90] sm:$0xff] %vm1949_vm4, %v1925_v13  ;;  %vm1331_vm14 = vweird.f32 %v9660_v10 }
 0x146   : > { %9663 = vrcp.f32 %v11546_v7  ;;  %v1318_v41 = vsel %vm1317_vm12, %v9656_v57, %v1314_v2  ;;  %vm1332_vm2 = vmor %vm1330_vm15, %vm1331_vm14  ;;  %v1337_v57 = vor.u32 1.1754944e-38, %v1336_v53  ;;  %vm1345_vm7 = vweird.f32 %v11546_v7 }
 0x147   : > { %v1327_v32 = vsub.f32 1.0, %v1326_v61  ;;  %8845 = vmatmul.msk.f32.gmra.mxu1 %vm1949_vm4, %v2007_v47  ;;  %v1323_v27 = vsel %vm1320_vm13, %v1322_v63, %v1318_v41  ;;  %v1351_v47 = vand.u32 2147483648, %v11546_v7 }
 0x148   : > { %v800_v35 = vpop.f32.mrf.mxu0  ;;  %v2192_v9 = vpop.f32.mrf.mxu1  ;;  %v1674_v31 = vmul.f32 %v1323_v27, %v11503_v49 }
 0x149   : > { %v11557_v45 = vadd.f32 %v11252_v18, %v800_v35  ;;  %v1328_v24 = vmul.f32 %v9660_v10, %v1327_v32  ;;  %v11569_v11 = vadd.f32 %v11543_v22, %v2192_v9  ;;  %v1349_v32 = vand.u32 2147483647, %v11546_v7 }
 0x14a   : > { %v1926_v50 = vmul.f32 %v10675_v51, %v1674_v31  ;;  %v2009_v31 = vld [vmem:[#allocation2 + $0x88] sm:$0xff] }
 0x14b   : > { %v9662_v58 = vpop.eup %9661  ;;  %v8810_v21 = vmul.f32 -1.442695, %v11557_v45  ;;  %v1329_v34 = vadd.f32 %v9660_v10, %v1328_v24  ;;  %v8874_v13 = vmul.f32 -1.442695, %v11569_v11  ;;  %v1352_v24 = vor.u32 1.1754944e-38, %v1351_v47 }
 0x14c   : > { %v11565_v25 = vadd.f32 1.0, %v9662_v58  ;;  %v9664_v1 = vpop.eup %9663  ;;  %1969 = vst.msk [vmem:[#allocation2 + $0x98] sm:$0xff] %vm1949_vm4, %v1926_v50  ;;  %vm1350_vm8 = vcmp.eq.f32.partialorder %v1349_v32, 8.507059e+37 }
 0x14d   : > { %9665 = vpow2.f32 %v8810_v21  ;;  %v1333_v16 = vsel %vm1332_vm2, %v9660_v10, %v1329_v34  ;;  %v1341_v49 = vmul.f32 %v9664_v1, %v11546_v7  ;;  %vm1346_vm6 = vweird.f32 %v9664_v1 }
 0x14e   : > { %v1338_v48 = vsel %vm1335_vm3, %v1337_v57, %v1333_v16  ;;  %9667 = vrcp.f32 %v11565_v25  ;;  %vm1347_vm5 = vmor %vm1345_vm7, %vm1346_vm6  ;;  %v1366_v16 = vand.u32 2147483648, %v11565_v25  ;;  %vm1360_vm9 = vweird.f32 %v11565_v25 }
 0x14f   : > { %v1675_v6 = vmul.f32 %v1338_v48, %v11512_v40  ;;  %v1342_v28 = vsub.f32 1.0, %v1341_v49  ;;  %9669 = vpow2.f32 %v8872_v62  ;;  %8846 = vmatmul.msk.f32.gmra.mxu1 %vm1949_vm4, %v2008_v4  ;;  %v1364_v4 = vand.u32 2147483647, %v11565_v25 }
 0x150   : > { %v803_v61 = vpop.f32.mrf.mxu0  ;;  %9671 = vpow2.f32 %v8874_v13  ;;  %v1367_v47 = vor.u32 1.1754944e-38, %v1366_v16 }
 0x151   : > { %v1927_v10 = vmul.f32 %v10617_v42, %v1675_v6  ;;  %v1343_v2 = vmul.f32 %v9664_v1, %v1342_v28  ;;  %v11586_v53 = vadd.f32 %v11252_v18, %v803_v61  ;;  %vm1365_vm12 = vcmp.eq.f32.partialorder %v1364_v4, 8.507059e+37 }
 0x153   : > { %v9666_v35 = vpop.eup %9665  ;;  %1970 = vst.msk [vmem:[#allocation2 + $0xa0] sm:$0xff] %vm1949_vm4, %v1927_v10  ;;  %v1344_v40 = vadd.f32 %v9664_v1, %v1343_v2  ;;  %v2195_v9 = vpop.f32.mrf.mxu1  ;;  %v8811_v62 = vmul.f32 -1.442695, %v11586_v53 }
 0x154   : > { %v11583_v63 = vadd.f32 1.0, %v9666_v35  ;;  %v9668_v41 = vpop.eup %9667  ;;  %v11609_v10 = vadd.f32 %v11543_v22, %v2195_v9 }
 0x155   : > { %v1348_v58 = vsel %vm1347_vm5, %v9664_v1, %v1344_v40  ;;  %v1356_v7 = vmul.f32 %v9668_v41, %v11565_v25  ;;  %v9670_v27 = vpop.eup %9669  ;;  %vm1361_vm10 = vweird.f32 %v9668_v41  ;;  %v2010_v25 = vld [vmem:[#allocation2 + $0x90] sm:$0xff] }
 0x156   : > { %9673 = vrcp.f32 %v11583_v63  ;;  %v1353_v21 = vsel %vm1350_vm8, %v1352_v24, %v1348_v58  ;;  %v9672_v49 = vpop.eup %9671  ;;  %v11601_v6 = vadd.f32 1.0, %v9670_v27  ;;  %vm1362_vm11 = vmor %vm1360_vm9, %vm1361_vm10  ;;  %v1381_v9 = vand.u32 2147483648, %v11583_v63 }
 0x157   : > { %v1676_v34 = vmul.f32 %v1353_v21, %v11524_v37  ;;  %v1357_v57 = vsub.f32 1.0, %v1356_v7  ;;  %8847 = vmatmul.msk.f32.gmra.mxu1 %vm1949_vm4, %v2009_v31  ;;  %9675 = vpow2.f32 %v8811_v62  ;;  %v11605_v61 = vadd.f32 1.0, %v9672_v49 }
 0x158   : > { %v806_v50 = vpop.f32.mrf.mxu0  ;;  %9677 = vpow2.f32 %v8873_v15  ;;  %v8875_v27 = vmul.f32 -1.442695, %v11609_v10  ;;  %vm1375_vm14 = vweird.f32 %v11583_v63 }
 0x159   : > { %v1928_v1 = vmul.f32 %v10743_v0, %v1676_v34  ;;  %v1358_v48 = vmul.f32 %v9668_v41, %v1357_v57  ;;  %v11612_v2 = vadd.f32 %v11252_v18, %v806_v50  ;;  %9679 = vrcp.f32 %v11601_v6 }
 0x15a   : > { %9681 = vrcp.f32 %v11605_v61  ;;  %v1379_v57 = vand.u32 2147483647, %v11583_v63 }
 0x15b   : > { %1971 = vst.msk [vmem:[#allocation2 + $0xa8] sm:$0xff] %vm1949_vm4, %v1928_v1  ;;  %v1359_v28 = vadd.f32 %v9668_v41, %v1358_v48  ;;  %v2198_v35 = vpop.f32.mrf.mxu1  ;;  %v8812_v21 = vmul.f32 -1.442695, %v11612_v2  ;;  %9683 = vpow2.f32 %v8875_v27  ;;  %v1382_v1 = vor.u32 1.1754944e-38, %v1381_v9 }
 0x15c   : > { %v9674_v37 = vpop.eup %9673  ;;  %vm1380_vm2 = vcmp.eq.f32.partialorder %v1379_v57, 8.507059e+37 }
 0x15d   : > { %v1371_v13 = vmul.f32 %v9674_v37, %v11583_v63  ;;  %v1363_v32 = vsel %vm1362_vm11, %v9668_v41, %v1359_v28  ;;  %v9676_v7 = vpop.eup %9675  ;;  %v11621_v41 = vadd.f32 %v11543_v22, %v2198_v35  ;;  %vm1376_vm13 = vweird.f32 %v9674_v37  ;;  %v9065_v35 = vld [vmem:[%s16286_s6 + $0x10] sm:$0xf] }
 0x15e   : > { %v1368_v40 = vsel %vm1365_vm12, %v1367_v47, %v1363_v32  ;;  %v11626_v62 = vadd.f32 1.0, %v9676_v7  ;;  %v9678_v50 = vpop.eup %9677  ;;  %9685 = vpow2.f32 %v8812_v21  ;;  %vm1377_vm15 = vmor %vm1375_vm14, %vm1376_vm13  ;;  %9066 = vmatpush.msk.msrb.mxu0 %vm2165_vm1, %v9065_v35  ;;  %v2012_v35 = vld [vmem:[#allocation2 + $0xa0] sm:$0xff] }
 0x15f   : > { %v1677_v24 = vmul.f32 %v1368_v40, %v11537_v33  ;;  %v1372_v58 = vsub.f32 1.0, %v1371_v13  ;;  %8848 = vmatmul.msk.f32.gmra.mxu1 %vm1949_vm4, %v2010_v25  ;;  %v8876_v15 = vmul.f32 -1.442695, %v11621_v41  ;;  %v11631_v49 = vpop.eup %9679  ;;  %v2011_v13 = vld [vmem:[#allocation2 + $0x98] sm:$0xff] }
 0x160   : > { %v809_v33 = vpop.f32.mrf.mxu0  ;;  %9687 = vrcp.f32 %v11626_v62  ;;  %v11637_v4 = vpop.eup %9681  ;;  %vm1390_vm3 = vweird.f32 %v11626_v62 }
 0x161   : > { %v1929_v31 = vmul.f32 %v10736_v38, %v1677_v24  ;;  %v1373_v34 = vmul.f32 %v9674_v37, %v1372_v58  ;;  %v11635_v48 = vadd.f32 %v11252_v18, %v809_v33  ;;  %9689 = vpow2.f32 %v8876_v15  ;;  %v9684_v40 = vpop.eup %9683 }
 0x162   : > { %v2511_v25 = vmul.f32 %v11637_v4, %v11605_v61  ;;  %v11651_v7 = vadd.f32 1.0, %v9684_v40  ;;  %v1394_v15 = vand.u32 2147483647, %v11626_v62  ;;  %v2013_v38 = vld [vmem:[#allocation2 + $0xa8] sm:$0xff] }
 0x163   : > { %1972 = vst.msk [vmem:[#allocation2 + $0xb0] sm:$0xff] %vm1949_vm4, %v1929_v31  ;;  %v1374_v16 = vadd.f32 %v9674_v37, %v1373_v34  ;;  %v8813_v24 = vmul.f32 -1.442695, %v11635_v48  ;;  %v11657_v31 = vadd.f32 1.0, %v9678_v50  ;;  %v11668_v50 = vmul.f32 %v11631_v49, %v11601_v6 }
 0x164   : > { %vm11683_vm7 = vcmp.eq.f32.partialorder %v1394_v15, 8.507059e+37  ;;  %vm2530_vm5 = vweird.f32 %v11651_v7 }
 0x165   : > { %v1378_v28 = vsel %vm1377_vm15, %v9674_v37, %v1374_v16  ;;  %v9686_v37 = vpop.eup %9685  ;;  %9691 = vpow2.f32 %v8813_v24  ;;  %v2512_v16 = vsub.f32 1.0, %v2511_v25  ;;  %v2536_v24 = vand.u32 2147483648, %v11651_v7 }
 0x166   : > { %v1383_v47 = vsel %vm1380_vm2, %v1382_v1, %v1378_v28  ;;  %v2201_v32 = vpop.f32.mrf.mxu1  ;;  %v9688_v9 = vpop.eup %9687  ;;  %v11655_v21 = vadd.f32 1.0, %v9686_v37  ;;  %9693 = vrcp.f32 %v11651_v7  ;;  %v1396_v1 = vand.u32 2147483648, %v11626_v62 }
 0x167   : > { %v1678_v63 = vmul.f32 %v1383_v47, %v11557_v45  ;;  %v11647_v58 = vadd.f32 %v11543_v22, %v2201_v32  ;;  %8849 = vmatmul.msk.f32.gmra.mxu1 %vm1949_vm4, %v2011_v13  ;;  %v1386_v34 = vmul.f32 %v9688_v9, %v11626_v62  ;;  %v9690_v28 = vpop.eup %9689  ;;  %vm1391_vm6 = vweird.f32 %v9688_v9 }
 0x168   : > { %v812_v33 = vpop.f32.mrf.mxu0  ;;  %9695 = vrcp.f32 %v11655_v21  ;;  %v2534_v32 = vand.u32 2147483647, %v11651_v7  ;;  %v11678_v37 = vadd.f32 1.0, %v9690_v28  ;;  %v11681_v27 = vmul.f32 %v11637_v4, %v2512_v16  ;;  %vm1392_vm10 = vmor %vm1390_vm3, %vm1391_vm6 }
 0x169   : > { %v1930_v45 = vmul.f32 %v10648_v5, %v1678_v63  ;;  %v8877_v57 = vmul.f32 -1.442695, %v11647_v58  ;;  %v1387_v63 = vsub.f32 1.0, %v1386_v34  ;;  %v11675_v40 = vadd.f32 %v11252_v18, %v812_v33 }
 0x16a   : > { %v1397_v47 = vor.u32 1.1754944e-38, %v1396_v1  ;;  %vm1405_vm8 = vweird.f32 %v11655_v21  ;;  %v1409_v28 = vand.u32 2147483647, %v11655_v21  ;;  %vm11696_vm9 = vcmp.eq.f32.partialorder %v2534_v32, 8.507059e+37 }
 0x16b   : > { %1973 = vst.msk [vmem:[#allocation2 + $0xb8] sm:$0xff] %vm1949_vm4, %v1930_v45  ;;  %v1388_v25 = vmul.f32 %v9688_v9, %v1387_v63  ;;  %9697 = vpow2.f32 %v8877_v57  ;;  %v9692_v45 = vpop.eup %9691  ;;  %v8814_v63 = vmul.f32 -1.442695, %v11675_v40  ;;  %v2537_v39 = vor.u32 1.1754944e-38, %v2536_v24 }
 0x16c   : > { %v9694_v18 = vpop.eup %9693  ;;  %9699 = vrcp.f32 %v11678_v37  ;;  %v11700_v1 = vadd.f32 1.0, %v9692_v45  ;;  %v1411_v32 = vand.u32 2147483648, %v11655_v21  ;;  %vm11718_vm13 = vcmp.eq.f32.partialorder %v1409_v28, 8.507059e+37 }
 0x16d   : > { %v1389_v33 = vadd.f32 %v9688_v9, %v1388_v25  ;;  %v2526_v16 = vmul.f32 %v9694_v18, %v11651_v7  ;;  %vm2531_vm11 = vweird.f32 %v9694_v18  ;;  %vm2545_vm15 = vweird.f32 %v11678_v37 }
 0x16e   : > { %v2204_v13 = vpop.f32.mrf.mxu1  ;;  %v9696_v57 = vpop.eup %9695  ;;  %9701 = vrcp.f32 %v11700_v1  ;;  %vm2532_vm14 = vmor %vm2530_vm5, %vm2531_vm11 }
 0x16f   : > { %8850 = vmatmul.msk.f32.gmra.mxu1 %vm1949_vm4, %v2012_v35  ;;  %v1393_v25 = vsel %vm1392_vm10, %v9688_v9, %v1389_v33  ;;  %v1401_v23 = vmul.f32 %v9696_v57, %v11655_v21  ;;  %v11705_v35 = vadd.f32 %v11543_v22, %v2204_v13  ;;  %v2527_v52 = vsub.f32 1.0, %v2526_v16 }
 0x170   : > { %v1398_v62 = vsel %vm11683_vm7, %v1397_v47, %v1393_v25  ;;  %v2549_v9 = vand.u32 2147483647, %v11678_v37  ;;  %v2551_v33 = vand.u32 2147483648, %v11678_v37  ;;  %9703 = vpow2.f32 %v8814_v63 }
 0x171   : > { %v9698_v36 = vpop.eup %9697  ;;  %v1679_v45 = vmul.f32 %v1398_v62, %v11586_v53  ;;  %v1402_v5 = vsub.f32 1.0, %v1401_v23  ;;  %v2528_v24 = vmul.f32 %v9694_v18, %v2527_v52  ;;  %vm1406_vm12 = vweird.f32 %v9696_v57  ;;  %v10176_v53 = vld [vmem:[%s16283_s3] ss:$0 sm:$0xff] }
 0x172   : > { %v11714_v13 = vadd.f32 1.0, %v9698_v36  ;;  %v9700_v47 = vpop.eup %9699  ;;  %v8878_v25 = vmul.f32 -1.442695, %v11705_v35  ;;  %v1412_v23 = vor.u32 1.1754944e-38, %v1411_v32  ;;  %vm11728_vm2 = vcmp.eq.f32.partialorder %v2549_v9, 8.507059e+37  ;;  %vm1407_vm3 = vmor %vm1405_vm8, %vm1406_vm12  ;;  %v815_v32 = vpop.f32.mrf.mxu0 }
 0x173   : > { %v1931_v34 = vmul.f32 %v10826_v55, %v1679_v45  ;;  %v1403_v16 = vmul.f32 %v9696_v57, %v1402_v5  ;;  %v2529_v0 = vadd.f32 %v9694_v18, %v2528_v24  ;;  %v2541_v52 = vmul.f32 %v9700_v47, %v11678_v37 }
 0x174   : > { %9705 = vrcp.f32 %v11714_v13  ;;  %v9702_v28 = vpop.eup %9701  ;;  %v2552_v7 = vor.u32 1.1754944e-38, %v2551_v33  ;;  %vm2546_vm6 = vweird.f32 %v9700_v47  ;;  %vm1420_vm7 = vweird.f32 %v11700_v1 }
 0x175   : > { %1974 = vst.msk [vmem:[#allocation2 + $0xc0] sm:$0xff] %vm1949_vm4, %v1931_v34  ;;  %v1404_v36 = vadd.f32 %v9696_v57, %v1403_v16  ;;  %v2533_v63 = vsel %vm2532_vm14, %v9694_v18, %v2529_v0  ;;  %v2542_v62 = vsub.f32 1.0, %v2541_v52  ;;  %9707 = vpow2.f32 %v8878_v25  ;;  %vm2547_vm5 = vmor %vm2545_vm15, %vm2546_vm6 }
 0x176   : > { %v2538_v45 = vsel %vm11696_vm9, %v2537_v39, %v2533_v63  ;;  %v1416_v24 = vmul.f32 %v9702_v28, %v11700_v1  ;;  %v1426_v34 = vand.u32 2147483648, %v11700_v1  ;;  %v9704_v16 = vpop.eup %9703  ;;  %v2207_v39 = vpop.f32.mrf.mxu1  ;;  %v1424_v52 = vand.u32 2147483647, %v11700_v1 }
 0x177   : > { %8851 = vmatmul.msk.f32.gmra.mxu1 %vm1949_vm4, %v2013_v38  ;;  %v1408_v9 = vsel %vm1407_vm3, %v9696_v57, %v1404_v36  ;;  %v3113_v38 = vmul.f32 %v2538_v45, %v11609_v10  ;;  %v2543_v21 = vmul.f32 %v9700_v47, %v2542_v62  ;;  %v11746_v15 = vadd.f32 1.0, %v9704_v16  ;;  %v2014_v10 = vld [vmem:[#allocation2 + $0xb0] sm:$0xff]  ;;  %v16564_v36 = vld [vmem:[#allocation29_spill] sm:$0xff] }
 0x178   : > { %v1413_v0 = vsel %vm11718_vm13, %v1412_v23, %v1408_v9  ;;  %v1417_v33 = vsub.f32 1.0, %v1416_v24  ;;  %v11755_v23 = vadd.f32 %v10176_v53, %v815_v32  ;;  %vm1421_vm8 = vweird.f32 %v9702_v28 }
 0x179   : > { %v1680_v18 = vmul.f32 %v1413_v0, %v11612_v2  ;;  %v11749_v57 = vmul.f32 %v3113_v38, %v10572_v14  ;;  %v2544_v25 = vadd.f32 %v9700_v47, %v2543_v21  ;;  %9709 = vrcp.f32 %v11746_v15  ;;  %vm1422_vm10 = vmor %vm1420_vm7, %vm1421_vm8 }
 0x17a   : > { %v9706_v2 = vpop.eup %9705  ;;  %v1418_v62 = vmul.f32 %v9702_v28, %v1417_v33  ;;  %v1427_v24 = vor.u32 1.1754944e-38, %v1426_v34  ;;  %v2564_v38 = vand.u32 2147483647, %v11714_v13  ;;  %v8815_v5 = vmul.f32 -1.442695, %v11755_v23  ;;  %v16565_v33 = vld [vmem:[#allocation3_spill] sm:$0xff] }
 0x17b   : > { %v1932_v63 = vmul.f32 %v16564_v36, %v1680_v18  ;;  %v9708_v45 = vpop.eup %9707  ;;  %v2548_v9 = vsel %vm2547_vm5, %v9700_v47, %v2544_v25  ;;  %v2556_v16 = vmul.f32 %v9706_v2, %v11714_v13  ;;  %9067 = vmatmul.msk.f32.vlgmr.msrb.gmra.mxu0 %vm1949_vm4, %v11749_v57  ;;  %v11772_v47 = vadd.f32 %v11543_v22, %v2207_v39 }
 0x17c   : > { %v2553_v37 = vsel %vm11728_vm2, %v2552_v7, %v2548_v9  ;;  %v1419_v32 = vadd.f32 %v9702_v28, %v1418_v62  ;;  %v11768_v0 = vadd.f32 1.0, %v9708_v45  ;;  %v2566_v18 = vand.u32 2147483648, %v11714_v13 }
 0x17d   : > { %1975 = vst.msk [vmem:[#allocation2 + $0xc8] sm:$0xff] %vm1949_vm4, %v1932_v63  ;;  %v3114_v34 = vmul.f32 %v2553_v37, %v11621_v41  ;;  %v2557_v21 = vsub.f32 1.0, %v2556_v16  ;;  %vm1425_vm9 = vcmp.eq.f32.partialorder %v1424_v52, 8.507059e+37  ;;  %vm2560_vm11 = vweird.f32 %v11714_v13  ;;  %v2015_v16 = vld [vmem:[#allocation2 + $0xb8] sm:$0xff]  ;;  %v16568_v37 = vld [vmem:[#allocation25_spill] sm:$0xff] }
 0x17e   : > { %v1423_v7 = vsel %vm1422_vm10, %v9702_v28, %v1419_v32  ;;  %9711 = vrcp.f32 %v11768_v0  ;;  %vm2561_vm12 = vweird.f32 %v9706_v2  ;;  %vm3236_vm13 = vcmask 1042432  }
 0x17f   : > { %8852 = vmatmul.msk.f32.gmra.mxu1 %vm1949_vm4, %v2014_v10  ;;  %v11783_v39 = vmul.f32 %v3114_v34, %v16565_v33  ;;  %v1428_v25 = vsel %vm1425_vm9, %v1427_v24, %v1423_v7  ;;  %v2558_v41 = vmul.f32 %v9706_v2, %v2557_v21  ;;  %v818_v10 = vpop.f32.mrf.mxu0  ;;  %v11785_v1 = vpop.eup %9709  ;;  %v1439_v62 = vand.u32 2147483647, %v11746_v15  ;;  %vm2562_vm15 = vmor %vm2560_vm11, %vm2561_vm12 }
 0x180   : > { %v1681_v63 = vmul.f32 %v1428_v25, %v11635_v48  ;;  %9713 = vpow2.f32 %v8815_v5  ;;  %v8879_v28 = vmul.f32 -1.442695, %v11772_v47  ;;  %vm11790_vm14 = vcmp.eq.f32.partialorder %v2564_v38, 8.507059e+37 }
 0x181   : > { %v2559_v52 = vadd.f32 %v9706_v2, %v2558_v41  ;;  %v2567_v9 = vor.u32 1.1754944e-38, %v2566_v18  ;;  %v1431_v24 = vmul.f32 %v11785_v1, %v11746_v15  ;;  %v1441_v48 = vand.u32 2147483648, %v11746_v15 }
 0x182   : > { %v1933_v32 = vmul.f32 %v16568_v37, %v1681_v63  ;;  %9715 = vpow2.f32 %v8879_v28  ;;  %v11800_v34 = vadd.f32 %v10176_v53, %v818_v10  ;;  %vm1435_vm2 = vweird.f32 %v11746_v15  ;;  %v8951_v28 = vld [vmem:[%s16286_s6 + $0x4] sm:$0xf] }
 0x183   : > { %v2563_v38 = vsel %vm2562_vm15, %v9706_v2, %v2559_v52  ;;  %v1432_v5 = vsub.f32 1.0, %v1431_v24  ;;  %9068 = vmatmul.msk.f32.gmra.mxu0 %vm1949_vm4, %v11783_v39  ;;  %vm11811_vm3 = vcmp.eq.f32.partialorder %v1439_v62, 8.507059e+37  ;;  %v3244_v25 = vrot.slane %v11783_v39, 5  ;;  %v3194_v62 = vld [vmem:[%s16286_s6] sm:$0xf]  ;;  %9508 = vmatpush.msk.msra.mxu3 %vm2165_vm1, %v8951_v28 }
 0x184   : > { %v9712_v7 = vpop.eup %9711  ;;  %1976 = vst.msk [vmem:[#allocation2 + $0xd0] sm:$0xff] %vm1949_vm4, %v1933_v32  ;;  %v2568_v13 = vsel %vm11790_vm14, %v2567_v9, %v2563_v38  ;;  %v8816_v2 = vmul.f32 -1.442695, %v11800_v34  ;;  %vm1436_vm6 = vweird.f32 %v11785_v1  ;;  %vm2515_vm7 = vweird.f32 %v11605_v61  ;;  %9507 = vmatpush.msk.msra.mxu2 %vm2165_vm1, %v3194_v62  ;;  %8914 = vmatpush.msk.msra.mxu1 %vm2165_vm1, %v3194_v62  ;;  %v2016_v15 = vld [vmem:[#allocation2 + $0xc0] sm:$0xff] }
 0x185   : > { %v3115_v41 = vmul.f32 %v2568_v13, %v11647_v58  ;;  %v1433_v10 = vmul.f32 %v11785_v1, %v1432_v5  ;;  %v2571_v63 = vmul.f32 %v9712_v7, %v11768_v0  ;;  %v1442_v45 = vor.u32 1.1754944e-38, %v1441_v48  ;;  %vm1437_vm5 = vmor %vm1435_vm2, %vm1436_vm6 }
 0x186   : > { %v9714_v52 = vpop.eup %9713  ;;  %9717 = vpow2.f32 %v8816_v2  ;;  %v16333_v9 = vrot.slane %v11749_v57, 5  ;;  %v2579_v38 = vand.u32 2147483647, %v11768_v0  ;;  %v2581_v5 = vand.u32 2147483648, %v11768_v0  ;;  %8952 = vmatpush.msk.msrb.mxu1 %vm2165_vm1, %v8951_v28 }
 0x187   : > { %v2210_v21 = vpop.f32.mrf.mxu1  ;;  %8853 = vmatmul.msk.f32.gmra.mxu1 %vm1949_vm4, %v2015_v16  ;;  %v11834_v24 = vmul.f32 %v3115_v41, %v10547_v3  ;;  %v1434_v16 = vadd.f32 %v11785_v1, %v1433_v10  ;;  %v2572_v32 = vsub.f32 1.0, %v2571_v63  ;;  %vm2576_vm8 = vweird.f32 %v9712_v7 }
 0x188   : > { %v11804_v18 = vadd.f32 %v11543_v22, %v2210_v21  ;;  %v11837_v21 = vadd.f32 1.0, %v9714_v52  ;;  %v9716_v48 = vpop.eup %9715  ;;  %v11849_v13 = vsel %vm3236_vm13, %v16333_v9, %v3244_v25  ;;  %vm2516_vm10 = vweird.f32 %v11637_v4 }
 0x189   : > { %16571 = vst [vmem:[#allocation45_spill] sm:$0xff] %v11849_v13  ;;  %v1438_v2 = vsel %vm1437_vm5, %v11785_v1, %v1434_v16  ;;  %v2573_v41 = vmul.f32 %v9712_v7, %v2572_v32  ;;  %v16572_v10 = vand.u32 2147483648, %v11605_v61  ;;  %v11861_v52 = vadd.f32 1.0, %v9716_v48  ;;  %vm11892_vm14 = vmor %vm2515_vm7, %vm2516_vm10 }
 0x18a   : > { %v8880_v58 = vmul.f32 -1.442695, %v11804_v18  ;;  %v1443_v62 = vsel %vm11811_vm3, %v1442_v45, %v1438_v2  ;;  %vm2575_vm9 = vweird.f32 %v11768_v0  ;;  %v16334_v16 = vrot.slane %v11834_v24, 5  ;;  %v16573_v0 = vld [vmem:[#allocation33_spill] sm:$0xff] }
 0x18b   : > { %v11857_v63 = vor.u32 1.1754944e-38, %v16572_v10  ;;  %v1682_v28 = vmul.f32 %v1443_v62, %v11675_v40  ;;  %v2574_v1 = vadd.f32 %v9712_v7, %v2573_v41  ;;  %9069 = vmatmul.msk.f32.gmra.mxu0 %vm1949_vm4, %v11834_v24  ;;  %v11870_v10 = vadd.f32 %v11637_v4, %v11681_v27  ;;  %vm2577_vm11 = vmor %vm2575_vm9, %vm2576_vm8  ;;  %v2018_v42 = vld [vmem:[#allocation2 + $0xd0] sm:$0xff] }
 0x18c   : > { %9719 = vpow2.f32 %v8880_v58  ;;  %v9718_v32 = vpop.eup %9717  ;;  %v2582_v53 = vor.u32 1.1754944e-38, %v2581_v5  ;;  %vm2580_vm12 = vcmp.eq.f32.partialorder %v2579_v38, 8.507059e+37  ;;  %v1454_v2 = vand.u32 2147483647, %v11837_v21 }
 0x18d   : > { %9721 = vrcp.f32 %v11837_v21  ;;  %v1934_v45 = vmul.f32 %v16573_v0, %v1682_v28  ;;  %v2578_v48 = vsel %vm2577_vm11, %v9712_v7, %v2574_v1  ;;  %v1456_v27 = vand.u32 2147483648, %v11837_v21 }
 0x18e   : > { %9723 = vrcp.f32 %v11861_v52  ;;  %v2583_v62 = vsel %vm2580_vm12, %v2582_v53, %v2578_v48  ;;  %v11881_v9 = vadd.f32 1.0, %v9718_v32  ;;  %v11886_v5 = vsel %vm3236_vm13, %v3244_v25, %v16334_v16 }
 0x18f   : > { %v2213_v58 = vpop.f32.mrf.mxu1  ;;  %8854 = vmatmul.msk.f32.gmra.mxu1 %vm1949_vm4, %v2016_v15  ;;  %16574 = vst [vmem:[#allocation46_spill] sm:$0xff] %v11886_v5  ;;  %v3116_v38 = vmul.f32 %v2583_v62, %v11705_v35  ;;  %v2596_v28 = vand.u32 2147483648, %v11861_v52  ;;  %vm1450_vm15 = vweird.f32 %v11837_v21  ;;  %v2017_v35 = vld [vmem:[#allocation2 + $0xc8] sm:$0xff]  ;;  %vm3512_vm2 = vcmask 1041408  }
 0x190   : > { %v11876_v40 = vadd.f32 %v11543_v22, %v2213_v58  ;;  %1977 = vst.msk [vmem:[#allocation2 + $0xd8] sm:$0xff] %vm1949_vm4, %v1934_v45  ;;  %v2594_v58 = vand.u32 2147483647, %v11861_v52  ;;  %9725 = vrcp.f32 %v11881_v9  ;;  %vm11915_vm3 = vcmp.eq.f32.partialorder %v1454_v2, 8.507059e+37 }
 0x191   : > { %v11910_v45 = vmul.f32 %v3116_v38, %v10587_v20  ;;  %v1457_v16 = vor.u32 1.1754944e-38, %v1456_v27  ;;  %vm2590_vm6 = vweird.f32 %v11861_v52  ;;  %v2597_v33 = vor.u32 1.1754944e-38, %v2596_v28 }
 0x192   : > { %v9720_v41 = vpop.eup %9719  ;;  %v8881_v53 = vmul.f32 -1.442695, %v11876_v40  ;;  %vm11921_vm5 = vcmp.eq.f32.partialorder %v2594_v58, 8.507059e+37  ;;  %v1469_v48 = vand.u32 2147483647, %v11881_v9  ;;  %vm1465_vm8 = vweird.f32 %v11881_v9 }
 0x193   : > { %v9722_v15 = vpop.eup %9721  ;;  %v11900_v1 = vadd.f32 1.0, %v9720_v41  ;;  %9070 = vmatmul.msk.f32.gmra.mxu0 %vm1949_vm4, %v11910_v45  ;;  %v3520_v27 = vrot.slane %v11783_v39, 6  ;;  %v16586_v26 = vrot.slane %v11749_v57, 6 }
 0x194   : > { %v1446_v32 = vmul.f32 %v9722_v15, %v11837_v21  ;;  %v9724_v41 = vpop.eup %9723  ;;  %vm1451_vm7 = vweird.f32 %v9722_v15 }
 0x195   : > { %9727 = vrcp.f32 %v11900_v1  ;;  %v2586_v38 = vmul.f32 %v9724_v41, %v11861_v52  ;;  %v2611_v58 = vand.u32 2147483648, %v11900_v1  ;;  %vm2591_vm10 = vweird.f32 %v9724_v41  ;;  %vm1452_vm11 = vmor %vm1450_vm15, %vm1451_vm7 }
 0x196   : > { %v1447_v62 = vsub.f32 1.0, %v1446_v32  ;;  %v1471_v32 = vand.u32 2147483648, %v11881_v9  ;;  %9729 = vpow2.f32 %v8881_v53  ;;  %v9726_v5 = vpop.eup %9725  ;;  %vm2592_vm15 = vmor %vm2590_vm6, %vm2591_vm10  ;;  %vm1470_vm7 = vcmp.eq.f32.partialorder %v1469_v48, 8.507059e+37 }
 0x197   : > { %v2216_v3 = vpop.f32.mrf.mxu1  ;;  %8855 = vmatmul.msk.f32.gmra.mxu1 %vm1949_vm4, %v2017_v35  ;;  %v2587_v14 = vsub.f32 1.0, %v2586_v38  ;;  %v16581_v35 = vand.u32 2147483647, %v11605_v61  ;;  %v1461_v0 = vmul.f32 %v9726_v5, %v11881_v9  ;;  %vm1466_vm12 = vweird.f32 %v9726_v5 }
 0x198   : > { %v1448_v2 = vmul.f32 %v9722_v15, %v1447_v62  ;;  %v11934_v28 = vadd.f32 %v11543_v22, %v2216_v3  ;;  %v16584_v61 = vrot.slane %v11910_v45, 5  ;;  %vm1467_vm6 = vmor %vm1465_vm8, %vm1466_vm12  ;;  %v1472_v20 = vor.u32 1.1754944e-38, %v1471_v32 }
 0x199   : > { %vm11941_vm9 = vcmp.eq.f32.partialorder %v16581_v35, 8.507059e+37  ;;  %v2588_v3 = vmul.f32 %v9724_v41, %v2587_v14  ;;  %v16585_v35 = vrot.slane %v11834_v24, 5  ;;  %v1462_v55 = vsub.f32 1.0, %v1461_v0 }
 0x19a   : > { %v1449_v37 = vadd.f32 %v9722_v15, %v1448_v2  ;;  %v8882_v2 = vmul.f32 -1.442695, %v11934_v28  ;;  %v16589_v48 = vsel %vm11892_vm14, %v11637_v4, %v11870_v10  ;;  %vm4551_vm14 = vcmask 1046528  }
 0x19b   : > { %v9728_v53 = vpop.eup %9727  ;;  %v11956_v36 = vsel %vm3236_vm13, %v16585_v35, %v16584_v61  ;;  %v2589_v14 = vadd.f32 %v9724_v41, %v2588_v3  ;;  %v11967_v61 = vsel %vm3512_vm2, %v16586_v26, %v3520_v27  ;;  %v1463_v0 = vmul.f32 %v9726_v5, %v1462_v55 }
 0x19c   : > { %v1453_v62 = vsel %vm1452_vm11, %v9722_v15, %v1449_v37  ;;  %v2601_v13 = vmul.f32 %v9728_v53, %v11900_v1  ;;  %vm2606_vm0 = vweird.f32 %v9728_v53  ;;  %9731 = vpow2.f32 %v8882_v2  ;;  %v9730_v51 = vpop.eup %9729 }
 0x19d   : > { %v1458_v21 = vsel %vm11915_vm3, %v1457_v16, %v1453_v62  ;;  %v3522_v16 = vrot.slane %v11834_v24, 6  ;;  %v2593_v25 = vsel %vm2592_vm15, %v9724_v41, %v2589_v14  ;;  %v11970_v62 = vadd.f32 1.0, %v9730_v51  ;;  %v8989_v51 = vld [vmem:[%s16286_s6 + $0x8] sm:$0xf] }
 0x19e   : > { %v1683_v37 = vmul.f32 %v1458_v21, %v11755_v23  ;;  %v2602_v15 = vsub.f32 1.0, %v2601_v13  ;;  %v16587_v23 = vld [vmem:[#allocation32_spill] sm:$0xff]  ;;  %v2598_v13 = vsel %vm11921_vm5, %v2597_v33, %v2593_v25  ;;  %v1464_v41 = vadd.f32 %v9726_v5, %v1463_v0  ;;  %8990 = vmatpush.msk.msrb.mxu2 %vm2165_vm1, %v8989_v51 }
 0x19f   : > { %v2219_v54 = vpop.f32.mrf.mxu1  ;;  %8856 = vmatmul.msk.f32.gmra.mxu1 %vm1949_vm4, %v2018_v42  ;;  %v11980_v26 = vsel %vm3512_vm2, %v3520_v27, %v3522_v16  ;;  %v3117_v35 = vmul.f32 %v2598_v13, %v11772_v47  ;;  %vm2605_vm3 = vweird.f32 %v11900_v1  ;;  %9733 = vrcp.f32 %v11970_v62 }
 0x1a0   : > { %v11973_v3 = vadd.f32 %v11543_v22, %v2219_v54  ;;  %v1935_v2 = vmul.f32 %v16587_v23, %v1683_v37  ;;  %v2603_v52 = vmul.f32 %v9728_v53, %v2602_v15  ;;  %v1468_v47 = vsel %vm1467_vm6, %v9726_v5, %v1464_v41  ;;  %vm2607_vm5 = vmor %vm2605_vm3, %vm2606_vm0 }
 0x1a1   : > { %v11995_v22 = vmul.f32 %v3117_v35, %v10585_v19  ;;  %v2612_v33 = vor.u32 1.1754944e-38, %v2611_v58  ;;  %v16588_v27 = vrot.slane %v11910_v45, 6  ;;  %v2523_v32 = vsel %vm11941_vm9, %v11857_v63, %v16589_v48 }
 0x1a2   : > { %1978 = vst.msk [vmem:[#allocation2 + $0xe0] sm:$0xff] %vm1949_vm4, %v1935_v2  ;;  %v2604_v42 = vadd.f32 %v9728_v53, %v2603_v52  ;;  %v8883_v54 = vmul.f32 -1.442695, %v11973_v3  ;;  %v9732_v55 = vpop.eup %9731  ;;  %v1473_v21 = vsel %vm1470_vm7, %v1472_v20, %v1468_v47  ;;  %v16590_v5 = vand.u32 2147483647, %v11900_v1 }
 0x1a3   : > { %v12001_v9 = vsel %vm3512_vm2, %v3522_v16, %v16588_v27  ;;  %v1684_v58 = vmul.f32 %v1473_v21, %v11800_v34  ;;  %v12014_v15 = vadd.f32 1.0, %v9732_v55  ;;  %v2019_v16 = vld [vmem:[#allocation2 + $0xd8] sm:$0xff]  ;;  %9071 = vmatmul.msk.f32.gmra.mxu0 %vm1949_vm4, %v11995_v22  ;;  %v3250_v63 = vrot.slane %v11995_v22, 5 }
 0x1a4   : > { %v2608_v14 = vsel %vm2607_vm5, %v9728_v53, %v2604_v42  ;;  %vm2610_vm0 = vcmp.eq.f32.partialorder %v16590_v5, 8.507059e+37  ;;  %9735 = vpow2.f32 %v8883_v54  ;;  %v3526_v10 = vrot.slane %v11995_v22, 6  ;;  %v16591_v53 = vld [vmem:[#allocation28_spill] sm:$0xff] }
 0x1a5   : > { %v2613_v37 = vsel %vm2610_vm0, %v2612_v33, %v2608_v14  ;;  %9737 = vrcp.f32 %v11657_v31  ;;  %v9734_v7 = vpop.eup %9733  ;;  %v2482_v1 = vsub.f32 1.0, %v11668_v50  ;;  %v2491_v34 = vand.u32 2147483648, %v11601_v6 }
 0x1a6   : > { %v3118_v4 = vmul.f32 %v2613_v37, %v11804_v18  ;;  %v1936_v38 = vmul.f32 %v16591_v53, %v1684_v58  ;;  %9739 = vrcp.f32 %v12014_v15  ;;  %v3112_v25 = vmul.f32 %v2523_v32, %v11569_v11  ;;  %v16594_v58 = vld [vmem:[#allocation6_spill] sm:$0xff] }
 0x1a7   : > { %v2616_v18 = vmul.f32 %v9734_v7, %v11970_v62  ;;  %8857 = vmatmul.msk.f32.gmra.mxu1 %vm1949_vm4, %v2019_v16  ;;  %v16592_v50 = vrot.slane %v11910_v45, 5  ;;  %v16593_v13 = vmov %v16588_v27  ;;  %v4552_v11 = vrot.slane %v11749_v57, 1 }
 0x1a8   : > { %v12028_v0 = vmul.f32 %v3118_v4, %v10560_v8  ;;  %1979 = vst.msk [vmem:[#allocation2 + $0xe8] sm:$0xff] %vm1949_vm4, %v1936_v38  ;;  %v3527_v52 = vsel %vm3512_vm2, %v16593_v13, %v3526_v10  ;;  %v4553_v35 = vrot.slane %v11783_v39, 1  ;;  %v2626_v51 = vand.u32 2147483648, %v11970_v62 }
 0x1a9   : > { %v3251_v2 = vsel %vm3236_vm13, %v16592_v50, %v3250_v63  ;;  %v2617_v41 = vsub.f32 1.0, %v2616_v18  ;;  %8959 = vmatmul.msk.f32.vlgmr.msra.gmra.mxu3 %vm1949_vm4, %v3527_v52  ;;  %v4555_v47 = vrot.slane %v11834_v24, 1  ;;  %v4557_v33 = vrot.slane %v11910_v45, 1  ;;  %v2020_v4 = vld [vmem:[#allocation2 + $0xe0] sm:$0xff] }
 0x1aa   : > { %8921 = vmatmul.msk.f32.vlgmr.msra.gmra.mxu2 %vm1949_vm4, %v3251_v2  ;;  %v3252_v20 = vrot.slane %v12028_v0, 5  ;;  %v3528_v42 = vrot.slane %v12028_v0, 6  ;;  %v9736_v54 = vpop.eup %9735  ;;  %v12047_v55 = vsel %vm4551_vm14, %v4552_v11, %v4553_v35  ;;  %v16350_v27 = vrot.slane %v11995_v22, 1  ;;  %v12081_v52 = vld [vmem:[%s16285_s5] ss:$0 sm:$0xff] }
 0x1ab   : > { %v12052_v48 = vpop.eup %9737  ;;  %v2618_v32 = vmul.f32 %v9734_v7, %v2617_v41  ;;  %vm2621_vm8 = vweird.f32 %v9734_v7  ;;  %v2624_v21 = vand.u32 2147483647, %v11970_v62  ;;  %v12055_v14 = vadd.f32 1.0, %v9736_v54  ;;  %9072 = vmatmul.msk.f32.gmra.mxu0 %vm1949_vm4, %v12028_v0 }
 0x1ac   : > { %v9740_v5 = vpop.eup %9739  ;;  %v12058_v37 = vmul.f32 %v3112_v25, %v16594_v58  ;;  %v2222_v16 = vpop.f32.mrf.mxu1  ;;  %v12063_v38 = vsel %vm4551_vm14, %v4553_v35, %v4555_v47  ;;  %v12066_v18 = vsel %vm4551_vm14, %v4555_v47, %v4557_v33  ;;  %v12071_v50 = vsel %vm4551_vm14, %v4557_v33, %v16350_v27  ;;  %v16603_v27 = vld [vmem:[#allocation7_spill] sm:$0xff] }
 0x1ad   : > { %16595 = vst [vmem:[#allocation6_spill] sm:$0xff] %v12066_v18  ;;  %v2619_v2 = vadd.f32 %v9734_v7, %v2618_v32  ;;  %vm2620_vm10 = vweird.f32 %v11970_v62  ;;  %v2631_v25 = vmul.f32 %v9740_v5, %v12014_v15  ;;  %9741 = vrcp.f32 %v12055_v14 }
 0x1ae   : > { %16596 = vst [vmem:[#allocation47_spill] sm:$0xff] %v12071_v50  ;;  %vm2486_vm9 = vweird.f32 %v11631_v49  ;;  %vm2622_vm11 = vmor %vm2620_vm10, %vm2621_vm8  ;;  %v2627_v13 = vor.u32 1.1754944e-38, %v2626_v51  ;;  %v12084_v11 = vadd.f32 %v12081_v52, %v2222_v16  ;;  %v3253_v62 = vsel %vm3236_vm13, %v3250_v63, %v3252_v20 }
 0x1af   : > { %v3529_v35 = vsel %vm3512_vm2, %v3526_v10, %v3528_v42  ;;  %v2623_v41 = vsel %vm2622_vm11, %v9734_v7, %v2619_v2  ;;  %vm2625_vm12 = vcmp.eq.f32.partialorder %v2624_v21, 8.507059e+37  ;;  %v2632_v54 = vsub.f32 1.0, %v2631_v25  ;;  %8858 = vmatmul.msk.f32.gmra.mxu1 %vm1949_vm4, %v2020_v4 }
 0x1b0   : > { %v2639_v51 = vand.u32 2147483647, %v12014_v15  ;;  %v2483_v47 = vmul.f32 %v11631_v49, %v2482_v1  ;;  %vm2485_vm15 = vweird.f32 %v11601_v6  ;;  %v2628_v33 = vsel %vm2625_vm12, %v2627_v13, %v2623_v41  ;;  %v2021_v13 = vld [vmem:[#allocation2 + $0xe8] sm:$0xff] }
 0x1b1   : > { %v2641_v32 = vand.u32 2147483648, %v12014_v15  ;;  %v8884_v63 = vmul.f32 -1.442695, %v12084_v11  ;;  %v3119_v58 = vmul.f32 %v2628_v33, %v11876_v40  ;;  %v2633_v16 = vmul.f32 %v9740_v5, %v2632_v54  ;;  %8960 = vmatmul.msk.f32.gmra.mxu3 %vm1949_vm4, %v3529_v35  ;;  %vm12141_vm10 = vmor %vm2485_vm15, %vm2486_vm9 }
 0x1b2   : > { %vm2635_vm3 = vweird.f32 %v12014_v15  ;;  %vm2636_vm6 = vweird.f32 %v9740_v5  ;;  %8922 = vmatmul.msk.f32.gmra.mxu2 %vm1949_vm4, %v3253_v62  ;;  %v16349_v10 = vrot.slane %v12058_v37, 7  ;;  %v3830_v7 = vrot.slane %v11749_v57, 7 }
 0x1b3   : > { %9743 = vpow2.f32 %v8884_v63  ;;  %v3832_v1 = vrot.slane %v11783_v39, 7  ;;  %v9742_v21 = vpop.eup %9741  ;;  %v12106_v4 = vmul.f32 %v3119_v58, %v10603_v30  ;;  %v2634_v40 = vadd.f32 %v9740_v5, %v2633_v16  ;;  %vm2637_vm0 = vmor %vm2635_vm3, %vm2636_vm6 }
 0x1b4   : > { %vm2640_vm7 = vcmp.eq.f32.partialorder %v2639_v51, 8.507059e+37  ;;  %vm3824_vm5 = vcmask 1040384   ;;  %v2642_v15 = vor.u32 1.1754944e-38, %v2641_v32  ;;  %v2646_v2 = vmul.f32 %v9742_v21, %v12055_v14  ;;  %v2225_v25 = vpop.f32.mrf.mxu1 }
 0x1b5   : > { %v12112_v62 = vsel %vm3824_vm5, %v16349_v10, %v3830_v7  ;;  %v12115_v39 = vsel %vm3824_vm5, %v3830_v7, %v3832_v1  ;;  %v2638_v35 = vsel %vm2637_vm0, %v9740_v5, %v2634_v40  ;;  %v12118_v41 = vadd.f32 %v12081_v52, %v2225_v25  ;;  %9073 = vmatmul.msk.f32.gmra.mxu0 %vm1949_vm4, %v12106_v4 }
 0x1b6   : > { %v3254_v54 = vrot.slane %v12106_v4, 5  ;;  %v3530_v51 = vrot.slane %v12106_v4, 6  ;;  %v2484_v33 = vadd.f32 %v11631_v49, %v2483_v47  ;;  %v2643_v32 = vsel %vm2640_vm7, %v2642_v15, %v2638_v35 }
 0x1b7   : > { %v2647_v63 = vsub.f32 1.0, %v2646_v2  ;;  %v2656_v58 = vand.u32 2147483648, %v12055_v14  ;;  %v3120_v16 = vmul.f32 %v2643_v32, %v11934_v28  ;;  %v8885_v5 = vmul.f32 -1.442695, %v12118_v41  ;;  %8859 = vmatmul.msk.f32.gmra.mxu1 %vm1949_vm4, %v2021_v13 }
 0x1b8   : > { %v3255_v7 = vsel %vm3236_vm13, %v3252_v20, %v3254_v54  ;;  %v3531_v40 = vsel %vm3512_vm2, %v3528_v42, %v3530_v51  ;;  %vm2651_vm8 = vweird.f32 %v9742_v21  ;;  %v2654_v15 = vand.u32 2147483647, %v12055_v14 }
 0x1b9   : > { %v9744_v25 = vpop.eup %9743  ;;  %v2648_v47 = vmul.f32 %v9742_v21, %v2647_v63  ;;  %v3834_v2 = vrot.slane %v11834_v24, 7  ;;  %v16599_v20 = vand.u32 2147483647, %v11601_v6  ;;  %v12152_v42 = vmul.f32 %v3120_v16, %v10601_v29  ;;  %8961 = vmatmul.msk.f32.gmra.mxu3 %vm1949_vm4, %v3531_v40 }
 0x1ba   : > { %v12154_v35 = vadd.f32 1.0, %v9744_v25  ;;  %9745 = vpow2.f32 %v8885_v5  ;;  %8923 = vmatmul.msk.f32.gmra.mxu2 %vm1949_vm4, %v3255_v7  ;;  %v2488_v32 = vsel %vm12141_vm10, %v11631_v49, %v2484_v33  ;;  %vm2650_vm9 = vweird.f32 %v12055_v14  ;;  %v2022_v25 = vld [vmem:[#allocation2 + $0xf0] sm:$0xff] }
 0x1bb   : > { %vm12147_vm11 = vcmp.eq.f32.partialorder %v16599_v20, 8.507059e+37  ;;  %v2649_v63 = vadd.f32 %v9742_v21, %v2648_v47  ;;  %v12163_v20 = vsel %vm3824_vm5, %v3832_v1, %v3834_v2  ;;  %v2492_v16 = vor.u32 1.1754944e-38, %v2491_v34  ;;  %vm2652_vm12 = vmor %vm2650_vm9, %vm2651_vm8 }
 0x1bc   : > { %v12169_v5 = vmul.f32 %v12052_v48, %v11657_v31  ;;  %v2657_v7 = vor.u32 1.1754944e-38, %v2656_v58  ;;  %9747 = vrcp.f32 %v12154_v35  ;;  %vm2655_vm15 = vcmp.eq.f32.partialorder %v2654_v15, 8.507059e+37  ;;  %v2228_v49 = vpop.f32.mrf.mxu1 }
 0x1bd   : > { %v2653_v40 = vsel %vm2652_vm12, %v9742_v21, %v2649_v63  ;;  %v3256_v14 = vrot.slane %v12152_v42, 5  ;;  %v3532_v1 = vrot.slane %v12152_v42, 6  ;;  %v2493_v6 = vsel %vm12147_vm11, %v2492_v16, %v2488_v32  ;;  %9074 = vmatmul.msk.f32.gmra.mxu0 %vm1949_vm4, %v12152_v42 }
 0x1be   : > { %v2658_v34 = vsel %vm2655_vm15, %v2657_v7, %v2653_v40  ;;  %v12178_v33 = vadd.f32 %v12081_v52, %v2228_v49  ;;  %v5352_v58 = vrot.slane %v11834_v24, 3  ;;  %v5040_v28 = vrot.slane %v11834_v24, 2 }
 0x1bf   : > { %v3121_v21 = vmul.f32 %v2658_v34, %v11973_v3  ;;  %v3257_v47 = vsel %vm3236_vm13, %v3254_v54, %v3256_v14  ;;  %v3533_v15 = vsel %vm3512_vm2, %v3530_v51, %v3532_v1  ;;  %8860 = vmatmul.msk.f32.gmra.mxu1 %vm1949_vm4, %v2022_v25  ;;  %v5353_v63 = vrot.slane %v11910_v45, 3 }
 0x1c0   : > { %v9746_v13 = vpop.eup %9745  ;;  %v8886_v32 = vmul.f32 -1.442695, %v12178_v33  ;;  %v3836_v16 = vrot.slane %v11910_v45, 7  ;;  %v5041_v7 = vrot.slane %v11910_v45, 2  ;;  %vm5351_vm3 = vcmask 1044480  }
 0x1c1   : > { %v12193_v3 = vmul.f32 %v3121_v21, %v10568_v12  ;;  %v12195_v40 = vadd.f32 1.0, %v9746_v13  ;;  %vm5039_vm6 = vcmask 1045504   ;;  %8962 = vmatmul.msk.f32.gmra.mxu3 %vm1949_vm4, %v3533_v15  ;;  %v12200_v24 = vsel %vm5351_vm3, %v5352_v58, %v5353_v63 }
 0x1c2   : > { %v9748_v54 = vpop.eup %9747  ;;  %9749 = vpow2.f32 %v8886_v32  ;;  %8924 = vmatmul.msk.f32.gmra.mxu2 %vm1949_vm4, %v3257_v47  ;;  %v12203_v51 = vsel %vm3824_vm5, %v3834_v2, %v3836_v16  ;;  %v12206_v45 = vsel %vm5039_vm6, %v5040_v28, %v5041_v7  ;;  %v3110_v34 = vmul.f32 %v2493_v6, %v11552_v56  ;;  %v2023_v6 = vld [vmem:[#allocation2 + $0xf8] sm:$0xff] }
 0x1c3   : > { %16602 = vst [vmem:[#allocation48_spill] sm:$0xff] %v12206_v45  ;;  %v2661_v49 = vmul.f32 %v9748_v54, %v12154_v35  ;;  %9751 = vrcp.f32 %v12195_v40  ;;  %v3258_v21 = vrot.slane %v12193_v3, 5  ;;  %v16355_v25 = vrot.slane %v12193_v3, 6 }
 0x1c4   : > { %v2506_v47 = vand.u32 2147483648, %v11657_v31  ;;  %v2231_v15 = vpop.f32.mrf.mxu1  ;;  %v2497_v2 = vsub.f32 1.0, %v12169_v5  ;;  %v2669_v13 = vand.u32 2147483647, %v12154_v35  ;;  %v2671_v28 = vand.u32 2147483648, %v12154_v35 }
 0x1c5   : > { %v2662_v58 = vsub.f32 1.0, %v2661_v49  ;;  %v12218_v32 = vadd.f32 %v12081_v52, %v2231_v15  ;;  %9075 = vmatmul.msk.f32.gmra.mxu0 %vm1949_vm4, %v12193_v3  ;;  %vm2666_vm7 = vweird.f32 %v9748_v54  ;;  %v3259_v49 = vsel %vm3236_vm13, %v3256_v14, %v3258_v21 }
 0x1c6   : > { %v3535_v5 = vsel %vm3512_vm2, %v3532_v1, %v16355_v25  ;;  %v12229_v12 = vmul.f32 %v3110_v34, %v16603_v27  ;;  %v16357_v29 = vrot.slane %v11995_v22, 7  ;;  %vm2665_vm0 = vweird.f32 %v12154_v35 }
 0x1c7   : > { %v2663_v56 = vmul.f32 %v9748_v54, %v2662_v58  ;;  %v8887_v15 = vmul.f32 -1.442695, %v12218_v32  ;;  %8861 = vmatmul.msk.f32.gmra.mxu1 %vm1949_vm4, %v2023_v6  ;;  %v16358_v58 = vrot.slane %v11995_v22, 3  ;;  %v16356_v1 = vrot.slane %v11995_v22, 2  ;;  %vm2667_vm8 = vmor %vm2665_vm0, %vm2666_vm7 }
 0x1c8   : > { %v9750_v10 = vpop.eup %9749  ;;  %v2672_v27 = vor.u32 1.1754944e-38, %v2671_v28  ;;  %vm2670_vm10 = vcmp.eq.f32.partialorder %v2669_v13, 8.507059e+37  ;;  %v2686_v25 = vand.u32 2147483648, %v12195_v40  ;;  %v2498_v13 = vmul.f32 %v12052_v48, %v2497_v2 }
 0x1c9   : > { %v9752_v30 = vpop.eup %9751  ;;  %v2664_v8 = vadd.f32 %v9748_v54, %v2663_v56  ;;  %v12236_v14 = vadd.f32 1.0, %v9750_v10  ;;  %9753 = vpow2.f32 %v8887_v15  ;;  %8963 = vmatmul.msk.f32.gmra.mxu3 %vm1949_vm4, %v3535_v5  ;;  %v12246_v56 = vsel %vm5351_vm3, %v5353_v63, %v16358_v58 }
 0x1ca   : > { %v2676_v34 = vmul.f32 %v9752_v30, %v12195_v40  ;;  %8925 = vmatmul.msk.f32.gmra.mxu2 %vm1949_vm4, %v3259_v49  ;;  %v2684_v10 = vand.u32 2147483647, %v12195_v40  ;;  %v12254_v49 = vsel %vm3824_vm5, %v3836_v16, %v16357_v29  ;;  %v12257_v15 = vor.u32 1.1754944e-38, %v2506_v47  ;;  %v2025_v29 = vld [vmem:[#allocation2 + $0x108] sm:$0xff] }
 0x1cb   : > { %v2668_v35 = vsel %vm2667_vm8, %v9748_v54, %v2664_v8  ;;  %9755 = vrcp.f32 %v12236_v14  ;;  %16604 = vst [vmem:[#allocation7_spill] sm:$0xff] %v12254_v49  ;;  %v12263_v54 = vsel %vm5039_vm6, %v5041_v7, %v16356_v1  ;;  %vm2681_vm11 = vweird.f32 %v9752_v30  ;;  %v2024_v7 = vld [vmem:[#allocation2 + $0x100] sm:$0xff] }
 0x1cc   : > { %v2673_v6 = vsel %vm2670_vm10, %v2672_v27, %v2668_v35  ;;  %v2677_v28 = vsub.f32 1.0, %v2676_v34  ;;  %v2234_v63 = vpop.f32.mrf.mxu1  ;;  %16605 = vst [vmem:[#allocation49_spill] sm:$0xff] %v12263_v54  ;;  %vm2680_vm9 = vweird.f32 %v12195_v40  ;;  %vm12274_vm12 = vcmp.eq.f32.partialorder %v2684_v10, 8.507059e+37 }
 0x1cd   : > { %v3122_v8 = vmul.f32 %v2673_v6, %v12084_v11  ;;  %v12267_v34 = vadd.f32 %v12081_v52, %v2234_v63  ;;  %vm2501_vm15 = vweird.f32 %v12052_v48  ;;  %v2687_v6 = vor.u32 1.1754944e-38, %v2686_v25  ;;  %vm2682_vm7 = vmor %vm2680_vm9, %vm2681_vm11 }
 0x1ce   : > { %v2678_v27 = vmul.f32 %v9752_v30, %v2677_v28  ;;  %vm2500_vm0 = vweird.f32 %v11657_v31  ;;  %v2699_v1 = vand.u32 2147483647, %v12236_v14  ;;  %v2701_v5 = vand.u32 2147483648, %v12236_v14 }
 0x1cf   : > { %v12271_v47 = vmul.f32 %v3122_v8, %v10621_v44  ;;  %v9754_v35 = vpop.eup %9753  ;;  %v8888_v28 = vmul.f32 -1.442695, %v12267_v34  ;;  %8862 = vmatmul.msk.f32.gmra.mxu1 %vm1949_vm4, %v2024_v7  ;;  %v16608_v11 = vrot.slane %v12193_v3, 6  ;;  %v16610_v58 = vrot.slane %v11995_v22, 1 }
 0x1d0   : > { %v2679_v2 = vadd.f32 %v9752_v30, %v2678_v27  ;;  %v12283_v40 = vadd.f32 1.0, %v9754_v35  ;;  %vm2695_vm10 = vweird.f32 %v12236_v14  ;;  %vm12332_vm11 = vcmp.eq.f32.partialorder %v2699_v1, 8.507059e+37 }
 0x1d1   : > { %v9756_v8 = vpop.eup %9755  ;;  %9076 = vmatmul.msk.f32.gmra.mxu0 %vm1949_vm4, %v12271_v47  ;;  %v3260_v10 = vrot.slane %v12271_v47, 5  ;;  %v3536_v16 = vrot.slane %v12271_v47, 6  ;;  %9757 = vpow2.f32 %v8888_v28 }
 0x1d2   : > { %v2683_v27 = vsel %vm2682_vm7, %v9752_v30, %v2679_v2  ;;  %v2691_v7 = vmul.f32 %v9756_v8, %v12236_v14  ;;  %9759 = vrcp.f32 %v12283_v40  ;;  %v12304_v2 = vadd.f32 %v12052_v48, %v2498_v13 }
 0x1d3   : > { %v2688_v35 = vsel %vm12274_vm12, %v2687_v6, %v2683_v27  ;;  %v3261_v30 = vsel %vm3236_vm13, %v3258_v21, %v3260_v10  ;;  %v3537_v6 = vsel %vm3512_vm2, %v16608_v11, %v3536_v16  ;;  %v16609_v27 = vrot.slane %v12028_v0, 1  ;;  %vm12361_vm12 = vmor %vm2500_vm0, %vm2501_vm15 }
 0x1d4   : > { %v3123_v25 = vmul.f32 %v2688_v35, %v12118_v41  ;;  %v2692_v63 = vsub.f32 1.0, %v2691_v7  ;;  %8926 = vmatmul.msk.f32.gmra.mxu2 %vm1949_vm4, %v3261_v30  ;;  %v2237_v28 = vpop.f32.mrf.mxu1  ;;  %v16612_v7 = vrot.slane %v12028_v0, 3  ;;  %v16613_v21 = vrot.slane %v11995_v22, 3  ;;  %8964 = vmatmul.msk.f32.gmra.mxu3 %vm1949_vm4, %v3537_v6 }
 0x1d5   : > { %v12315_v41 = vsel %vm4551_vm14, %v16610_v58, %v16609_v27  ;;  %vm2696_vm8 = vweird.f32 %v9756_v8  ;;  %v12329_v11 = vadd.f32 %v12081_v52, %v2237_v28  ;;  %v2702_v27 = vor.u32 1.1754944e-38, %v2701_v5 }
 0x1d6   : > { %16611 = vst [vmem:[#allocation50_spill] sm:$0xff] %v12315_v41  ;;  %v12322_v13 = vsel %vm5351_vm3, %v16613_v21, %v16612_v7  ;;  %v12325_v35 = vmul.f32 %v3123_v25, %v10619_v43  ;;  %v2693_v30 = vmul.f32 %v9756_v8, %v2692_v63  ;;  %v16617_v7 = vrot.slane %v12028_v0, 7  ;;  %vm2697_vm9 = vmor %vm2695_vm10, %vm2696_vm8 }
 0x1d7   : > { %16614 = vst [vmem:[#allocation51_spill] sm:$0xff] %v12322_v13  ;;  %v16618_v25 = vrot.slane %v11995_v22, 7  ;;  %v9758_v21 = vpop.eup %9757  ;;  %v2714_v28 = vand.u32 2147483647, %v12283_v40  ;;  %v8889_v43 = vmul.f32 -1.442695, %v12329_v11  ;;  %8863 = vmatmul.msk.f32.gmra.mxu1 %vm1949_vm4, %v2025_v29  ;;  %v2503_v45 = vsel %vm12361_vm12, %v12052_v48, %v12304_v2 }
 0x1d8   : > { %v2694_v6 = vadd.f32 %v9756_v8, %v2693_v30  ;;  %v9760_v1 = vpop.eup %9759  ;;  %v12348_v5 = vadd.f32 1.0, %v9758_v21  ;;  %v4563_v30 = vrot.slane %v12106_v4, 1  ;;  %v2716_v29 = vand.u32 2147483648, %v12283_v40 }
 0x1d9   : > { %v12341_v63 = vsel %vm3824_vm5, %v16618_v25, %v16617_v7  ;;  %9077 = vmatmul.msk.f32.gmra.mxu0 %vm1949_vm4, %v12325_v35  ;;  %v3538_v7 = vrot.slane %v12325_v35, 6  ;;  %v5359_v25 = vrot.slane %v12106_v4, 3  ;;  %v2706_v19 = vmul.f32 %v9760_v1, %v12283_v40 }
 0x1da   : > { %16619 = vst [vmem:[#allocation52_spill] sm:$0xff] %v12341_v63  ;;  %v2698_v44 = vsel %vm2697_vm9, %v9756_v8, %v2694_v6  ;;  %9761 = vpow2.f32 %v8889_v43  ;;  %v16622_v14 = vand.u32 2147483647, %v11657_v31  ;;  %v3842_v43 = vrot.slane %v12106_v4, 7 }
 0x1db   : > { %v2703_v8 = vsel %vm12332_vm11, %v2702_v27, %v2698_v44  ;;  %9763 = vrcp.f32 %v12348_v5  ;;  %v5045_v6 = vrot.slane %v12028_v0, 2  ;;  %v16625_v63 = vrot.slane %v12325_v35, 5 }
 0x1dc   : > { %vm12367_vm7 = vcmp.eq.f32.partialorder %v16622_v14, 8.507059e+37  ;;  %v3124_v31 = vmul.f32 %v2703_v8, %v12178_v33  ;;  %v2707_v14 = vsub.f32 1.0, %v2706_v19  ;;  %vm2710_vm15 = vweird.f32 %v12283_v40  ;;  %v2240_v58 = vpop.f32.mrf.mxu1 }
 0x1dd   : > { %v3263_v49 = vsel %vm3236_vm13, %v3260_v10, %v16625_v63  ;;  %v3539_v44 = vsel %vm3512_vm2, %v3536_v16, %v3538_v7  ;;  %v16626_v27 = vrot.slane %v12028_v0, 1  ;;  %v16628_v48 = vrot.slane %v12028_v0, 3  ;;  %v2026_v63 = vld [vmem:[#allocation2 + $0x110] sm:$0xff] }
 0x1de   : > { %8927 = vmatmul.msk.f32.gmra.mxu2 %vm1949_vm4, %v3263_v49  ;;  %v12398_v33 = vmul.f32 %v3124_v31, %v10577_v17  ;;  %v2708_v10 = vmul.f32 %v9760_v1, %v2707_v14  ;;  %vm2711_vm0 = vweird.f32 %v9760_v1  ;;  %8965 = vmatmul.msk.f32.gmra.mxu3 %vm1949_vm4, %v3539_v44  ;;  %v12402_v49 = vadd.f32 %v12081_v52, %v2240_v58 }
 0x1df   : > { %v12390_v13 = vsel %vm4551_vm14, %v16626_v27, %v4563_v30  ;;  %v12395_v19 = vsel %vm5351_vm3, %v16628_v48, %v5359_v25  ;;  %vm12404_vm8 = vcmp.eq.f32.partialorder %v2714_v28, 8.507059e+37  ;;  %v2717_v2 = vor.u32 1.1754944e-38, %v2716_v29  ;;  %8864 = vmatmul.msk.f32.gmra.mxu1 %vm1949_vm4, %v2026_v63  ;;  %vm2712_vm10 = vmor %vm2710_vm15, %vm2711_vm0 }
 0x1e0   : > { %16627 = vst [vmem:[#allocation53_spill] sm:$0xff] %v12390_v13  ;;  %v16632_v21 = vrot.slane %v12028_v0, 7  ;;  %v16634_v31 = vrot.slane %v11995_v22, 2  ;;  %v9762_v44 = vpop.eup %9761  ;;  %v2709_v27 = vadd.f32 %v9760_v1, %v2708_v10  ;;  %v2729_v58 = vand.u32 2147483647, %v12348_v5 }
 0x1e1   : > { %16629 = vst [vmem:[#allocation54_spill] sm:$0xff] %v12395_v19  ;;  %v8890_v28 = vmul.f32 -1.442695, %v12402_v49  ;;  %v3264_v29 = vrot.slane %v12398_v33, 5  ;;  %v9764_v48 = vpop.eup %9763  ;;  %v12425_v0 = vadd.f32 1.0, %v9762_v44  ;;  %9078 = vmatmul.msk.f32.gmra.mxu0 %vm1949_vm4, %v12398_v33  ;;  %v3540_v22 = vrot.slane %v12398_v33, 6 }
 0x1e2   : > { %v12411_v8 = vsel %vm3824_vm5, %v16632_v21, %v3842_v43  ;;  %v12416_v14 = vsel %vm5039_vm6, %v16634_v31, %v5045_v6  ;;  %v4565_v10 = vrot.slane %v12152_v42, 1  ;;  %v5361_v21 = vrot.slane %v12152_v42, 3 }
 0x1e3   : > { %16633 = vst [vmem:[#allocation55_spill] sm:$0xff] %v12411_v8  ;;  %v2713_v31 = vsel %vm2712_vm10, %v9760_v1, %v2709_v27  ;;  %v2721_v63 = vmul.f32 %v9764_v48, %v12348_v5  ;;  %v2731_v17 = vand.u32 2147483648, %v12348_v5  ;;  %9765 = vpow2.f32 %v8890_v28 }
 0x1e4   : > { %16635 = vst [vmem:[#allocation56_spill] sm:$0xff] %v12416_v14  ;;  %v2718_v40 = vsel %vm12404_vm8, %v2717_v2, %v2713_v31  ;;  %9767 = vrcp.f32 %v12425_v0  ;;  %v3844_v44 = vrot.slane %v12152_v42, 7  ;;  %v5047_v14 = vrot.slane %v12106_v4, 2  ;;  %v2243_v2 = vpop.f32.mrf.mxu1 }
 0x1e5   : > { %v2508_v8 = vsel %vm12367_vm7, %v12257_v15, %v2503_v45  ;;  %v3125_v1 = vmul.f32 %v2718_v40, %v12218_v32  ;;  %v2722_v27 = vsub.f32 1.0, %v2721_v63  ;;  %v16636_v19 = vrot.slane %v12325_v35, 5 }
 0x1e6   : > { %vm2725_vm11 = vweird.f32 %v12348_v5  ;;  %v3541_v16 = vsel %vm3512_vm2, %v3538_v7, %v3540_v22  ;;  %v12450_v4 = vsel %vm4551_vm14, %v4563_v30, %v4565_v10  ;;  %v12453_v54 = vsel %vm5351_vm3, %v5359_v25, %v5361_v21  ;;  %v2027_v30 = vld [vmem:[#allocation2 + $0x118] sm:$0xff] }
 0x1e7   : > { %v3265_v28 = vsel %vm3236_vm13, %v16636_v19, %v3264_v29  ;;  %16637 = vst [vmem:[#allocation57_spill] sm:$0xff] %v12450_v4  ;;  %v12456_v45 = vmul.f32 %v3125_v1, %v10643_v60  ;;  %v2723_v32 = vmul.f32 %v9764_v48, %v2722_v27  ;;  %vm2726_vm9 = vweird.f32 %v9764_v48  ;;  %8966 = vmatmul.msk.f32.gmra.mxu3 %vm1949_vm4, %v3541_v16 }
 0x1e8   : > { %8928 = vmatmul.msk.f32.gmra.mxu2 %vm1949_vm4, %v3265_v28  ;;  %16638 = vst [vmem:[#allocation58_spill] sm:$0xff] %v12453_v54  ;;  %v12460_v15 = vadd.f32 %v12081_v52, %v2243_v2  ;;  %vm12462_vm12 = vcmp.eq.f32.partialorder %v2729_v58, 8.507059e+37  ;;  %v2732_v7 = vor.u32 1.1754944e-38, %v2731_v17  ;;  %v12467_v31 = vsel %vm3824_vm5, %v3842_v43, %v3844_v44  ;;  %8865 = vmatmul.msk.f32.gmra.mxu1 %vm1949_vm4, %v2027_v30  ;;  %vm2727_vm7 = vmor %vm2725_vm11, %vm2726_vm9 }
 0x1e9   : > { %16641 = vst [vmem:[#allocation59_spill] sm:$0xff] %v12467_v31  ;;  %v12470_v25 = vsel %vm5039_vm6, %v5045_v6, %v5047_v14  ;;  %v9766_v63 = vpop.eup %9765  ;;  %v2724_v40 = vadd.f32 %v9764_v48, %v2723_v32  ;;  %v2744_v1 = vand.u32 2147483647, %v12425_v0  ;;  %v3266_v58 = vrot.slane %v12456_v45, 5  ;;  %9079 = vmatmul.msk.f32.gmra.mxu0 %vm1949_vm4, %v12456_v45 }
 0x1ea   : > { %16642 = vst [vmem:[#allocation60_spill] sm:$0xff] %v12470_v25  ;;  %v8891_v27 = vmul.f32 -1.442695, %v12460_v15  ;;  %v9768_v28 = vpop.eup %9767  ;;  %v12479_v17 = vadd.f32 1.0, %v9766_v63  ;;  %v3542_v43 = vrot.slane %v12456_v45, 6  ;;  %v4567_v6 = vrot.slane %v12193_v3, 1 }
 0x1eb   : > { %v5363_v16 = vrot.slane %v12193_v3, 3  ;;  %v2728_v2 = vsel %vm2727_vm7, %v9764_v48, %v2724_v40  ;;  %v2736_v32 = vmul.f32 %v9768_v28, %v12425_v0  ;;  %v2746_v30 = vand.u32 2147483648, %v12425_v0 }
 0x1ec   : > { %9769 = vpow2.f32 %v8891_v27  ;;  %v2733_v5 = vsel %vm12462_vm12, %v2732_v7, %v2728_v2  ;;  %v3846_v63 = vrot.slane %v12193_v3, 7  ;;  %v5049_v60 = vrot.slane %v12152_v42, 2  ;;  %v2246_v7 = vpop.f32.mrf.mxu1 }
 0x1ed   : > { %9771 = vrcp.f32 %v12479_v17  ;;  %v3111_v25 = vmul.f32 %v2508_v8, %v11590_v46  ;;  %v3126_v31 = vmul.f32 %v2733_v5, %v12267_v34  ;;  %v2737_v54 = vsub.f32 1.0, %v2736_v32 }
 0x1ee   : > { %v3267_v48 = vsel %vm3236_vm13, %v3264_v29, %v3266_v58  ;;  %vm2740_vm15 = vweird.f32 %v12425_v0  ;;  %v3543_v19 = vsel %vm3512_vm2, %v3540_v22, %v3542_v43  ;;  %v12500_v40 = vsel %vm4551_vm14, %v4565_v10, %v4567_v6  ;;  %v2028_v22 = vld [vmem:[#allocation2 + $0x120] sm:$0xff] }
 0x1ef   : > { %16643 = vst [vmem:[#allocation61_spill] sm:$0xff] %v12500_v40  ;;  %v12503_v27 = vsel %vm5351_vm3, %v5361_v21, %v5363_v16  ;;  %v12506_v46 = vmul.f32 %v3126_v31, %v10641_v59  ;;  %v2738_v42 = vmul.f32 %v9768_v28, %v2737_v54  ;;  %vm2741_vm0 = vweird.f32 %v9768_v28  ;;  %8967 = vmatmul.msk.f32.gmra.mxu3 %vm1949_vm4, %v3543_v19  ;;  %v16649_v59 = vld [vmem:[#allocation10_spill] sm:$0xff] }
 0x1f0   : > { %8929 = vmatmul.msk.f32.gmra.mxu2 %vm1949_vm4, %v3267_v48  ;;  %16644 = vst [vmem:[#allocation62_spill] sm:$0xff] %v12503_v27  ;;  %v12510_v34 = vadd.f32 %v12081_v52, %v2246_v7  ;;  %vm12512_vm8 = vcmp.eq.f32.partialorder %v2744_v1, 8.507059e+37  ;;  %v2747_v29 = vor.u32 1.1754944e-38, %v2746_v30  ;;  %v12517_v10 = vsel %vm3824_vm5, %v3844_v44, %v3846_v63  ;;  %8866 = vmatmul.msk.f32.gmra.mxu1 %vm1949_vm4, %v2028_v22  ;;  %vm2742_vm10 = vmor %vm2740_vm15, %vm2741_vm0 }
 0x1f1   : > { %16647 = vst [vmem:[#allocation63_spill] sm:$0xff] %v12517_v10  ;;  %v12520_v21 = vsel %vm5039_vm6, %v5047_v14, %v5049_v60  ;;  %v2739_v54 = vadd.f32 %v9768_v28, %v2738_v42  ;;  %v2759_v2 = vand.u32 2147483647, %v12479_v17  ;;  %v3268_v1 = vrot.slane %v12506_v46, 5  ;;  %9080 = vmatmul.msk.f32.gmra.mxu0 %vm1949_vm4, %v12506_v46 }
 0x1f2   : > { %16648 = vst [vmem:[#allocation64_spill] sm:$0xff] %v12520_v21  ;;  %v9770_v31 = vpop.eup %9769  ;;  %v8892_v32 = vmul.f32 -1.442695, %v12510_v34  ;;  %v3544_v14 = vrot.slane %v12506_v46, 6  ;;  %v4569_v30 = vrot.slane %v12271_v47, 1  ;;  %v5365_v48 = vrot.slane %v12271_v47, 3 }
 0x1f3   : > { %v9772_v5 = vpop.eup %9771  ;;  %v12529_v44 = vadd.f32 1.0, %v9770_v31  ;;  %v2743_v19 = vsel %vm2742_vm10, %v9768_v28, %v2739_v54  ;;  %v2761_v42 = vand.u32 2147483648, %v12479_v17  ;;  %v16371_v22 = vrot.slane %v12271_v47, 7 }
 0x1f4   : > { %v2751_v7 = vmul.f32 %v9772_v5, %v12479_v17  ;;  %9773 = vpow2.f32 %v8892_v32  ;;  %v2748_v0 = vsel %vm12512_vm8, %v2747_v29, %v2743_v19  ;;  %v16370_v31 = vrot.slane %v12193_v3, 2  ;;  %v2249_v29 = vpop.f32.mrf.mxu1 }
 0x1f5   : > { %9775 = vrcp.f32 %v12529_v44  ;;  %v12544_v21 = vmul.f32 %v3111_v25, %v16649_v59  ;;  %v3127_v10 = vmul.f32 %v2748_v0, %v12329_v11  ;;  %v3269_v54 = vsel %vm3236_vm13, %v3266_v58, %v3268_v1  ;;  %v16652_v59 = vld [vmem:[#allocation14_spill] sm:$0xff] }
 0x1f6   : > { %v2752_v28 = vsub.f32 1.0, %v2751_v7  ;;  %vm2755_vm11 = vweird.f32 %v12479_v17  ;;  %v3545_v8 = vsel %vm3512_vm2, %v3542_v43, %v3544_v14  ;;  %v12552_v32 = vsel %vm4551_vm14, %v4567_v6, %v4569_v30  ;;  %v2029_v6 = vld [vmem:[#allocation2 + $0x128] sm:$0xff] }
 0x1f7   : > { %16650 = vst [vmem:[#allocation10_spill] sm:$0xff] %v12552_v32  ;;  %v12555_v19 = vsel %vm5351_vm3, %v5363_v16, %v5365_v48  ;;  %v12558_v25 = vmul.f32 %v3127_v10, %v16652_v59  ;;  %vm2756_vm9 = vweird.f32 %v9772_v5  ;;  %8968 = vmatmul.msk.f32.gmra.mxu3 %vm1949_vm4, %v3545_v8  ;;  %v12562_v58 = vadd.f32 %v12081_v52, %v2249_v29 }
 0x1f8   : > { %8930 = vmatmul.msk.f32.gmra.mxu2 %vm1949_vm4, %v3269_v54  ;;  %16651 = vst [vmem:[#allocation65_spill] sm:$0xff] %v12555_v19  ;;  %v2753_v11 = vmul.f32 %v9772_v5, %v2752_v28  ;;  %vm12564_vm12 = vcmp.eq.f32.partialorder %v2759_v2, 8.507059e+37  ;;  %v2762_v43 = vor.u32 1.1754944e-38, %v2761_v42  ;;  %v12571_v16 = vsel %vm3824_vm5, %v3846_v63, %v16371_v22  ;;  %8867 = vmatmul.msk.f32.gmra.mxu1 %vm1949_vm4, %v2029_v6  ;;  %vm2757_vm7 = vmor %vm2755_vm11, %vm2756_vm9 }
 0x1f9   : > { %16655 = vst [vmem:[#allocation66_spill] sm:$0xff] %v12571_v16  ;;  %v12576_v10 = vsel %vm5039_vm6, %v5049_v60, %v16370_v31  ;;  %v2774_v54 = vand.u32 2147483647, %v12529_v44  ;;  %v8893_v2 = vmul.f32 -1.442695, %v12562_v58  ;;  %v3270_v42 = vrot.slane %v12558_v25, 5  ;;  %9081 = vmatmul.msk.f32.gmra.mxu0 %vm1949_vm4, %v12558_v25 }
 0x1fa   : > { %16656 = vst [vmem:[#allocation67_spill] sm:$0xff] %v12576_v10  ;;  %v9774_v0 = vpop.eup %9773  ;;  %v2754_v28 = vadd.f32 %v9772_v5, %v2753_v11  ;;  %v3546_v60 = vrot.slane %v12558_v25, 6  ;;  %v4571_v29 = vrot.slane %v12325_v35, 1  ;;  %v5367_v11 = vrot.slane %v12325_v35, 3  ;;  %v16660_v10 = vld [vmem:[#allocation24_spill] sm:$0xff] }
 0x1fb   : > { %v9776_v8 = vpop.eup %9775  ;;  %v12585_v63 = vadd.f32 1.0, %v9774_v0  ;;  %v2776_v22 = vand.u32 2147483648, %v12529_v44  ;;  %9777 = vpow2.f32 %v8893_v2  ;;  %v16374_v0 = vrot.slane %v12325_v35, 7 }
 0x1fc   : > { %v2758_v31 = vsel %vm2757_vm7, %v9772_v5, %v2754_v28  ;;  %v2766_v6 = vmul.f32 %v9776_v8, %v12529_v44  ;;  %v16373_v59 = vrot.slane %v12271_v47, 2  ;;  %v3271_v5 = vsel %vm3236_vm13, %v3268_v1, %v3270_v42  ;;  %v12602_v28 = vpop.f32.mrf.mxu0  ;;  %v2252_v7 = vpop.f32.mrf.mxu1 }
 0x1fd   : > { %v2763_v17 = vsel %vm12564_vm12, %v2762_v43, %v2758_v31  ;;  %9779 = vrcp.f32 %v12585_v63  ;;  %16657 = vst [vmem:[#allocation68_spill] sm:$0xff] %v12602_v28  ;;  %vm2770_vm15 = vweird.f32 %v12529_v44  ;;  %v3547_v31 = vsel %vm3512_vm2, %v3544_v14, %v3546_v60 }
 0x1fe   : > { %v3128_v16 = vmul.f32 %v2763_v17, %v12402_v49  ;;  %v2767_v19 = vsub.f32 1.0, %v2766_v6  ;;  %v12608_v43 = vsel %vm4551_vm14, %v4569_v30, %v4571_v29  ;;  %v12611_v2 = vsel %vm5351_vm3, %v5365_v48, %v5367_v11  ;;  %v2030_v30 = vld [vmem:[#allocation2 + $0x130] sm:$0xff] }
 0x1ff   : > { %16658 = vst [vmem:[#allocation69_spill] sm:$0xff] %v12608_v43  ;;  %vm2771_vm0 = vweird.f32 %v9776_v8  ;;  %8969 = vmatmul.msk.f32.gmra.mxu3 %vm1949_vm4, %v3547_v31  ;;  %v12618_v1 = vadd.f32 %v12081_v52, %v2252_v7  ;;  %vm12620_vm8 = vcmp.eq.f32.partialorder %v2774_v54, 8.507059e+37  ;;  %v2777_v14 = vor.u32 1.1754944e-38, %v2776_v22 }
 0x200   : > { %8931 = vmatmul.msk.f32.gmra.mxu2 %vm1949_vm4, %v3271_v5  ;;  %16659 = vst [vmem:[#allocation70_spill] sm:$0xff] %v12611_v2  ;;  %v12614_v49 = vmul.f32 %v3128_v16, %v16660_v10  ;;  %v2768_v6 = vmul.f32 %v9776_v8, %v2767_v19  ;;  %v16663_v48 = vrot.slane %v12271_v47, 7  ;;  %v16665_v19 = vrot.slane %v12193_v3, 2  ;;  %8868 = vmatmul.msk.f32.gmra.mxu1 %vm1949_vm4, %v2030_v30  ;;  %vm2772_vm10 = vmor %vm2770_vm15, %vm2771_vm0 }
 0x201   : > { %v9778_v54 = vpop.eup %9777  ;;  %v2789_v7 = vand.u32 2147483647, %v12585_v63  ;;  %v8894_v22 = vmul.f32 -1.442695, %v12618_v1  ;;  %vm2785_vm11 = vweird.f32 %v12585_v63 }
 0x202   : > { %v12629_v16 = vsel %vm3824_vm5, %v16663_v48, %v16374_v0  ;;  %v12636_v5 = vsel %vm5039_vm6, %v16665_v19, %v16373_v59  ;;  %v2769_v31 = vadd.f32 %v9776_v8, %v2768_v6  ;;  %v3272_v10 = vrot.slane %v12614_v49, 5  ;;  %9082 = vmatmul.msk.f32.gmra.mxu0 %vm1949_vm4, %v12614_v49 }
 0x203   : > { %16664 = vst [vmem:[#allocation71_spill] sm:$0xff] %v12629_v16  ;;  %v9780_v28 = vpop.eup %9779  ;;  %v12645_v48 = vadd.f32 1.0, %v9778_v54  ;;  %v3548_v3 = vrot.slane %v12614_v49, 6  ;;  %v4573_v6 = vrot.slane %v12398_v33, 1  ;;  %v5369_v19 = vrot.slane %v12398_v33, 3  ;;  %v16670_v16 = vld [vmem:[#allocation23_spill] sm:$0xff] }
 0x204   : > { %16666 = vst [vmem:[#allocation72_spill] sm:$0xff] %v12636_v5  ;;  %v2773_v59 = vsel %vm2772_vm10, %v9776_v8, %v2769_v31  ;;  %v2781_v30 = vmul.f32 %v9780_v28, %v12585_v63  ;;  %v2791_v0 = vand.u32 2147483648, %v12585_v63  ;;  %9781 = vpow2.f32 %v8894_v22  ;;  %v12662_v31 = vpop.f32.mrf.mxu0  ;;  %v2255_v17 = vpop.f32.mrf.mxu1 }
 0x205   : > { %v2778_v44 = vsel %vm12620_vm8, %v2777_v14, %v2773_v59  ;;  %9783 = vrcp.f32 %v12645_v48  ;;  %v16377_v54 = vrot.slane %v12398_v33, 7  ;;  %v16376_v5 = vrot.slane %v12325_v35, 2  ;;  %16667 = vst [vmem:[#allocation73_spill] sm:$0xff] %v12662_v31 }
 0x206   : > { %v3129_v2 = vmul.f32 %v2778_v44, %v12460_v15  ;;  %v2782_v27 = vsub.f32 1.0, %v2781_v30  ;;  %v3273_v8 = vsel %vm3236_vm13, %v3270_v42, %v3272_v10  ;;  %v3549_v59 = vsel %vm3512_vm2, %v3546_v60, %v3548_v3 }
 0x207   : > { %v12668_v14 = vsel %vm4551_vm14, %v4571_v29, %v4573_v6  ;;  %v12671_v22 = vsel %vm5351_vm3, %v5367_v11, %v5369_v19  ;;  %vm2786_vm9 = vweird.f32 %v9780_v28  ;;  %8970 = vmatmul.msk.f32.gmra.mxu3 %vm1949_vm4, %v3549_v59  ;;  %v12678_v42 = vadd.f32 %v12081_v52, %v2255_v17  ;;  %v2031_v29 = vld [vmem:[#allocation2 + $0x138] sm:$0xff] }
 0x208   : > { %8932 = vmatmul.msk.f32.gmra.mxu2 %vm1949_vm4, %v3273_v8  ;;  %16668 = vst [vmem:[#allocation74_spill] sm:$0xff] %v12668_v14  ;;  %v12674_v15 = vmul.f32 %v3129_v2, %v16670_v16  ;;  %v2783_v30 = vmul.f32 %v9780_v28, %v2782_v27  ;;  %vm12680_vm12 = vcmp.eq.f32.partialorder %v2789_v7, 8.507059e+37  ;;  %v2792_v60 = vor.u32 1.1754944e-38, %v2791_v0  ;;  %8869 = vmatmul.msk.f32.gmra.mxu1 %vm1949_vm4, %v2031_v29  ;;  %vm2787_vm7 = vmor %vm2785_vm11, %vm2786_vm9 }
 0x209   : > { %16669 = vst [vmem:[#allocation75_spill] sm:$0xff] %v12671_v22  ;;  %v16673_v11 = vrot.slane %v12325_v35, 7  ;;  %v16675_v27 = vrot.slane %v12271_v47, 2  ;;  %v2804_v17 = vand.u32 2147483647, %v12645_v48  ;;  %vm2800_vm15 = vweird.f32 %v12645_v48 }
 0x20a   : > { %v9782_v7 = vpop.eup %9781  ;;  %v2784_v59 = vadd.f32 %v9780_v28, %v2783_v30  ;;  %v8895_v0 = vmul.f32 -1.442695, %v12678_v42  ;;  %v3274_v16 = vrot.slane %v12674_v15, 5  ;;  %9083 = vmatmul.msk.f32.gmra.mxu0 %vm1949_vm4, %v12674_v15  ;;  %v3550_v47 = vrot.slane %v12674_v15, 6 }
 0x20b   : > { %v12689_v2 = vsel %vm3824_vm5, %v16673_v11, %v16377_v54  ;;  %v12696_v8 = vsel %vm5039_vm6, %v16675_v27, %v16376_v5  ;;  %v9784_v31 = vpop.eup %9783  ;;  %v12705_v11 = vadd.f32 1.0, %v9782_v7  ;;  %v4575_v30 = vrot.slane %v12456_v45, 1 }
 0x20c   : > { %16674 = vst [vmem:[#allocation76_spill] sm:$0xff] %v12689_v2  ;;  %v5371_v27 = vrot.slane %v12456_v45, 3  ;;  %v2788_v5 = vsel %vm2787_vm7, %v9780_v28, %v2784_v59  ;;  %v2796_v29 = vmul.f32 %v9784_v31, %v12645_v48  ;;  %v2806_v54 = vand.u32 2147483648, %v12645_v48  ;;  %v2258_v44 = vpop.f32.mrf.mxu1 }
 0x20d   : > { %16676 = vst [vmem:[#allocation77_spill] sm:$0xff] %v12696_v8  ;;  %9785 = vpow2.f32 %v8895_v0  ;;  %v2793_v63 = vsel %vm12680_vm12, %v2792_v60, %v2788_v5  ;;  %v16381_v7 = vrot.slane %v12456_v45, 7  ;;  %v16380_v8 = vrot.slane %v12398_v33, 2 }
 0x20e   : > { %9787 = vrcp.f32 %v12705_v11  ;;  %v3130_v2 = vmul.f32 %v2793_v63, %v12510_v34  ;;  %v2797_v22 = vsub.f32 1.0, %v2796_v29  ;;  %v3275_v14 = vsel %vm3236_vm13, %v3272_v10, %v3274_v16  ;;  %v16681_v10 = vld [vmem:[#allocation17_spill] sm:$0xff] }
 0x20f   : > { %v16677_v28 = vrot.slane %v12544_v21, 5  ;;  %v16678_v59 = vrot.slane %v12229_v12, 5  ;;  %v3551_v5 = vsel %vm3512_vm2, %v3548_v3, %v3550_v47  ;;  %v12732_v60 = vsel %vm4551_vm14, %v4573_v6, %v4575_v30 }
 0x210   : > { %8933 = vmatmul.msk.f32.gmra.mxu2 %vm1949_vm4, %v3275_v14  ;;  %16679 = vst [vmem:[#allocation78_spill] sm:$0xff] %v12732_v60  ;;  %v12735_v34 = vsel %vm5351_vm3, %v5369_v19, %v5371_v27  ;;  %v12738_v29 = vmul.f32 %v3130_v2, %v16681_v10  ;;  %v2798_v63 = vmul.f32 %v9784_v31, %v2797_v22  ;;  %vm2801_vm0 = vweird.f32 %v9784_v31  ;;  %v12744_v14 = vpop.f32.mrf.mxu0 }
 0x211   : > { %v12726_v0 = vsel %vm3236_vm13, %v16678_v59, %v16677_v28  ;;  %16680 = vst [vmem:[#allocation79_spill] sm:$0xff] %v12735_v34  ;;  %8971 = vmatmul.msk.f32.gmra.mxu3 %vm1949_vm4, %v3551_v5  ;;  %v12742_v28 = vadd.f32 %v12081_v52, %v2258_v44  ;;  %vm12746_vm8 = vcmp.eq.f32.partialorder %v2804_v17, 8.507059e+37  ;;  %v2807_v6 = vor.u32 1.1754944e-38, %v2806_v54  ;;  %v2032_v59 = vld [vmem:[#allocation2 + $0x140] sm:$0xff]  ;;  %vm2802_vm10 = vmor %vm2800_vm15, %vm2801_vm0 }
 0x212   : > { %16682 = vst [vmem:[#allocation80_spill] sm:$0xff] %v12744_v14  ;;  %v16685_v19 = vrot.slane %v12398_v33, 7  ;;  %v16687_v52 = vrot.slane %v12325_v35, 2  ;;  %v2799_v5 = vadd.f32 %v9784_v31, %v2798_v63  ;;  %v2819_v44 = vand.u32 2147483647, %v12705_v11  ;;  %8870 = vmatmul.msk.f32.gmra.mxu1 %vm1949_vm4, %v2032_v59  ;;  %9084 = vmatmul.msk.f32.gmra.mxu0 %vm1949_vm4, %v12738_v29 }
 0x213   : > { %v9786_v17 = vpop.eup %9785  ;;  %v8896_v54 = vmul.f32 -1.442695, %v12742_v28  ;;  %v3276_v10 = vrot.slane %v12738_v29, 5  ;;  %v3552_v35 = vrot.slane %v12738_v29, 6  ;;  %v4577_v63 = vrot.slane %v12506_v46, 1 }
 0x214   : > { %v12755_v22 = vsel %vm3824_vm5, %v16685_v19, %v16381_v7  ;;  %v12762_v2 = vsel %vm5039_vm6, %v16687_v52, %v16380_v8  ;;  %v9788_v14 = vpop.eup %9787  ;;  %v12771_v19 = vadd.f32 1.0, %v9786_v17  ;;  %v5373_v52 = vrot.slane %v12506_v46, 3 }
 0x215   : > { %16686 = vst [vmem:[#allocation81_spill] sm:$0xff] %v12755_v22  ;;  %v2803_v8 = vsel %vm2802_vm10, %v9784_v31, %v2799_v5  ;;  %v2811_v59 = vmul.f32 %v9788_v14, %v12705_v11  ;;  %v2821_v7 = vand.u32 2147483648, %v12705_v11  ;;  %9789 = vpow2.f32 %v8896_v54  ;;  %v16691_v54 = vld [vmem:[#allocation27_spill] sm:$0xff] }
 0x216   : > { %16688 = vst [vmem:[#allocation82_spill] sm:$0xff] %v12762_v2  ;;  %v2808_v48 = vsel %vm12746_vm8, %v2807_v6, %v2803_v8  ;;  %9791 = vrcp.f32 %v12771_v19  ;;  %v16385_v17 = vrot.slane %v12506_v46, 7  ;;  %v16384_v2 = vrot.slane %v12456_v45, 2  ;;  %v2261_v8 = vpop.f32.mrf.mxu1 }
 0x217   : > { %v3131_v22 = vmul.f32 %v2808_v48, %v12562_v58  ;;  %v2812_v34 = vsub.f32 1.0, %v2811_v59  ;;  %v3277_v60 = vsel %vm3236_vm13, %v3274_v16, %v3276_v10  ;;  %vm2815_vm11 = vweird.f32 %v12705_v11  ;;  %v12804_v16 = vld [vmem:[%s16285_s5] ss:$0 sm:$0xff] }
 0x218   : > { %8934 = vmatmul.msk.f32.gmra.mxu2 %vm1949_vm4, %v3277_v60  ;;  %v3553_v3 = vsel %vm3512_vm2, %v3550_v47, %v3552_v35  ;;  %v12792_v6 = vsel %vm4551_vm14, %v4575_v30, %v4577_v63  ;;  %v12795_v5 = vsel %vm5351_vm3, %v5371_v27, %v5373_v52  ;;  %vm2816_vm9 = vweird.f32 %v9788_v14  ;;  %v2033_v60 = vld [vmem:[#allocation2 + $0x148] sm:$0xff] }
 0x219   : > { %16689 = vst [vmem:[#allocation83_spill] sm:$0xff] %v12792_v6  ;;  %v12798_v58 = vmul.f32 %v3131_v22, %v16691_v54  ;;  %v2813_v59 = vmul.f32 %v9788_v14, %v2812_v34  ;;  %8972 = vmatmul.msk.f32.gmra.mxu3 %vm1949_vm4, %v3553_v3  ;;  %v12807_v47 = vadd.f32 %v12804_v16, %v2261_v8  ;;  %vm12809_vm12 = vcmp.eq.f32.partialorder %v2819_v44, 8.507059e+37  ;;  %vm2817_vm7 = vmor %vm2815_vm11, %vm2816_vm9 }
 0x21a   : > { %16690 = vst [vmem:[#allocation84_spill] sm:$0xff] %v12795_v5  ;;  %v2822_v27 = vor.u32 1.1754944e-38, %v2821_v7  ;;  %v16694_v34 = vrot.slane %v12456_v45, 7  ;;  %v16696_v48 = vrot.slane %v12398_v33, 2  ;;  %v2834_v31 = vand.u32 2147483647, %v12771_v19  ;;  %8871 = vmatmul.msk.f32.gmra.mxu1 %vm1949_vm4, %v2033_v60  ;;  %v12831_v5 = vpop.f32.mrf.mxu0 }
 0x21b   : > { %v9790_v44 = vpop.eup %9789  ;;  %v2814_v8 = vadd.f32 %v9788_v14, %v2813_v59  ;;  %v8897_v7 = vmul.f32 -1.442695, %v12807_v47  ;;  %v3278_v54 = vrot.slane %v12798_v58, 5  ;;  %16698 = vst [vmem:[#allocation87_spill] sm:$0xff] %v12831_v5  ;;  %9085 = vmatmul.msk.f32.gmra.mxu0 %vm1949_vm4, %v12798_v58  ;;  %v3554_v59 = vrot.slane %v12798_v58, 6 }
 0x21c   : > { %v12818_v22 = vsel %vm3824_vm5, %v16694_v34, %v16385_v17  ;;  %v12825_v3 = vsel %vm5039_vm6, %v16696_v48, %v16384_v2  ;;  %v9792_v34 = vpop.eup %9791  ;;  %v12836_v33 = vadd.f32 1.0, %v9790_v44  ;;  %v4579_v48 = vrot.slane %v12558_v25, 1 }
 0x21d   : > { %16695 = vst [vmem:[#allocation85_spill] sm:$0xff] %v12818_v22  ;;  %v5375_v60 = vrot.slane %v12558_v25, 3  ;;  %v2818_v2 = vsel %vm2817_vm7, %v9788_v14, %v2814_v8  ;;  %v2826_v17 = vmul.f32 %v9792_v34, %v12771_v19  ;;  %v2836_v5 = vand.u32 2147483648, %v12771_v19 }
 0x21e   : > { %16697 = vst [vmem:[#allocation86_spill] sm:$0xff] %v12825_v3  ;;  %9793 = vpow2.f32 %v8897_v7  ;;  %v2823_v11 = vsel %vm12809_vm12, %v2822_v27, %v2818_v2  ;;  %v3858_v44 = vrot.slane %v12558_v25, 7  ;;  %v5061_v3 = vrot.slane %v12506_v46, 2  ;;  %v2264_v30 = vpop.f32.mrf.mxu1 }
 0x21f   : > { %9795 = vrcp.f32 %v12836_v33  ;;  %v3132_v22 = vmul.f32 %v2823_v11, %v12618_v1  ;;  %v2827_v6 = vsub.f32 1.0, %v2826_v17  ;;  %v3279_v43 = vsel %vm3236_vm13, %v3276_v10, %v3278_v54  ;;  %v16701_v10 = vld [vmem:[#allocation26_spill] sm:$0xff] }
 0x220   : > { %v16699_v14 = vrot.slane %v12058_v37, 5  ;;  %v16700_v8 = vrot.slane %v12544_v21, 5  ;;  %vm2830_vm15 = vweird.f32 %v12771_v19  ;;  %8935 = vmatmul.msk.f32.gmra.mxu2 %vm1949_vm4, %v3279_v43  ;;  %v3555_v2 = vsel %vm3512_vm2, %v3552_v35, %v3554_v59 }
 0x221   : > { %v12861_v27 = vsel %vm4551_vm14, %v4577_v63, %v4579_v48  ;;  %v12864_v1 = vsel %vm5351_vm3, %v5373_v52, %v5375_v60  ;;  %v12867_v17 = vmul.f32 %v3132_v22, %v16701_v10  ;;  %v2828_v11 = vmul.f32 %v9792_v34, %v2827_v6  ;;  %8973 = vmatmul.msk.f32.gmra.mxu3 %vm1949_vm4, %v3555_v2 }
 0x222   : > { %v3241_v7 = vsel %vm3236_vm13, %v16700_v8, %v16699_v14  ;;  %vm2831_vm0 = vweird.f32 %v9792_v34  ;;  %v12871_v14 = vadd.f32 %v12804_v16, %v2264_v30  ;;  %vm12873_vm8 = vcmp.eq.f32.partialorder %v2834_v31, 8.507059e+37  ;;  %8915 = vmatmul.msk.f32.vlgmr.msra.gmra.mxu1 %vm1949_vm4, %v12726_v0 }
 0x223   : > { %v2837_v35 = vor.u32 1.1754944e-38, %v2836_v5  ;;  %v16704_v63 = vrot.slane %v12506_v46, 7  ;;  %v16706_v22 = vrot.slane %v12456_v45, 2  ;;  %v2829_v2 = vadd.f32 %v9792_v34, %v2828_v11  ;;  %vm2832_vm10 = vmor %vm2830_vm15, %vm2831_vm0  ;;  %9086 = vmatmul.msk.f32.gmra.mxu0 %vm1949_vm4, %v12867_v17 }
 0x224   : > { %v9794_v8 = vpop.eup %9793  ;;  %v2849_v30 = vand.u32 2147483647, %v12836_v33  ;;  %v8898_v31 = vmul.f32 -1.442695, %v12871_v14  ;;  %v3556_v45 = vrot.slane %v12867_v17, 6  ;;  %v2851_v5 = vand.u32 2147483648, %v12836_v33 }
 0x225   : > { %v12880_v52 = vsel %vm3824_vm5, %v16704_v63, %v3858_v44  ;;  %v12885_v6 = vsel %vm5039_vm6, %v16706_v22, %v5061_v3  ;;  %v9796_v46 = vpop.eup %9795  ;;  %v12894_v63 = vadd.f32 1.0, %v9794_v8  ;;  %v2833_v10 = vsel %vm2832_vm10, %v9792_v34, %v2829_v2 }
 0x226   : > { %16705 = vst [vmem:[#allocation88_spill] sm:$0xff] %v12880_v52  ;;  %v2841_v0 = vmul.f32 %v9796_v46, %v12836_v33  ;;  %9797 = vpow2.f32 %v8898_v31  ;;  %v2838_v19 = vsel %vm12873_vm8, %v2837_v35, %v2833_v10  ;;  %v16391_v8 = vrot.slane %v12614_v49, 7  ;;  %v2267_v35 = vpop.f32.mrf.mxu1 }
 0x227   : > { %16707 = vst [vmem:[#allocation89_spill] sm:$0xff] %v12885_v6  ;;  %v12903_v6 = vpop.f32.mrf.mxu0  ;;  %9799 = vrcp.f32 %v12894_v63  ;;  %v16390_v52 = vrot.slane %v12558_v25, 2  ;;  %v3133_v11 = vmul.f32 %v2838_v19, %v12678_v42  ;;  %v16709_v34 = vrot.slane %v12867_v17, 5 }
 0x228   : > { %16708 = vst [vmem:[#allocation90_spill] sm:$0xff] %v12903_v6  ;;  %v2842_v22 = vsub.f32 1.0, %v2841_v0  ;;  %v16710_v31 = vrot.slane %v11749_v57, 5  ;;  %v16711_v6 = vrot.slane %v12058_v37, 5  ;;  %vm2845_vm11 = vweird.f32 %v12836_v33 }
 0x229   : > { %v3281_v2 = vsel %vm3236_vm13, %v3278_v54, %v16709_v34  ;;  %v3557_v10 = vsel %vm3512_vm2, %v3554_v59, %v3556_v45  ;;  %v16712_v42 = vrot.slane %v12614_v49, 1  ;;  %v16713_v54 = vrot.slane %v12614_v49, 3  ;;  %v16715_v34 = vld [vmem:[#allocation22_spill] sm:$0xff] }
 0x22a   : > { %v12919_v43 = vsel %vm3236_vm13, %v16711_v6, %v16710_v31  ;;  %8936 = vmatmul.msk.f32.gmra.mxu2 %vm1949_vm4, %v3281_v2  ;;  %v12935_v6 = vmul.f32 %v3133_v11, %v16715_v34  ;;  %v2843_v31 = vmul.f32 %v9796_v46, %v2842_v22  ;;  %vm2846_vm9 = vweird.f32 %v9796_v46  ;;  %8974 = vmatmul.msk.f32.gmra.mxu3 %vm1949_vm4, %v3557_v10 }
 0x22b   : > { %v12927_v0 = vsel %vm4551_vm14, %v4579_v48, %v16712_v42  ;;  %v12932_v19 = vsel %vm5351_vm3, %v5375_v60, %v16713_v54  ;;  %v12939_v59 = vadd.f32 %v12804_v16, %v2267_v35  ;;  %vm12941_vm12 = vcmp.eq.f32.partialorder %v2849_v30, 8.507059e+37  ;;  %8916 = vmatmul.msk.f32.gmra.mxu1 %vm1949_vm4, %v3241_v7  ;;  %vm2847_vm7 = vmor %vm2845_vm11, %vm2846_vm9 }
 0x22c   : > { %16714 = vst [vmem:[#allocation91_spill] sm:$0xff] %v12932_v19  ;;  %v2852_v48 = vor.u32 1.1754944e-38, %v2851_v5  ;;  %v12948_v60 = vsel %vm3824_vm5, %v3858_v44, %v16391_v8  ;;  %v12953_v11 = vsel %vm5039_vm6, %v5061_v3, %v16390_v52  ;;  %v9798_v22 = vpop.eup %9797  ;;  %v2844_v10 = vadd.f32 %v9796_v46, %v2843_v31  ;;  %9087 = vmatmul.msk.f32.gmra.mxu0 %vm1949_vm4, %v12935_v6 }
 0x22d   : > { %16718 = vst [vmem:[#allocation92_spill] sm:$0xff] %v12948_v60  ;;  %v2866_v35 = vand.u32 2147483648, %v12894_v63  ;;  %v8899_v30 = vmul.f32 -1.442695, %v12939_v59  ;;  %v16392_v5 = vrot.slane %v12935_v6, 5  ;;  %v9800_v42 = vpop.eup %9799  ;;  %v12961_v44 = vadd.f32 1.0, %v9798_v22 }
 0x22e   : > { %16719 = vst [vmem:[#allocation93_spill] sm:$0xff] %v12953_v11  ;;  %v16393_v3 = vrot.slane %v12935_v6, 6  ;;  %v2848_v52 = vsel %vm2847_vm7, %v9796_v46, %v2844_v10  ;;  %v2856_v7 = vmul.f32 %v9800_v42, %v12894_v63  ;;  %vm2860_vm15 = vweird.f32 %v12894_v63  ;;  %v12978_v22 = vld [vmem:[%s16287_s7] ss:$0 sm:$0xff]  ;;  %v2270_v34 = vpop.f32.mrf.mxu1  ;;  %v3420_v46 = vpop.f32.mrf.mxu2 }
 0x22f   : > { %9801 = vpow2.f32 %v8899_v30  ;;  %v12970_v8 = vpop.f32.mrf.mxu0  ;;  %v2853_v33 = vsel %vm12941_vm12, %v2852_v48, %v2848_v52  ;;  %v2864_v30 = vand.u32 2147483647, %v12894_v63  ;;  %v16721_v52 = vrot.slane %v12867_v17, 5  ;;  %v3696_v11 = vpop.f32.mrf.mxu3 }
 0x230   : > { %16720 = vst [vmem:[#allocation94_spill] sm:$0xff] %v12970_v8  ;;  %9803 = vrcp.f32 %v12961_v44  ;;  %v3134_v10 = vmul.f32 %v2853_v33, %v12742_v28  ;;  %v2857_v54 = vsub.f32 1.0, %v2856_v7  ;;  %v2867_v48 = vor.u32 1.1754944e-38, %v2866_v35 }
 0x231   : > { %v3283_v2 = vsel %vm3236_vm13, %v16721_v52, %v16392_v5  ;;  %v3559_v31 = vsel %vm3512_vm2, %v3556_v45, %v16393_v3  ;;  %v16722_v28 = vrot.slane %v12674_v15, 1  ;;  %v16723_v7 = vrot.slane %v12614_v49, 1 }
 0x232   : > { %8937 = vmatmul.msk.f32.gmra.mxu2 %vm1949_vm4, %v3283_v2  ;;  %v16725_v8 = vrot.slane %v12674_v15, 3  ;;  %v16726_v52 = vrot.slane %v12614_v49, 3  ;;  %v16728_v2 = vld [vmem:[#allocation30_spill] sm:$0xff]  ;;  %v2858_v45 = vmul.f32 %v9800_v42, %v2857_v54  ;;  %vm2861_vm0 = vweird.f32 %v9800_v42  ;;  %8975 = vmatmul.msk.f32.gmra.mxu3 %vm1949_vm4, %v3559_v31 }
 0x233   : > { %v12998_v33 = vsel %vm4551_vm14, %v16723_v7, %v16722_v28  ;;  %v13008_v5 = vmul.f32 %v3134_v10, %v16728_v2  ;;  %v13012_v3 = vadd.f32 %v12804_v16, %v2270_v34  ;;  %v9027_v28 = vld [vmem:[%s16286_s6 + $0xc] sm:$0xf]  ;;  %v2879_v7 = vand.u32 2147483647, %v12961_v44  ;;  %8917 = vmatmul.msk.f32.gmra.mxu1 %vm1949_vm4, %v12919_v43  ;;  %vm2862_vm8 = vmor %vm2860_vm15, %vm2861_vm0 }
 0x234   : > { %16724 = vst [vmem:[#allocation95_spill] sm:$0xff] %v12998_v33  ;;  %v13005_v35 = vsel %vm5351_vm3, %v16726_v52, %v16725_v8  ;;  %v3421_v8 = vadd.f32 %v12978_v22, %v3420_v46  ;;  %9028 = vmatpush.msk.msrb.mxu3 %vm2165_vm1, %v9027_v28  ;;  %v16729_v10 = vrot.slane %v12674_v15, 7  ;;  %v16730_v54 = vrot.slane %v12614_v49, 7 }
 0x235   : > { %16727 = vst [vmem:[#allocation96_spill] sm:$0xff] %v13005_v35  ;;  %v16732_v34 = vrot.slane %v12614_v49, 2  ;;  %v16733_v52 = vrot.slane %v12558_v25, 2  ;;  %v9802_v60 = vpop.eup %9801  ;;  %v2859_v35 = vadd.f32 %v9800_v42, %v2858_v45  ;;  %v8900_v46 = vmul.f32 -1.442695, %v13012_v3  ;;  %9088 = vmatmul.msk.f32.gmra.mxu0 %vm1949_vm4, %v13008_v5 }
 0x236   : > { %v13025_v31 = vsel %vm3824_vm5, %v16730_v54, %v16729_v10  ;;  %v9804_v10 = vpop.eup %9803  ;;  %v13042_v25 = vadd.f32 1.0, %v9802_v60  ;;  %v13044_v54 = vadd.f32 %v3696_v11, %v3421_v8  ;;  %v16395_v45 = vrot.slane %v12738_v29, 1 }
 0x237   : > { %16731 = vst [vmem:[#allocation97_spill] sm:$0xff] %v13025_v31  ;;  %v13032_v2 = vsel %vm5039_vm6, %v16733_v52, %v16732_v34  ;;  %v16397_v43 = vrot.slane %v12738_v29, 3  ;;  %v2863_v34 = vsel %vm2862_vm8, %v9800_v42, %v2859_v35  ;;  %vm2865_vm10 = vcmp.eq.f32.partialorder %v2864_v30, 8.507059e+37  ;;  %v13053_v60 = vpop.f32.mrf.mxu0 }
 0x238   : > { %16734 = vst [vmem:[#allocation98_spill] sm:$0xff] %v13032_v2  ;;  %v2871_v52 = vmul.f32 %v9804_v10, %v12961_v44  ;;  %9805 = vpow2.f32 %v8900_v46  ;;  %v2868_v19 = vsel %vm2865_vm10, %v2867_v48, %v2863_v34  ;;  %v2881_v63 = vand.u32 2147483648, %v12961_v44  ;;  %v3699_v2 = vpop.f32.mrf.mxu3 }
 0x239   : > { %16735 = vst [vmem:[#allocation99_spill] sm:$0xff] %v13044_v54  ;;  %9807 = vrcp.f32 %v13042_v25  ;;  %v3135_v8 = vmul.f32 %v2868_v19, %v12807_v47  ;;  %vm2875_vm11 = vweird.f32 %v12961_v44  ;;  %v16737_v42 = vrot.slane %v13008_v5, 5  ;;  %v2273_v19 = vpop.f32.mrf.mxu1 }
 0x23a   : > { %16736 = vst [vmem:[#allocation100_spill] sm:$0xff] %v13053_v60  ;;  %v2872_v28 = vsub.f32 1.0, %v2871_v52  ;;  %v16738_v30 = vrot.slane %v12935_v6, 5  ;;  %vm13063_vm9 = vcmp.eq.f32.partialorder %v2879_v7, 8.507059e+37  ;;  %v16741_v46 = vrot.slane %v13008_v5, 6  ;;  %v3423_v52 = vpop.f32.mrf.mxu2 }
 0x23b   : > { %v16742_v34 = vrot.slane %v12935_v6, 6  ;;  %v16743_v11 = vrot.slane %v12674_v15, 1  ;;  %v16745_v7 = vrot.slane %v12674_v15, 3  ;;  %vm2876_vm12 = vweird.f32 %v9804_v10 }
 0x23c   : > { %v3285_v35 = vsel %vm3236_vm13, %v16738_v30, %v16737_v42  ;;  %v3424_v54 = vadd.f32 %v12978_v22, %v3423_v52  ;;  %v16749_v31 = vrot.slane %v12674_v15, 2  ;;  %vm2877_vm7 = vmor %vm2875_vm11, %vm2876_vm12  ;;  %vm2890_vm15 = vweird.f32 %v13042_v25 }
 0x23d   : > { %8938 = vmatmul.msk.f32.gmra.mxu2 %vm1949_vm4, %v3285_v35  ;;  %v3561_v47 = vsel %vm3512_vm2, %v16742_v34, %v16741_v46  ;;  %v13078_v42 = vsel %vm4551_vm14, %v16743_v11, %v16395_v45  ;;  %v13085_v30 = vsel %vm5351_vm3, %v16745_v7, %v16397_v43  ;;  %v16747_v35 = vld [vmem:[#allocation29_spill] sm:$0xff]  ;;  %v2873_v46 = vmul.f32 %v9804_v10, %v2872_v28 }
 0x23e   : > { %16744 = vst [vmem:[#allocation101_spill] sm:$0xff] %v13078_v42  ;;  %v13088_v60 = vmul.f32 %v3135_v8, %v16747_v35  ;;  %8976 = vmatmul.msk.f32.gmra.mxu3 %vm1949_vm4, %v3561_v47  ;;  %v13092_v34 = vadd.f32 %v12804_v16, %v2273_v19  ;;  %v2882_v11 = vor.u32 1.1754944e-38, %v2881_v63  ;;  %v2894_v45 = vand.u32 2147483647, %v13042_v25  ;;  %v9806_v28 = vpop.eup %9805  ;;  %v16752_v35 = vld [vmem:[#allocation45_spill] sm:$0xff] }
 0x23f   : > { %16746 = vst [vmem:[#allocation102_spill] sm:$0xff] %v13085_v30  ;;  %v16750_v7 = vrot.slane %v12614_v49, 2  ;;  %v2874_v43 = vadd.f32 %v9804_v10, %v2873_v46  ;;  %8918 = vmatmul.msk.f32.gmra.mxu1 %vm1949_vm4, %v16752_v35  ;;  %v9808_v30 = vpop.eup %9807  ;;  %v13111_v49 = vadd.f32 1.0, %v9806_v28  ;;  %v2896_v19 = vand.u32 2147483648, %v13042_v25 }
 0x240   : > { %16748 = vst [vmem:[#allocation103_spill] sm:$0xff] %v13088_v60  ;;  %v8901_v47 = vmul.f32 -1.442695, %v13092_v34  ;;  %v16398_v63 = vrot.slane %v13088_v60, 5  ;;  %9089 = vmatmul.msk.f32.gmra.mxu0 %vm1949_vm4, %v13088_v60  ;;  %vm13135_vm0 = vcmp.eq.f32.partialorder %v2894_v45, 8.507059e+37  ;;  %v16761_v28 = vrot.slane %v12738_v29, 1 }
 0x241   : > { %v13101_v8 = vsel %vm5039_vm6, %v16750_v7, %v16749_v31  ;;  %v13113_v31 = vadd.f32 %v3699_v2, %v3424_v54  ;;  %v2878_v46 = vsel %vm2877_vm7, %v9804_v10, %v2874_v43  ;;  %v2886_v7 = vmul.f32 %v9808_v30, %v13042_v25  ;;  %v13124_v2 = vpop.f32.mrf.mxu0  ;;  %v16766_v54 = vld [vmem:[#allocation25_spill] sm:$0xff] }
 0x242   : > { %16751 = vst [vmem:[#allocation104_spill] sm:$0xff] %v13101_v8  ;;  %9809 = vpow2.f32 %v8901_v47  ;;  %v2883_v44 = vsel %vm13063_vm9, %v2882_v11, %v2878_v46  ;;  %v16755_v10 = vrot.slane %v13008_v5, 5  ;;  %v16758_v11 = vrot.slane %v13088_v60, 6  ;;  %v2276_v46 = vpop.f32.mrf.mxu1  ;;  %v3702_v8 = vpop.f32.mrf.mxu3 }
 0x243   : > { %16753 = vst [vmem:[#allocation45_spill] sm:$0xff] %v13113_v31  ;;  %9811 = vrcp.f32 %v13111_v49  ;;  %v3136_v52 = vmul.f32 %v2883_v44, %v12871_v14  ;;  %v2887_v35 = vsub.f32 1.0, %v2886_v7  ;;  %v16759_v47 = vrot.slane %v13008_v5, 6  ;;  %v3426_v7 = vpop.f32.mrf.mxu2 }
 0x244   : > { %16754 = vst [vmem:[#allocation105_spill] sm:$0xff] %v13124_v2  ;;  %v3287_v43 = vsel %vm3236_vm13, %v16755_v10, %v16398_v63  ;;  %v16760_v44 = vrot.slane %v12798_v58, 1  ;;  %v16763_v45 = vrot.slane %v12798_v58, 3  ;;  %v16764_v63 = vrot.slane %v12738_v29, 3 }
 0x245   : > { %8939 = vmatmul.msk.f32.gmra.mxu2 %vm1949_vm4, %v3287_v43  ;;  %v3563_v14 = vsel %vm3512_vm2, %v16759_v47, %v16758_v11  ;;  %v13160_v2 = vmul.f32 %v3136_v52, %v16766_v54  ;;  %v2888_v11 = vmul.f32 %v9808_v30, %v2887_v35  ;;  %vm2891_vm8 = vweird.f32 %v9808_v30  ;;  %v16774_v54 = vld [vmem:[#allocation46_spill] sm:$0xff] }
 0x246   : > { %v13150_v10 = vsel %vm4551_vm14, %v16761_v28, %v16760_v44  ;;  %v13157_v43 = vsel %vm5351_vm3, %v16764_v63, %v16763_v45  ;;  %8977 = vmatmul.msk.f32.gmra.mxu3 %vm1949_vm4, %v3563_v14  ;;  %v13164_v47 = vadd.f32 %v12804_v16, %v2276_v46  ;;  %v2897_v28 = vor.u32 1.1754944e-38, %v2896_v19  ;;  %vm2892_vm10 = vmor %vm2890_vm15, %vm2891_vm8 }
 0x247   : > { %16762 = vst [vmem:[#allocation106_spill] sm:$0xff] %v13150_v10  ;;  %v3427_v44 = vadd.f32 %v12978_v22, %v3426_v7  ;;  %v16768_v31 = vrot.slane %v12738_v29, 7  ;;  %v16769_v10 = vrot.slane %v12674_v15, 7  ;;  %v16771_v52 = vrot.slane %v12738_v29, 2  ;;  %8919 = vmatmul.msk.f32.gmra.mxu1 %vm1949_vm4, %v16774_v54 }
 0x248   : > { %16765 = vst [vmem:[#allocation107_spill] sm:$0xff] %v13157_v43  ;;  %v16772_v35 = vrot.slane %v12674_v15, 2  ;;  %v9810_v46 = vpop.eup %9809  ;;  %v2889_v45 = vadd.f32 %v9808_v30, %v2888_v11  ;;  %v8902_v19 = vmul.f32 -1.442695, %v13164_v47  ;;  %v16400_v7 = vrot.slane %v13160_v2, 5  ;;  %9090 = vmatmul.msk.f32.gmra.mxu0 %vm1949_vm4, %v13160_v2 }
 0x249   : > { %16767 = vst [vmem:[#allocation108_spill] sm:$0xff] %v13160_v2  ;;  %v13172_v63 = vsel %vm3824_vm5, %v16769_v10, %v16768_v31  ;;  %v9812_v31 = vpop.eup %9811  ;;  %v13189_v15 = vadd.f32 1.0, %v9810_v46  ;;  %v13191_v10 = vadd.f32 %v3702_v8, %v3427_v44  ;;  %v2909_v43 = vand.u32 2147483647, %v13111_v49  ;;  %v13210_v54 = vpop.f32.mrf.mxu0 }
 0x24a   : > { %16770 = vst [vmem:[#allocation109_spill] sm:$0xff] %v13172_v63  ;;  %v13179_v14 = vsel %vm5039_vm6, %v16772_v35, %v16771_v52  ;;  %v2893_v52 = vsel %vm2892_vm10, %v9808_v30, %v2889_v45  ;;  %v2901_v35 = vmul.f32 %v9812_v31, %v13111_v49  ;;  %9813 = vpow2.f32 %v8902_v19  ;;  %v3705_v63 = vpop.f32.mrf.mxu3 }
 0x24b   : > { %16773 = vst [vmem:[#allocation110_spill] sm:$0xff] %v13179_v14  ;;  %v2898_v25 = vsel %vm13135_vm0, %v2897_v28, %v2893_v52  ;;  %v2911_v46 = vand.u32 2147483648, %v13111_v49  ;;  %9815 = vrcp.f32 %v13189_v15  ;;  %v16776_v30 = vrot.slane %v13088_v60, 5  ;;  %v16788_v14 = vld [vmem:[#allocation33_spill] sm:$0xff] }
 0x24c   : > { %16775 = vst [vmem:[#allocation46_spill] sm:$0xff] %v13191_v10  ;;  %v3137_v44 = vmul.f32 %v2898_v25, %v12939_v59  ;;  %v2902_v11 = vsub.f32 1.0, %v2901_v35  ;;  %v16778_v48 = vrot.slane %v12544_v21, 6  ;;  %v16779_v28 = vrot.slane %v12229_v12, 6  ;;  %v2279_v25 = vpop.f32.mrf.mxu1 }
 0x24d   : > { %v3289_v45 = vsel %vm3236_vm13, %v16776_v30, %v16400_v7  ;;  %16777 = vst [vmem:[#allocation111_spill] sm:$0xff] %v13210_v54  ;;  %vm2905_vm11 = vweird.f32 %v13111_v49  ;;  %v16780_v59 = vrot.slane %v13160_v2, 6  ;;  %v16781_v52 = vrot.slane %v13088_v60, 6  ;;  %v3429_v30 = vpop.f32.mrf.mxu2 }
 0x24e   : > { %v13217_v19 = vsel %vm3512_vm2, %v16779_v28, %v16778_v48  ;;  %8940 = vmatmul.msk.f32.gmra.mxu2 %vm1949_vm4, %v3289_v45  ;;  %v16782_v7 = vrot.slane %v12867_v17, 1  ;;  %v16783_v8 = vrot.slane %v12798_v58, 1  ;;  %v16785_v48 = vrot.slane %v12867_v17, 3 }
 0x24f   : > { %v3565_v35 = vsel %vm3512_vm2, %v16781_v52, %v16780_v59  ;;  %v16786_v28 = vrot.slane %v12798_v58, 3  ;;  %v13241_v10 = vmul.f32 %v3137_v44, %v16788_v14  ;;  %v2903_v59 = vmul.f32 %v9812_v31, %v2902_v11  ;;  %8920 = vmatmul.msk.f32.gmra.mxu1 %vm1949_vm4, %v11956_v36 }
 0x250   : > { %v13231_v54 = vsel %vm4551_vm14, %v16783_v8, %v16782_v7  ;;  %vm2906_vm9 = vweird.f32 %v9812_v31  ;;  %8978 = vmatmul.msk.f32.gmra.mxu3 %vm1949_vm4, %v3565_v35  ;;  %v13245_v52 = vadd.f32 %v12804_v16, %v2279_v25  ;;  %vm13247_vm12 = vcmp.eq.f32.partialorder %v2909_v43, 8.507059e+37 }
 0x251   : > { %16784 = vst [vmem:[#allocation112_spill] sm:$0xff] %v13231_v54  ;;  %v13238_v45 = vsel %vm5351_vm3, %v16786_v28, %v16785_v48  ;;  %v2912_v8 = vor.u32 1.1754944e-38, %v2911_v46  ;;  %v3430_v60 = vadd.f32 %v12978_v22, %v3429_v30  ;;  %v16792_v48 = vrot.slane %v12798_v58, 7  ;;  %v9814_v28 = vpop.eup %9813  ;;  %vm2907_vm7 = vmor %vm2905_vm11, %vm2906_vm9  ;;  %9091 = vmatmul.msk.f32.gmra.mxu0 %vm1949_vm4, %v13241_v10 }
 0x252   : > { %16787 = vst [vmem:[#allocation113_spill] sm:$0xff] %v13238_v45  ;;  %v16793_v44 = vrot.slane %v12738_v29, 7  ;;  %v2904_v35 = vadd.f32 %v9812_v31, %v2903_v59  ;;  %v8903_v25 = vmul.f32 -1.442695, %v13245_v52  ;;  %v9816_v14 = vpop.eup %9815  ;;  %v13267_v30 = vadd.f32 1.0, %v9814_v28  ;;  %v3708_v45 = vpop.f32.mrf.mxu3 }
 0x253   : > { %16789 = vst [vmem:[#allocation114_spill] sm:$0xff] %v13241_v10  ;;  %v4591_v59 = vrot.slane %v12935_v6, 1  ;;  %v5387_v36 = vrot.slane %v12935_v6, 3  ;;  %v2916_v43 = vmul.f32 %v9816_v14, %v13189_v15  ;;  %v2926_v46 = vand.u32 2147483648, %v13189_v15 }
 0x254   : > { %v13257_v11 = vsel %vm3824_vm5, %v16793_v44, %v16792_v48  ;;  %v13269_v48 = vadd.f32 %v3705_v63, %v3430_v60  ;;  %v2908_v44 = vsel %vm2907_vm7, %v9812_v31, %v2904_v35  ;;  %9817 = vpow2.f32 %v8903_v25 }
 0x255   : > { %16794 = vst [vmem:[#allocation115_spill] sm:$0xff] %v13257_v11  ;;  %v2913_v49 = vsel %vm13247_vm12, %v2912_v8, %v2908_v44  ;;  %9819 = vrcp.f32 %v13267_v30  ;;  %vm2920_vm15 = vweird.f32 %v13189_v15  ;;  %v16796_v31 = vrot.slane %v13241_v10, 5 }
 0x256   : > { %16795 = vst [vmem:[#allocation116_spill] sm:$0xff] %v13269_v48  ;;  %v3138_v28 = vmul.f32 %v2913_v49, %v13012_v3  ;;  %v2917_v48 = vsub.f32 1.0, %v2916_v43  ;;  %v16797_v35 = vrot.slane %v13160_v2, 5  ;;  %v2924_v7 = vand.u32 2147483647, %v13189_v15  ;;  %v2282_v3 = vpop.f32.mrf.mxu1  ;;  %v3432_v43 = vpop.f32.mrf.mxu2 }
 0x257   : > { %v16798_v8 = vrot.slane %v13241_v10, 6  ;;  %v16799_v44 = vrot.slane %v13160_v2, 6  ;;  %v16800_v49 = vrot.slane %v12867_v17, 1  ;;  %v16802_v11 = vrot.slane %v12867_v17, 3  ;;  %8953 = vmatmul.msk.f32.vlgmr.msrb.gmra.mxu1 %vm1949_vm4, %v13217_v19 }
 0x258   : > { %v3291_v25 = vsel %vm3236_vm13, %v16797_v35, %v16796_v31  ;;  %v13307_v35 = vmul.f32 %v3138_v28, %v16587_v23  ;;  %vm2921_vm0 = vweird.f32 %v9816_v14  ;;  %v2927_v2 = vor.u32 1.1754944e-38, %v2926_v46 }
 0x259   : > { %8941 = vmatmul.msk.f32.gmra.mxu2 %vm1949_vm4, %v3291_v25  ;;  %v3567_v63 = vsel %vm3512_vm2, %v16799_v44, %v16798_v8  ;;  %v13299_v60 = vsel %vm4551_vm14, %v16800_v49, %v4591_v59  ;;  %v13304_v31 = vsel %vm5351_vm3, %v16802_v11, %v5387_v36  ;;  %v2918_v25 = vmul.f32 %v9816_v14, %v2917_v48  ;;  %v13313_v44 = vpop.f32.mrf.mxu0  ;;  %vm2922_vm8 = vmor %vm2920_vm15, %vm2921_vm0 }
 0x25a   : > { %16801 = vst [vmem:[#allocation117_spill] sm:$0xff] %v13299_v60  ;;  %8979 = vmatmul.msk.f32.gmra.mxu3 %vm1949_vm4, %v3567_v63  ;;  %v13311_v8 = vadd.f32 %v12804_v16, %v2282_v3  ;;  %v3433_v49 = vadd.f32 %v12978_v22, %v3432_v43  ;;  %v16805_v60 = vrot.slane %v12867_v17, 7  ;;  %v16806_v11 = vrot.slane %v12798_v58, 7  ;;  %v9818_v23 = vpop.eup %9817  ;;  %9092 = vmatmul.msk.f32.gmra.mxu0 %vm1949_vm4, %v13307_v35 }
 0x25b   : > { %16803 = vst [vmem:[#allocation118_spill] sm:$0xff] %v13304_v31  ;;  %v16808_v48 = vrot.slane %v12798_v58, 2  ;;  %v16809_v63 = vrot.slane %v12738_v29, 2  ;;  %v13338_v29 = vadd.f32 1.0, %v9818_v23  ;;  %v16409_v19 = vrot.slane %v13008_v5, 3 }
 0x25c   : > { %16804 = vst [vmem:[#allocation119_spill] sm:$0xff] %v13313_v44  ;;  %v13321_v28 = vsel %vm3824_vm5, %v16806_v11, %v16805_v60  ;;  %v2919_v44 = vadd.f32 %v9816_v14, %v2918_v25  ;;  %v8904_v46 = vmul.f32 -1.442695, %v13311_v8  ;;  %v9820_v60 = vpop.eup %9819  ;;  %v13340_v11 = vadd.f32 %v3708_v45, %v3433_v49 }
 0x25d   : > { %16807 = vst [vmem:[#allocation120_spill] sm:$0xff] %v13321_v28  ;;  %v13328_v3 = vsel %vm5039_vm6, %v16809_v63, %v16808_v48  ;;  %vm2925_vm10 = vcmp.eq.f32.partialorder %v2924_v7, 8.507059e+37  ;;  %v2931_v63 = vmul.f32 %v9820_v60, %v13267_v30  ;;  %v3516_v23 = vrot.slane %v12058_v37, 6 }
 0x25e   : > { %16810 = vst [vmem:[#allocation121_spill] sm:$0xff] %v13328_v3  ;;  %v2923_v48 = vsel %vm2922_vm8, %v9816_v14, %v2919_v44  ;;  %9821 = vpow2.f32 %v8904_v46  ;;  %v3870_v15 = vrot.slane %v12935_v6, 7  ;;  %v2941_v43 = vand.u32 2147483648, %v13267_v30 }
 0x25f   : > { %16811 = vst [vmem:[#allocation122_spill] sm:$0xff] %v13340_v11  ;;  %v2928_v31 = vsel %vm2925_vm10, %v2927_v2, %v2923_v48  ;;  %9823 = vrcp.f32 %v13338_v29  ;;  %v2932_v49 = vsub.f32 1.0, %v2931_v63  ;;  %v16812_v25 = vrot.slane %v13307_v35, 5  ;;  %v3711_v11 = vpop.f32.mrf.mxu3 }
 0x260   : > { %v3139_v45 = vmul.f32 %v2928_v31, %v13092_v34  ;;  %v16813_v14 = vrot.slane %v13241_v10, 5  ;;  %v2939_v44 = vand.u32 2147483647, %v13267_v30  ;;  %v16814_v2 = vrot.slane %v13307_v35, 6  ;;  %v2285_v34 = vpop.f32.mrf.mxu1 }
 0x261   : > { %v16815_v46 = vrot.slane %v13241_v10, 6  ;;  %v16816_v31 = vrot.slane %v13008_v5, 1  ;;  %vm2936_vm11 = vweird.f32 %v9820_v60  ;;  %v16821_v3 = vrot.slane %v12867_v17, 7 }
 0x262   : > { %v3293_v7 = vsel %vm3236_vm13, %v16813_v14, %v16812_v25  ;;  %v13372_v25 = vsel %vm5351_vm3, %v5387_v36, %v16409_v19  ;;  %v13375_v14 = vmul.f32 %v3139_v45, %v16591_v53  ;;  %vm2935_vm9 = vweird.f32 %v13267_v30 }
 0x263   : > { %8942 = vmatmul.msk.f32.gmra.mxu2 %vm1949_vm4, %v3293_v7  ;;  %v3569_v48 = vsel %vm3512_vm2, %v16815_v46, %v16814_v2  ;;  %v13367_v63 = vsel %vm4551_vm14, %v4591_v59, %v16816_v31  ;;  %16818 = vst [vmem:[#allocation124_spill] sm:$0xff] %v13372_v25  ;;  %v2933_v7 = vmul.f32 %v9820_v60, %v2932_v49  ;;  %v13381_v46 = vpop.f32.mrf.mxu0  ;;  %v16820_v59 = vrot.slane %v12544_v21, 6  ;;  %vm2937_vm12 = vmor %vm2935_vm9, %vm2936_vm11 }
 0x264   : > { %16817 = vst [vmem:[#allocation123_spill] sm:$0xff] %v13367_v63  ;;  %8980 = vmatmul.msk.f32.gmra.mxu3 %vm1949_vm4, %v3569_v48  ;;  %v13379_v2 = vadd.f32 %v12804_v16, %v2285_v34  ;;  %v13389_v36 = vsel %vm3824_vm5, %v16821_v3, %v3870_v15  ;;  %v9822_v45 = vpop.eup %9821  ;;  %v2942_v49 = vor.u32 1.1754944e-38, %v2941_v43  ;;  %v3435_v34 = vpop.f32.mrf.mxu2  ;;  %9093 = vmatmul.msk.f32.gmra.mxu0 %vm1949_vm4, %v13375_v14  ;;  %v3294_v3 = vrot.slane %v13375_v14, 5 }
 0x265   : > { %16819 = vst [vmem:[#allocation125_spill] sm:$0xff] %v13381_v46  ;;  %v3517_v31 = vsel %vm3512_vm2, %v16820_v59, %v3516_v23  ;;  %v2934_v19 = vadd.f32 %v9820_v60, %v2933_v7  ;;  %v9824_v53 = vpop.eup %9823  ;;  %v13394_v46 = vadd.f32 1.0, %v9822_v45  ;;  %v3436_v59 = vadd.f32 %v12978_v22, %v3435_v34  ;;  %v16826_v45 = vld [vmem:[#allocation35_spill] sm:$0xff] }
 0x266   : > { %16822 = vst [vmem:[#allocation126_spill] sm:$0xff] %v13389_v36  ;;  %v8905_v48 = vmul.f32 -1.442695, %v13379_v2  ;;  %8954 = vmatmul.msk.f32.gmra.mxu1 %vm1949_vm4, %v3517_v31  ;;  %v3570_v30 = vrot.slane %v13375_v14, 6  ;;  %vm2940_vm7 = vcmp.eq.f32.partialorder %v2939_v44, 8.507059e+37  ;;  %v2946_v7 = vmul.f32 %v9824_v53, %v13338_v29 }
 0x267   : > { %v2938_v43 = vsel %vm2937_vm12, %v9820_v60, %v2934_v19  ;;  %v5073_v34 = vrot.slane %v12867_v17, 2  ;;  %v2956_v28 = vand.u32 2147483648, %v13338_v29  ;;  %v13407_v10 = vadd.f32 %v3711_v11, %v3436_v59 }
 0x268   : > { %9825 = vpow2.f32 %v8905_v48  ;;  %v2943_v31 = vsel %vm2940_vm7, %v2942_v49, %v2938_v43  ;;  %v2947_v25 = vsub.f32 1.0, %v2946_v7  ;;  %v2954_v60 = vand.u32 2147483647, %v13338_v29  ;;  %v2288_v43 = vpop.f32.mrf.mxu1 }
 0x269   : > { %9827 = vrcp.f32 %v13394_v46  ;;  %v3140_v36 = vmul.f32 %v2943_v31, %v13164_v47  ;;  %16823 = vst [vmem:[#allocation127_spill] sm:$0xff] %v13407_v10  ;;  %v16824_v19 = vrot.slane %v13307_v35, 5  ;;  %v16825_v49 = vrot.slane %v13307_v35, 6 }
 0x26a   : > { %v2948_v47 = vmul.f32 %v9824_v53, %v2947_v25  ;;  %vm2951_vm15 = vweird.f32 %v9824_v53  ;;  %v13422_v11 = vadd.f32 %v12804_v16, %v2288_v43  ;;  %v16828_v7 = vrot.slane %v11749_v57, 6 }
 0x26b   : > { %v3295_v44 = vsel %vm3236_vm13, %v16824_v19, %v3294_v3  ;;  %v3571_v48 = vsel %vm3512_vm2, %v16825_v49, %v3570_v30  ;;  %v13417_v17 = vmul.f32 %v3140_v36, %v16826_v45  ;;  %v13424_v59 = vpop.f32.mrf.mxu0  ;;  %v16829_v19 = vrot.slane %v13008_v5, 7 }
 0x26c   : > { %8943 = vmatmul.msk.f32.gmra.mxu2 %vm1949_vm4, %v3295_v44  ;;  %8981 = vmatmul.msk.f32.gmra.mxu3 %vm1949_vm4, %v3571_v48  ;;  %16827 = vst [vmem:[#allocation128_spill] sm:$0xff] %v13424_v59  ;;  %v3519_v31 = vsel %vm3512_vm2, %v3516_v23, %v16828_v7  ;;  %v16830_v25 = vrot.slane %v12798_v58, 2  ;;  %v2949_v48 = vadd.f32 %v9824_v53, %v2948_v47  ;;  %vm2950_vm0 = vweird.f32 %v13338_v29  ;;  %v3438_v57 = vpop.f32.mrf.mxu2  ;;  %v3714_v7 = vpop.f32.mrf.mxu3 }
 0x26d   : > { %v13432_v36 = vsel %vm3824_vm5, %v3870_v15, %v16829_v19  ;;  %v2957_v43 = vor.u32 1.1754944e-38, %v2956_v28  ;;  %v8906_v45 = vmul.f32 -1.442695, %v13422_v11  ;;  %vm2952_vm8 = vmor %vm2950_vm0, %vm2951_vm15  ;;  %v3439_v58 = vadd.f32 %v12978_v22, %v3438_v57  ;;  %9094 = vmatmul.msk.f32.gmra.mxu0 %vm1949_vm4, %v13417_v17 }
 0x26e   : > { %v13437_v44 = vsel %vm5039_vm6, %v16830_v25, %v5073_v34  ;;  %v9826_v49 = vpop.eup %9825  ;;  %8955 = vmatmul.msk.f32.gmra.mxu1 %vm1949_vm4, %v3519_v31  ;;  %v3296_v47 = vrot.slane %v13417_v17, 5  ;;  %v3572_v28 = vrot.slane %v13417_v17, 6  ;;  %v2953_v29 = vsel %vm2952_vm8, %v9824_v53, %v2949_v48 }
 0x26f   : > { %16831 = vst [vmem:[#allocation129_spill] sm:$0xff] %v13437_v44  ;;  %v9828_v23 = vpop.eup %9827  ;;  %v13443_v15 = vadd.f32 1.0, %v9826_v49  ;;  %vm2955_vm10 = vcmp.eq.f32.partialorder %v2954_v60, 8.507059e+37  ;;  %9829 = vpow2.f32 %v8906_v45  ;;  %v16415_v25 = vrot.slane %v12935_v6, 2  ;;  %v16833_v45 = vld [vmem:[#allocation34_spill] sm:$0xff] }
 0x270   : > { %v2961_v19 = vmul.f32 %v9828_v23, %v13394_v46  ;;  %v2958_v31 = vsel %vm2955_vm10, %v2957_v43, %v2953_v29  ;;  %v2971_v59 = vand.u32 2147483648, %v13394_v46  ;;  %v13455_v44 = vadd.f32 %v3714_v7, %v3439_v58  ;;  %v2291_v48 = vpop.f32.mrf.mxu1 }
 0x271   : > { %9831 = vrcp.f32 %v13443_v15  ;;  %v3141_v49 = vmul.f32 %v2958_v31, %v13245_v52  ;;  %v2969_v10 = vand.u32 2147483647, %v13394_v46  ;;  %v3297_v53 = vsel %vm3236_vm13, %v3294_v3, %v3296_v47 }
 0x272   : > { %v2962_v57 = vsub.f32 1.0, %v2961_v19  ;;  %16832 = vst [vmem:[#allocation130_spill] sm:$0xff] %v13455_v44  ;;  %v3573_v60 = vsel %vm3512_vm2, %v3570_v30, %v3572_v28  ;;  %vm2966_vm11 = vweird.f32 %v9828_v23  ;;  %v13466_v52 = vadd.f32 %v12804_v16, %v2291_v48 }
 0x273   : > { %v13461_v43 = vmul.f32 %v3141_v49, %v16833_v45  ;;  %v13468_v58 = vpop.f32.mrf.mxu0  ;;  %v13473_v3 = vsel %vm5039_vm6, %v5073_v34, %v16415_v25  ;;  %vm2965_vm9 = vweird.f32 %v13394_v46  ;;  %v2972_v19 = vor.u32 1.1754944e-38, %v2971_v59 }
 0x274   : > { %v2963_v29 = vmul.f32 %v9828_v23, %v2962_v57  ;;  %8944 = vmatmul.msk.f32.gmra.mxu2 %vm1949_vm4, %v3297_v53  ;;  %8982 = vmatmul.msk.f32.gmra.mxu3 %vm1949_vm4, %v3573_v60  ;;  %16834 = vst [vmem:[#allocation131_spill] sm:$0xff] %v13468_v58  ;;  %v8907_v31 = vmul.f32 -1.442695, %v13466_v52  ;;  %v3441_v49 = vpop.f32.mrf.mxu2  ;;  %vm2967_vm12 = vmor %vm2965_vm9, %vm2966_vm11  ;;  %v3717_v48 = vpop.f32.mrf.mxu3  ;;  %vm2970_vm7 = vcmp.eq.f32.partialorder %v2969_v10, 8.507059e+37  ;;  %v2984_v58 = vand.u32 2147483647, %v13443_v15 }
 0x275   : > { %16835 = vst [vmem:[#allocation132_spill] sm:$0xff] %v13473_v3  ;;  %v9830_v30 = vpop.eup %9829  ;;  %v3442_v60 = vadd.f32 %v12978_v22, %v3441_v49  ;;  %9095 = vmatmul.msk.f32.gmra.mxu0 %vm1949_vm4, %v13461_v43  ;;  %v3298_v34 = vrot.slane %v13461_v43, 5  ;;  %v3574_v46 = vrot.slane %v13461_v43, 6  ;;  %v2986_v49 = vand.u32 2147483648, %v13443_v15 }
 0x276   : > { %v2964_v7 = vadd.f32 %v9828_v23, %v2963_v29  ;;  %8956 = vmatmul.msk.f32.gmra.mxu1 %vm1949_vm4, %v11967_v61  ;;  %v13479_v53 = vadd.f32 1.0, %v9830_v30  ;;  %9833 = vpow2.f32 %v8907_v31  ;;  %vm2980_vm0 = vweird.f32 %v13443_v15 }
 0x277   : > { %v9832_v57 = vpop.eup %9831  ;;  %v13490_v45 = vadd.f32 %v3717_v48, %v3442_v60  ;;  %v3299_v3 = vsel %vm3236_vm13, %v3296_v47, %v3298_v34  ;;  %v2987_v47 = vor.u32 1.1754944e-38, %v2986_v49  ;;  %vm2985_vm10 = vcmp.eq.f32.partialorder %v2984_v58, 8.507059e+37 }
 0x278   : > { %v2968_v59 = vsel %vm2967_vm12, %v9828_v23, %v2964_v7  ;;  %v2976_v29 = vmul.f32 %v9832_v57, %v13443_v15  ;;  %9835 = vrcp.f32 %v13479_v53  ;;  %v3575_v23 = vsel %vm3512_vm2, %v3572_v28, %v3574_v46  ;;  %v2294_v10 = vpop.f32.mrf.mxu1  ;;  %v16837_v7 = vld [vmem:[#allocation31_spill] sm:$0xff] }
 0x279   : > { %v2973_v61 = vsel %vm2970_vm7, %v2972_v19, %v2968_v59  ;;  %16836 = vst [vmem:[#allocation133_spill] sm:$0xff] %v13490_v45  ;;  %vm2981_vm15 = vweird.f32 %v9832_v57  ;;  %vm2995_vm9 = vweird.f32 %v13479_v53 }
 0x27a   : > { %v3142_v30 = vmul.f32 %v2973_v61, %v13311_v8  ;;  %v2977_v25 = vsub.f32 1.0, %v2976_v29  ;;  %v13501_v8 = vadd.f32 %v12804_v16, %v2294_v10  ;;  %vm2982_vm8 = vmor %vm2980_vm0, %vm2981_vm15  ;;  %v16416_v10 = vrot.slane %v13008_v5, 2 }
 0x27b   : > { %v13503_v31 = vpop.f32.mrf.mxu0 }
 0x27c   : > { %v13496_v44 = vmul.f32 %v3142_v30, %v16837_v7  ;;  %v2978_v19 = vmul.f32 %v9832_v57, %v2977_v25  ;;  %8945 = vmatmul.msk.f32.gmra.mxu2 %vm1949_vm4, %v3299_v3  ;;  %8983 = vmatmul.msk.f32.gmra.mxu3 %vm1949_vm4, %v3575_v23  ;;  %16838 = vst [vmem:[#allocation134_spill] sm:$0xff] %v13503_v31  ;;  %v9834_v60 = vpop.eup %9833  ;;  %v8908_v28 = vmul.f32 -1.442695, %v13501_v8  ;;  %v3444_v59 = vpop.f32.mrf.mxu2  ;;  %v2999_v31 = vand.u32 2147483647, %v13479_v53 }
 0x27d   : > { %v13509_v3 = vadd.f32 1.0, %v9834_v60  ;;  %v3445_v29 = vadd.f32 %v12978_v22, %v3444_v59  ;;  %v3720_v61 = vpop.f32.mrf.mxu3  ;;  %v3001_v59 = vand.u32 2147483648, %v13479_v53 }
 0x27e   : > { %v2979_v48 = vadd.f32 %v9832_v57, %v2978_v19  ;;  %8957 = vmatmul.msk.f32.gmra.mxu1 %vm1949_vm4, %v11980_v26  ;;  %v9836_v25 = vpop.eup %9835  ;;  %9096 = vmatmul.msk.f32.gmra.mxu0 %vm1949_vm4, %v13496_v44  ;;  %v3300_v30 = vrot.slane %v13496_v44, 5  ;;  %v3576_v15 = vrot.slane %v13496_v44, 6  ;;  %9837 = vpow2.f32 %v8908_v28  ;;  %v16840_v28 = vld [vmem:[#allocation36_spill] sm:$0xff] }
 0x27f   : > { %v2991_v23 = vmul.f32 %v9836_v25, %v13479_v53  ;;  %9839 = vrcp.f32 %v13509_v3  ;;  %v13521_v7 = vadd.f32 %v3720_v61, %v3445_v29  ;;  %vm2996_vm11 = vweird.f32 %v9836_v25 }
 0x280   : > { %v2983_v49 = vsel %vm2982_vm8, %v9832_v57, %v2979_v48  ;;  %v3301_v57 = vsel %vm3236_vm13, %v3298_v34, %v3300_v30  ;;  %v3577_v58 = vsel %vm3512_vm2, %v3574_v46, %v3576_v15  ;;  %v2297_v48 = vpop.f32.mrf.mxu1  ;;  %v9103_v34 = vld [vmem:[%s16286_s6 + $0x14] sm:$0xf]  ;;  %v16842_v46 = vrot.slane %v12935_v6, 2  ;;  %vm2997_vm12 = vmor %vm2995_vm9, %vm2996_vm11 }
 0x281   : > { %v2988_v26 = vsel %vm2985_vm10, %v2987_v47, %v2983_v49  ;;  %v2992_v60 = vsub.f32 1.0, %v2991_v23  ;;  %16839 = vst [vmem:[#allocation135_spill] sm:$0xff] %v13521_v7  ;;  %9104 = vmatpush.msk.msra.mxu1 %vm2165_vm1, %v9103_v34  ;;  %vm3000_vm7 = vcmp.eq.f32.partialorder %v2999_v31, 8.507059e+37  ;;  %vm3010_vm0 = vweird.f32 %v13509_v3 }
 0x282   : > { %v3143_v19 = vmul.f32 %v2988_v26, %v13379_v2  ;;  %v13532_v2 = vadd.f32 %v12804_v16, %v2297_v48  ;;  %v13545_v61 = vsel %vm5039_vm6, %v16842_v46, %v16416_v10  ;;  %v3002_v16 = vor.u32 1.1754944e-38, %v3001_v59 }
 0x283   : > { %v2993_v49 = vmul.f32 %v9836_v25, %v2992_v60  ;;  %v13534_v29 = vpop.f32.mrf.mxu0  ;;  %16843 = vst [vmem:[#allocation137_spill] sm:$0xff] %v13545_v61 }
 0x284   : > { %v13527_v47 = vmul.f32 %v3143_v19, %v16840_v28  ;;  %8946 = vmatmul.msk.f32.gmra.mxu2 %vm1949_vm4, %v3301_v57  ;;  %8984 = vmatmul.msk.f32.gmra.mxu3 %vm1949_vm4, %v3577_v58  ;;  %16841 = vst [vmem:[#allocation136_spill] sm:$0xff] %v13534_v29  ;;  %v9838_v23 = vpop.eup %9837  ;;  %v8909_v19 = vmul.f32 -1.442695, %v13532_v2  ;;  %v3447_v60 = vpop.f32.mrf.mxu2  ;;  %v3014_v28 = vand.u32 2147483647, %v13509_v3 }
 0x285   : > { %v2994_v26 = vadd.f32 %v9836_v25, %v2993_v49  ;;  %v9840_v57 = vpop.eup %9839  ;;  %v13552_v58 = vadd.f32 1.0, %v9838_v23  ;;  %v3448_v6 = vadd.f32 %v12978_v22, %v3447_v60  ;;  %v3723_v48 = vpop.f32.mrf.mxu3  ;;  %v3016_v60 = vand.u32 2147483648, %v13509_v3 }
 0x286   : > { %8958 = vmatmul.msk.f32.gmra.mxu1 %vm1949_vm4, %v12001_v9  ;;  %9097 = vmatmul.msk.f32.gmra.mxu0 %vm1949_vm4, %v13527_v47  ;;  %v3302_v53 = vrot.slane %v13527_v47, 5  ;;  %v3578_v59 = vrot.slane %v13527_v47, 6  ;;  %v3006_v34 = vmul.f32 %v9840_v57, %v13509_v3  ;;  %9841 = vpow2.f32 %v8909_v19 }
 0x287   : > { %v2998_v49 = vsel %vm2997_vm12, %v9836_v25, %v2994_v26  ;;  %9843 = vrcp.f32 %v13552_v58  ;;  %v13563_v10 = vadd.f32 %v3723_v48, %v3448_v6  ;;  %v16845_v26 = vld [vmem:[#allocation38_spill] sm:$0xff]  ;;  %vm3011_vm15 = vweird.f32 %v9840_v57 }
 0x288   : > { %v3003_v9 = vsel %vm3000_vm7, %v3002_v16, %v2998_v49  ;;  %v3007_v23 = vsub.f32 1.0, %v3006_v34  ;;  %v3303_v29 = vsel %vm3236_vm13, %v3300_v30, %v3302_v53  ;;  %v3579_v25 = vsel %vm3512_vm2, %v3576_v15, %v3578_v59  ;;  %v2300_v31 = vpop.f32.mrf.mxu1  ;;  %vm3012_vm8 = vmor %vm3010_vm0, %vm3011_vm15 }
 0x289   : > { %v3144_v46 = vmul.f32 %v3003_v9, %v13422_v11  ;;  %16844 = vst [vmem:[#allocation138_spill] sm:$0xff] %v13563_v10  ;;  %v13576_v11 = vld [vmem:[%s16285_s5] ss:$0 sm:$0xff]  ;;  %v3017_v6 = vor.u32 1.1754944e-38, %v3016_v60  ;;  %vm3015_vm10 = vcmp.eq.f32.partialorder %v3014_v28, 8.507059e+37  ;;  %vm3025_vm9 = vweird.f32 %v13552_v58 }
 0x28a   : > { %v3008_v16 = vmul.f32 %v9840_v57, %v3007_v23  ;;  %v13579_v19 = vadd.f32 %v13576_v11, %v2300_v31  ;;  %v16848_v28 = vld [vmem:[#allocation37_spill] sm:$0xff] }
 0x28b   : > { %v13569_v61 = vmul.f32 %v3144_v46, %v16845_v26  ;;  %v13583_v49 = vpop.f32.mrf.mxu0 }
 0x28c   : > { %8947 = vmatmul.msk.f32.gmra.mxu2 %vm1949_vm4, %v3303_v29  ;;  %8985 = vmatmul.msk.f32.gmra.mxu3 %vm1949_vm4, %v3579_v25  ;;  %v9842_v30 = vpop.eup %9841  ;;  %v3009_v15 = vadd.f32 %v9840_v57, %v3008_v16  ;;  %v8910_v48 = vmul.f32 -1.442695, %v13579_v19  ;;  %16846 = vst [vmem:[#allocation139_spill] sm:$0xff] %v13583_v49  ;;  %v3450_v29 = vpop.f32.mrf.mxu2 }
 0x28d   : > { %v9844_v34 = vpop.eup %9843  ;;  %v13587_v9 = vadd.f32 1.0, %v9842_v30  ;;  %v3451_v46 = vadd.f32 %v12978_v22, %v3450_v29  ;;  %v3726_v23 = vpop.f32.mrf.mxu3  ;;  %v3304_v3 = vrot.slane %v13569_v61, 5  ;;  %v3580_v60 = vrot.slane %v13569_v61, 6 }
 0x28e   : > { %9105 = vmatmul.msk.f32.vlgmr.msra.gmra.mxu1 %vm1949_vm4, %v12047_v55  ;;  %9098 = vmatmul.msk.f32.gmra.mxu0 %vm1949_vm4, %v13569_v61  ;;  %v3013_v25 = vsel %vm3012_vm8, %v9840_v57, %v3009_v15  ;;  %v3021_v31 = vmul.f32 %v9844_v34, %v13552_v58  ;;  %9845 = vpow2.f32 %v8910_v48  ;;  %v3031_v29 = vand.u32 2147483648, %v13552_v58 }
 0x28f   : > { %v3018_v55 = vsel %vm3015_vm10, %v3017_v6, %v3013_v25  ;;  %9847 = vrcp.f32 %v13587_v9  ;;  %v13598_v26 = vadd.f32 %v3726_v23, %v3451_v46  ;;  %v3305_v49 = vsel %vm3236_vm13, %v3302_v53, %v3304_v3 }
 0x290   : > { %v3145_v16 = vmul.f32 %v3018_v55, %v13466_v52  ;;  %v3022_v30 = vsub.f32 1.0, %v3021_v31  ;;  %v3581_v10 = vsel %vm3512_vm2, %v3578_v59, %v3580_v60  ;;  %v13602_v7 = vpop.f32.mrf.mxu1  ;;  %vm3026_vm11 = vweird.f32 %v9844_v34 }
 0x291   : > { %16847 = vst [vmem:[#allocation140_spill] sm:$0xff] %v13598_v26  ;;  %v3029_v6 = vand.u32 2147483647, %v13552_v58  ;;  %v3032_v53 = vor.u32 1.1754944e-38, %v3031_v29  ;;  %vm3027_vm12 = vmor %vm3025_vm9, %vm3026_vm11  ;;  %v4607_v58 = vrot.slane %v13461_v43, 1  ;;  %v16418_v29 = vrot.slane %v13417_v17, 1 }
 0x292   : > { %v13605_v57 = vmul.f32 %v3145_v16, %v16848_v28  ;;  %v3023_v15 = vmul.f32 %v9844_v34, %v3022_v30  ;;  %v3046_v28 = vand.u32 2147483648, %v13587_v9  ;;  %vm3040_vm0 = vweird.f32 %v13587_v9 }
 0x293   : > { %vm3030_vm7 = vcmp.eq.f32.partialorder %v3029_v6, 8.507059e+37  ;;  %v13622_v16 = vpop.f32.mrf.mxu0 }
 0x294   : > { %8948 = vmatmul.msk.f32.gmra.mxu2 %vm1949_vm4, %v3305_v49  ;;  %8986 = vmatmul.msk.f32.gmra.mxu3 %vm1949_vm4, %v3581_v10  ;;  %v9846_v52 = vpop.eup %9845  ;;  %v3024_v48 = vadd.f32 %v9844_v34, %v3023_v15  ;;  %v3453_v46 = vpop.f32.mrf.mxu2  ;;  %v3306_v59 = vrot.slane %v13605_v57, 5  ;;  %v3582_v10 = vrot.slane %v13605_v57, 6  ;;  %16849 = vst [vmem:[#allocation141_spill] sm:$0xff] %v13622_v16  ;;  %v5403_v15 = vrot.slane %v13461_v43, 3  ;;  %v16852_v16 = vld [vmem:[#allocation39_spill] sm:$0xff] }
 0x295   : > { %v9848_v23 = vpop.eup %9847  ;;  %v13614_v25 = vadd.f32 1.0, %v9846_v52  ;;  %v3454_v31 = vadd.f32 %v12978_v22, %v3453_v46  ;;  %v3729_v49 = vpop.f32.mrf.mxu3 }
 0x296   : > { %9106 = vmatmul.msk.f32.gmra.mxu1 %vm1949_vm4, %v12063_v38  ;;  %9099 = vmatmul.msk.f32.gmra.mxu0 %vm1949_vm4, %v13605_v57  ;;  %v3028_v55 = vsel %vm3027_vm12, %v9844_v34, %v3024_v48  ;;  %v3036_v38 = vmul.f32 %v9848_v23, %v13587_v9  ;;  %v3307_v34 = vsel %vm3236_vm13, %v3304_v3, %v3306_v59  ;;  %vm3041_vm15 = vweird.f32 %v9848_v23 }
 0x297   : > { %v3033_v30 = vsel %vm3030_vm7, %v3032_v53, %v3028_v55  ;;  %9849 = vrcp.f32 %v13614_v25  ;;  %v13629_v26 = vadd.f32 %v3729_v49, %v3454_v31  ;;  %v3583_v6 = vsel %vm3512_vm2, %v3580_v60, %v3582_v10  ;;  %vm3042_vm8 = vmor %vm3040_vm0, %vm3041_vm15 }
 0x298   : > { %v3146_v52 = vmul.f32 %v3033_v30, %v13501_v8  ;;  %v3037_v46 = vsub.f32 1.0, %v3036_v38  ;;  %v13633_v48 = vpop.f32.mrf.mxu1  ;;  %v13638_v53 = vsel %vm4551_vm14, %v16418_v29, %v4607_v58  ;;  %v16417_v55 = vrot.slane %v13417_v17, 3 }
 0x299   : > { %16850 = vst [vmem:[#allocation142_spill] sm:$0xff] %v13629_v26  ;;  %v3044_v31 = vand.u32 2147483647, %v13587_v9  ;;  %v3047_v49 = vor.u32 1.1754944e-38, %v3046_v28  ;;  %v3061_v26 = vand.u32 2147483648, %v13614_v25 }
 0x29a   : > { %16851 = vst [vmem:[#allocation143_spill] sm:$0xff] %v13638_v53  ;;  %v13642_v8 = vmul.f32 %v3146_v52, %v16852_v16  ;;  %v3038_v38 = vmul.f32 %v9848_v23, %v3037_v46  ;;  %v13650_v3 = vsel %vm5351_vm3, %v16417_v55, %v5403_v15  ;;  %v5405_v16 = vrot.slane %v13496_v44, 3 }
 0x29b   : > { %16853 = vst [vmem:[#allocation144_spill] sm:$0xff] %v13650_v3  ;;  %vm3045_vm10 = vcmp.eq.f32.partialorder %v3044_v31, 8.507059e+37  ;;  %v13666_v45 = vpop.f32.mrf.mxu0 }
 0x29c   : > { %8949 = vmatmul.msk.f32.gmra.mxu2 %vm1949_vm4, %v3307_v34  ;;  %8987 = vmatmul.msk.f32.gmra.mxu3 %vm1949_vm4, %v3583_v6  ;;  %v3039_v60 = vadd.f32 %v9848_v23, %v3038_v38  ;;  %v3456_v30 = vpop.f32.mrf.mxu2  ;;  %v3308_v6 = vrot.slane %v13642_v8, 5  ;;  %v3584_v55 = vrot.slane %v13642_v8, 6  ;;  %v4609_v38 = vrot.slane %v13496_v44, 1  ;;  %16854 = vst [vmem:[#allocation145_spill] sm:$0xff] %v13666_v45 }
 0x29d   : > { %v9850_v52 = vpop.eup %9849  ;;  %v3457_v46 = vadd.f32 %v12978_v22, %v3456_v30  ;;  %v3732_v34 = vpop.f32.mrf.mxu3 }
 0x29e   : > { %9107 = vmatmul.msk.f32.gmra.mxu1 %vm1949_vm4, %v12066_v18  ;;  %9100 = vmatmul.msk.f32.gmra.mxu0 %vm1949_vm4, %v13642_v8  ;;  %v3043_v9 = vsel %vm3042_vm8, %v9848_v23, %v3039_v60  ;;  %v3051_v28 = vmul.f32 %v9850_v52, %v13614_v25  ;;  %v3886_v18 = vrot.slane %v13461_v43, 7  ;;  %v3309_v53 = vsel %vm3236_vm13, %v3306_v59, %v3308_v6  ;;  %v9141_v59 = vld [vmem:[%s16286_s6 + $0x18] sm:$0xf] }
 0x29f   : > { %v3048_v29 = vsel %vm3045_vm10, %v3047_v49, %v3043_v9  ;;  %v13668_v3 = vadd.f32 %v3732_v34, %v3457_v46  ;;  %v3585_v23 = vsel %vm3512_vm2, %v3582_v10, %v3584_v55  ;;  %v13675_v60 = vsel %vm4551_vm14, %v4607_v58, %v4609_v38  ;;  %v16857_v9 = vld [vmem:[#allocation40_spill] sm:$0xff]  ;;  %v9217_v10 = vld [vmem:[%s16286_s6 + $0x20] sm:$0xf]  ;;  %9142 = vmatpush.msk.msra.mxu2 %vm2165_vm1, %v9141_v59 }
 0x2a0   : > { %v3147_v22 = vmul.f32 %v3048_v29, %v13532_v2  ;;  %v3052_v30 = vsub.f32 1.0, %v3051_v28  ;;  %v13672_v31 = vpop.f32.mrf.mxu1  ;;  %16856 = vst [vmem:[#allocation147_spill] sm:$0xff] %v13675_v60  ;;  %v16421_v49 = vrot.slane %v13417_v17, 7  ;;  %vm3056_vm11 = vweird.f32 %v9850_v52  ;;  %9218 = vmatpush.msk.msra.mxu0 %vm2165_vm1, %v9217_v10 }
 0x2a1   : > { %16855 = vst [vmem:[#allocation146_spill] sm:$0xff] %v13668_v3  ;;  %v3059_v28 = vand.u32 2147483647, %v13614_v25  ;;  %v3826_v58 = vrot.slane %v12544_v21, 7  ;;  %v13694_v55 = vsel %vm5351_vm3, %v5403_v15, %v5405_v16  ;;  %v3888_v46 = vrot.slane %v13496_v44, 7 }
 0x2a2   : > { %v13679_v2 = vmul.f32 %v3147_v22, %v16857_v9  ;;  %v3053_v29 = vmul.f32 %v9850_v52, %v3052_v30  ;;  %vm3055_vm13 = vweird.f32 %v13614_v25  ;;  %v3062_v6 = vor.u32 1.1754944e-38, %v3061_v26  ;;  %v13710_v15 = vld [vmem:[%s16287_s7] ss:$0 sm:$0xff] }
 0x2a3   : > { %v4611_v21 = vrot.slane %v13527_v47, 1  ;;  %vm3057_vm2 = vmor %vm3055_vm13, %vm3056_vm11  ;;  %v5407_v26 = vrot.slane %v13527_v47, 3  ;;  %v13717_v25 = vsel %vm3824_vm5, %v3886_v18, %v3888_v46  ;;  %vm3060_vm9 = vcmp.eq.f32.partialorder %v3059_v28, 8.507059e+37  ;;  %v16860_v28 = vld [vmem:[#allocation41_spill] sm:$0xff] }
 0x2a4   : > { %8950 = vmatmul.msk.f32.gmra.mxu2 %vm1949_vm4, %v3309_v53  ;;  %8988 = vmatmul.msk.f32.gmra.mxu3 %vm1949_vm4, %v3585_v23  ;;  %v13699_v53 = vsel %vm3824_vm5, %v16421_v49, %v3886_v18  ;;  %v3054_v34 = vadd.f32 %v9850_v52, %v3053_v29  ;;  %v3459_v22 = vpop.f32.mrf.mxu2  ;;  %v3890_v29 = vrot.slane %v13527_v47, 7  ;;  %v3825_v49 = vrot.slane %v12229_v12, 7  ;;  %v13739_v12 = vpop.f32.mrf.mxu0 }
 0x2a5   : > { %v3460_v30 = vadd.f32 %v13710_v15, %v3459_v22  ;;  %v3735_v23 = vpop.f32.mrf.mxu3  ;;  %v13728_v3 = vsel %vm4551_vm14, %v4609_v38, %v4611_v21  ;;  %v13731_v18 = vsel %vm5351_vm3, %v5405_v16, %v5407_v26  ;;  %16861 = vst [vmem:[#allocation150_spill] sm:$0xff] %v13739_v12  ;;  %v4613_v16 = vrot.slane %v13569_v61, 1 }
 0x2a6   : > { %9108 = vmatmul.msk.f32.gmra.mxu1 %vm1949_vm4, %v12071_v50  ;;  %9101 = vmatmul.msk.f32.gmra.mxu0 %vm1949_vm4, %v13679_v2  ;;  %v3058_v59 = vsel %vm3057_vm2, %v9850_v52, %v3054_v34  ;;  %v3827_v22 = vsel %vm3824_vm5, %v3825_v49, %v3826_v58  ;;  %16859 = vst [vmem:[#allocation149_spill] sm:$0xff] %v13728_v3 }
 0x2a7   : > { %v3063_v10 = vsel %vm3060_vm9, %v3062_v6, %v3058_v59  ;;  %v13722_v45 = vadd.f32 %v3735_v23, %v3460_v30  ;;  %v13734_v52 = vsel %vm3824_vm5, %v3888_v46, %v3890_v29  ;;  %v13749_v38 = vadd.f32 %v13576_v11, %v13602_v7 }
 0x2a8   : > { %v3148_v9 = vmul.f32 %v3063_v10, %v13579_v19  ;;  %v13725_v50 = vpop.f32.mrf.mxu1  ;;  %v5409_v46 = vrot.slane %v13569_v61, 3  ;;  %v3892_v6 = vrot.slane %v13569_v61, 7  ;;  %v13757_v30 = vsel %vm4551_vm14, %v4611_v21, %v4613_v16 }
 0x2a9   : > { %16858 = vst [vmem:[#allocation148_spill] sm:$0xff] %v13722_v45  ;;  %v8911_v59 = vmul.f32 -1.442695, %v13749_v38  ;;  %v16864_v7 = vrot.slane %v12058_v37, 7  ;;  %v5093_v37 = vrot.slane %v13496_v44, 2  ;;  %v16866_v44 = vrot.slane %v13417_v17, 2 }
 0x2aa   : > { %v13737_v34 = vmul.f32 %v3148_v9, %v16860_v28  ;;  %16862 = vst [vmem:[#allocation151_spill] sm:$0xff] %v13757_v30  ;;  %v13771_v28 = vsel %vm3824_vm5, %v3890_v29, %v3892_v6  ;;  %v5411_v29 = vrot.slane %v13605_v57, 3 }
 0x2ab   : > { %v3829_v10 = vsel %vm3824_vm5, %v3826_v58, %v16864_v7  ;;  %v3894_v7 = vrot.slane %v13605_v57, 7  ;;  %9851 = vpow2.f32 %v8911_v59  ;;  %v13802_v59 = vadd.f32 %v13576_v11, %v13633_v48 }
 0x2ac   : > { %8991 = vmatmul.msk.f32.vlgmr.msrb.gmra.mxu2 %vm1949_vm4, %v3827_v22  ;;  %9029 = vmatmul.msk.f32.vlgmr.msrb.gmra.mxu3 %vm1949_vm4, %v12112_v62  ;;  %v3462_v19 = vpop.f32.mrf.mxu2  ;;  %v13779_v58 = vpop.f32.mrf.mxu0 }
 0x2ad   : > { %v3463_v49 = vadd.f32 %v13710_v15, %v3462_v19  ;;  %v3738_v9 = vpop.f32.mrf.mxu3  ;;  %v13768_v19 = vsel %vm5351_vm3, %v5407_v26, %v5409_v46  ;;  %16865 = vst [vmem:[#allocation153_spill] sm:$0xff] %v13779_v58  ;;  %v4615_v26 = vrot.slane %v13605_v57, 1  ;;  %v8912_v48 = vmul.f32 -1.442695, %v13802_v59 }
 0x2ae   : > { %9109 = vmatmul.msk.f32.gmra.mxu1 %vm1949_vm4, %v12315_v41  ;;  %9102 = vmatmul.msk.f32.gmra.mxu0 %vm1949_vm4, %v13737_v34 }
 0x2af   : > { %v13759_v23 = vadd.f32 %v3738_v9, %v3463_v49  ;;  %v5091_v49 = vrot.slane %v13461_v43, 2  ;;  %v13798_v12 = vsel %vm4551_vm14, %v4613_v16, %v4615_v26  ;;  %9853 = vpow2.f32 %v8912_v48 }
 0x2b0   : > { %v13765_v22 = vpop.f32.mrf.mxu1 }
 0x2b1   : > { %16863 = vst [vmem:[#allocation152_spill] sm:$0xff] %v13759_v23  ;;  %v13792_v43 = vsel %vm5039_vm6, %v16866_v44, %v5091_v49  ;;  %v13795_v58 = vsel %vm5039_vm6, %v5091_v49, %v5093_v37  ;;  %v9852_v16 = vpop.eup %9851 }
 0x2b2   : > { %16867 = vst [vmem:[#allocation154_spill] sm:$0xff] %v13792_v43 }
 0x2b3   : > { %16868 = vst [vmem:[#allocation155_spill] sm:$0xff] %v13795_v58 }
 0x2b4   : > { %8992 = vmatmul.msk.f32.gmra.mxu2 %vm1949_vm4, %v3829_v10  ;;  %9030 = vmatmul.msk.f32.gmra.mxu3 %vm1949_vm4, %v12115_v39  ;;  %v3465_v9 = vpop.f32.mrf.mxu2  ;;  %v13833_v41 = vpop.f32.mrf.mxu0 }
 0x2b5   : > { %v3466_v10 = vadd.f32 %v13710_v15, %v3465_v9  ;;  %v3741_v21 = vpop.f32.mrf.mxu3  ;;  %16872 = vst [vmem:[#allocation159_spill] sm:$0xff] %v13833_v41  ;;  %v9854_v48 = vpop.eup %9853 }
 0x2b6   : > { %9110 = vmatmul.msk.f32.gmra.mxu1 %vm1949_vm4, %v12390_v13  ;;  %9219 = vmatmul.msk.f32.vlgmr.msra.gmra.mxu0 %vm1949_vm4, %v12200_v24  ;;  %v13807_v13 = vsel %vm5351_vm3, %v5409_v46, %v5411_v29  ;;  %v13810_v24 = vsel %vm3824_vm5, %v3892_v6, %v3894_v7  ;;  %v4617_v46 = vrot.slane %v13642_v8, 1  ;;  %v5413_v6 = vrot.slane %v13642_v8, 3 }
 0x2b7   : > { %v13804_v9 = vadd.f32 %v3741_v21, %v3466_v10  ;;  %16870 = vst [vmem:[#allocation157_spill] sm:$0xff] %v13810_v24  ;;  %v5095_v21 = vrot.slane %v13527_v47, 2  ;;  %v3896_v10 = vrot.slane %v13642_v8, 7  ;;  %v13831_v47 = vadd.f32 1.0, %v9852_v16 }
 0x2b8   : > { %v13812_v44 = vpop.f32.mrf.mxu1  ;;  %v13883_v45 = vadd.f32 1.0, %v9854_v48  ;;  %v16431_v48 = vrot.slane %v13737_v34, 1 }
 0x2b9   : > { %16869 = vst [vmem:[#allocation156_spill] sm:$0xff] %v13804_v9  ;;  %v13829_v43 = vsel %vm5039_vm6, %v5093_v37, %v5095_v21  ;;  %v13839_v9 = vsel %vm5351_vm3, %v5411_v29, %v5413_v6  ;;  %v13842_v23 = vsel %vm3824_vm5, %v3894_v7, %v3896_v10  ;;  %9855 = vrcp.f32 %v13831_v47 }
 0x2ba   : > { %16871 = vst [vmem:[#allocation158_spill] sm:$0xff] %v13829_v43  ;;  %v5097_v29 = vrot.slane %v13569_v61, 2  ;;  %vm3070_vm7 = vweird.f32 %v13831_v47  ;;  %vm3085_vm10 = vweird.f32 %v13883_v45 }
 0x2bb   : > { %16873 = vst [vmem:[#allocation160_spill] sm:$0xff] %v13842_v23 }
 0x2bc   : > { %8993 = vmatmul.msk.f32.gmra.mxu2 %vm1949_vm4, %v12112_v62  ;;  %9031 = vmatmul.msk.f32.gmra.mxu3 %vm1949_vm4, %v12163_v20  ;;  %v3468_v49 = vpop.f32.mrf.mxu2  ;;  %v13868_v41 = vsel %vm5039_vm6, %v5095_v21, %v5097_v29 }
 0x2bd   : > { %v3469_v62 = vadd.f32 %v13710_v15, %v3468_v49  ;;  %v3744_v58 = vpop.f32.mrf.mxu3 }
 0x2be   : > { %9111 = vmatmul.msk.f32.gmra.mxu1 %vm1949_vm4, %v12450_v4  ;;  %9220 = vmatmul.msk.f32.gmra.mxu0 %vm1949_vm4, %v12246_v56  ;;  %v13836_v4 = vsel %vm4551_vm14, %v4615_v26, %v4617_v46  ;;  %v13846_v56 = vadd.f32 %v13576_v11, %v13672_v31  ;;  %v4619_v11 = vrot.slane %v13679_v2, 1  ;;  %v5415_v31 = vrot.slane %v13679_v2, 3 }
 0x2bf   : > { %v13848_v37 = vadd.f32 %v3744_v58, %v3469_v62  ;;  %v4138_v58 = vrot.slane %v13679_v2, 7  ;;  %v16875_v62 = vld [vmem:[#allocation51_spill] sm:$0xff] }
 0x2c0   : > { %v13850_v16 = vpop.f32.mrf.mxu1  ;;  %v8913_v26 = vmul.f32 -1.442695, %v13846_v56  ;;  %16876 = vst [vmem:[#allocation51_spill] sm:$0xff] %v13868_v41  ;;  %v13871_v61 = vsel %vm4551_vm14, %v4617_v46, %v4619_v11  ;;  %v13874_v43 = vsel %vm5351_vm3, %v5413_v6, %v5415_v31  ;;  %v16881_v46 = vld [vmem:[#allocation7_spill] sm:$0xff] }
 0x2c1   : > { %16874 = vst [vmem:[#allocation161_spill] sm:$0xff] %v13848_v37 }
 0x2c2   : > { %16877 = vst [vmem:[#allocation162_spill] sm:$0xff] %v13874_v43  ;;  %9857 = vpow2.f32 %v8913_v26 }
 0x2c3   : > { %9859 = vrcp.f32 %v13883_v45 }
 0x2c4   : > { %8994 = vmatmul.msk.f32.gmra.mxu2 %vm1949_vm4, %v12115_v39  ;;  %9032 = vmatmul.msk.f32.gmra.mxu3 %vm1949_vm4, %v12203_v51  ;;  %v3471_v7 = vpop.f32.mrf.mxu2 }
 0x2c5   : > { %v3472_v39 = vadd.f32 %v13710_v15, %v3471_v7  ;;  %v3747_v49 = vpop.f32.mrf.mxu3  ;;  %v13881_v7 = vpop.eup %9855 }
 0x2c6   : > { %9112 = vmatmul.msk.f32.gmra.mxu1 %vm1949_vm4, %v12500_v40  ;;  %9221 = vmatmul.msk.f32.gmra.mxu0 %vm1949_vm4, %v16875_v62  ;;  %v13877_v40 = vsel %vm3824_vm5, %v3896_v10, %v4138_v58  ;;  %v13885_v62 = vpop.f32.mrf.mxu0  ;;  %v3066_v6 = vmul.f32 %v13881_v7, %v13831_v47  ;;  %v5099_v10 = vrot.slane %v13605_v57, 2  ;;  %vm3071_vm12 = vweird.f32 %v13881_v7 }
 0x2c7   : > { %16878 = vst [vmem:[#allocation163_spill] sm:$0xff] %v13877_v40  ;;  %v13879_v37 = vadd.f32 %v3747_v49, %v3472_v39  ;;  %v16430_v39 = vrot.slane %v13737_v34, 3  ;;  %vm13962_vm15 = vmor %vm3070_vm7, %vm3071_vm12 }
 0x2c8   : > { %16880 = vst [vmem:[#allocation165_spill] sm:$0xff] %v13885_v62  ;;  %v13887_v21 = vpop.f32.mrf.mxu1  ;;  %v9858_v49 = vpop.eup %9857  ;;  %v13906_v57 = vsel %vm5039_vm6, %v5097_v29, %v5099_v10  ;;  %v3067_v43 = vsub.f32 1.0, %v3066_v6 }
 0x2c9   : > { %16879 = vst [vmem:[#allocation164_spill] sm:$0xff] %v13879_v37  ;;  %v16882_v37 = vld [vmem:[#allocation54_spill] sm:$0xff]  ;;  %v13916_v40 = vsel %vm5351_vm3, %v5415_v31, %v16430_v39  ;;  %v5101_v31 = vrot.slane %v13642_v8, 2 }
 0x2ca   : > { %16883 = vst [vmem:[#allocation7_spill] sm:$0xff] %v13906_v57  ;;  %v13927_v57 = vpop.eup %9859 }
 0x2cb   : > { %16884 = vst [vmem:[#allocation54_spill] sm:$0xff] %v13916_v40  ;;  %v3081_v6 = vmul.f32 %v13927_v57, %v13883_v45  ;;  %v13946_v39 = vsel %vm5039_vm6, %v5099_v10, %v5101_v31  ;;  %v16893_v10 = vld [vmem:[#allocation55_spill] sm:$0xff]  ;;  %v16898_v40 = vld [vmem:[#allocation62_spill] sm:$0xff]  ;;  %vm3086_vm8 = vweird.f32 %v13927_v57 }
 0x2cc   : > { %8995 = vmatmul.msk.f32.gmra.mxu2 %vm1949_vm4, %v12163_v20  ;;  %9033 = vmatmul.msk.f32.gmra.mxu3 %vm1949_vm4, %v16881_v46  ;;  %v3474_v26 = vpop.f32.mrf.mxu2  ;;  %v4140_v20 = vrot.slane %v13737_v34, 7  ;;  %vm3087_vm11 = vmor %vm3085_vm10, %vm3086_vm8 }
 0x2cd   : > { %v3475_v62 = vadd.f32 %v13710_v15, %v3474_v26  ;;  %v3750_v41 = vpop.f32.mrf.mxu3 }
 0x2ce   : > { %9113 = vmatmul.msk.f32.gmra.mxu1 %vm1949_vm4, %v12552_v32  ;;  %9222 = vmatmul.msk.f32.gmra.mxu0 %vm1949_vm4, %v16882_v37  ;;  %v13911_v32 = vsel %vm4551_vm14, %v4619_v11, %v16431_v48  ;;  %v13919_v23 = vsel %vm3824_vm5, %v4138_v58, %v4140_v20  ;;  %v13923_v37 = vadd.f32 1.0, %v9858_v49  ;;  %v13929_v24 = vpop.f32.mrf.mxu0  ;;  %v16888_v11 = vld [vmem:[#allocation52_spill] sm:$0xff]  ;;  %v3082_v48 = vsub.f32 1.0, %v3081_v6 }
 0x2cf   : > { %16885 = vst [vmem:[#allocation166_spill] sm:$0xff] %v13919_v23  ;;  %v13921_v26 = vadd.f32 %v3750_v41, %v3475_v62  ;;  %v3068_v41 = vmul.f32 %v13881_v7, %v3067_v43  ;;  %v16889_v62 = vld [vmem:[#allocation69_spill] sm:$0xff]  ;;  %v5103_v6 = vrot.slane %v13679_v2, 2 }
 0x2d0   : > { %v13925_v29 = vpop.f32.mrf.mxu1  ;;  %16887 = vst [vmem:[#allocation168_spill] sm:$0xff] %v13929_v24  ;;  %9861 = vrcp.f32 %v13923_v37  ;;  %vm3100_vm9 = vweird.f32 %v13923_v37 }
 0x2d1   : > { %16886 = vst [vmem:[#allocation167_spill] sm:$0xff] %v13921_v26  ;;  %v3069_v43 = vadd.f32 %v13881_v7, %v3068_v41  ;;  %v3074_v41 = vand.u32 2147483647, %v13831_v47  ;;  %v13982_v2 = vsel %vm5039_vm6, %v5101_v31, %v5103_v6 }
 0x2d2   : > { %16891 = vst [vmem:[#allocation52_spill] sm:$0xff] %v13946_v39 }
 0x2d3   : > { %16899 = vst [vmem:[#allocation62_spill] sm:$0xff] %v13982_v2  ;;  %vm3075_vm0 = vcmp.eq.f32.partialorder %v3074_v41, 8.507059e+37  ;;  %v16902_v41 = vld [vmem:[#allocation78_spill] sm:$0xff] }
 0x2d4   : > { %8996 = vmatmul.msk.f32.gmra.mxu2 %vm1949_vm4, %v12203_v51  ;;  %9034 = vmatmul.msk.f32.gmra.mxu3 %vm1949_vm4, %v16888_v11  ;;  %v3477_v58 = vpop.f32.mrf.mxu2  ;;  %v16890_v51 = vld [vmem:[#allocation58_spill] sm:$0xff] }
 0x2d5   : > { %v3478_v20 = vadd.f32 %v13710_v15, %v3477_v58  ;;  %v3753_v49 = vpop.f32.mrf.mxu3  ;;  %v3076_v58 = vand.u32 2147483648, %v13831_v47  ;;  %v16906_v2 = vld [vmem:[#allocation42_spill] sm:$0xff] }
 0x2d6   : > { %9114 = vmatmul.msk.f32.gmra.mxu1 %vm1949_vm4, %v16889_v62  ;;  %9223 = vmatmul.msk.f32.gmra.mxu0 %vm1949_vm4, %v16890_v51  ;;  %v13954_v62 = vpop.eup %9861  ;;  %v13971_v51 = vpop.f32.mrf.mxu0 }
 0x2d7   : > { %v13948_v8 = vadd.f32 %v3753_v49, %v3478_v20  ;;  %v3073_v49 = vsel %vm13962_vm15, %v13881_v7, %v3069_v43  ;;  %16896 = vst [vmem:[#allocation55_spill] sm:$0xff] %v13971_v51  ;;  %v3096_v26 = vmul.f32 %v13954_v62, %v13923_v37  ;;  %v3077_v7 = vor.u32 1.1754944e-38, %v3076_v58 }
 0x2d8   : > { %v13952_v24 = vpop.f32.mrf.mxu1  ;;  %v5105_v58 = vrot.slane %v13737_v34, 2  ;;  %vm3101_vm2 = vweird.f32 %v13954_v62 }
 0x2d9   : > { %16892 = vst [vmem:[#allocation58_spill] sm:$0xff] %v13948_v8  ;;  %v16897_v8 = vld [vmem:[#allocation74_spill] sm:$0xff]  ;;  %v3078_v20 = vsel %vm3075_vm0, %v3077_v7, %v3073_v49  ;;  %v16903_v7 = vld [vmem:[#allocation65_spill] sm:$0xff]  ;;  %vm3102_vm12 = vmor %vm3100_vm9, %vm3101_vm2 }
 0x2da   : > { %v3149_v31 = vmul.f32 %v3078_v20, %v13749_v38  ;;  %v14007_v38 = vsel %vm5039_vm6, %v5103_v6, %v5105_v58  ;;  %v16907_v6 = vld [vmem:[#allocation63_spill] sm:$0xff] }
 0x2dc   : > { %8997 = vmatmul.msk.f32.gmra.mxu2 %vm1949_vm4, %v16881_v46  ;;  %9035 = vmatmul.msk.f32.gmra.mxu3 %vm1949_vm4, %v16893_v10  ;;  %v3480_v39 = vpop.f32.mrf.mxu2  ;;  %v3083_v46 = vmul.f32 %v13927_v57, %v3082_v48  ;;  %v3097_v48 = vsub.f32 1.0, %v3096_v26 }
 0x2dd   : > { %v3481_v23 = vadd.f32 %v13710_v15, %v3480_v39  ;;  %v3756_v47 = vpop.f32.mrf.mxu3  ;;  %v3091_v39 = vand.u32 2147483648, %v13883_v45 }
 0x2de   : > { %9115 = vmatmul.msk.f32.gmra.mxu1 %vm1949_vm4, %v16897_v8  ;;  %9224 = vmatmul.msk.f32.gmra.mxu0 %vm1949_vm4, %v16898_v40  ;;  %v3084_v51 = vadd.f32 %v13927_v57, %v3083_v46  ;;  %v16901_v40 = vld [vmem:[#allocation59_spill] sm:$0xff]  ;;  %v14009_v20 = vpop.f32.mrf.mxu0 }
 0x2df   : > { %v13984_v43 = vadd.f32 %v3756_v47, %v3481_v23  ;;  %v3089_v23 = vand.u32 2147483647, %v13883_v45  ;;  %16904 = vst [vmem:[#allocation59_spill] sm:$0xff] %v14007_v38  ;;  %v3092_v45 = vor.u32 1.1754944e-38, %v3091_v39  ;;  %v3104_v39 = vand.u32 2147483647, %v13923_v37 }
 0x2e0   : > { %v3088_v49 = vsel %vm3087_vm11, %v13927_v57, %v3084_v51  ;;  %16905 = vst [vmem:[#allocation65_spill] sm:$0xff] %v14009_v20 }
 0x2e1   : > { %16900 = vst [vmem:[#allocation169_spill] sm:$0xff] %v13984_v43  ;;  %v14012_v43 = vmul.f32 %v3149_v31, %v16906_v2  ;;  %vm3090_vm13 = vcmp.eq.f32.partialorder %v3089_v23, 8.507059e+37  ;;  %v16908_v23 = vld [vmem:[#allocation83_spill] sm:$0xff]  ;;  %vm3105_vm7 = vcmp.eq.f32.partialorder %v3104_v39, 8.507059e+37 }
 0x2e2   : > { %v3093_v57 = vsel %vm3090_vm13, %v3092_v45, %v3088_v49 }
 0x2e3   : > { %v13988_v8 = vpop.f32.mrf.mxu1  ;;  %v3150_v2 = vmul.f32 %v3093_v57, %v13802_v59  ;;  %v5107_v31 = vrot.slane %v14012_v43, 2 }
 0x2e4   : > { %8998 = vmatmul.msk.f32.gmra.mxu2 %vm1949_vm4, %v16888_v11  ;;  %9036 = vmatmul.msk.f32.gmra.mxu3 %vm1949_vm4, %v16901_v40  ;;  %v3098_v11 = vmul.f32 %v13954_v62, %v3097_v48 }
 0x2e6   : > { %v3483_v26 = vpop.f32.mrf.mxu2  ;;  %9116 = vmatmul.msk.f32.gmra.mxu1 %vm1949_vm4, %v16902_v41  ;;  %9225 = vmatmul.msk.f32.gmra.mxu0 %vm1949_vm4, %v16903_v7  ;;  %v3099_v51 = vadd.f32 %v13954_v62, %v3098_v11  ;;  %v14041_v20 = vpop.f32.mrf.mxu0 }
 0x2e7   : > { %v3484_v46 = vadd.f32 %v13710_v15, %v3483_v26  ;;  %v3759_v47 = vpop.f32.mrf.mxu3  ;;  %v3106_v26 = vand.u32 2147483648, %v13923_v37  ;;  %v16911_v37 = vld [vmem:[#allocation43_spill] sm:$0xff]  ;;  %16912 = vst [vmem:[#allocation63_spill] sm:$0xff] %v14041_v20 }
 0x2e8   : > { %v3103_v49 = vsel %vm3102_vm12, %v13954_v62, %v3099_v51  ;;  %v14039_v45 = vmul.f32 %v3150_v2, %v16911_v37  ;;  %v16913_v51 = vld [vmem:[#allocation66_spill] sm:$0xff] }
 0x2e9   : > { %v14014_v41 = vadd.f32 %v3759_v47, %v3484_v46  ;;  %v14035_v47 = vsel %vm5039_vm6, %v5105_v58, %v5107_v31  ;;  %v3107_v59 = vor.u32 1.1754944e-38, %v3106_v26  ;;  %v16432_v26 = vrot.slane %v14012_v43, 1 }
 0x2ea   : > { %16910 = vst [vmem:[#allocation42_spill] sm:$0xff] %v14035_v47  ;;  %v4865_v2 = vrot.slane %v14039_v45, 1  ;;  %v5109_v39 = vrot.slane %v14039_v45, 2 }
 0x2eb   : > { %v14018_v48 = vpop.f32.mrf.mxu1  ;;  %v3108_v57 = vsel %vm3105_vm7, %v3107_v59, %v3103_v49  ;;  %v16917_v59 = vld [vmem:[#allocation44_spill] sm:$0xff] }
 0x2ec   : > { %8999 = vmatmul.msk.f32.gmra.mxu2 %vm1949_vm4, %v16893_v10  ;;  %9037 = vmatmul.msk.f32.gmra.mxu3 %vm1949_vm4, %v16907_v6  ;;  %v16909_v10 = vld [vmem:[#allocation70_spill] sm:$0xff]  ;;  %v3151_v58 = vmul.f32 %v3108_v57, %v13846_v56  ;;  %v14065_v56 = vsel %vm5039_vm6, %v5107_v31, %v5109_v39 }
 0x2ed   : > { %16916 = vst [vmem:[#allocation70_spill] sm:$0xff] %v14065_v56 }
 0x2ee   : > { %9117 = vmatmul.msk.f32.gmra.mxu1 %vm1949_vm4, %v16908_v23  ;;  %9226 = vmatmul.msk.f32.gmra.mxu0 %vm1949_vm4, %v16909_v10  ;;  %v14075_v20 = vpop.f32.mrf.mxu0 }
 0x2ef   : > { %v3486_v11 = vpop.f32.mrf.mxu2  ;;  %v3762_v46 = vpop.f32.mrf.mxu3  ;;  %16918 = vst [vmem:[#allocation43_spill] sm:$0xff] %v14075_v20 }
 0x2f0   : > { %v3487_v7 = vadd.f32 %v13710_v15, %v3486_v11 }
 0x2f2   : > { %v14043_v38 = vadd.f32 %v3762_v46, %v3487_v7  ;;  %v16914_v46 = vld [vmem:[#allocation75_spill] sm:$0xff]  ;;  %v14069_v7 = vmul.f32 %v3151_v58, %v16917_v59 }
 0x2f3   : > { %v14045_v62 = vpop.f32.mrf.mxu1 }
 0x2f4   : > { %9000 = vmatmul.msk.f32.gmra.mxu2 %vm1949_vm4, %v16901_v40  ;;  %9038 = vmatmul.msk.f32.gmra.mxu3 %vm1949_vm4, %v16913_v51  ;;  %v14062_v40 = vsel %vm4551_vm14, %v16432_v26, %v4865_v2  ;;  %v4867_v31 = vrot.slane %v14069_v7, 1  ;;  %v5111_v26 = vrot.slane %v14069_v7, 2 }
 0x2f5   : > { %16915 = vst [vmem:[#allocation83_spill] sm:$0xff] %v14062_v40  ;;  %v16923_v40 = vld [vmem:[#allocation76_spill] sm:$0xff] }
 0x2f6   : > { %9118 = vmatmul.msk.f32.gmra.mxu1 %vm1949_vm4, %v12861_v27  ;;  %9227 = vmatmul.msk.f32.gmra.mxu0 %vm1949_vm4, %v16914_v46  ;;  %v16919_v46 = vld [vmem:[#allocation71_spill] sm:$0xff]  ;;  %v14102_v47 = vpop.f32.mrf.mxu0 }
 0x2f7   : > { %v3489_v49 = vpop.f32.mrf.mxu2  ;;  %v3765_v11 = vpop.f32.mrf.mxu3  ;;  %16924 = vst [vmem:[#allocation44_spill] sm:$0xff] %v14102_v47  ;;  %v9179_v47 = vld [vmem:[%s16286_s6 + $0x1c] sm:$0xf] }
 0x2f8   : > { %v3490_v10 = vadd.f32 %v13710_v15, %v3489_v49  ;;  %9180 = vmatpush.msk.msra.mxu3 %vm2165_vm1, %v9179_v47  ;;  %v16934_v47 = vld [vmem:[#allocation88_spill] sm:$0xff] }
 0x2fa   : > { %v14071_v37 = vadd.f32 %v3765_v11, %v3490_v10  ;;  %v16920_v11 = vld [vmem:[#allocation79_spill] sm:$0xff]  ;;  %v14088_v10 = vsel %vm4551_vm14, %v4865_v2, %v4867_v31 }
 0x2fb   : > { %v14073_v57 = vpop.f32.mrf.mxu1  ;;  %16921 = vst [vmem:[#allocation66_spill] sm:$0xff] %v14088_v10 }
 0x2fc   : > { %9001 = vmatmul.msk.f32.gmra.mxu2 %vm1949_vm4, %v16907_v6  ;;  %9039 = vmatmul.msk.f32.gmra.mxu3 %vm1949_vm4, %v16919_v46  ;;  %v14091_v6 = vsel %vm5039_vm6, %v5109_v39, %v5111_v26  ;;  %v16925_v39 = vld [vmem:[#allocation84_spill] sm:$0xff] }
 0x2fd   : > { %16922 = vst [vmem:[#allocation75_spill] sm:$0xff] %v14091_v6 }
 0x2fe   : > { %9119 = vmatmul.msk.f32.gmra.mxu1 %vm1949_vm4, %v12927_v0  ;;  %9228 = vmatmul.msk.f32.gmra.mxu0 %vm1949_vm4, %v16920_v11 }
 0x2ff   : > { %v3492_v58 = vpop.f32.mrf.mxu2  ;;  %v3768_v49 = vpop.f32.mrf.mxu3 }
 0x300   : > { %v3493_v59 = vadd.f32 %v13710_v15, %v3492_v58 }
 0x302   : > { %v14094_v20 = vadd.f32 %v3768_v49, %v3493_v59 }
 0x303   : > { %v14096_v56 = vpop.f32.mrf.mxu1 }
 0x304   : > { %9002 = vmatmul.msk.f32.gmra.mxu2 %vm1949_vm4, %v16913_v51  ;;  %9040 = vmatmul.msk.f32.gmra.mxu3 %vm1949_vm4, %v16923_v40  ;;  %v16926_v51 = vld [vmem:[#allocation81_spill] sm:$0xff] }
 0x306   : > { %9120 = vmatmul.msk.f32.gmra.mxu1 %vm1949_vm4, %v12998_v33  ;;  %9229 = vmatmul.msk.f32.gmra.mxu0 %vm1949_vm4, %v16925_v39  ;;  %v14121_v39 = vpop.f32.mrf.mxu0 }
 0x307   : > { %v3495_v2 = vpop.f32.mrf.mxu2  ;;  %v3771_v26 = vpop.f32.mrf.mxu3  ;;  %16927 = vst [vmem:[#allocation71_spill] sm:$0xff] %v14121_v39 }
 0x308   : > { %v3496_v31 = vadd.f32 %v13710_v15, %v3495_v2 }
 0x30a   : > { %v14109_v58 = vadd.f32 %v3771_v26, %v3496_v31 }
 0x30b   : > { %v14111_v49 = vpop.f32.mrf.mxu1 }
 0x30c   : > { %9003 = vmatmul.msk.f32.gmra.mxu2 %vm1949_vm4, %v16919_v46  ;;  %9041 = vmatmul.msk.f32.gmra.mxu3 %vm1949_vm4, %v16926_v51  ;;  %v16928_v46 = vld [vmem:[#allocation85_spill] sm:$0xff] }
 0x30e   : > { %9121 = vmatmul.msk.f32.gmra.mxu1 %vm1949_vm4, %v13078_v42  ;;  %9230 = vmatmul.msk.f32.gmra.mxu0 %vm1949_vm4, %v12864_v1  ;;  %v16929_v1 = vld [vmem:[#allocation106_spill] sm:$0xff] }
 0x30f   : > { %v3498_v11 = vpop.f32.mrf.mxu2  ;;  %v3774_v59 = vpop.f32.mrf.mxu3 }
 0x310   : > { %v3499_v2 = vadd.f32 %v13710_v15, %v3498_v11 }
 0x312   : > { %v14124_v26 = vadd.f32 %v3774_v59, %v3499_v2  ;;  %v16930_v2 = vld [vmem:[#allocation91_spill] sm:$0xff] }
 0x313   : > { %v14126_v31 = vpop.f32.mrf.mxu1 }
 0x314   : > { %9004 = vmatmul.msk.f32.gmra.mxu2 %vm1949_vm4, %v16923_v40  ;;  %9042 = vmatmul.msk.f32.gmra.mxu3 %vm1949_vm4, %v16928_v46  ;;  %v14141_v40 = vpop.f32.mrf.mxu0 }
 0x315   : > { %16931 = vst [vmem:[#allocation79_spill] sm:$0xff] %v14141_v40 }
 0x316   : > { %9122 = vmatmul.msk.f32.gmra.mxu1 %vm1949_vm4, %v16929_v1  ;;  %9231 = vmatmul.msk.f32.gmra.mxu0 %vm1949_vm4, %v16930_v2  ;;  %v16935_v2 = vld [vmem:[#allocation96_spill] sm:$0xff] }
 0x317   : > { %v3501_v11 = vpop.f32.mrf.mxu2  ;;  %v3777_v59 = vpop.f32.mrf.mxu3 }
 0x318   : > { %v3502_v39 = vadd.f32 %v13710_v15, %v3501_v11 }
 0x31a   : > { %v14143_v6 = vadd.f32 %v3777_v59, %v3502_v39 }
 0x31b   : > { %v14145_v10 = vpop.f32.mrf.mxu1 }
 0x31c   : > { %16932 = vst [vmem:[#allocation76_spill] sm:$0xff] %v14143_v6  ;;  %9005 = vmatmul.msk.f32.gmra.mxu2 %vm1949_vm4, %v16926_v51  ;;  %9043 = vmatmul.msk.f32.gmra.mxu3 %vm1949_vm4, %v16934_v47  ;;  %v14160_v40 = vpop.f32.mrf.mxu0  ;;  %v16939_v51 = vld [vmem:[#allocation92_spill] sm:$0xff] }
 0x31d   : > { %16933 = vst [vmem:[#allocation84_spill] sm:$0xff] %v14145_v10  ;;  %v16940_v10 = vld [vmem:[#allocation117_spill] sm:$0xff] }
 0x31e   : > { %9123 = vmatmul.msk.f32.gmra.mxu1 %vm1949_vm4, %v13231_v54  ;;  %9232 = vmatmul.msk.f32.gmra.mxu0 %vm1949_vm4, %v16935_v2  ;;  %16938 = vst [vmem:[#allocation91_spill] sm:$0xff] %v14160_v40  ;;  %v16941_v2 = vld [vmem:[#allocation102_spill] sm:$0xff]  ;;  %v16944_v40 = vld [vmem:[#allocation97_spill] sm:$0xff] }
 0x31f   : > { %v3504_v1 = vpop.f32.mrf.mxu2  ;;  %v3780_v42 = vpop.f32.mrf.mxu3 }
 0x320   : > { %v3505_v11 = vadd.f32 %v13710_v15, %v3504_v1 }
 0x322   : > { %v14156_v39 = vadd.f32 %v3780_v42, %v3505_v11 }
 0x323   : > { %v14158_v59 = vpop.f32.mrf.mxu1 }
 0x324   : > { %16936 = vst [vmem:[#allocation81_spill] sm:$0xff] %v14156_v39  ;;  %9006 = vmatmul.msk.f32.gmra.mxu2 %vm1949_vm4, %v16928_v46  ;;  %9044 = vmatmul.msk.f32.gmra.mxu3 %vm1949_vm4, %v16939_v51  ;;  %v3403_v46 = vadd.f32 %v13710_v15, %v13725_v50  ;;  %v16947_v50 = vld [vmem:[#allocation103_spill] sm:$0xff]  ;;  %v3406_v39 = vadd.f32 %v13710_v15, %v13765_v22 }
 0x325   : > { %16937 = vst [vmem:[#allocation85_spill] sm:$0xff] %v14158_v59 }
 0x326   : > { %9124 = vmatmul.msk.f32.gmra.mxu1 %vm1949_vm4, %v16940_v10  ;;  %9233 = vmatmul.msk.f32.gmra.mxu0 %vm1949_vm4, %v16941_v2  ;;  %v3786_v59 = vadd.f32 %v13952_v24, %v3403_v46  ;;  %v14182_v10 = vpop.f32.mrf.mxu0  ;;  %v16946_v2 = vld [vmem:[#allocation107_spill] sm:$0xff]  ;;  %v16949_v24 = vld [vmem:[#allocation109_spill] sm:$0xff]  ;;  %v16950_v46 = vrot.slane %v13008_v5, 1 }
 0x327   : > { %v3507_v54 = vpop.f32.mrf.mxu2  ;;  %v3783_v6 = vpop.f32.mrf.mxu3  ;;  %16945 = vst [vmem:[#allocation92_spill] sm:$0xff] %v14182_v10 }
 0x328   : > { %v3508_v42 = vadd.f32 %v13710_v15, %v3507_v54 }
 0x32a   : > { %v14171_v1 = vadd.f32 %v3783_v6, %v3508_v42 }
 0x32b   : > { %v14173_v11 = vpop.f32.mrf.mxu1 }
 0x32c   : > { %16942 = vst [vmem:[#allocation88_spill] sm:$0xff] %v14171_v1  ;;  %9007 = vmatmul.msk.f32.gmra.mxu2 %vm1949_vm4, %v16934_v47  ;;  %9045 = vmatmul.msk.f32.gmra.mxu3 %vm1949_vm4, %v16944_v40 }
 0x32d   : > { %16943 = vst [vmem:[#allocation96_spill] sm:$0xff] %v14173_v11  ;;  %v4595_v11 = vrot.slane %v16947_v50, 1 }
 0x32e   : > { %9125 = vmatmul.msk.f32.gmra.mxu1 %vm1949_vm4, %v13367_v63  ;;  %9234 = vmatmul.msk.f32.gmra.mxu0 %vm1949_vm4, %v16946_v2  ;;  %v16952_v2 = vld [vmem:[#allocation113_spill] sm:$0xff]  ;;  %v14207_v22 = vpop.f32.mrf.mxu0 }
 0x32f   : > { %v3990_v54 = vpop.f32.mrf.mxu2  ;;  %v4166_v6 = vpop.f32.mrf.mxu3  ;;  %v14200_v10 = vsel %vm4551_vm14, %v16950_v46, %v4595_v11  ;;  %16953 = vst [vmem:[#allocation107_spill] sm:$0xff] %v14207_v22  ;;  %v3409_v46 = vadd.f32 %v13710_v15, %v13812_v44 }
 0x330   : > { %v4098_v42 = vadd.f32 %v3990_v54, %v3786_v59  ;;  %16951 = vst [vmem:[#allocation97_spill] sm:$0xff] %v14200_v10  ;;  %v3787_v59 = vadd.f32 %v13988_v8, %v3406_v39  ;;  %v16956_v8 = vld [vmem:[#allocation115_spill] sm:$0xff] }
 0x332   : > { %v4274_v1 = vadd.f32 %v4166_v6, %v4098_v42  ;;  %v16954_v42 = vld [vmem:[#allocation108_spill] sm:$0xff] }
 0x333   : > { %v14189_v47 = vpop.f32.mrf.mxu1 }
 0x334   : > { %16948 = vst [vmem:[#allocation102_spill] sm:$0xff] %v14189_v47  ;;  %9008 = vmatmul.msk.f32.gmra.mxu2 %vm1949_vm4, %v16939_v51  ;;  %9046 = vmatmul.msk.f32.gmra.mxu3 %vm1949_vm4, %v16949_v24  ;;  %v4597_v47 = vrot.slane %v16954_v42, 1 }
 0x336   : > { %9126 = vmatmul.msk.f32.gmra.mxu1 %vm1949_vm4, %v14200_v10  ;;  %9235 = vmatmul.msk.f32.gmra.mxu0 %vm1949_vm4, %v16952_v2  ;;  %v14219_v39 = vsel %vm4551_vm14, %v4595_v11, %v4597_v47  ;;  %v3788_v2 = vadd.f32 %v14018_v48, %v3409_v46  ;;  %v3412_v48 = vadd.f32 %v13710_v15, %v13850_v16  ;;  %v16961_v11 = vld [vmem:[#allocation120_spill] sm:$0xff] }
 0x337   : > { %v3993_v54 = vpop.f32.mrf.mxu2  ;;  %v4169_v6 = vpop.f32.mrf.mxu3 }
 0x338   : > { %v4099_v51 = vadd.f32 %v3993_v54, %v3787_v59 }
 0x33a   : > { %v4275_v63 = vadd.f32 %v4169_v6, %v4099_v51  ;;  %v16957_v6 = vld [vmem:[#allocation118_spill] sm:$0xff] }
 0x33b   : > { %v14210_v33 = vpop.f32.mrf.mxu1  ;;  %v16958_v51 = vld [vmem:[#allocation114_spill] sm:$0xff] }
 0x33c   : > { %16955 = vst [vmem:[#allocation103_spill] sm:$0xff] %v14210_v33  ;;  %9009 = vmatmul.msk.f32.gmra.mxu2 %vm1949_vm4, %v16944_v40  ;;  %9047 = vmatmul.msk.f32.gmra.mxu3 %vm1949_vm4, %v16956_v8  ;;  %v4599_v22 = vrot.slane %v16958_v51, 1  ;;  %v14227_v40 = vpop.f32.mrf.mxu0 }
 0x33d   : > { %16959 = vst [vmem:[#allocation109_spill] sm:$0xff] %v14227_v40  ;;  %v5391_v40 = vrot.slane %v16947_v50, 3 }
 0x33e   : > { %9127 = vmatmul.msk.f32.gmra.mxu1 %vm1949_vm4, %v14219_v39  ;;  %9236 = vmatmul.msk.f32.gmra.mxu0 %vm1949_vm4, %v16957_v6  ;;  %v14240_v46 = vsel %vm4551_vm14, %v4597_v47, %v4599_v22  ;;  %v16963_v6 = vld [vmem:[#allocation124_spill] sm:$0xff] }
 0x33f   : > { %v3996_v59 = vpop.f32.mrf.mxu2  ;;  %v4172_v54 = vpop.f32.mrf.mxu3  ;;  %16962 = vst [vmem:[#allocation108_spill] sm:$0xff] %v14240_v46 }
 0x340   : > { %v4100_v44 = vadd.f32 %v3996_v59, %v3788_v2  ;;  %v3789_v2 = vadd.f32 %v14045_v62, %v3412_v48  ;;  %v3415_v62 = vadd.f32 %v13710_v15, %v13887_v21  ;;  %v16966_v48 = vld [vmem:[#allocation126_spill] sm:$0xff] }
 0x342   : > { %v14229_v33 = vadd.f32 %v4172_v54, %v4100_v44  ;;  %v4601_v44 = vrot.slane %v13307_v35, 1 }
 0x343   : > { %v14231_v10 = vpop.f32.mrf.mxu1 }
 0x344   : > { %16960 = vst [vmem:[#allocation113_spill] sm:$0xff] %v14231_v10  ;;  %9010 = vmatmul.msk.f32.gmra.mxu2 %vm1949_vm4, %v16949_v24  ;;  %9048 = vmatmul.msk.f32.gmra.mxu3 %vm1949_vm4, %v16961_v11  ;;  %v14255_v47 = vpop.f32.mrf.mxu0 }
 0x345   : > { %16965 = vst [vmem:[#allocation118_spill] sm:$0xff] %v14255_v47 }
 0x346   : > { %9128 = vmatmul.msk.f32.gmra.mxu1 %vm1949_vm4, %v14240_v46  ;;  %9237 = vmatmul.msk.f32.gmra.mxu0 %vm1949_vm4, %v16963_v6  ;;  %v16969_v6 = vld [vmem:[#allocation68_spill] sm:$0xff]  ;;  %v4603_v46 = vrot.slane %v13375_v14, 1 }
 0x347   : > { %v3999_v59 = vpop.f32.mrf.mxu2  ;;  %v4175_v54 = vpop.f32.mrf.mxu3 }
 0x348   : > { %v4101_v16 = vadd.f32 %v3999_v59, %v3789_v2  ;;  %v14262_v2 = vsel %vm4551_vm14, %v4599_v22, %v4601_v44  ;;  %v3790_v59 = vadd.f32 %v14073_v57, %v3415_v62  ;;  %v5393_v57 = vrot.slane %v16954_v42, 3 }
 0x349   : > { %16967 = vst [vmem:[#allocation114_spill] sm:$0xff] %v14262_v2 }
 0x34a   : > { %v14248_v24 = vadd.f32 %v4175_v54, %v4101_v16  ;;  %v16968_v54 = vrot.slane %v13008_v5, 3  ;;  %v4512_v16 = vadd.f32 %v16969_v6, %v4274_v1  ;;  %v14288_v1 = vsel %vm4551_vm14, %v4601_v44, %v4603_v46 }
 0x34b   : > { %v14251_v10 = vpop.f32.mrf.mxu1 }
 0x34c   : > { %16964 = vst [vmem:[#allocation115_spill] sm:$0xff] %v14251_v10  ;;  %9011 = vmatmul.msk.f32.gmra.mxu2 %vm1949_vm4, %v16956_v8  ;;  %9049 = vmatmul.msk.f32.gmra.mxu3 %vm1949_vm4, %v16966_v48  ;;  %v5392_v21 = vsel %vm5351_vm3, %v16968_v54, %v5391_v40  ;;  %v3418_v54 = vadd.f32 %v13710_v15, %v13925_v29 }
 0x34e   : > { %9129 = vmatmul.msk.f32.gmra.mxu1 %vm1949_vm4, %v14262_v2  ;;  %9238 = vmatmul.msk.f32.gmra.mxu0 %vm1949_vm4, %v5392_v21  ;;  %v14279_v2 = vadd.f32 %v14111_v49, %v4512_v16  ;;  %v5394_v49 = vsel %vm5351_vm3, %v5391_v40, %v5393_v57  ;;  %v16973_v16 = vrot.slane %v13008_v5, 7 }
 0x34f   : > { %v4002_v47 = vpop.f32.mrf.mxu2  ;;  %v4178_v10 = vpop.f32.mrf.mxu3 }
 0x350   : > { %v4102_v8 = vadd.f32 %v4002_v47, %v3790_v59  ;;  %v14291_v47 = vpop.f32.mrf.mxu0  ;;  %v16972_v59 = vld [vmem:[#allocation73_spill] sm:$0xff] }
 0x351   : > { %16971 = vst [vmem:[#allocation124_spill] sm:$0xff] %v14291_v47  ;;  %v4513_v15 = vadd.f32 %v16972_v59, %v4275_v63  ;;  %v16975_v63 = vrot.slane %v13417_v17, 1 }
 0x352   : > { %v14273_v22 = vadd.f32 %v4178_v10, %v4102_v8  ;;  %v3791_v10 = vadd.f32 %v14096_v56, %v3418_v54  ;;  %v5395_v56 = vrot.slane %v16958_v51, 3 }
 0x353   : > { %v14276_v62 = vpop.f32.mrf.mxu1  ;;  %v14308_v40 = vadd.f32 %v14126_v31, %v4513_v15  ;;  %v3876_v31 = vrot.slane %v16954_v42, 7 }
 0x354   : > { %16970 = vst [vmem:[#allocation120_spill] sm:$0xff] %v14276_v62  ;;  %9012 = vmatmul.msk.f32.gmra.mxu2 %vm1949_vm4, %v16961_v11  ;;  %9050 = vmatmul.msk.f32.gmra.mxu3 %vm1949_vm4, %v13432_v36  ;;  %v3874_v11 = vrot.slane %v16947_v50, 7 }
 0x356   : > { %9130 = vmatmul.msk.f32.gmra.mxu1 %vm1949_vm4, %v14288_v1  ;;  %9239 = vmatmul.msk.f32.gmra.mxu0 %vm1949_vm4, %v5394_v49  ;;  %v3875_v8 = vsel %vm3824_vm5, %v16973_v16, %v3874_v11  ;;  %v5396_v49 = vsel %vm5351_vm3, %v5393_v57, %v5395_v56  ;;  %v3877_v16 = vsel %vm3824_vm5, %v3874_v11, %v3876_v31  ;;  %v16978_v57 = vld [vmem:[#allocation143_spill] sm:$0xff] }
 0x357   : > { %v4005_v29 = vpop.f32.mrf.mxu2  ;;  %v4181_v21 = vpop.f32.mrf.mxu3 }
 0x358   : > { %v4103_v6 = vadd.f32 %v4005_v29, %v3791_v10  ;;  %v14316_v10 = vsel %vm4551_vm14, %v4603_v46, %v16975_v63  ;;  %v14323_v15 = vpop.f32.mrf.mxu0  ;;  %v5397_v46 = vrot.slane %v13307_v35, 3 }
 0x35a   : > { %v14299_v44 = vadd.f32 %v4181_v21, %v4103_v6 }
 0x35b   : > { %v14305_v54 = vpop.f32.mrf.mxu1 }
 0x35c   : > { %16974 = vst [vmem:[#allocation126_spill] sm:$0xff] %v14305_v54  ;;  %9013 = vmatmul.msk.f32.gmra.mxu2 %vm1949_vm4, %v16966_v48  ;;  %9051 = vmatmul.msk.f32.gmra.mxu3 %vm1949_vm4, %v3875_v8  ;;  %v16976_v48 = vld [vmem:[#allocation99_spill] sm:$0xff] }
 0x35e   : > { %9131 = vmatmul.msk.f32.gmra.mxu1 %vm1949_vm4, %v14316_v10  ;;  %9240 = vmatmul.msk.f32.gmra.mxu0 %vm1949_vm4, %v5396_v49  ;;  %v5398_v49 = vsel %vm5351_vm3, %v5395_v56, %v5397_v46 }
 0x35f   : > { %v4008_v59 = vpop.f32.mrf.mxu2  ;;  %v4184_v29 = vpop.f32.mrf.mxu3 }
 0x360   : > { %v4104_v21 = vadd.f32 %v4008_v59, %v16976_v48  ;;  %v16979_v48 = vld [vmem:[#allocation45_spill] sm:$0xff] }
 0x362   : > { %v14326_v6 = vadd.f32 %v4184_v29, %v4104_v21  ;;  %v3878_v29 = vrot.slane %v16958_v51, 7  ;;  %v14341_v21 = vpop.f32.mrf.mxu0 }
 0x363   : > { %v14330_v63 = vpop.f32.mrf.mxu1 }
 0x364   : > { %16977 = vst [vmem:[#allocation68_spill] sm:$0xff] %v14330_v63  ;;  %9014 = vmatmul.msk.f32.gmra.mxu2 %vm1949_vm4, %v13432_v36  ;;  %9052 = vmatmul.msk.f32.gmra.mxu3 %vm1949_vm4, %v3877_v16  ;;  %v5399_v36 = vrot.slane %v13375_v14, 3  ;;  %v3879_v54 = vsel %vm3824_vm5, %v3876_v31, %v3878_v29 }
 0x366   : > { %9132 = vmatmul.msk.f32.gmra.mxu1 %vm1949_vm4, %v16978_v57  ;;  %9241 = vmatmul.msk.f32.gmra.mxu0 %vm1949_vm4, %v5398_v49  ;;  %v5400_v56 = vsel %vm5351_vm3, %v5397_v46, %v5399_v36  ;;  %v16983_v46 = vrot.slane %v13417_v17, 3 }
 0x367   : > { %v4011_v47 = vpop.f32.mrf.mxu2  ;;  %v4187_v59 = vpop.f32.mrf.mxu3 }
 0x368   : > { %v4105_v11 = vadd.f32 %v4011_v47, %v16979_v48  ;;  %v16981_v48 = vld [vmem:[#allocation46_spill] sm:$0xff] }
 0x36a   : > { %v14343_v63 = vadd.f32 %v4187_v59, %v4105_v11  ;;  %v3880_v59 = vrot.slane %v13307_v35, 7  ;;  %v14362_v57 = vpop.f32.mrf.mxu0 }
 0x36b   : > { %v14347_v62 = vpop.f32.mrf.mxu1 }
 0x36c   : > { %16980 = vst [vmem:[#allocation73_spill] sm:$0xff] %v14347_v62  ;;  %9015 = vmatmul.msk.f32.gmra.mxu2 %vm1949_vm4, %v3875_v8  ;;  %9053 = vmatmul.msk.f32.gmra.mxu3 %vm1949_vm4, %v3879_v54  ;;  %v3881_v62 = vsel %vm3824_vm5, %v3878_v29, %v3880_v59  ;;  %v3882_v29 = vrot.slane %v13375_v14, 7 }
 0x36e   : > { %9133 = vmatmul.msk.f32.gmra.mxu1 %vm1949_vm4, %v13675_v60  ;;  %9242 = vmatmul.msk.f32.gmra.mxu0 %vm1949_vm4, %v5400_v56  ;;  %v5402_v56 = vsel %vm5351_vm3, %v5399_v36, %v16983_v46 }
 0x36f   : > { %v4014_v47 = vpop.f32.mrf.mxu2  ;;  %v4190_v49 = vpop.f32.mrf.mxu3 }
 0x370   : > { %v4106_v11 = vadd.f32 %v4014_v47, %v16981_v48  ;;  %v16984_v48 = vld [vmem:[#allocation116_spill] sm:$0xff] }
 0x372   : > { %v14357_v31 = vadd.f32 %v4190_v49, %v4106_v11 }
 0x373   : > { %v14360_v8 = vpop.f32.mrf.mxu1 }
 0x374   : > { %16982 = vst [vmem:[#allocation99_spill] sm:$0xff] %v14360_v8  ;;  %9016 = vmatmul.msk.f32.gmra.mxu2 %vm1949_vm4, %v3877_v16  ;;  %9054 = vmatmul.msk.f32.gmra.mxu3 %vm1949_vm4, %v3881_v62  ;;  %v3883_v16 = vsel %vm3824_vm5, %v3880_v59, %v3882_v29  ;;  %v16988_v59 = vrot.slane %v13417_v17, 7 }
 0x376   : > { %9134 = vmatmul.msk.f32.gmra.mxu1 %vm1949_vm4, %v13728_v3  ;;  %9243 = vmatmul.msk.f32.gmra.mxu0 %vm1949_vm4, %v5402_v56  ;;  %v14381_v3 = vpop.f32.mrf.mxu0  ;;  %v16986_v56 = vld [vmem:[#allocation144_spill] sm:$0xff] }
 0x377   : > { %v4017_v47 = vpop.f32.mrf.mxu2  ;;  %v4193_v49 = vpop.f32.mrf.mxu3 }
 0x378   : > { %v4107_v11 = vadd.f32 %v4017_v47, %v16984_v48  ;;  %v16987_v47 = vld [vmem:[#allocation122_spill] sm:$0xff] }
 0x37a   : > { %v14374_v8 = vadd.f32 %v4193_v49, %v4107_v11 }
 0x37b   : > { %v14377_v60 = vpop.f32.mrf.mxu1 }
 0x37c   : > { %16985 = vst [vmem:[#allocation45_spill] sm:$0xff] %v14377_v60  ;;  %9017 = vmatmul.msk.f32.gmra.mxu2 %vm1949_vm4, %v3879_v54  ;;  %9055 = vmatmul.msk.f32.gmra.mxu3 %vm1949_vm4, %v3883_v16  ;;  %v3885_v54 = vsel %vm3824_vm5, %v3882_v29, %v16988_v59 }
 0x37e   : > { %9135 = vmatmul.msk.f32.gmra.mxu1 %vm1949_vm4, %v13757_v30  ;;  %9244 = vmatmul.msk.f32.gmra.mxu0 %vm1949_vm4, %v16986_v56 }
 0x37f   : > { %v4020_v36 = vpop.f32.mrf.mxu2  ;;  %v4196_v46 = vpop.f32.mrf.mxu3 }
 0x380   : > { %v4108_v49 = vadd.f32 %v4020_v36, %v16987_v47  ;;  %v14401_v36 = vpop.f32.mrf.mxu0 }
 0x382   : > { %v14388_v48 = vadd.f32 %v4196_v46, %v4108_v49  ;;  %v16990_v46 = vld [vmem:[#allocation127_spill] sm:$0xff] }
 0x383   : > { %v14393_v11 = vpop.f32.mrf.mxu1 }
 0x384   : > { %16989 = vst [vmem:[#allocation46_spill] sm:$0xff] %v14393_v11  ;;  %9018 = vmatmul.msk.f32.gmra.mxu2 %vm1949_vm4, %v3881_v62  ;;  %9056 = vmatmul.msk.f32.gmra.mxu3 %vm1949_vm4, %v3885_v54 }
 0x386   : > { %9136 = vmatmul.msk.f32.gmra.mxu1 %vm1949_vm4, %v13798_v12  ;;  %9245 = vmatmul.msk.f32.gmra.mxu0 %vm1949_vm4, %v13694_v55  ;;  %v16992_v55 = vld [vmem:[#allocation130_spill] sm:$0xff] }
 0x387   : > { %v4023_v60 = vpop.f32.mrf.mxu2  ;;  %v4199_v30 = vpop.f32.mrf.mxu3 }
 0x388   : > { %v4109_v56 = vadd.f32 %v4023_v60, %v16990_v46  ;;  %v14416_v60 = vpop.f32.mrf.mxu0 }
 0x38a   : > { %v14404_v47 = vadd.f32 %v4199_v30, %v4109_v56 }
 0x38b   : > { %v14406_v29 = vpop.f32.mrf.mxu1 }
 0x38c   : > { %16991 = vst [vmem:[#allocation116_spill] sm:$0xff] %v14406_v29  ;;  %9019 = vmatmul.msk.f32.gmra.mxu2 %vm1949_vm4, %v3883_v16  ;;  %9057 = vmatmul.msk.f32.gmra.mxu3 %vm1949_vm4, %v13699_v53  ;;  %v6531_v16 = vld [vmem:[%s16288_s8] sm:$0xf] }
 0x38d   : > { %9291 = vmatpush.msk.msrb.mxu1 %vm2165_vm1, %v6531_v16  ;;  %v6489_v29 = vld [vmem:[#allocation2] sm:$0xff] }
 0x38e   : > { %9137 = vmatmul.msk.f32.gmra.mxu1 %vm1949_vm4, %v13836_v4  ;;  %9246 = vmatmul.msk.f32.gmra.mxu0 %vm1949_vm4, %v13731_v18 }
 0x38f   : > { %v4026_v62 = vpop.f32.mrf.mxu2  ;;  %v4202_v49 = vpop.f32.mrf.mxu3 }
 0x390   : > { %v4110_v59 = vadd.f32 %v4026_v62, %v16992_v55  ;;  %v16994_v62 = vld [vmem:[#allocation133_spill] sm:$0xff] }
 0x392   : > { %v14418_v30 = vadd.f32 %v4202_v49, %v4110_v59  ;;  %v14438_v59 = vpop.f32.mrf.mxu0 }
 0x393   : > { %v14420_v46 = vpop.f32.mrf.mxu1 }
 0x394   : > { %16993 = vst [vmem:[#allocation144_spill] sm:$0xff] %v14420_v46  ;;  %9020 = vmatmul.msk.f32.gmra.mxu2 %vm1949_vm4, %v3885_v54  ;;  %9058 = vmatmul.msk.f32.gmra.mxu3 %vm1949_vm4, %v13717_v25 }
 0x396   : > { %9138 = vmatmul.msk.f32.gmra.mxu1 %vm1949_vm4, %v13871_v61  ;;  %9247 = vmatmul.msk.f32.gmra.mxu0 %vm1949_vm4, %v13768_v19  ;;  %v16996_v19 = vld [vmem:[#allocation135_spill] sm:$0xff] }
 0x397   : > { %v4029_v18 = vpop.f32.mrf.mxu2  ;;  %v4205_v56 = vpop.f32.mrf.mxu3 }
 0x398   : > { %v4111_v49 = vadd.f32 %v4029_v18, %v16994_v62 }
 0x39a   : > { %v14434_v54 = vadd.f32 %v4205_v56, %v4111_v49  ;;  %v17000_v49 = vrot.slane %v13737_v34, 1 }
 0x39b   : > { %v14436_v55 = vpop.f32.mrf.mxu1 }
 0x39c   : > { %16995 = vst [vmem:[#allocation122_spill] sm:$0xff] %v14436_v55  ;;  %9021 = vmatmul.msk.f32.gmra.mxu2 %vm1949_vm4, %v13699_v53  ;;  %9059 = vmatmul.msk.f32.gmra.mxu3 %vm1949_vm4, %v13734_v52  ;;  %v16999_v53 = vrot.slane %v14012_v43, 1 }
 0x39e   : > { %9139 = vmatmul.msk.f32.gmra.mxu1 %vm1949_vm4, %v13911_v32  ;;  %9248 = vmatmul.msk.f32.gmra.mxu0 %vm1949_vm4, %v13807_v13  ;;  %v14462_v55 = vsel %vm4551_vm14, %v17000_v49, %v16999_v53  ;;  %v14464_v13 = vpop.f32.mrf.mxu0  ;;  %v17005_v53 = vld [vmem:[#allocation157_spill] sm:$0xff] }
 0x39f   : > { %v4032_v16 = vpop.f32.mrf.mxu2  ;;  %v4208_v46 = vpop.f32.mrf.mxu3  ;;  %17001 = vst [vmem:[#allocation133_spill] sm:$0xff] %v14462_v55  ;;  %v6808_v49 = vld [vmem:[%s16290_s10] sm:$0xff] }
 0x3a0   : > { %v4112_v18 = vadd.f32 %v4032_v16, %v16996_v19  ;;  %6828 = vmatpush.msrb.mxu2 %v6808_v49 }
 0x3a2   : > { %v14449_v56 = vadd.f32 %v4208_v46, %v4112_v18 }
 0x3a3   : > { %v14451_v62 = vpop.f32.mrf.mxu1 }
 0x3a4   : > { %16997 = vst [vmem:[#allocation127_spill] sm:$0xff] %v14449_v56  ;;  %9022 = vmatmul.msk.f32.gmra.mxu2 %vm1949_vm4, %v13717_v25  ;;  %9060 = vmatmul.msk.f32.gmra.mxu3 %vm1949_vm4, %v13771_v28  ;;  %v17002_v25 = vld [vmem:[#allocation138_spill] sm:$0xff] }
 0x3a5   : > { %16998 = vst [vmem:[#allocation130_spill] sm:$0xff] %v14451_v62 }
 0x3a6   : > { %9140 = vmatmul.msk.f32.gmra.mxu1 %vm1949_vm4, %v14462_v55  ;;  %9249 = vmatmul.msk.f32.gmra.mxu0 %vm1949_vm4, %v13839_v9  ;;  %v17012_v55 = vld [vmem:[#allocation142_spill] sm:$0xff] }
 0x3a7   : > { %v4035_v46 = vpop.f32.mrf.mxu2  ;;  %v4211_v16 = vpop.f32.mrf.mxu3 }
 0x3a8   : > { %v4113_v19 = vadd.f32 %v4035_v46, %v17002_v25  ;;  %v14485_v25 = vpop.f32.mrf.mxu0 }
 0x3aa   : > { %v14471_v18 = vadd.f32 %v4211_v16, %v4113_v19  ;;  %v17006_v16 = vld [vmem:[#allocation162_spill] sm:$0xff]  ;;  %v17007_v19 = vld [vmem:[#allocation140_spill] sm:$0xff] }
 0x3ab   : > { %v14473_v62 = vpop.f32.mrf.mxu1 }
 0x3ac   : > { %17003 = vst [vmem:[#allocation135_spill] sm:$0xff] %v14471_v18  ;;  %9023 = vmatmul.msk.f32.gmra.mxu2 %vm1949_vm4, %v13734_v52  ;;  %9061 = vmatmul.msk.f32.gmra.mxu3 %vm1949_vm4, %v17005_v53  ;;  %v17010_v18 = vld [vmem:[#allocation160_spill] sm:$0xff] }
 0x3ad   : > { %17004 = vst [vmem:[#allocation138_spill] sm:$0xff] %v14473_v62 }
 0x3ae   : > { %9292 = vmatmul.msk.f32.vlgmr.msrb.gmra.mxu1 %vm1949_vm4, %v6489_v29  ;;  %9250 = vmatmul.msk.f32.gmra.mxu0 %vm1949_vm4, %v17006_v16  ;;  %v6490_v29 = vld [vmem:[#allocation2 + $0x8] sm:$0xff] }
 0x3af   : > { %v4038_v9 = vpop.f32.mrf.mxu2  ;;  %v4214_v46 = vpop.f32.mrf.mxu3  ;;  %v17011_v16 = vld [vmem:[#allocation54_spill] sm:$0xff] }
 0x3b0   : > { %v4114_v52 = vadd.f32 %v4038_v9, %v17007_v19 }
 0x3b2   : > { %v14488_v62 = vadd.f32 %v4214_v46, %v4114_v52  ;;  %v14500_v46 = vpop.f32.mrf.mxu0  ;;  %v5419_v52 = vrot.slane %v14012_v43, 3  ;;  %v17017_v43 = vld [vmem:[#allocation146_spill] sm:$0xff] }
 0x3b3   : > { %v14490_v11 = vpop.f32.mrf.mxu1 }
 0x3b4   : > { %17008 = vst [vmem:[#allocation157_spill] sm:$0xff] %v14488_v62  ;;  %9024 = vmatmul.msk.f32.gmra.mxu2 %vm1949_vm4, %v13771_v28  ;;  %9062 = vmatmul.msk.f32.gmra.mxu3 %vm1949_vm4, %v17010_v18  ;;  %v17016_v62 = vrot.slane %v13737_v34, 3  ;;  %v17020_v34 = vld [vmem:[#allocation166_spill] sm:$0xff] }
 0x3b5   : > { %17009 = vst [vmem:[#allocation162_spill] sm:$0xff] %v14490_v11  ;;  %v17015_v11 = vld [vmem:[#allocation163_spill] sm:$0xff] }
 0x3b6   : > { %9293 = vmatmul.msk.f32.gmra.mxu1 %vm1949_vm4, %v6490_v29  ;;  %9251 = vmatmul.msk.f32.gmra.mxu0 %vm1949_vm4, %v17011_v16  ;;  %v6491_v29 = vld [vmem:[#allocation2 + $0x10] sm:$0xff]  ;;  %v5420_v16 = vsel %vm5351_vm3, %v17016_v62, %v5419_v52 }
 0x3b7   : > { %v4041_v49 = vpop.f32.mrf.mxu2  ;;  %v4217_v56 = vpop.f32.mrf.mxu3 }
 0x3b8   : > { %v4115_v9 = vadd.f32 %v4041_v49, %v17012_v55 }
 0x3ba   : > { %v14502_v19 = vadd.f32 %v4217_v56, %v4115_v9 }
 0x3bb   : > { %v14505_v28 = vpop.f32.mrf.mxu1 }
 0x3bc   : > { %17013 = vst [vmem:[#allocation140_spill] sm:$0xff] %v14502_v19  ;;  %9025 = vmatmul.msk.f32.gmra.mxu2 %vm1949_vm4, %v17005_v53  ;;  %9063 = vmatmul.msk.f32.gmra.mxu3 %vm1949_vm4, %v17015_v11  ;;  %v5421_v53 = vrot.slane %v14039_v45, 3  ;;  %v14522_v11 = vpop.f32.mrf.mxu0  ;;  %v5423_v45 = vrot.slane %v14069_v7, 3 }
 0x3bd   : > { %17014 = vst [vmem:[#allocation160_spill] sm:$0xff] %v14505_v28 }
 0x3be   : > { %9294 = vmatmul.msk.f32.gmra.mxu1 %vm1949_vm4, %v6491_v29  ;;  %9252 = vmatmul.msk.f32.gmra.mxu0 %vm1949_vm4, %v5420_v16  ;;  %v5422_v62 = vsel %vm5351_vm3, %v5419_v52, %v5421_v53  ;;  %v5424_v52 = vsel %vm5351_vm3, %v5421_v53, %v5423_v45 }
 0x3bf   : > { %v4044_v55 = vpop.f32.mrf.mxu2  ;;  %v4220_v56 = vpop.f32.mrf.mxu3 }
 0x3c0   : > { %v4116_v49 = vadd.f32 %v4044_v55, %v17017_v43  ;;  %v17021_v55 = vld [vmem:[#allocation148_spill] sm:$0xff] }
 0x3c2   : > { %v14517_v9 = vadd.f32 %v4220_v56, %v4116_v49 }
 0x3c3   : > { %v14520_v28 = vpop.f32.mrf.mxu1 }
 0x3c4   : > { %17018 = vst [vmem:[#allocation54_spill] sm:$0xff] %v14517_v9  ;;  %9026 = vmatmul.msk.f32.gmra.mxu2 %vm1949_vm4, %v17010_v18  ;;  %9064 = vmatmul.msk.f32.gmra.mxu3 %vm1949_vm4, %v17020_v34  ;;  %v17025_v18 = vld [vmem:[#allocation48_spill] sm:$0xff]  ;;  %v14540_v34 = vpop.f32.mrf.mxu0 }
 0x3c5   : > { %17019 = vst [vmem:[#allocation142_spill] sm:$0xff] %v14520_v28  ;;  %v17024_v28 = vld [vmem:[#allocation6_spill] sm:$0xff] }
 0x3c6   : > { %9253 = vmatmul.msk.f32.gmra.mxu0 %vm1949_vm4, %v5422_v62 }
 0x3c7   : > { %v4047_v29 = vpop.f32.mrf.mxu2  ;;  %v4223_v16 = vpop.f32.mrf.mxu3 }
 0x3c8   : > { %v4117_v56 = vadd.f32 %v4047_v29, %v17021_v55  ;;  %v17026_v29 = vld [vmem:[#allocation152_spill] sm:$0xff] }
 0x3ca   : > { %v14531_v43 = vadd.f32 %v4223_v16, %v4117_v56  ;;  %v17029_v56 = vld [vmem:[#allocation47_spill] sm:$0xff] }
 0x3cb   : > { %v14534_v49 = vpop.f32.mrf.mxu1 }
 0x3cc   : > { %17022 = vst [vmem:[#allocation163_spill] sm:$0xff] %v14531_v43  ;;  %9143 = vmatmul.msk.f32.vlgmr.msra.gmra.mxu2 %vm1949_vm4, %v17024_v28  ;;  %9181 = vmatmul.msk.f32.vlgmr.msra.gmra.mxu3 %vm1949_vm4, %v17025_v18  ;;  %v17030_v28 = vld [vmem:[#allocation49_spill] sm:$0xff]  ;;  %v17031_v43 = vld [vmem:[#allocation156_spill] sm:$0xff] }
 0x3cd   : > { %17023 = vst [vmem:[#allocation146_spill] sm:$0xff] %v14534_v49 }
 0x3ce   : > { %9254 = vmatmul.msk.f32.gmra.mxu0 %vm1949_vm4, %v5424_v52  ;;  %v17034_v52 = vld [vmem:[#allocation50_spill] sm:$0xff] }
 0x3cf   : > { %v4050_v9 = vpop.f32.mrf.mxu2  ;;  %v4226_v62 = vpop.f32.mrf.mxu3 }
 0x3d0   : > { %v4118_v16 = vadd.f32 %v4050_v9, %v17026_v29  ;;  %v17035_v9 = vld [vmem:[#allocation56_spill] sm:$0xff] }
 0x3d2   : > { %v14545_v55 = vadd.f32 %v4226_v62, %v4118_v16  ;;  %v17036_v16 = vld [vmem:[#allocation161_spill] sm:$0xff] }
 0x3d3   : > { %v14547_v7 = vpop.f32.mrf.mxu1 }
 0x3d4   : > { %17027 = vst [vmem:[#allocation166_spill] sm:$0xff] %v14545_v55  ;;  %9144 = vmatmul.msk.f32.gmra.mxu2 %vm1949_vm4, %v17029_v56  ;;  %9182 = vmatmul.msk.f32.gmra.mxu3 %vm1949_vm4, %v17030_v28  ;;  %v17039_v55 = vld [vmem:[#allocation53_spill] sm:$0xff] }
 0x3d5   : > { %17028 = vst [vmem:[#allocation148_spill] sm:$0xff] %v14547_v7 }
 0x3d7   : > { %v4053_v18 = vpop.f32.mrf.mxu2  ;;  %v4229_v49 = vpop.f32.mrf.mxu3 }
 0x3d8   : > { %v4119_v53 = vadd.f32 %v4053_v18, %v17031_v43  ;;  %v17040_v43 = vld [vmem:[#allocation60_spill] sm:$0xff] }
 0x3da   : > { %v14554_v45 = vadd.f32 %v4229_v49, %v4119_v53  ;;  %v17041_v53 = vld [vmem:[#allocation164_spill] sm:$0xff] }
 0x3db   : > { %v14556_v19 = vpop.f32.mrf.mxu1 }
 0x3dc   : > { %17032 = vst [vmem:[#allocation6_spill] sm:$0xff] %v14554_v45  ;;  %9145 = vmatmul.msk.f32.gmra.mxu2 %vm1949_vm4, %v17034_v52  ;;  %9183 = vmatmul.msk.f32.gmra.mxu3 %vm1949_vm4, %v17035_v9  ;;  %v17044_v45 = vld [vmem:[#allocation57_spill] sm:$0xff] }
 0x3dd   : > { %17033 = vst [vmem:[#allocation48_spill] sm:$0xff] %v14556_v19 }
 0x3df   : > { %v4056_v62 = vpop.f32.mrf.mxu2  ;;  %v4232_v29 = vpop.f32.mrf.mxu3 }
 0x3e0   : > { %v4120_v56 = vadd.f32 %v4056_v62, %v17036_v16  ;;  %v17045_v62 = vld [vmem:[#allocation64_spill] sm:$0xff] }
 0x3e2   : > { %v14563_v7 = vadd.f32 %v4232_v29, %v4120_v56 }
 0x3e3   : > { %v14565_v28 = vpop.f32.mrf.mxu1 }
 0x3e4   : > { %17037 = vst [vmem:[#allocation152_spill] sm:$0xff] %v14563_v7  ;;  %9146 = vmatmul.msk.f32.gmra.mxu2 %vm1949_vm4, %v17039_v55  ;;  %9184 = vmatmul.msk.f32.gmra.mxu3 %vm1949_vm4, %v17040_v43  ;;  %v17046_v55 = vld [vmem:[#allocation167_spill] sm:$0xff]  ;;  %v17049_v7 = vld [vmem:[#allocation61_spill] sm:$0xff] }
 0x3e5   : > { %17038 = vst [vmem:[#allocation47_spill] sm:$0xff] %v14565_v28 }
 0x3e7   : > { %v4059_v49 = vpop.f32.mrf.mxu2  ;;  %v4235_v18 = vpop.f32.mrf.mxu3 }
 0x3e8   : > { %v4121_v52 = vadd.f32 %v4059_v49, %v17041_v53  ;;  %v17050_v49 = vld [vmem:[#allocation67_spill] sm:$0xff] }
 0x3ea   : > { %v14572_v19 = vadd.f32 %v4235_v18, %v4121_v52 }
 0x3eb   : > { %v14574_v9 = vpop.f32.mrf.mxu1 }
 0x3ec   : > { %17042 = vst [vmem:[#allocation49_spill] sm:$0xff] %v14572_v19  ;;  %9147 = vmatmul.msk.f32.gmra.mxu2 %vm1949_vm4, %v17044_v45  ;;  %9185 = vmatmul.msk.f32.gmra.mxu3 %vm1949_vm4, %v17045_v62  ;;  %v17051_v45 = vld [vmem:[#allocation58_spill] sm:$0xff] }
 0x3ed   : > { %17043 = vst [vmem:[#allocation156_spill] sm:$0xff] %v14574_v9  ;;  %v17053_v19 = vld [vmem:[#allocation10_spill] sm:$0xff] }
 0x3ef   : > { %v4062_v29 = vpop.f32.mrf.mxu2  ;;  %v4238_v16 = vpop.f32.mrf.mxu3 }
 0x3f0   : > { %v4122_v56 = vadd.f32 %v4062_v29, %v17046_v55  ;;  %v17054_v29 = vld [vmem:[#allocation72_spill] sm:$0xff] }
 0x3f2   : > { %v14581_v28 = vadd.f32 %v4238_v16, %v4122_v56 }
 0x3f3   : > { %v14583_v43 = vpop.f32.mrf.mxu1 }
 0x3f4   : > { %17047 = vst [vmem:[#allocation50_spill] sm:$0xff] %v14581_v28  ;;  %9148 = vmatmul.msk.f32.gmra.mxu2 %vm1949_vm4, %v17049_v7  ;;  %9186 = vmatmul.msk.f32.gmra.mxu3 %vm1949_vm4, %v17050_v49  ;;  %v17055_v7 = vld [vmem:[#allocation169_spill] sm:$0xff] }
 0x3f5   : > { %17048 = vst [vmem:[#allocation56_spill] sm:$0xff] %v14583_v43  ;;  %v17057_v28 = vld [vmem:[#allocation69_spill] sm:$0xff] }
 0x3f7   : > { %v4065_v18 = vpop.f32.mrf.mxu2  ;;  %v4241_v53 = vpop.f32.mrf.mxu3 }
 0x3f8   : > { %v4123_v52 = vadd.f32 %v4065_v18, %v17051_v45  ;;  %v17058_v18 = vld [vmem:[#allocation77_spill] sm:$0xff] }
 0x3fa   : > { %v14590_v9 = vadd.f32 %v4241_v53, %v4123_v52 }
 0x3fb   : > { %v14592_v62 = vpop.f32.mrf.mxu1 }
 0x3fc   : > { %17052 = vst [vmem:[#allocation161_spill] sm:$0xff] %v14592_v62  ;;  %9149 = vmatmul.msk.f32.gmra.mxu2 %vm1949_vm4, %v17053_v19  ;;  %9187 = vmatmul.msk.f32.gmra.mxu3 %vm1949_vm4, %v17054_v29  ;;  %v17060_v62 = vld [vmem:[#allocation74_spill] sm:$0xff] }
 0x3ff   : > { %v4068_v16 = vpop.f32.mrf.mxu2  ;;  %v4244_v55 = vpop.f32.mrf.mxu3 }
 0x400   : > { %v4124_v56 = vadd.f32 %v4068_v16, %v17055_v7  ;;  %v17061_v16 = vld [vmem:[#allocation82_spill] sm:$0xff] }
 0x402   : > { %v14599_v43 = vadd.f32 %v4244_v55, %v4124_v56 }
 0x403   : > { %v14601_v49 = vpop.f32.mrf.mxu1 }
 0x404   : > { %17056 = vst [vmem:[#allocation53_spill] sm:$0xff] %v14601_v49  ;;  %9150 = vmatmul.msk.f32.gmra.mxu2 %vm1949_vm4, %v17057_v28  ;;  %9188 = vmatmul.msk.f32.gmra.mxu3 %vm1949_vm4, %v17058_v18  ;;  %v17063_v49 = vld [vmem:[#allocation78_spill] sm:$0xff] }
 0x407   : > { %v4071_v53 = vpop.f32.mrf.mxu2  ;;  %v4247_v45 = vpop.f32.mrf.mxu3 }
 0x408   : > { %v4125_v19 = vadd.f32 %v4071_v53, %v14014_v41  ;;  %v17064_v41 = vld [vmem:[#allocation86_spill] sm:$0xff] }
 0x40a   : > { %v14608_v52 = vadd.f32 %v4247_v45, %v4125_v19 }
 0x40b   : > { %v14610_v29 = vpop.f32.mrf.mxu1 }
 0x40c   : > { %17059 = vst [vmem:[#allocation60_spill] sm:$0xff] %v14610_v29  ;;  %9151 = vmatmul.msk.f32.gmra.mxu2 %vm1949_vm4, %v17060_v62  ;;  %9189 = vmatmul.msk.f32.gmra.mxu3 %vm1949_vm4, %v17061_v16  ;;  %v7208_v62 = vld [vmem:[%s16292_s12] sm:$0xf] }
 0x40d   : > { %9419 = vmatpush.msk.msrb.mxu0 %vm2165_vm1, %v7208_v62 }
 0x40f   : > { %v4074_v55 = vpop.f32.mrf.mxu2  ;;  %v4250_v7 = vpop.f32.mrf.mxu3 }
 0x410   : > { %v4126_v28 = vadd.f32 %v4074_v55, %v14043_v38 }
 0x412   : > { %v14617_v56 = vadd.f32 %v4250_v7, %v4126_v28 }
 0x413   : > { %v14619_v18 = vpop.f32.mrf.mxu1 }
 0x414   : > { %17062 = vst [vmem:[#allocation164_spill] sm:$0xff] %v14619_v18  ;;  %9152 = vmatmul.msk.f32.gmra.mxu2 %vm1949_vm4, %v17063_v49  ;;  %9190 = vmatmul.msk.f32.gmra.mxu3 %vm1949_vm4, %v17064_v41  ;;  %v17067_v49 = vld [vmem:[#allocation89_spill] sm:$0xff] }
 0x417   : > { %v4077_v53 = vpop.f32.mrf.mxu2  ;;  %v4253_v45 = vpop.f32.mrf.mxu3 }
 0x418   : > { %v4127_v38 = vadd.f32 %v4077_v53, %v14071_v37  ;;  %v17070_v37 = vld [vmem:[#allocation93_spill] sm:$0xff] }
 0x41a   : > { %v14630_v19 = vadd.f32 %v4253_v45, %v4127_v38  ;;  %v9524_v38 = vld [vmem:[%s16289_s9] ss:$0 sm:$0xff] }
 0x41b   : > { %v14632_v16 = vpop.f32.mrf.mxu1 }
 0x41c   : > { %17065 = vst [vmem:[#allocation57_spill] sm:$0xff] %v14630_v19  ;;  %9153 = vmatmul.msk.f32.gmra.mxu2 %vm1949_vm4, %v16908_v23  ;;  %9191 = vmatmul.msk.f32.gmra.mxu3 %vm1949_vm4, %v17067_v49 }
 0x41d   : > { %17066 = vst [vmem:[#allocation64_spill] sm:$0xff] %v14632_v16  ;;  %v17074_v16 = vld [vmem:[#allocation95_spill] sm:$0xff] }
 0x41f   : > { %v4080_v55 = vpop.f32.mrf.mxu2  ;;  %v4256_v7 = vpop.f32.mrf.mxu3 }
 0x420   : > { %v4128_v28 = vadd.f32 %v4080_v55, %v14094_v20  ;;  %v14653_v55 = vpop.f32.mrf.mxu0 }
 0x422   : > { %v14639_v41 = vadd.f32 %v4256_v7, %v4128_v28 }
 0x423   : > { %v14641_v62 = vpop.f32.mrf.mxu1 }
 0x424   : > { %17068 = vst [vmem:[#allocation167_spill] sm:$0xff] %v14639_v41  ;;  %9154 = vmatmul.msk.f32.gmra.mxu2 %vm1949_vm4, %v12861_v27  ;;  %9192 = vmatmul.msk.f32.gmra.mxu3 %vm1949_vm4, %v17070_v37  ;;  %v17072_v27 = vld [vmem:[#allocation98_spill] sm:$0xff]  ;;  %v17079_v41 = vld [vmem:[#allocation81_spill] sm:$0xff] }
 0x425   : > { %17069 = vst [vmem:[#allocation61_spill] sm:$0xff] %v14641_v62 }
 0x427   : > { %v4083_v53 = vpop.f32.mrf.mxu2  ;;  %v4259_v45 = vpop.f32.mrf.mxu3 }
 0x428   : > { %v4129_v23 = vadd.f32 %v4083_v53, %v14109_v58 }
 0x42a   : > { %v14651_v49 = vadd.f32 %v4259_v45, %v4129_v23 }
 0x42b   : > { %v6682_v20 = vpop.f32.mrf.mxu1 }
 0x42c   : > { %17071 = vst [vmem:[#allocation67_spill] sm:$0xff] %v14651_v49  ;;  %9155 = vmatmul.msk.f32.gmra.mxu2 %vm1949_vm4, %v12927_v0  ;;  %9193 = vmatmul.msk.f32.gmra.mxu3 %vm1949_vm4, %v17072_v27  ;;  %v6683_v7 = vadd.f32 %v9524_v38, %v6682_v20  ;;  %v17075_v0 = vld [vmem:[#allocation104_spill] sm:$0xff]  ;;  %v14667_v20 = vpop.f32.mrf.mxu0 }
 0x42e   : > { %vm6956_vm14 = vcmp.gt.f32.partialorder %v6683_v7, 0.0  ;;  %v6998_v28 = vmul.f32 0.1, %v6683_v7 }
 0x42f   : > { %v4086_v37 = vpop.f32.mrf.mxu2  ;;  %v4262_v58 = vpop.f32.mrf.mxu3 }
 0x430   : > { %v7040_v53 = vsel %vm6956_vm14, %v6683_v7, %v6998_v28  ;;  %v4130_v62 = vadd.f32 %v4086_v37, %v14124_v26  ;;  %v17076_v28 = vld [vmem:[#allocation76_spill] sm:$0xff] }
 0x431   : > { %9420 = vmatmul.msk.f32.vlgmr.msrb.gmra.mxu0 %vm1949_vm4, %v7040_v53  ;;  %v17077_v53 = vld [vmem:[#allocation101_spill] sm:$0xff] }
 0x432   : > { %v14661_v45 = vadd.f32 %v4262_v58, %v4130_v62 }
 0x433   : > { %v6685_v23 = vpop.f32.mrf.mxu1 }
 0x434   : > { %17073 = vst [vmem:[#allocation58_spill] sm:$0xff] %v14661_v45  ;;  %9156 = vmatmul.msk.f32.gmra.mxu2 %vm1949_vm4, %v17074_v16  ;;  %9194 = vmatmul.msk.f32.gmra.mxu3 %vm1949_vm4, %v17075_v0  ;;  %v6686_v27 = vadd.f32 %v9524_v38, %v6685_v23  ;;  %v17078_v16 = vld [vmem:[#allocation110_spill] sm:$0xff] }
 0x436   : > { %v6999_v18 = vmul.f32 0.1, %v6686_v27  ;;  %vm6957_vm5 = vcmp.gt.f32.partialorder %v6686_v27, 0.0 }
 0x437   : > { %v4089_v29 = vpop.f32.mrf.mxu2  ;;  %v4265_v7 = vpop.f32.mrf.mxu3 }
 0x438   : > { %v4131_v26 = vadd.f32 %v4089_v29, %v17076_v28  ;;  %v7041_v37 = vsel %vm6957_vm5, %v6686_v27, %v6999_v18  ;;  %v14678_v18 = vpop.f32.mrf.mxu0  ;;  %v17081_v28 = vld [vmem:[#allocation121_spill] sm:$0xff] }
 0x439   : > { %9421 = vmatmul.msk.f32.gmra.mxu0 %vm1949_vm4, %v7041_v37  ;;  %v17082_v37 = vld [vmem:[#allocation88_spill] sm:$0xff] }
 0x43a   : > { %v14671_v62 = vadd.f32 %v4265_v7, %v4131_v26  ;;  %v17080_v7 = vld [vmem:[#allocation106_spill] sm:$0xff] }
 0x43b   : > { %v6688_v58 = vpop.f32.mrf.mxu1 }
 0x43c   : > { %9157 = vmatmul.msk.f32.gmra.mxu2 %vm1949_vm4, %v17077_v53  ;;  %9195 = vmatmul.msk.f32.gmra.mxu3 %vm1949_vm4, %v17078_v16  ;;  %v6689_v23 = vadd.f32 %v9524_v38, %v6688_v58 }
 0x43e   : > { %v7000_v0 = vmul.f32 0.1, %v6689_v23  ;;  %vm6958_vm3 = vcmp.gt.f32.partialorder %v6689_v23, 0.0 }
 0x43f   : > { %v4092_v45 = vpop.f32.mrf.mxu2  ;;  %v4268_v49 = vpop.f32.mrf.mxu3 }
 0x440   : > { %v4132_v19 = vadd.f32 %v4092_v45, %v17079_v41  ;;  %v7042_v29 = vsel %vm6958_vm3, %v6689_v23, %v7000_v0  ;;  %v17083_v41 = vld [vmem:[#allocation112_spill] sm:$0xff]  ;;  %v17084_v45 = vld [vmem:[#allocation129_spill] sm:$0xff] }
 0x441   : > { %9422 = vmatmul.msk.f32.gmra.mxu0 %vm1949_vm4, %v7042_v29  ;;  %v17085_v29 = vld [vmem:[#allocation117_spill] sm:$0xff] }
 0x442   : > { %v14681_v27 = vadd.f32 %v4268_v49, %v4132_v19 }
 0x444   : > { %9158 = vmatmul.msk.f32.gmra.mxu2 %vm1949_vm4, %v17080_v7  ;;  %9196 = vmatmul.msk.f32.gmra.mxu3 %vm1949_vm4, %v17081_v28  ;;  %v17086_v7 = vld [vmem:[#allocation132_spill] sm:$0xff] }
 0x447   : > { %v4095_v38 = vpop.f32.mrf.mxu2  ;;  %v4271_v26 = vpop.f32.mrf.mxu3 }
 0x448   : > { %v4133_v58 = vadd.f32 %v4095_v38, %v17082_v37  ;;  %v7209_v38 = vld [vmem:[%s16293_s13] sm:$0xf] }
 0x449   : > { %9376 = vmatpush.msk.msrb.mxu3 %vm2165_vm1, %v7209_v38 }
 0x44a   : > { %v14688_v53 = vadd.f32 %v4271_v26, %v4133_v58  ;;  %v17087_v58 = vld [vmem:[#allocation123_spill] sm:$0xff] }
 0x44c   : > { %9159 = vmatmul.msk.f32.gmra.mxu2 %vm1949_vm4, %v17083_v41  ;;  %9197 = vmatmul.msk.f32.gmra.mxu3 %vm1949_vm4, %v17084_v45  ;;  %v17088_v41 = vld [vmem:[#allocation137_spill] sm:$0xff]  ;;  %v17089_v45 = vld [vmem:[#allocation80_spill] sm:$0xff] }
 0x44f   : > { %v4893_v19 = vpop.f32.mrf.mxu2  ;;  %v5205_v49 = vpop.f32.mrf.mxu3 }
 0x450   : > { %v5001_v16 = vadd.f32 %v4893_v19, %v14279_v2  ;;  %v4514_v19 = vadd.f32 %v17089_v45, %v14229_v33 }
 0x452   : > { %v5313_v23 = vadd.f32 %v5205_v49, %v5001_v16 }
 0x454   : > { %v14696_v0 = vadd.f32 %v14323_v15, %v5313_v23  ;;  %9160 = vmatmul.msk.f32.gmra.mxu2 %vm1949_vm4, %v17085_v29  ;;  %9198 = vmatmul.msk.f32.gmra.mxu3 %vm1949_vm4, %v17086_v7  ;;  %v17090_v7 = vld [vmem:[#allocation84_spill] sm:$0xff] }
 0x456   : > { %v9255_v28 = vmul.f32 -1.442695, %v14696_v0 }
 0x457   : > { %v4896_v26 = vpop.f32.mrf.mxu2  ;;  %v5208_v15 = vpop.f32.mrf.mxu3 }
 0x458   : > { %9863 = vpow2.f32 %v9255_v28  ;;  %v5002_v2 = vadd.f32 %v4896_v26, %v14308_v40  ;;  %v5079_v40 = vrot.slane %v16947_v50, 2  ;;  %v4827_v28 = vadd.f32 %v17090_v7, %v4514_v19  ;;  %v17093_v50 = vld [vmem:[#allocation87_spill] sm:$0xff] }
 0x459   : > { %v5081_v19 = vrot.slane %v16954_v42, 2 }
 0x45a   : > { %v5314_v37 = vadd.f32 %v5208_v15, %v5002_v2  ;;  %v17091_v15 = vrot.slane %v13008_v5, 2 }
 0x45c   : > { %9161 = vmatmul.msk.f32.gmra.mxu2 %vm1949_vm4, %v17087_v58  ;;  %9199 = vmatmul.msk.f32.gmra.mxu3 %vm1949_vm4, %v17088_v41  ;;  %v14715_v49 = vadd.f32 %v14341_v21, %v5314_v37  ;;  %v5080_v33 = vsel %vm5039_vm6, %v17091_v15, %v5079_v40  ;;  %v17092_v58 = vld [vmem:[#allocation97_spill] sm:$0xff]  ;;  %v4515_v41 = vadd.f32 %v17093_v50, %v14248_v24 }
 0x45d   : > { %v17094_v15 = vld [vmem:[#allocation85_spill] sm:$0xff] }
 0x45e   : > { %v9864_v16 = vpop.eup %9863  ;;  %v9256_v29 = vmul.f32 -1.442695, %v14715_v49 }
 0x45f   : > { %v5769_v23 = vadd.f32 1.0, %v9864_v16  ;;  %v4899_v38 = vpop.f32.mrf.mxu2  ;;  %v5211_v2 = vpop.f32.mrf.mxu3 }
 0x460   : > { %v5003_v26 = vadd.f32 %v4899_v38, %v4827_v28 }
 0x461   : > { %9865 = vrcp.f32 %v5769_v23  ;;  %v5816_v38 = vand.u32 2147483648, %v5769_v23  ;;  %v5814_v24 = vand.u32 2147483647, %v5769_v23  ;;  %vm5810_vm15 = vweird.f32 %v5769_v23 }
 0x462   : > { %9867 = vpow2.f32 %v9256_v29  ;;  %v5315_v21 = vadd.f32 %v5211_v2, %v5003_v26  ;;  %v5082_v26 = vsel %vm5039_vm6, %v5079_v40, %v5081_v19 }
 0x463   : > { %v5817_v50 = vor.u32 1.1754944e-38, %v5816_v38  ;;  %vm5815_vm8 = vcmp.eq.f32.partialorder %v5814_v24, 8.507059e+37 }
 0x464   : > { %9162 = vmatmul.msk.f32.gmra.mxu2 %vm1949_vm4, %v17092_v58  ;;  %9200 = vmatmul.msk.f32.gmra.mxu3 %vm1949_vm4, %v5080_v33  ;;  %v14729_v45 = vadd.f32 %v14362_v57, %v5315_v21  ;;  %v4828_v33 = vadd.f32 %v17094_v15, %v4515_v41  ;;  %v5083_v41 = vrot.slane %v16958_v51, 2 }
 0x466   : > { %v9257_v7 = vmul.f32 -1.442695, %v14729_v45  ;;  %v5084_v51 = vsel %vm5039_vm6, %v5081_v19, %v5083_v41 }
 0x467   : > { %v9866_v37 = vpop.eup %9865  ;;  %v4902_v57 = vpop.f32.mrf.mxu2 }
 0x468   : > { %v9868_v16 = vpop.eup %9867  ;;  %v5806_v29 = vmul.f32 %v9866_v37, %v5769_v23  ;;  %vm5811_vm1 = vweird.f32 %v9866_v37  ;;  %v5004_v42 = vadd.f32 %v4902_v57, %v4828_v33  ;;  %v5214_v58 = vpop.f32.mrf.mxu3 }
 0x469   : > { %v5770_v5 = vadd.f32 1.0, %v9868_v16  ;;  %vm5812_vm0 = vmor %vm5810_vm15, %vm5811_vm1 }
 0x46a   : > { %v5807_v28 = vsub.f32 1.0, %v5806_v29  ;;  %v5316_v16 = vadd.f32 %v5214_v58, %v5004_v42  ;;  %v17096_v42 = vld [vmem:[#allocation108_spill] sm:$0xff] }
 0x46b   : > { %9869 = vrcp.f32 %v5770_v5  ;;  %vm5825_vm11 = vweird.f32 %v5770_v5 }
 0x46c   : > { %v5808_v2 = vmul.f32 %v9866_v37, %v5807_v28  ;;  %9871 = vpow2.f32 %v9257_v7  ;;  %9163 = vmatmul.msk.f32.gmra.mxu2 %vm1949_vm4, %v14219_v39  ;;  %9201 = vmatmul.msk.f32.gmra.mxu3 %vm1949_vm4, %v5082_v26  ;;  %v17095_v7 = vld [vmem:[#allocation90_spill] sm:$0xff]  ;;  %v14742_v39 = vadd.f32 %v14381_v3, %v5316_v16  ;;  %v5829_v3 = vand.u32 2147483647, %v5770_v5 }
 0x46d   : > { %v4516_v28 = vadd.f32 %v17095_v7, %v14273_v22  ;;  %v5831_v22 = vand.u32 2147483648, %v5770_v5 }
 0x46e   : > { %v5809_v21 = vadd.f32 %v9866_v37, %v5808_v2  ;;  %v9258_v38 = vmul.f32 -1.442695, %v14742_v39  ;;  %vm5830_vm2 = vcmp.eq.f32.partialorder %v5829_v3, 8.507059e+37 }
 0x46f   : > { %v4905_v19 = vpop.f32.mrf.mxu2 }
 0x470   : > { %v5813_v40 = vsel %vm5812_vm0, %v9866_v37, %v5809_v21  ;;  %v10181_v37 = vld [vmem:[#allocation2 + $0x18] sm:$0xff]  ;;  %v17098_v21 = vld [vmem:[#allocation9_spill] sm:$0xff]  ;;  %v5217_v7 = vpop.f32.mrf.mxu3 }
 0x471   : > { %v9870_v29 = vpop.eup %9869  ;;  %v5818_v15 = vsel %vm5815_vm8, %v5817_v50, %v5813_v40 }
 0x472   : > { %v9872_v26 = vpop.eup %9871  ;;  %v6345_v33 = vmul.f32 %v5818_v15, %v14696_v0  ;;  %v5821_v2 = vmul.f32 %v9870_v29, %v5770_v5  ;;  %v17097_v0 = vld [vmem:[#allocation96_spill] sm:$0xff]  ;;  %vm5826_vm10 = vweird.f32 %v9870_v29  ;;  %v5085_v15 = vrot.slane %v13307_v35, 2 }
 0x473   : > { %v14745_v23 = vadd.f32 1.0, %v9872_v26  ;;  %v4829_v58 = vadd.f32 %v17097_v0, %v4516_v28  ;;  %vm5827_vm13 = vmor %vm5825_vm11, %vm5826_vm10 }
 0x474   : > { %v6381_v24 = vadd.f32 %v10181_v37, %v6345_v33  ;;  %v5822_v57 = vsub.f32 1.0, %v5821_v2  ;;  %9164 = vmatmul.msk.f32.gmra.mxu2 %vm1949_vm4, %v17096_v42  ;;  %9202 = vmatmul.msk.f32.gmra.mxu3 %vm1949_vm4, %v5084_v51  ;;  %v5832_v33 = vor.u32 1.1754944e-38, %v5831_v22  ;;  %v17099_v37 = vld [vmem:[#allocation94_spill] sm:$0xff]  ;;  %v5086_v42 = vsel %vm5039_vm6, %v5083_v41, %v5085_v15 }
 0x475   : > { %9873 = vrcp.f32 %v14745_v23  ;;  %v5005_v40 = vadd.f32 %v4905_v19, %v4829_v58  ;;  %v17100_v58 = vld [vmem:[#allocation114_spill] sm:$0xff]  ;;  %v5844_v41 = vand.u32 2147483647, %v14745_v23  ;;  %v17102_v19 = vld [vmem:[#allocation3_spill] sm:$0xff]  ;;  %vm5840_vm12 = vweird.f32 %v14745_v23 }
 0x476   : > { %v6417_v50 = vmul.f32 %v6381_v24, %v17098_v21  ;;  %v5823_v16 = vmul.f32 %v9870_v29, %v5822_v57  ;;  %9875 = vpow2.f32 %v9258_v38  ;;  %v4517_v24 = vadd.f32 %v17099_v37, %v14299_v44  ;;  %v10182_v44 = vld [vmem:[#allocation2 + $0x20] sm:$0xff] }
 0x477   : > { %v5317_v2 = vadd.f32 %v5217_v7, %v5005_v40  ;;  %vm5845_vm14 = vcmp.eq.f32.partialorder %v5844_v41, 8.507059e+37 }
 0x478   : > { %6453 = vst.msk [vmem:[#allocation2 + $0x18] sm:$0xff] %vm1949_vm4, %v6417_v50  ;;  %v5824_v26 = vadd.f32 %v9870_v29, %v5823_v16  ;;  %v5846_v50 = vand.u32 2147483648, %v14745_v23 }
 0x479   : > { %v14760_v38 = vadd.f32 %v14401_v36, %v5317_v2  ;;  %v5087_v36 = vrot.slane %v13375_v14, 2  ;;  %v5220_v2 = vpop.f32.mrf.mxu3 }
 0x47a   : > { %v5828_v51 = vsel %vm5827_vm13, %v9870_v29, %v5824_v26  ;;  %v4908_v26 = vpop.f32.mrf.mxu2  ;;  %v5847_v14 = vor.u32 1.1754944e-38, %v5846_v50 }
 0x47b   : > { %v9874_v28 = vpop.eup %9873  ;;  %v5833_v57 = vsel %vm5830_vm2, %v5832_v33, %v5828_v51  ;;  %v9259_v3 = vmul.f32 -1.442695, %v14760_v38 }
 0x47c   : > { %v9876_v35 = vpop.eup %9875  ;;  %v6346_v0 = vmul.f32 %v5833_v57, %v14715_v49  ;;  %v5836_v5 = vmul.f32 %v9874_v28, %v14745_v23  ;;  %9165 = vmatmul.msk.f32.gmra.mxu2 %vm1949_vm4, %v17100_v58  ;;  %9203 = vmatmul.msk.f32.gmra.mxu3 %vm1949_vm4, %v5086_v42  ;;  %v17101_v49 = vld [vmem:[#allocation102_spill] sm:$0xff]  ;;  %vm5841_vm9 = vweird.f32 %v9874_v28  ;;  %v5088_v57 = vsel %vm5039_vm6, %v5085_v15, %v5087_v36 }
 0x47d   : > { %v5772_v29 = vadd.f32 1.0, %v9876_v35  ;;  %v4830_v16 = vadd.f32 %v17101_v49, %v4517_v24  ;;  %vm5842_vm7 = vmor %vm5840_vm12, %vm5841_vm9  ;;  %v17103_v35 = vld [vmem:[#allocation100_spill] sm:$0xff]  ;;  %v17104_v49 = vld [vmem:[#allocation103_spill] sm:$0xff] }
 0x47e   : > { %v6382_v22 = vadd.f32 %v10182_v44, %v6346_v0  ;;  %v5837_v21 = vsub.f32 1.0, %v5836_v5  ;;  %v4518_v0 = vadd.f32 %v17103_v35, %v14326_v6  ;;  %v17105_v6 = vld [vmem:[#allocation4_spill] sm:$0xff] }
 0x47f   : > { %9877 = vrcp.f32 %v5772_v29  ;;  %v5006_v33 = vadd.f32 %v4908_v26, %v4830_v16  ;;  %v5859_v41 = vand.u32 2147483647, %v5772_v29  ;;  %v5861_v50 = vand.u32 2147483648, %v5772_v29 }
 0x480   : > { %v6418_v40 = vmul.f32 %v6382_v22, %v17102_v19  ;;  %v5838_v7 = vmul.f32 %v9874_v28, %v5837_v21  ;;  %9879 = vpow2.f32 %v9259_v3  ;;  %v10183_v22 = vld [vmem:[#allocation2 + $0x28] sm:$0xff]  ;;  %v4831_v16 = vadd.f32 %v17104_v49, %v4518_v0  ;;  %v17110_v49 = vld [vmem:[#allocation143_spill] sm:$0xff] }
 0x481   : > { %v5318_v37 = vadd.f32 %v5220_v2, %v5006_v33  ;;  %v17106_v26 = vrot.slane %v13417_v17, 2  ;;  %vm5855_vm3 = vweird.f32 %v5772_v29  ;;  %vm5860_vm15 = vcmp.eq.f32.partialorder %v5859_v41, 8.507059e+37 }
 0x482   : > { %6454 = vst.msk [vmem:[#allocation2 + $0x20] sm:$0xff] %vm1949_vm4, %v6418_v40  ;;  %v5839_v51 = vadd.f32 %v9874_v28, %v5838_v7 }
 0x483   : > { %v14783_v58 = vadd.f32 %v14416_v60, %v5318_v37  ;;  %v4911_v60 = vpop.f32.mrf.mxu2  ;;  %v5090_v33 = vsel %vm5039_vm6, %v5087_v36, %v17106_v26 }
 0x484   : > { %v5843_v42 = vsel %vm5842_vm7, %v9874_v28, %v5839_v51  ;;  %9166 = vmatmul.msk.f32.gmra.mxu2 %vm1949_vm4, %v14288_v1  ;;  %9204 = vmatmul.msk.f32.gmra.mxu3 %vm1949_vm4, %v5088_v57  ;;  %v5007_v7 = vadd.f32 %v4911_v60, %v4831_v16  ;;  %v5862_v51 = vor.u32 1.1754944e-38, %v5861_v50  ;;  %v17111_v16 = vld [vmem:[#allocation154_spill] sm:$0xff] }
 0x485   : > { %v9878_v24 = vpop.eup %9877  ;;  %v5848_v5 = vsel %vm5845_vm14, %v5847_v14, %v5843_v42  ;;  %v9260_v28 = vmul.f32 -1.442695, %v14783_v58  ;;  %v17107_v42 = vld [vmem:[#allocation105_spill] sm:$0xff] }
 0x486   : > { %v9880_v23 = vpop.eup %9879  ;;  %v6347_v3 = vmul.f32 %v5848_v5, %v14729_v45  ;;  %v5851_v44 = vmul.f32 %v9878_v24, %v5772_v29  ;;  %vm5856_vm5 = vweird.f32 %v9878_v24  ;;  %v5223_v45 = vpop.f32.mrf.mxu3  ;;  %v4519_v17 = vadd.f32 %v17107_v42, %v14343_v63  ;;  %v17108_v63 = vld [vmem:[#allocation113_spill] sm:$0xff] }
 0x487   : > { %v5773_v15 = vadd.f32 1.0, %v9880_v23  ;;  %vm5857_vm1 = vmor %vm5855_vm3, %vm5856_vm5  ;;  %v5319_v14 = vadd.f32 %v5223_v45, %v5007_v7 }
 0x488   : > { %v6383_v21 = vadd.f32 %v10183_v22, %v6347_v3  ;;  %v5852_v1 = vsub.f32 1.0, %v5851_v44  ;;  %v10184_v3 = vld [vmem:[#allocation2 + $0x30] sm:$0xff] }
 0x489   : > { %9881 = vrcp.f32 %v5773_v15  ;;  %v14799_v36 = vadd.f32 %v14438_v59, %v5319_v14  ;;  %v5876_v22 = vand.u32 2147483648, %v5773_v15  ;;  %vm5870_vm0 = vweird.f32 %v5773_v15 }
 0x48a   : > { %v6419_v19 = vmul.f32 %v6383_v21, %v17105_v6  ;;  %v5853_v40 = vmul.f32 %v9878_v24, %v5852_v1  ;;  %9883 = vpow2.f32 %v9260_v28  ;;  %v5874_v28 = vand.u32 2147483647, %v5773_v15  ;;  %v17109_v1 = vld [vmem:[#allocation13_spill] sm:$0xff] }
 0x48b   : > { %v9261_v23 = vmul.f32 -1.442695, %v14799_v36  ;;  %v4832_v21 = vadd.f32 %v17108_v63, %v4519_v17  ;;  %v4914_v50 = vpop.f32.mrf.mxu2  ;;  %v5877_v60 = vor.u32 1.1754944e-38, %v5876_v22  ;;  %v6493_v22 = vld [vmem:[#allocation2 + $0x20] sm:$0xff] }
 0x48c   : > { %6455 = vst.msk [vmem:[#allocation2 + $0x28] sm:$0xff] %vm1949_vm4, %v6419_v19  ;;  %v5854_v2 = vadd.f32 %v9878_v24, %v5853_v40  ;;  %9167 = vmatmul.msk.f32.gmra.mxu2 %vm1949_vm4, %v14316_v10  ;;  %9205 = vmatmul.msk.f32.gmra.mxu3 %vm1949_vm4, %v5090_v33  ;;  %vm5875_vm10 = vcmp.eq.f32.partialorder %v5874_v28, 8.507059e+37  ;;  %v17112_v33 = vld [vmem:[#allocation111_spill] sm:$0xff] }
 0x48d   : > { %v5008_v6 = vadd.f32 %v4914_v50, %v4832_v21 }
 0x48e   : > { %v5858_v37 = vsel %vm5857_vm1, %v9878_v24, %v5854_v2  ;;  %v5226_v19 = vpop.f32.mrf.mxu3  ;;  %v4520_v2 = vadd.f32 %v17112_v33, %v14357_v31  ;;  %v17114_v31 = vld [vmem:[#allocation155_spill] sm:$0xff]  ;;  %v17118_v33 = vld [vmem:[#allocation149_spill] sm:$0xff] }
 0x48f   : > { %v9882_v57 = vpop.eup %9881  ;;  %v5863_v35 = vsel %vm5860_vm15, %v5862_v51, %v5858_v37  ;;  %v5320_v7 = vadd.f32 %v5226_v19, %v5008_v6 }
 0x490   : > { %v9884_v0 = vpop.eup %9883  ;;  %v6348_v29 = vmul.f32 %v5863_v35, %v14742_v39  ;;  %v5866_v5 = vmul.f32 %v9882_v57, %v5773_v15  ;;  %vm5871_vm6 = vweird.f32 %v9882_v57  ;;  %v6492_v39 = vld [vmem:[#allocation2 + $0x18] sm:$0xff] }
 0x491   : > { %v14802_v10 = vadd.f32 1.0, %v9884_v0  ;;  %9295 = vmatmul.msk.f32.gmra.mxu1 %vm1949_vm4, %v6492_v39  ;;  %vm5872_vm8 = vmor %vm5870_vm0, %vm5871_vm6  ;;  %v14817_v14 = vadd.f32 %v14464_v13, %v5320_v7  ;;  %v10185_v0 = vld [vmem:[#allocation2 + $0x38] sm:$0xff] }
 0x492   : > { %v6384_v44 = vadd.f32 %v10184_v3, %v6348_v29  ;;  %v5867_v24 = vsub.f32 1.0, %v5866_v5  ;;  %v17113_v5 = vld [vmem:[#allocation147_spill] sm:$0xff] }
 0x493   : > { %9885 = vrcp.f32 %v14802_v10  ;;  %v9262_v15 = vmul.f32 -1.442695, %v14817_v14  ;;  %v5889_v13 = vand.u32 2147483647, %v14802_v10  ;;  %v4917_v63 = vpop.f32.mrf.mxu2  ;;  %vm5885_vm13 = vweird.f32 %v14802_v10 }
 0x494   : > { %v6420_v59 = vmul.f32 %v6384_v44, %v17109_v1  ;;  %v5868_v41 = vmul.f32 %v9882_v57, %v5867_v24  ;;  %9887 = vpow2.f32 %v9261_v23  ;;  %9168 = vmatmul.msk.f32.gmra.mxu2 %vm1949_vm4, %v17110_v49  ;;  %9206 = vmatmul.msk.f32.gmra.mxu3 %vm1949_vm4, %v17111_v16  ;;  %v5891_v23 = vand.u32 2147483648, %v14802_v10  ;;  %v17116_v44 = vld [vmem:[#allocation12_spill] sm:$0xff]  ;;  %v17117_v16 = vld [vmem:[#allocation119_spill] sm:$0xff] }
 0x495   : > { %vm5890_vm9 = vcmp.eq.f32.partialorder %v5889_v13, 8.507059e+37  ;;  %v4521_v6 = vadd.f32 %v17117_v16, %v14374_v8  ;;  %v10186_v8 = vld [vmem:[#allocation2 + $0x40] sm:$0xff]  ;;  %v10187_v16 = vld [vmem:[#allocation2 + $0x48] sm:$0xff] }
 0x496   : > { %6456 = vst.msk [vmem:[#allocation2 + $0x30] sm:$0xff] %vm1949_vm4, %v6420_v59  ;;  %v5869_v40 = vadd.f32 %v9882_v57, %v5868_v41  ;;  %v5229_v1 = vpop.f32.mrf.mxu3  ;;  %v5892_v41 = vor.u32 1.1754944e-38, %v5891_v23 }
 0x498   : > { %v5873_v45 = vsel %vm5872_vm8, %v9882_v57, %v5869_v40 }
 0x499   : > { %v9886_v26 = vpop.eup %9885  ;;  %v5878_v51 = vsel %vm5875_vm10, %v5877_v60, %v5873_v45  ;;  %9296 = vmatmul.msk.f32.gmra.mxu1 %vm1949_vm4, %v6493_v22 }
 0x49a   : > { %v9888_v37 = vpop.eup %9887  ;;  %v6349_v42 = vmul.f32 %v5878_v51, %v14760_v38  ;;  %v5881_v17 = vmul.f32 %v9886_v26, %v14802_v10  ;;  %v17115_v38 = vld [vmem:[#allocation115_spill] sm:$0xff]  ;;  %vm5886_vm11 = vweird.f32 %v9886_v26  ;;  %v17119_v10 = vld [vmem:[#allocation158_spill] sm:$0xff] }
 0x49b   : > { %v14821_v35 = vadd.f32 1.0, %v9888_v37  ;;  %v4833_v3 = vadd.f32 %v17115_v38, %v4520_v2  ;;  %vm5887_vm2 = vmor %vm5885_vm13, %vm5886_vm11 }
 0x49c   : > { %v6385_v57 = vadd.f32 %v10185_v0, %v6349_v42  ;;  %v5882_v29 = vsub.f32 1.0, %v5881_v17  ;;  %9169 = vmatmul.msk.f32.gmra.mxu2 %vm1949_vm4, %v17113_v5  ;;  %9207 = vmatmul.msk.f32.gmra.mxu3 %vm1949_vm4, %v17114_v31  ;;  %v4920_v5 = vpop.f32.mrf.mxu2 }
 0x49d   : > { %9889 = vrcp.f32 %v14821_v35  ;;  %v5009_v21 = vadd.f32 %v4917_v63, %v4833_v3  ;;  %v5906_v42 = vand.u32 2147483648, %v14821_v35  ;;  %vm5900_vm7 = vweird.f32 %v14821_v35  ;;  %v17124_v63 = vld [vmem:[#allocation125_spill] sm:$0xff] }
 0x49e   : > { %v6421_v24 = vmul.f32 %v6385_v57, %v17116_v44  ;;  %v5883_v28 = vmul.f32 %v9886_v26, %v5882_v29  ;;  %9891 = vpow2.f32 %v9262_v15  ;;  %v17121_v15 = vld [vmem:[#allocation5_spill] sm:$0xff]  ;;  %v6494_v29 = vld [vmem:[#allocation2 + $0x28] sm:$0xff]  ;;  %v5232_v13 = vpop.f32.mrf.mxu3 }
 0x49f   : > { %v5321_v39 = vadd.f32 %v5229_v1, %v5009_v21  ;;  %v5907_v38 = vor.u32 1.1754944e-38, %v5906_v42  ;;  %v4522_v21 = vadd.f32 %v17124_v63, %v14388_v48 }
 0x4a0   : > { %6457 = vst.msk [vmem:[#allocation2 + $0x38] sm:$0xff] %vm1949_vm4, %v6421_v24  ;;  %v5884_v59 = vadd.f32 %v9886_v26, %v5883_v28  ;;  %v17122_v24 = vld [vmem:[#allocation151_spill] sm:$0xff] }
 0x4a1   : > { %v14839_v40 = vadd.f32 %v14485_v25, %v5321_v39  ;;  %v5904_v25 = vand.u32 2147483647, %v14821_v35  ;;  %9297 = vmatmul.msk.f32.gmra.mxu1 %vm1949_vm4, %v6494_v29  ;;  %v17123_v28 = vld [vmem:[#allocation51_spill] sm:$0xff] }
 0x4a2   : > { %v5888_v50 = vsel %vm5887_vm2, %v9886_v26, %v5884_v59 }
 0x4a3   : > { %v9890_v49 = vpop.eup %9889  ;;  %v5893_v19 = vsel %vm5890_vm9, %v5892_v41, %v5888_v50  ;;  %v9263_v2 = vmul.f32 -1.442695, %v14839_v40  ;;  %vm5905_vm5 = vcmp.eq.f32.partialorder %v5904_v25, 8.507059e+37  ;;  %v17127_v25 = vld [vmem:[#allocation7_spill] sm:$0xff] }
 0x4a4   : > { %v9892_v60 = vpop.eup %9891  ;;  %v6350_v7 = vmul.f32 %v5893_v19, %v14783_v58  ;;  %v5896_v45 = vmul.f32 %v9890_v49, %v14821_v35  ;;  %9170 = vmatmul.msk.f32.gmra.mxu2 %vm1949_vm4, %v17118_v33  ;;  %9208 = vmatmul.msk.f32.gmra.mxu3 %vm1949_vm4, %v17119_v10  ;;  %v17120_v58 = vld [vmem:[#allocation120_spill] sm:$0xff]  ;;  %vm5901_vm12 = vweird.f32 %v9890_v49  ;;  %v6495_v10 = vld [vmem:[#allocation2 + $0x30] sm:$0xff] }
 0x4a5   : > { %v14847_v26 = vadd.f32 1.0, %v9892_v60  ;;  %v4834_v17 = vadd.f32 %v17120_v58, %v4521_v6  ;;  %vm5902_vm14 = vmor %vm5900_vm7, %vm5901_vm12 }
 0x4a6   : > { %v6386_v51 = vadd.f32 %v10186_v8, %v6350_v7  ;;  %v5897_v37 = vsub.f32 1.0, %v5896_v45  ;;  %v17126_v45 = vld [vmem:[#allocation16_spill] sm:$0xff] }
 0x4a7   : > { %9893 = vrcp.f32 %v14847_v26  ;;  %v5010_v31 = vadd.f32 %v4920_v5, %v4834_v17  ;;  %v5919_v60 = vand.u32 2147483647, %v14847_v26  ;;  %v5921_v48 = vand.u32 2147483648, %v14847_v26 }
 0x4a8   : > { %v6422_v0 = vmul.f32 %v6386_v51, %v17121_v15  ;;  %v5898_v57 = vmul.f32 %v9890_v49, %v5897_v37  ;;  %9895 = vpow2.f32 %v9263_v2  ;;  %v4923_v2 = vpop.f32.mrf.mxu2  ;;  %v5235_v51 = vpop.f32.mrf.mxu3  ;;  %vm5915_vm1 = vweird.f32 %v14847_v26 }
 0x4a9   : > { %v5322_v3 = vadd.f32 %v5232_v13, %v5010_v31  ;;  %9298 = vmatmul.msk.f32.gmra.mxu1 %vm1949_vm4, %v6495_v10  ;;  %v5922_v42 = vor.u32 1.1754944e-38, %v5921_v48  ;;  %vm5920_vm6 = vcmp.eq.f32.partialorder %v5919_v60, 8.507059e+37 }
 0x4aa   : > { %6458 = vst.msk [vmem:[#allocation2 + $0x40] sm:$0xff] %vm1949_vm4, %v6422_v0  ;;  %v5899_v23 = vadd.f32 %v9890_v49, %v5898_v57  ;;  %v17128_v0 = vld [vmem:[#allocation128_spill] sm:$0xff] }
 0x4ab   : > { %v14865_v59 = vadd.f32 %v14500_v46, %v5322_v3  ;;  %v17125_v46 = vld [vmem:[#allocation126_spill] sm:$0xff]  ;;  %v4523_v57 = vadd.f32 %v17128_v0, %v14404_v47 }
 0x4ac   : > { %v5903_v44 = vsel %vm5902_vm14, %v9890_v49, %v5899_v23  ;;  %9171 = vmatmul.msk.f32.gmra.mxu2 %vm1949_vm4, %v17122_v24  ;;  %9209 = vmatmul.msk.f32.gmra.mxu3 %vm1949_vm4, %v17123_v28  ;;  %v4835_v7 = vadd.f32 %v17125_v46, %v4522_v21  ;;  %v6496_v21 = vld [vmem:[#allocation2 + $0x38] sm:$0xff] }
 0x4ad   : > { %v9894_v22 = vpop.eup %9893  ;;  %v5908_v1 = vsel %vm5905_vm5, %v5907_v38, %v5903_v44  ;;  %v9264_v49 = vmul.f32 -1.442695, %v14865_v59  ;;  %v10188_v38 = vld [vmem:[#allocation2 + $0x50] sm:$0xff] }
 0x4ae   : > { %v9896_v35 = vpop.eup %9895  ;;  %v6351_v41 = vmul.f32 %v5908_v1, %v14799_v36  ;;  %v5911_v39 = vmul.f32 %v9894_v22, %v14847_v26  ;;  %vm5916_vm3 = vweird.f32 %v9894_v22  ;;  %v5011_v8 = vadd.f32 %v4923_v2, %v4835_v7  ;;  %v10189_v2 = vld [vmem:[#allocation2 + $0x58] sm:$0xff] }
 0x4af   : > { %v14869_v50 = vadd.f32 1.0, %v9896_v35  ;;  %vm5917_vm15 = vmor %vm5915_vm1, %vm5916_vm3  ;;  %v17131_v35 = vld [vmem:[#allocation52_spill] sm:$0xff] }
 0x4b0   : > { %v6387_v6 = vadd.f32 %v10187_v16, %v6351_v41  ;;  %v5912_v19 = vsub.f32 1.0, %v5911_v39  ;;  %v5323_v58 = vadd.f32 %v5235_v51, %v5011_v8  ;;  %v4926_v1 = vpop.f32.mrf.mxu2  ;;  %v5238_v39 = vpop.f32.mrf.mxu3 }
 0x4b1   : > { %9897 = vrcp.f32 %v14869_v50  ;;  %v5934_v24 = vand.u32 2147483647, %v14869_v50  ;;  %v5936_v47 = vand.u32 2147483648, %v14869_v50  ;;  %9299 = vmatmul.msk.f32.gmra.mxu1 %vm1949_vm4, %v6496_v21  ;;  %vm5930_vm8 = vweird.f32 %v14869_v50 }
 0x4b2   : > { %v6423_v33 = vmul.f32 %v6387_v6, %v17126_v45  ;;  %v5913_v36 = vmul.f32 %v9894_v22, %v5912_v19  ;;  %9899 = vpow2.f32 %v9264_v49  ;;  %v14887_v5 = vadd.f32 %v14522_v11, %v5323_v58  ;;  %v17129_v11 = vld [vmem:[#allocation68_spill] sm:$0xff] }
 0x4b3   : > { %v4836_v28 = vadd.f32 %v17129_v11, %v4523_v57  ;;  %v5937_v16 = vor.u32 1.1754944e-38, %v5936_v47  ;;  %vm5935_vm11 = vcmp.eq.f32.partialorder %v5934_v24, 8.507059e+37 }
 0x4b4   : > { %6459 = vst.msk [vmem:[#allocation2 + $0x48] sm:$0xff] %vm1949_vm4, %v6423_v33  ;;  %v5914_v37 = vadd.f32 %v9894_v22, %v5913_v36  ;;  %9172 = vmatmul.msk.f32.gmra.mxu2 %vm1949_vm4, %v13798_v12  ;;  %9210 = vmatmul.msk.f32.gmra.mxu3 %vm1949_vm4, %v17127_v25  ;;  %v9265_v23 = vmul.f32 -1.442695, %v14887_v5 }
 0x4b5   : > { %v5012_v41 = vadd.f32 %v4926_v1, %v4836_v28 }
 0x4b6   : > { %v5918_v17 = vsel %vm5917_vm15, %v9894_v22, %v5914_v37  ;;  %v17130_v22 = vld [vmem:[#allocation15_spill] sm:$0xff] }
 0x4b7   : > { %v9898_v15 = vpop.eup %9897  ;;  %v5923_v29 = vsel %vm5920_vm6, %v5922_v42, %v5918_v17  ;;  %v5324_v6 = vadd.f32 %v5238_v39, %v5012_v41  ;;  %v17135_v42 = vld [vmem:[#allocation8_spill] sm:$0xff]  ;;  %v17139_v41 = vld [vmem:[#allocation19_spill] sm:$0xff] }
 0x4b8   : > { %v9900_v26 = vpop.eup %9899  ;;  %v6352_v31 = vmul.f32 %v5923_v29, %v14817_v14  ;;  %v5926_v12 = vmul.f32 %v9898_v15, %v14869_v50  ;;  %vm5931_vm0 = vweird.f32 %v9898_v15  ;;  %v4929_v0 = vpop.f32.mrf.mxu2 }
 0x4b9   : > { %v14891_v13 = vadd.f32 1.0, %v9900_v26  ;;  %vm5932_vm10 = vmor %vm5930_vm8, %vm5931_vm0  ;;  %v14909_v7 = vadd.f32 %v14540_v34, %v5324_v6  ;;  %v5241_v57 = vpop.f32.mrf.mxu3 }
 0x4ba   : > { %v6388_v3 = vadd.f32 %v10188_v38, %v6352_v31  ;;  %v5927_v44 = vsub.f32 1.0, %v5926_v12  ;;  %v17136_v38 = vld [vmem:[#allocation134_spill] sm:$0xff] }
 0x4bb   : > { %9901 = vrcp.f32 %v14891_v13  ;;  %v9266_v50 = vmul.f32 -1.442695, %v14909_v7  ;;  %v5949_v34 = vand.u32 2147483647, %v14891_v13  ;;  %v5951_v37 = vand.u32 2147483648, %v14891_v13 }
 0x4bc   : > { %v6424_v63 = vmul.f32 %v6388_v3, %v17130_v22  ;;  %v5928_v14 = vmul.f32 %v9898_v15, %v5927_v44  ;;  %9903 = vpow2.f32 %v9265_v23  ;;  %9173 = vmatmul.msk.f32.gmra.mxu2 %vm1949_vm4, %v13836_v4  ;;  %9211 = vmatmul.msk.f32.gmra.mxu3 %vm1949_vm4, %v17131_v35  ;;  %v17132_v4 = vld [vmem:[#allocation131_spill] sm:$0xff]  ;;  %vm5945_vm2 = vweird.f32 %v14891_v13 }
 0x4bd   : > { %v4524_v48 = vadd.f32 %v17132_v4, %v14418_v30  ;;  %v17133_v30 = vld [vmem:[#allocation62_spill] sm:$0xff]  ;;  %v5952_v26 = vor.u32 1.1754944e-38, %v5951_v37  ;;  %vm5950_vm12 = vcmp.eq.f32.partialorder %v5949_v34, 8.507059e+37  ;;  %v4525_v3 = vadd.f32 %v17136_v38, %v14434_v54  ;;  %v10190_v54 = vld [vmem:[#allocation2 + $0x60] sm:$0xff] }
 0x4be   : > { %6460 = vst.msk [vmem:[#allocation2 + $0x50] sm:$0xff] %vm1949_vm4, %v6424_v63  ;;  %v5929_v49 = vadd.f32 %v9898_v15, %v5928_v14 }
 0x4c0   : > { %v5933_v19 = vsel %vm5932_vm10, %v9898_v15, %v5929_v49  ;;  %v6497_v15 = vld [vmem:[#allocation2 + $0x40] sm:$0xff]  ;;  %v6498_v49 = vld [vmem:[#allocation2 + $0x48] sm:$0xff] }
 0x4c1   : > { %v9902_v60 = vpop.eup %9901  ;;  %v5938_v46 = vsel %vm5935_vm11, %v5937_v16, %v5933_v19  ;;  %9300 = vmatmul.msk.f32.gmra.mxu1 %vm1949_vm4, %v6497_v15  ;;  %v4932_v16 = vpop.f32.mrf.mxu2 }
 0x4c2   : > { %v9904_v45 = vpop.eup %9903  ;;  %v6353_v33 = vmul.f32 %v5938_v46, %v14839_v40  ;;  %v5941_v36 = vmul.f32 %v9902_v60, %v14891_v13  ;;  %v17134_v40 = vld [vmem:[#allocation73_spill] sm:$0xff]  ;;  %vm5946_vm13 = vweird.f32 %v9902_v60  ;;  %v17137_v13 = vld [vmem:[#allocation59_spill] sm:$0xff]  ;;  %v5244_v19 = vpop.f32.mrf.mxu3 }
 0x4c3   : > { %v14913_v10 = vadd.f32 1.0, %v9904_v45  ;;  %v4837_v25 = vadd.f32 %v17134_v40, %v4524_v48  ;;  %vm5947_vm9 = vmor %vm5945_vm2, %vm5946_vm13  ;;  %v17140_v45 = vld [vmem:[#allocation133_spill] sm:$0xff]  ;;  %vm17156_vm2 = vcmask 64512  }
 0x4c4   : > { %v6389_v8 = vadd.f32 %v10189_v2, %v6353_v33  ;;  %v5942_v51 = vsub.f32 1.0, %v5941_v36  ;;  %9174 = vmatmul.msk.f32.gmra.mxu2 %vm1949_vm4, %v13871_v61  ;;  %9212 = vmatmul.msk.f32.gmra.mxu3 %vm1949_vm4, %v17133_v30  ;;  %v17141_v33 = vld [vmem:[#allocation42_spill] sm:$0xff]  ;;  %v17143_v2 = vld [vmem:[#allocation136_spill] sm:$0xff] }
 0x4c5   : > { %9905 = vrcp.f32 %v14913_v10  ;;  %v5013_v61 = vadd.f32 %v4929_v0, %v4837_v25  ;;  %v5966_v1 = vand.u32 2147483648, %v14913_v10  ;;  %vm5960_vm14 = vweird.f32 %v14913_v10 }
 0x4c6   : > { %v6425_v58 = vmul.f32 %v6389_v8, %v17135_v42  ;;  %v5943_v17 = vmul.f32 %v9902_v60, %v5942_v51  ;;  %9907 = vpow2.f32 %v9266_v50  ;;  %v17142_v50 = vld [vmem:[#allocation127_spill] sm:$0xff]  ;;  %v14964_v42 = vpop.f32.mrf.mxu0 }
 0x4c7   : > { %v5325_v31 = vadd.f32 %v5241_v57, %v5013_v61  ;;  %v5967_v4 = vor.u32 1.1754944e-38, %v5966_v1  ;;  %v4526_v8 = vadd.f32 %v17143_v2, %v17142_v50  ;;  %v17153_v50 = vld [vmem:[#allocation75_spill] sm:$0xff] }
 0x4c8   : > { %6461 = vst.msk [vmem:[#allocation2 + $0x58] sm:$0xff] %vm1949_vm4, %v6425_v58  ;;  %v5944_v29 = vadd.f32 %v9902_v60, %v5943_v17  ;;  %v10191_v58 = vld [vmem:[#allocation2 + $0x68] sm:$0xff] }
 0x4c9   : > { %v14931_v24 = vadd.f32 %v14653_v55, %v5325_v31  ;;  %v5964_v55 = vand.u32 2147483647, %v14913_v10  ;;  %9301 = vmatmul.msk.f32.gmra.mxu1 %vm1949_vm4, %v6498_v49  ;;  %v6499_v31 = vld [vmem:[#allocation2 + $0x50] sm:$0xff] }
 0x4ca   : > { %v5948_v12 = vsel %vm5947_vm9, %v9902_v60, %v5944_v29  ;;  %v5247_v38 = vpop.f32.mrf.mxu3  ;;  %v10192_v49 = vld [vmem:[#allocation2 + $0x70] sm:$0xff] }
 0x4cb   : > { %v9906_v23 = vpop.eup %9905  ;;  %v5953_v44 = vsel %vm5950_vm12, %v5952_v26, %v5948_v12  ;;  %v9267_v63 = vmul.f32 -1.442695, %v14931_v24  ;;  %vm5965_vm3 = vcmp.eq.f32.partialorder %v5964_v55, 8.507059e+37  ;;  %v4935_v12 = vpop.f32.mrf.mxu2 }
 0x4cc   : > { %v9908_v47 = vpop.eup %9907  ;;  %v6354_v11 = vmul.f32 %v5953_v44, %v14865_v59  ;;  %v5956_v28 = vmul.f32 %v9906_v23, %v14913_v10  ;;  %9175 = vmatmul.msk.f32.gmra.mxu2 %vm1949_vm4, %v13911_v32  ;;  %9213 = vmatmul.msk.f32.gmra.mxu3 %vm1949_vm4, %v17137_v13  ;;  %v17138_v59 = vld [vmem:[#allocation99_spill] sm:$0xff]  ;;  %vm5961_vm7 = vweird.f32 %v9906_v23 }
 0x4cd   : > { %v14939_v22 = vadd.f32 1.0, %v9908_v47  ;;  %v4838_v35 = vadd.f32 %v17138_v59, %v4525_v3  ;;  %vm5962_vm5 = vmor %vm5960_vm14, %vm5961_vm7  ;;  %v17146_v44 = vld [vmem:[#allocation83_spill] sm:$0xff]  ;;  %v17147_v47 = vld [vmem:[#allocation70_spill] sm:$0xff] }
 0x4ce   : > { %v6390_v14 = vadd.f32 %v10190_v54, %v6354_v11  ;;  %v5957_v21 = vsub.f32 1.0, %v5956_v28  ;;  %v17148_v54 = vld [vmem:[#allocation135_spill] sm:$0xff] }
 0x4cf   : > { %9909 = vrcp.f32 %v14939_v22  ;;  %v5014_v6 = vadd.f32 %v4932_v16, %v4838_v35  ;;  %v5979_v0 = vand.u32 2147483647, %v14939_v22  ;;  %v5981_v61 = vand.u32 2147483648, %v14939_v22 }
 0x4d0   : > { %v6426_v32 = vmul.f32 %v6390_v14, %v17139_v41  ;;  %v5958_v39 = vmul.f32 %v9906_v23, %v5957_v21  ;;  %9911 = vpow2.f32 %v9267_v63  ;;  %vm5975_vm15 = vweird.f32 %v14939_v22  ;;  %v17149_v14 = vld [vmem:[#allocation139_spill] sm:$0xff] }
 0x4d1   : > { %v5326_v48 = vadd.f32 %v5244_v19, %v5014_v6  ;;  %9302 = vmatmul.msk.f32.gmra.mxu1 %vm1949_vm4, %v6499_v31  ;;  %v5982_v11 = vor.u32 1.1754944e-38, %v5981_v61  ;;  %vm5980_vm0 = vcmp.eq.f32.partialorder %v5979_v0, 8.507059e+37  ;;  %v4527_v21 = vadd.f32 %v17149_v14, %v17148_v54  ;;  %v10193_v31 = vld [vmem:[#allocation2 + $0x78] sm:$0xff] }
 0x4d2   : > { %6462 = vst.msk [vmem:[#allocation2 + $0x60] sm:$0xff] %vm1949_vm4, %v6426_v32  ;;  %v5959_v60 = vadd.f32 %v9906_v23, %v5958_v39  ;;  %v14988_v39 = vpop.f32.mrf.mxu0 }
 0x4d3   : > { %v14957_v30 = vadd.f32 %v14667_v20, %v5326_v48  ;;  %v17144_v20 = vld [vmem:[#allocation45_spill] sm:$0xff] }
 0x4d4   : > { %v5963_v46 = vsel %vm5962_vm5, %v9906_v23, %v5959_v60  ;;  %9176 = vmatmul.msk.f32.gmra.mxu2 %vm1949_vm4, %v17140_v45  ;;  %9214 = vmatmul.msk.f32.gmra.mxu3 %vm1949_vm4, %v17141_v33  ;;  %v4839_v57 = vadd.f32 %v17144_v20, %v4526_v8  ;;  %v6500_v45 = vld [vmem:[#allocation2 + $0x58] sm:$0xff]  ;;  %v4938_v33 = vpop.f32.mrf.mxu2  ;;  %v5250_v8 = vpop.f32.mrf.mxu3  ;;  %vm17161_vm5 = vmmov %vm17156_vm2 }
 0x4d5   : > { %v9910_v36 = vpop.eup %9909  ;;  %v5968_v51 = vsel %vm5965_vm3, %v5967_v4, %v5963_v46  ;;  %v9268_v25 = vmul.f32 -1.442695, %v14957_v30 }
 0x4d6   : > { %v9912_v10 = vpop.eup %9911  ;;  %v6355_v34 = vmul.f32 %v5968_v51, %v14887_v5  ;;  %v5971_v37 = vmul.f32 %v9910_v36, %v14939_v22  ;;  %v17145_v5 = vld [vmem:[#allocation18_spill] sm:$0xff]  ;;  %vm5976_vm1 = vweird.f32 %v9910_v36  ;;  %v5015_v23 = vadd.f32 %v4935_v12, %v4839_v57 }
 0x4d7   : > { %v14961_v40 = vadd.f32 1.0, %v9912_v10  ;;  %vm5977_vm6 = vmor %vm5975_vm15, %vm5976_vm1 }
 0x4d8   : > { %v6391_v17 = vadd.f32 %v10191_v58, %v6355_v34  ;;  %v5972_v15 = vsub.f32 1.0, %v5971_v37  ;;  %v5327_v28 = vadd.f32 %v5247_v38, %v5015_v23  ;;  %v17154_v58 = vld [vmem:[#allocation157_spill] sm:$0xff] }
 0x4d9   : > { %9913 = vrcp.f32 %v14961_v40  ;;  %v5994_v19 = vand.u32 2147483647, %v14961_v40  ;;  %v5996_v60 = vand.u32 2147483648, %v14961_v40  ;;  %9303 = vmatmul.msk.f32.gmra.mxu1 %vm1949_vm4, %v6500_v45  ;;  %vm5990_vm10 = vweird.f32 %v14961_v40  ;;  %v10194_v38 = vld [vmem:[%s10386_s20] sm:$0xff] }
 0x4da   : > { %v6427_v29 = vmul.f32 %v6391_v17, %v17145_v5  ;;  %v5973_v26 = vmul.f32 %v9910_v36, %v5972_v15  ;;  %9915 = vpow2.f32 %v9268_v25  ;;  %v14981_v1 = vadd.f32 %v14678_v18, %v5327_v28  ;;  %v17150_v18 = vld [vmem:[#allocation46_spill] sm:$0xff]  ;;  %v17155_v17 = vld [vmem:[#allocation141_spill] sm:$0xff] }
 0x4db   : > { %v4840_v4 = vadd.f32 %v17150_v18, %v4527_v21  ;;  %v5997_v10 = vor.u32 1.1754944e-38, %v5996_v60  ;;  %vm5995_vm13 = vcmp.eq.f32.partialorder %v5994_v19, 8.507059e+37  ;;  %v4528_v15 = vadd.f32 %v17155_v17, %v17154_v58  ;;  %v10196_v45 = vld [vmem:[#allocation2 + $0x80] sm:$0xff] }
 0x4dc   : > { %6463 = vst.msk [vmem:[#allocation2 + $0x68] sm:$0xff] %vm1949_vm4, %v6427_v29  ;;  %v5974_v3 = vadd.f32 %v9910_v36, %v5973_v26  ;;  %9177 = vmatmul.msk.f32.gmra.mxu2 %vm1949_vm4, %v17146_v44  ;;  %9215 = vmatmul.msk.f32.gmra.mxu3 %vm1949_vm4, %v17147_v47  ;;  %v9269_v32 = vmul.f32 -1.442695, %v14981_v1  ;;  %v15012_v26 = vpop.f32.mrf.mxu0  ;;  %v17158_v47 = vld [vmem:[#allocation21_spill] sm:$0xff]  ;;  %v5253_v14 = vpop.f32.mrf.mxu3 }
 0x4dd   : > { %v5016_v2 = vadd.f32 %v4938_v33, %v4840_v4 }
 0x4de   : > { %v5978_v13 = vsel %vm5977_vm6, %v9910_v36, %v5974_v3  ;;  %v17152_v36 = vld [vmem:[#allocation66_spill] sm:$0xff] }
 0x4df   : > { %v9914_v63 = vpop.eup %9913  ;;  %v5983_v55 = vsel %vm5980_vm0, %v5982_v11, %v5978_v13  ;;  %v5328_v34 = vadd.f32 %v5250_v8, %v5016_v2  ;;  %v6501_v13 = vld [vmem:[#allocation2 + $0x60] sm:$0xff]  ;;  %v17163_v8 = vld [vmem:[#allocation20_spill] sm:$0xff]  ;;  %vm17164_vm0 = vmmov %vm17156_vm2 }
 0x4e0   : > { %v9916_v22 = vpop.eup %9915  ;;  %v6356_v59 = vmul.f32 %v5983_v55, %v14909_v7  ;;  %v5986_v35 = vmul.f32 %v9914_v63, %v14961_v40  ;;  %v17151_v7 = vld [vmem:[#allocation11_spill] sm:$0xff]  ;;  %vm5991_vm8 = vweird.f32 %v9914_v63 }
 0x4e1   : > { %v14985_v41 = vadd.f32 1.0, %v9916_v22  ;;  %vm5992_vm11 = vmor %vm5990_vm10, %vm5991_vm8  ;;  %v15005_v61 = vadd.f32 %v14964_v42, %v5328_v34  ;;  %9304 = vmatmul.msk.f32.gmra.mxu1 %vm1949_vm4, %v6501_v13 }
 0x4e2   : > { %v6392_v16 = vadd.f32 %v10192_v49, %v6356_v59  ;;  %v5987_v6 = vsub.f32 1.0, %v5986_v35  ;;  %v17160_v49 = vld [vmem:[#allocation145_spill] sm:$0xff] }
 0x4e3   : > { %9917 = vrcp.f32 %v14985_v41  ;;  %v9270_v29 = vmul.f32 -1.442695, %v15005_v61  ;;  %v6009_v42 = vand.u32 2147483647, %v14985_v41  ;;  %v6011_v3 = vand.u32 2147483648, %v14985_v41  ;;  %v6502_v34 = vld [vmem:[#allocation2 + $0x68] sm:$0xff] }
 0x4e4   : > { %v6428_v48 = vmul.f32 %v6392_v16, %v17151_v7  ;;  %v5988_v46 = vmul.f32 %v9914_v63, %v5987_v6  ;;  %9919 = vpow2.f32 %v9269_v32  ;;  %9178 = vmatmul.msk.f32.gmra.mxu2 %vm1949_vm4, %v17152_v36  ;;  %9216 = vmatmul.msk.f32.gmra.mxu3 %vm1949_vm4, %v17153_v50  ;;  %vm6005_vm12 = vweird.f32 %v14985_v41  ;;  %v17159_v32 = vld [vmem:[#allocation140_spill] sm:$0xff]  ;;  %v10195_v7 = vld [vmem:[%s10386_s20 + $0x8] sm:$0xff]  ;;  %v5256_v58 = vpop.f32.mrf.mxu3 }
 0x4e5   : > { %v6012_v55 = vor.u32 1.1754944e-38, %v6011_v3  ;;  %vm6010_vm14 = vcmp.eq.f32.partialorder %v6009_v42, 8.507059e+37  ;;  %v4529_v16 = vadd.f32 %v17160_v49, %v17159_v32 }
 0x4e6   : > { %6464 = vst.msk [vmem:[#allocation2 + $0x70] sm:$0xff] %vm1949_vm4, %v6428_v48  ;;  %v5989_v51 = vadd.f32 %v9914_v63, %v5988_v46  ;;  %v15036_v46 = vpop.f32.mrf.mxu0 }
 0x4e8   : > { %v5993_v37 = vsel %vm5992_vm11, %v9914_v63, %v5989_v51  ;;  %v4941_v63 = vpop.f32.mrf.mxu2  ;;  %vm17169_vm11 = vmmov %vm17164_vm0 }
 0x4e9   : > { %v9918_v25 = vpop.eup %9917  ;;  %v5998_v0 = vsel %vm5995_vm13, %v5997_v10, %v5993_v37  ;;  %9305 = vmatmul.msk.f32.gmra.mxu1 %vm1949_vm4, %v6502_v34 }
 0x4ea   : > { %v9920_v20 = vpop.eup %9919  ;;  %v6357_v57 = vmul.f32 %v5998_v0, %v14931_v24  ;;  %v6001_v5 = vmul.f32 %v9918_v25, %v14985_v41  ;;  %v17157_v24 = vld [vmem:[#allocation116_spill] sm:$0xff]  ;;  %vm6006_vm9 = vweird.f32 %v9918_v25 }
 0x4eb   : > { %v15009_v40 = vadd.f32 1.0, %v9920_v20  ;;  %v4841_v44 = vadd.f32 %v17157_v24, %v4528_v15  ;;  %vm6007_vm7 = vmor %vm6005_vm12, %vm6006_vm9 }
 0x4ec   : > { %v6393_v12 = vadd.f32 %v10193_v31, %v6357_v57  ;;  %v6002_v23 = vsub.f32 1.0, %v6001_v5  ;;  %9334 = vmatmul.msk.f32.vlgmr.msrb.gmra.mxu2 %vm17156_vm2, %v10194_v38  ;;  %v10197_v57 = vld [vmem:[%s10386_s20 + $0x10] sm:$0xff]  ;;  %v17166_v31 = vld [vmem:[#allocation150_spill] sm:$0xff]  ;;  %v5259_v32 = vpop.f32.mrf.mxu3  ;;  %vm17174_vm12 = vmmov %vm17164_vm0 }
 0x4ed   : > { %9921 = vrcp.f32 %v15009_v40  ;;  %v5017_v54 = vadd.f32 %v4941_v63, %v4841_v44  ;;  %v6026_v50 = vand.u32 2147483648, %v15009_v40  ;;  %vm6020_vm1 = vweird.f32 %v15009_v40 }
 0x4ee   : > { %v6429_v11 = vmul.f32 %v6393_v12, %v17158_v47  ;;  %v6003_v28 = vmul.f32 %v9918_v25, %v6002_v23  ;;  %9923 = vpow2.f32 %v9270_v29  ;;  %v17165_v29 = vld [vmem:[#allocation54_spill] sm:$0xff]  ;;  %v15058_v47 = vpop.f32.mrf.mxu0 }
 0x4ef   : > { %v5329_v22 = vadd.f32 %v5253_v14, %v5017_v54  ;;  %v6027_v15 = vor.u32 1.1754944e-38, %v6026_v50  ;;  %v4530_v12 = vadd.f32 %v17166_v31, %v17165_v29  ;;  %v17167_v54 = vld [vmem:[#allocation122_spill] sm:$0xff] }
 0x4f0   : > { %6465 = vst.msk [vmem:[#allocation2 + $0x78] sm:$0xff] %vm1949_vm4, %v6429_v11  ;;  %v6004_v21 = vadd.f32 %v9918_v25, %v6003_v28  ;;  %v4944_v37 = vpop.f32.mrf.mxu2  ;;  %v10198_v11 = vld [vmem:[#allocation2 + $0x88] sm:$0xff] }
 0x4f1   : > { %v15027_v19 = vadd.f32 %v14988_v39, %v5329_v22  ;;  %v6024_v39 = vand.u32 2147483647, %v15009_v40  ;;  %v17168_v14 = vld [vmem:[#allocation14_spill] sm:$0xff]  ;;  %v6503_v22 = vld [vmem:[#allocation2 + $0x70] sm:$0xff] }
 0x4f2   : > { %v6008_v59 = vsel %vm6007_vm7, %v9918_v25, %v6004_v21  ;;  %9306 = vmatmul.msk.f32.gmra.mxu1 %vm1949_vm4, %v6503_v22 }
 0x4f3   : > { %v9922_v35 = vpop.eup %9921  ;;  %v6013_v6 = vsel %vm6010_vm14, %v6012_v55, %v6008_v59  ;;  %v9271_v48 = vmul.f32 -1.442695, %v15027_v19  ;;  %vm6025_vm6 = vcmp.eq.f32.partialorder %v6024_v39, 8.507059e+37 }
 0x4f4   : > { %v9924_v60 = vpop.eup %9923  ;;  %v6358_v18 = vmul.f32 %v6013_v6, %v14957_v30  ;;  %v6016_v4 = vmul.f32 %v9922_v35, %v15009_v40  ;;  %9335 = vmatmul.msk.f32.gmra.mxu2 %vm17161_vm5, %v10195_v7  ;;  %v17162_v30 = vld [vmem:[#allocation144_spill] sm:$0xff]  ;;  %vm6021_vm3 = vweird.f32 %v9922_v35  ;;  %v17170_v7 = vld [vmem:[#allocation163_spill] sm:$0xff]  ;;  %v5262_v29 = vpop.f32.mrf.mxu3 }
 0x4f5   : > { %v15033_v41 = vadd.f32 1.0, %v9924_v60  ;;  %v4842_v2 = vadd.f32 %v17162_v30, %v4529_v16  ;;  %vm6022_vm15 = vmor %vm6020_vm1, %vm6021_vm3  ;;  %v10199_v16 = vld [vmem:[%s10386_s20 + $0x18] sm:$0xff] }
 0x4f6   : > { %v6394_v33 = vadd.f32 %v10196_v45, %v6358_v18  ;;  %v6017_v36 = vsub.f32 1.0, %v6016_v4  ;;  %vm17177_vm3 = vmmov %vm17164_vm0 }
 0x4f7   : > { %9925 = vrcp.f32 %v15033_v41  ;;  %v5018_v25 = vadd.f32 %v4944_v37, %v4842_v2  ;;  %v6039_v63 = vand.u32 2147483647, %v15033_v41  ;;  %vm6035_vm10 = vweird.f32 %v15033_v41 }
 0x4f8   : > { %v6430_v51 = vmul.f32 %v6394_v33, %v17163_v8  ;;  %v6018_v10 = vmul.f32 %v9922_v35, %v6017_v36  ;;  %9927 = vpow2.f32 %v9271_v48  ;;  %v4947_v59 = vpop.f32.mrf.mxu2  ;;  %v17171_v48 = vld [vmem:[#allocation153_spill] sm:$0xff]  ;;  %v15080_v8 = vpop.f32.mrf.mxu0 }
 0x4f9   : > { %v5330_v0 = vadd.f32 %v5256_v58, %v5018_v25  ;;  %vm6040_vm2 = vcmp.eq.f32.partialorder %v6039_v63, 8.507059e+37  ;;  %v4531_v45 = vadd.f32 %v17171_v48, %v17170_v7  ;;  %v17172_v25 = vld [vmem:[#allocation130_spill] sm:$0xff]  ;;  %v17173_v58 = vld [vmem:[#allocation24_spill] sm:$0xff] }
 0x4fa   : > { %6466 = vst.msk [vmem:[#allocation2 + $0x80] sm:$0xff] %vm1949_vm4, %v6430_v51  ;;  %v6019_v17 = vadd.f32 %v9922_v35, %v6018_v10  ;;  %v10200_v51 = vld [vmem:[#allocation2 + $0x90] sm:$0xff] }
 0x4fb   : > { %v15051_v38 = vadd.f32 %v15012_v26, %v5330_v0  ;;  %v6041_v26 = vand.u32 2147483648, %v15033_v41  ;;  %v6504_v0 = vld [vmem:[#allocation2 + $0x78] sm:$0xff] }
 0x4fc   : > { %v6023_v20 = vsel %vm6022_vm15, %v9922_v35, %v6019_v17  ;;  %9336 = vmatmul.msk.f32.gmra.mxu2 %vm17164_vm0, %v10197_v57  ;;  %v10201_v57 = vld [vmem:[%s10386_s20 + $0x20] sm:$0xff]  ;;  %9307 = vmatmul.msk.f32.gmra.mxu1 %vm1949_vm4, %v6504_v0  ;;  %v5265_v7 = vpop.f32.mrf.mxu3 }
 0x4fd   : > { %v9926_v5 = vpop.eup %9925  ;;  %v6028_v23 = vsel %vm6025_vm6, %v6027_v15, %v6023_v20  ;;  %v9272_v44 = vmul.f32 -1.442695, %v15051_v38  ;;  %v6042_v6 = vor.u32 1.1754944e-38, %v6041_v26 }
 0x4fe   : > { %v9928_v42 = vpop.eup %9927  ;;  %v6359_v3 = vmul.f32 %v6028_v23, %v14981_v1  ;;  %v6031_v40 = vmul.f32 %v9926_v5, %v15033_v41  ;;  %v4843_v1 = vadd.f32 %v17167_v54, %v4530_v12  ;;  %vm6036_vm8 = vweird.f32 %v9926_v5 }
 0x4ff   : > { %v15055_v24 = vadd.f32 1.0, %v9928_v42  ;;  %vm6037_vm13 = vmor %vm6035_vm10, %vm6036_vm8 }
 0x500   : > { %v6395_v28 = vadd.f32 %v10198_v11, %v6359_v3  ;;  %v6032_v13 = vsub.f32 1.0, %v6031_v40  ;;  %v5019_v35 = vadd.f32 %v4947_v59, %v4843_v1  ;;  %v4950_v20 = vpop.f32.mrf.mxu2  ;;  %v17175_v40 = vld [vmem:[#allocation166_spill] sm:$0xff]  ;;  %vm17182_vm8 = vmmov %vm17177_vm3 }
 0x501   : > { %9929 = vrcp.f32 %v15055_v24  ;;  %v6054_v37 = vand.u32 2147483647, %v15055_v24  ;;  %vm6050_vm7 = vweird.f32 %v15055_v24  ;;  %v10203_v59 = vld [vmem:[%s10386_s20 + $0x28] sm:$0xff] }
 0x502   : > { %v6431_v21 = vmul.f32 %v6395_v28, %v17168_v14  ;;  %v6033_v55 = vmul.f32 %v9926_v5, %v6032_v13  ;;  %9931 = vpow2.f32 %v9272_v44  ;;  %v5331_v60 = vadd.f32 %v5259_v32, %v5019_v35  ;;  %v17176_v44 = vld [vmem:[#allocation159_spill] sm:$0xff]  ;;  %v15102_v14 = vpop.f32.mrf.mxu0 }
 0x503   : > { %vm6055_vm5 = vcmp.eq.f32.partialorder %v6054_v37, 8.507059e+37  ;;  %v4532_v11 = vadd.f32 %v17176_v44, %v17175_v40 }
 0x504   : > { %6467 = vst.msk [vmem:[#allocation2 + $0x88] sm:$0xff] %vm1949_vm4, %v6431_v21  ;;  %v6034_v49 = vadd.f32 %v9926_v5, %v6033_v55  ;;  %9337 = vmatmul.msk.f32.gmra.mxu2 %vm17169_vm11, %v10199_v16  ;;  %v15073_v36 = vadd.f32 %v15036_v46, %v5331_v60  ;;  %v6056_v46 = vand.u32 2147483648, %v15055_v24  ;;  %v10202_v21 = vld [vmem:[#allocation2 + $0x98] sm:$0xff]  ;;  %v6505_v60 = vld [vmem:[#allocation2 + $0x80] sm:$0xff]  ;;  %v5268_v40 = vpop.f32.mrf.mxu3 }
 0x505   : > { %9308 = vmatmul.msk.f32.gmra.mxu1 %vm1949_vm4, %v6505_v60 }
 0x506   : > { %v6038_v18 = vsel %vm6037_vm13, %v9926_v5, %v6034_v49  ;;  %v9273_v2 = vmul.f32 -1.442695, %v15073_v36  ;;  %v6057_v12 = vor.u32 1.1754944e-38, %v6056_v46  ;;  %v17179_v49 = vld [vmem:[#allocation23_spill] sm:$0xff] }
 0x507   : > { %v9930_v4 = vpop.eup %9929  ;;  %v6043_v33 = vsel %vm6040_vm2, %v6042_v6, %v6038_v18 }
 0x508   : > { %v9932_v39 = vpop.eup %9931  ;;  %v6360_v50 = vmul.f32 %v6043_v33, %v15005_v61  ;;  %v6046_v41 = vmul.f32 %v9930_v4, %v15055_v24  ;;  %v4844_v61 = vadd.f32 %v17172_v25, %v4531_v45  ;;  %vm6051_vm9 = vweird.f32 %v9930_v4  ;;  %v4953_v18 = vpop.f32.mrf.mxu2 }
 0x509   : > { %v15077_v30 = vadd.f32 1.0, %v9932_v39  ;;  %vm6052_vm14 = vmor %vm6050_vm7, %vm6051_vm9 }
 0x50a   : > { %v6396_v10 = vadd.f32 %v10200_v51, %v6360_v50  ;;  %v6047_v34 = vsub.f32 1.0, %v6046_v41  ;;  %v5020_v5 = vadd.f32 %v4950_v20, %v4844_v61  ;;  %v17180_v41 = vld [vmem:[#allocation6_spill] sm:$0xff]  ;;  %v10204_v61 = vld [vmem:[%s10386_s20 + $0x30] sm:$0xff]  ;;  %vm17185_vm9 = vmmov %vm17177_vm3 }
 0x50b   : > { %9933 = vrcp.f32 %v15077_v30  ;;  %v6071_v35 = vand.u32 2147483648, %v15077_v30  ;;  %vm6065_vm15 = vweird.f32 %v15077_v30 }
 0x50c   : > { %v6432_v17 = vmul.f32 %v6396_v10, %v17173_v58  ;;  %v6048_v15 = vmul.f32 %v9930_v4, %v6047_v34  ;;  %9935 = vpow2.f32 %v9273_v2  ;;  %9338 = vmatmul.msk.f32.gmra.mxu2 %vm17174_vm12, %v10201_v57  ;;  %v5332_v23 = vadd.f32 %v5262_v29, %v5020_v5  ;;  %v17181_v2 = vld [vmem:[#allocation165_spill] sm:$0xff] }
 0x50d   : > { %v6072_v45 = vor.u32 1.1754944e-38, %v6071_v35  ;;  %v4533_v51 = vadd.f32 %v17181_v2, %v17180_v41  ;;  %v17184_v29 = vld [vmem:[#allocation17_spill] sm:$0xff]  ;;  %v5271_v2 = vpop.f32.mrf.mxu3 }
 0x50e   : > { %6468 = vst.msk [vmem:[#allocation2 + $0x90] sm:$0xff] %vm1949_vm4, %v6432_v17  ;;  %v6049_v31 = vadd.f32 %v9930_v4, %v6048_v15  ;;  %v15095_v13 = vadd.f32 %v15058_v47, %v5332_v23  ;;  %v6069_v47 = vand.u32 2147483647, %v15077_v30  ;;  %v15126_v17 = vpop.f32.mrf.mxu0  ;;  %v10205_v15 = vld [vmem:[#allocation2 + $0xa0] sm:$0xff]  ;;  %v6506_v23 = vld [vmem:[#allocation2 + $0x88] sm:$0xff] }
 0x50f   : > { %9309 = vmatmul.msk.f32.gmra.mxu1 %vm1949_vm4, %v6506_v23 }
 0x510   : > { %v6053_v42 = vsel %vm6052_vm14, %v9930_v4, %v6049_v31  ;;  %v9274_v1 = vmul.f32 -1.442695, %v15095_v13  ;;  %vm6070_vm0 = vcmp.eq.f32.partialorder %v6069_v47, 8.507059e+37  ;;  %vm17190_vm14 = vmmov %vm17177_vm3 }
 0x511   : > { %v9934_v3 = vpop.eup %9933  ;;  %v6058_v28 = vsel %vm6055_vm5, %v6057_v12, %v6053_v42  ;;  %v4956_v42 = vpop.f32.mrf.mxu2 }
 0x512   : > { %v9936_v63 = vpop.eup %9935  ;;  %v6361_v26 = vmul.f32 %v6058_v28, %v15027_v19  ;;  %v6061_v54 = vmul.f32 %v9934_v3, %v15077_v30  ;;  %v17178_v19 = vld [vmem:[#allocation138_spill] sm:$0xff]  ;;  %vm6066_vm1 = vweird.f32 %v9934_v3 }
 0x513   : > { %v15099_v24 = vadd.f32 1.0, %v9936_v63  ;;  %v4845_v32 = vadd.f32 %v17178_v19, %v4532_v11  ;;  %vm6067_vm6 = vmor %vm6065_vm15, %vm6066_vm1 }
 0x514   : > { %v6397_v55 = vadd.f32 %v10202_v21, %v6361_v26  ;;  %v6062_v22 = vsub.f32 1.0, %v6061_v54  ;;  %9339 = vmatmul.msk.f32.gmra.mxu2 %vm17177_vm3, %v10203_v59  ;;  %v10206_v26 = vld [vmem:[%s10386_s20 + $0x38] sm:$0xff] }
 0x515   : > { %9937 = vrcp.f32 %v15099_v24  ;;  %v5021_v4 = vadd.f32 %v4953_v18, %v4845_v32  ;;  %v6086_v57 = vand.u32 2147483648, %v15099_v24  ;;  %vm6080_vm11 = vweird.f32 %v15099_v24  ;;  %v17187_v21 = vld [vmem:[#allocation168_spill] sm:$0xff] }
 0x516   : > { %v6433_v16 = vmul.f32 %v6397_v55, %v17179_v49  ;;  %v6063_v6 = vmul.f32 %v9934_v3, %v6062_v22  ;;  %9939 = vpow2.f32 %v9274_v1  ;;  %v17186_v1 = vld [vmem:[#allocation152_spill] sm:$0xff]  ;;  %v15148_v49 = vpop.f32.mrf.mxu0 }
 0x517   : > { %v5333_v33 = vadd.f32 %v5265_v7, %v5021_v4  ;;  %v6087_v11 = vor.u32 1.1754944e-38, %v6086_v57  ;;  %v4534_v55 = vadd.f32 %v17187_v21, %v17186_v1  ;;  %v17189_v7 = vld [vmem:[#allocation27_spill] sm:$0xff] }
 0x518   : > { %6469 = vst.msk [vmem:[#allocation2 + $0x98] sm:$0xff] %vm1949_vm4, %v6433_v16  ;;  %v6064_v48 = vadd.f32 %v9934_v3, %v6063_v6  ;;  %v10207_v16 = vld [vmem:[#allocation2 + $0xa8] sm:$0xff] }
 0x519   : > { %v15117_v34 = vadd.f32 %v15080_v8, %v5333_v33  ;;  %v6084_v8 = vand.u32 2147483647, %v15099_v24  ;;  %v6507_v33 = vld [vmem:[#allocation2 + $0x90] sm:$0xff] }
 0x51a   : > { %v6068_v39 = vsel %vm6067_vm6, %v9934_v3, %v6064_v48  ;;  %9310 = vmatmul.msk.f32.gmra.mxu1 %vm1949_vm4, %v6507_v33  ;;  %vm17195_vm6 = vmmov %vm17182_vm8 }
 0x51b   : > { %v9938_v50 = vpop.eup %9937  ;;  %v6073_v10 = vsel %vm6070_vm0, %v6072_v45, %v6068_v39  ;;  %v9275_v58 = vmul.f32 -1.442695, %v15117_v34  ;;  %vm6085_vm2 = vcmp.eq.f32.partialorder %v6084_v8, 8.507059e+37  ;;  %v6691_v39 = vpop.f32.mrf.mxu1 }
 0x51c   : > { %v9940_v37 = vpop.eup %9939  ;;  %v6362_v46 = vmul.f32 %v6073_v10, %v15051_v38  ;;  %v6076_v25 = vmul.f32 %v9938_v50, %v15099_v24  ;;  %9340 = vmatmul.msk.f32.gmra.mxu2 %vm17182_vm8, %v10204_v61  ;;  %v17183_v38 = vld [vmem:[#allocation162_spill] sm:$0xff]  ;;  %vm6081_vm10 = vweird.f32 %v9938_v50  ;;  %v10208_v10 = vld [vmem:[%s10386_s20 + $0x40] sm:$0xff] }
 0x51d   : > { %v15123_v30 = vadd.f32 1.0, %v9940_v37  ;;  %v4846_v5 = vadd.f32 %v17183_v38, %v4533_v51  ;;  %vm6082_vm13 = vmor %vm6080_vm11, %vm6081_vm10 }
 0x51e   : > { %v6398_v0 = vadd.f32 %v10205_v15, %v6362_v46  ;;  %v6077_v20 = vsub.f32 1.0, %v6076_v25  ;;  %v15163_v46 = vld [vmem:[%s16289_s9] ss:$0 sm:$0xff]  ;;  %v17192_v15 = vld [vmem:[#allocation55_spill] sm:$0xff] }
 0x51f   : > { %9941 = vrcp.f32 %v15123_v30  ;;  %v5022_v3 = vadd.f32 %v4956_v42, %v4846_v5  ;;  %v6099_v18 = vand.u32 2147483647, %v15123_v30  ;;  %v6101_v4 = vand.u32 2147483648, %v15123_v30  ;;  %v15176_v42 = vpop.f32.mrf.mxu0 }
 0x520   : > { %v6434_v31 = vmul.f32 %v6398_v0, %v17184_v29  ;;  %v6078_v12 = vmul.f32 %v9938_v50, %v6077_v20  ;;  %9943 = vpow2.f32 %v9275_v58  ;;  %vm6095_vm7 = vweird.f32 %v15123_v30  ;;  %v17191_v58 = vld [vmem:[#allocation49_spill] sm:$0xff] }
 0x521   : > { %v5334_v28 = vadd.f32 %v5268_v40, %v5022_v3  ;;  %v6102_v37 = vor.u32 1.1754944e-38, %v6101_v4  ;;  %v6692_v25 = vadd.f32 %v15163_v46, %v6691_v39  ;;  %v4535_v0 = vadd.f32 %v17192_v15, %v17191_v58  ;;  %v10210_v3 = vld [vmem:[#allocation2 + $0xb0] sm:$0xff] }
 0x522   : > { %6470 = vst.msk [vmem:[#allocation2 + $0xa0] sm:$0xff] %vm1949_vm4, %v6434_v31  ;;  %v6079_v44 = vadd.f32 %v9938_v50, %v6078_v12  ;;  %vm6100_vm3 = vcmp.eq.f32.partialorder %v6099_v18, 8.507059e+37 }
 0x523   : > { %v15141_v59 = vadd.f32 %v15102_v14, %v5334_v28  ;;  %v17188_v14 = vld [vmem:[#allocation160_spill] sm:$0xff]  ;;  %v7001_v12 = vmul.f32 0.1, %v6692_v25  ;;  %vm6959_vm15 = vcmp.gt.f32.partialorder %v6692_v25, 0.0  ;;  %v6694_v21 = vpop.f32.mrf.mxu1 }
 0x524   : > { %v6083_v63 = vsel %vm6082_vm13, %v9938_v50, %v6079_v44  ;;  %9341 = vmatmul.msk.f32.gmra.mxu2 %vm17185_vm9, %v10206_v26  ;;  %v4959_v50 = vpop.f32.mrf.mxu2  ;;  %v17194_v26 = vld [vmem:[#allocation26_spill] sm:$0xff]  ;;  %vm17199_vm13 = vmmov %vm17195_vm6 }
 0x525   : > { %v9942_v54 = vpop.eup %9941  ;;  %v6088_v22 = vsel %vm6085_vm2, %v6087_v11, %v6083_v63  ;;  %v9276_v32 = vmul.f32 -1.442695, %v15141_v59  ;;  %v17193_v11 = vld [vmem:[#allocation142_spill] sm:$0xff]  ;;  %v6508_v63 = vld [vmem:[#allocation2 + $0x98] sm:$0xff] }
 0x526   : > { %v9944_v47 = vpop.eup %9943  ;;  %v6363_v35 = vmul.f32 %v6088_v22, %v15073_v36  ;;  %v6091_v24 = vmul.f32 %v9942_v54, %v15123_v30  ;;  %v4847_v36 = vadd.f32 %v17188_v14, %v4534_v55  ;;  %vm6096_vm12 = vweird.f32 %v9942_v54  ;;  %9311 = vmatmul.msk.f32.gmra.mxu1 %vm1949_vm4, %v6508_v63  ;;  %v10211_v22 = vld [vmem:[%s10386_s20 + $0x48] sm:$0xff]  ;;  %v17201_v63 = vld [vmem:[#allocation63_spill] sm:$0xff] }
 0x527   : > { %v15145_v19 = vadd.f32 1.0, %v9944_v47  ;;  %vm6097_vm5 = vmor %vm6095_vm7, %vm6096_vm12  ;;  %v4848_v28 = vadd.f32 %v17193_v11, %v4535_v0  ;;  %v7043_v47 = vsel %vm6959_vm15, %v6692_v25, %v7001_v12  ;;  %v10212_v25 = vld [vmem:[#allocation2 + $0xb8] sm:$0xff] }
 0x528   : > { %v6399_v6 = vadd.f32 %v10207_v16, %v6363_v35  ;;  %v6092_v60 = vsub.f32 1.0, %v6091_v24  ;;  %v5023_v41 = vadd.f32 %v4959_v50, %v4847_v36  ;;  %v5274_v35 = vpop.f32.mrf.mxu3  ;;  %9423 = vmatmul.msk.f32.gmra.mxu0 %vm1949_vm4, %v7043_v47  ;;  %v10214_v47 = vld [vmem:[%s10386_s20 + $0x58] sm:$0xff] }
 0x529   : > { %9945 = vrcp.f32 %v15145_v19  ;;  %vm6110_vm0 = vweird.f32 %v15145_v19 }
 0x52a   : > { %v6435_v48 = vmul.f32 %v6399_v6, %v17189_v7  ;;  %v6093_v45 = vmul.f32 %v9942_v54, %v6092_v60  ;;  %9947 = vpow2.f32 %v9276_v32  ;;  %v5335_v61 = vadd.f32 %v5271_v2, %v5023_v41  ;;  %v17196_v6 = vld [vmem:[#allocation50_spill] sm:$0xff]  ;;  %v17197_v60 = vld [vmem:[#allocation65_spill] sm:$0xff] }
 0x52b   : > { %v6695_v32 = vadd.f32 %v15163_v46, %v6694_v21  ;;  %v4536_v18 = vadd.f32 %v17197_v60, %v17196_v6  ;;  %v6509_v2 = vld [vmem:[#allocation2 + $0xa0] sm:$0xff] }
 0x52c   : > { %6471 = vst.msk [vmem:[#allocation2 + $0xa8] sm:$0xff] %vm1949_vm4, %v6435_v48  ;;  %v6094_v51 = vadd.f32 %v9942_v54, %v6093_v45  ;;  %9342 = vmatmul.msk.f32.gmra.mxu2 %vm17190_vm14, %v10208_v10  ;;  %v15169_v57 = vadd.f32 %v15126_v17, %v5335_v61  ;;  %v6114_v17 = vand.u32 2147483647, %v15145_v19  ;;  %v4962_v55 = vpop.f32.mrf.mxu2 }
 0x52d   : > { %v5024_v16 = vadd.f32 %v4962_v55, %v4848_v28  ;;  %v7002_v39 = vmul.f32 0.1, %v6695_v32  ;;  %vm6960_vm11 = vcmp.gt.f32.partialorder %v6695_v32, 0.0 }
 0x52e   : > { %v6098_v20 = vsel %vm6097_vm5, %v9942_v54, %v6094_v51  ;;  %v9277_v23 = vmul.f32 -1.442695, %v15169_v57  ;;  %vm6115_vm10 = vcmp.eq.f32.partialorder %v6114_v17, 8.507059e+37  ;;  %v17198_v51 = vld [vmem:[#allocation146_spill] sm:$0xff]  ;;  %9312 = vmatmul.msk.f32.gmra.mxu1 %vm1949_vm4, %v6509_v2  ;;  %vm17202_vm5 = vmmov %vm17195_vm6 }
 0x52f   : > { %v9946_v8 = vpop.eup %9945  ;;  %v6103_v30 = vsel %vm6100_vm3, %v6102_v37, %v6098_v20  ;;  %v5336_v36 = vadd.f32 %v5274_v35, %v5024_v16  ;;  %v4849_v10 = vadd.f32 %v17198_v51, %v4536_v18  ;;  %v15201_v37 = vpop.f32.mrf.mxu0  ;;  %v17200_v20 = vld [vmem:[#allocation22_spill] sm:$0xff]  ;;  %v17203_v18 = vld [vmem:[#allocation148_spill] sm:$0xff] }
 0x530   : > { %v9948_v38 = vpop.eup %9947  ;;  %v6364_v5 = vmul.f32 %v6103_v30, %v15095_v13  ;;  %v6106_v29 = vmul.f32 %v9946_v8, %v15145_v19  ;;  %vm6111_vm1 = vweird.f32 %v9946_v8  ;;  %v6116_v13 = vand.u32 2147483648, %v15145_v19 }
 0x531   : > { %v15173_v31 = vadd.f32 1.0, %v9948_v38  ;;  %vm6112_vm8 = vmor %vm6110_vm0, %vm6111_vm1  ;;  %v15196_v50 = vadd.f32 %v15148_v49, %v5336_v36  ;;  %v7044_v38 = vsel %vm6960_vm11, %v6695_v32, %v7002_v39 }
 0x532   : > { %v6400_v40 = vadd.f32 %v10210_v3, %v6364_v5  ;;  %v6107_v44 = vsub.f32 1.0, %v6106_v29  ;;  %v6117_v4 = vor.u32 1.1754944e-38, %v6116_v13  ;;  %v6697_v5 = vpop.f32.mrf.mxu1  ;;  %9424 = vmatmul.msk.f32.gmra.mxu0 %vm1949_vm4, %v7044_v38  ;;  %v5277_v3 = vpop.f32.mrf.mxu3 }
 0x533   : > { %9949 = vrcp.f32 %v15173_v31  ;;  %v9278_v15 = vmul.f32 -1.442695, %v15196_v50  ;;  %v6129_v49 = vand.u32 2147483647, %v15173_v31  ;;  %v6131_v0 = vand.u32 2147483648, %v15173_v31  ;;  %v6510_v21 = vld [vmem:[#allocation2 + $0xa8] sm:$0xff] }
 0x534   : > { %v6436_v54 = vmul.f32 %v6400_v40, %v17194_v26  ;;  %v6108_v1 = vmul.f32 %v9946_v8, %v6107_v44  ;;  %9951 = vpow2.f32 %v9277_v23  ;;  %9343 = vmatmul.msk.f32.gmra.mxu2 %vm17195_vm6, %v10211_v22  ;;  %v4965_v29 = vpop.f32.mrf.mxu2  ;;  %v6698_v12 = vadd.f32 %v15163_v46, %v6697_v5 }
 0x535   : > { %v5025_v23 = vadd.f32 %v4965_v29, %v4849_v10  ;;  %vm6125_vm9 = vweird.f32 %v15173_v31  ;;  %v6132_v44 = vor.u32 1.1754944e-38, %v6131_v0  ;;  %vm6130_vm7 = vcmp.eq.f32.partialorder %v6129_v49, 8.507059e+37  ;;  %v10216_v49 = vld [vmem:[%s10386_s20 + $0x60] sm:$0xff] }
 0x536   : > { %6472 = vst.msk [vmem:[#allocation2 + $0xb0] sm:$0xff] %vm1949_vm4, %v6436_v54  ;;  %v6109_v24 = vadd.f32 %v9946_v8, %v6108_v1  ;;  %v7003_v17 = vmul.f32 0.1, %v6698_v12  ;;  %v4537_v26 = vadd.f32 %v17201_v63, %v14590_v9  ;;  %9313 = vmatmul.msk.f32.gmra.mxu1 %vm1949_vm4, %v6510_v21  ;;  %vm6961_vm14 = vcmp.gt.f32.partialorder %v6698_v12, 0.0 }
 0x537   : > { %v5337_v11 = vadd.f32 %v5277_v3, %v5025_v23  ;;  %v10217_v23 = vld [vmem:[#allocation2 + $0xc8] sm:$0xff] }
 0x538   : > { %v6113_v14 = vsel %vm6112_vm8, %v9946_v8, %v6109_v24  ;;  %v15229_v24 = vpop.f32.mrf.mxu0  ;;  %v7045_v6 = vsel %vm6961_vm14, %v6698_v12, %v7003_v17  ;;  %vm17206_vm8 = vmmov %vm17202_vm5  ;;  %v17208_v17 = vld [vmem:[#allocation29_spill] sm:$0xff] }
 0x539   : > { %v9950_v7 = vpop.eup %9949  ;;  %v6118_v48 = vsel %vm6115_vm10, %v6117_v4, %v6113_v14  ;;  %v15219_v1 = vadd.f32 %v15176_v42, %v5337_v11  ;;  %v10215_v42 = vld [vmem:[#allocation2 + $0xc0] sm:$0xff]  ;;  %v4850_v4 = vadd.f32 %v17203_v18, %v4537_v26  ;;  %v17204_v14 = vld [vmem:[#allocation30_spill] sm:$0xff] }
 0x53a   : > { %v9952_v45 = vpop.eup %9951  ;;  %v6365_v19 = vmul.f32 %v6118_v48, %v15117_v34  ;;  %v6121_v33 = vmul.f32 %v9950_v7, %v15173_v31  ;;  %v10213_v34 = vld [vmem:[%s10386_s20 + $0x50] sm:$0xff]  ;;  %vm6126_vm2 = vweird.f32 %v9950_v7  ;;  %9425 = vmatmul.msk.f32.gmra.mxu0 %vm1949_vm4, %v7045_v6  ;;  %v6700_v48 = vpop.f32.mrf.mxu1 }
 0x53b   : > { %v15198_v41 = vadd.f32 1.0, %v9952_v45  ;;  %vm6127_vm12 = vmor %vm6125_vm9, %vm6126_vm2  ;;  %v9279_v9 = vmul.f32 -1.442695, %v15219_v1  ;;  %v5280_v39 = vpop.f32.mrf.mxu3 }
 0x53c   : > { %v6401_v61 = vadd.f32 %v10212_v25, %v6365_v19  ;;  %v6122_v58 = vsub.f32 1.0, %v6121_v33  ;;  %9344 = vmatmul.msk.f32.gmra.mxu2 %vm17199_vm13, %v10213_v34  ;;  %v4968_v45 = vpop.f32.mrf.mxu2  ;;  %v6701_v19 = vadd.f32 %v15163_v46, %v6700_v48  ;;  %vm17209_vm2 = vmmov %vm17202_vm5 }
 0x53d   : > { %9953 = vrcp.f32 %v15198_v41  ;;  %v6146_v60 = vand.u32 2147483648, %v15198_v41  ;;  %v5026_v33 = vadd.f32 %v4968_v45, %v4850_v4  ;;  %vm6140_vm1 = vweird.f32 %v15198_v41  ;;  %vm17213_vm14 = vmmov %vm17209_vm2 }
 0x53e   : > { %v6437_v8 = vmul.f32 %v6401_v61, %v17200_v20  ;;  %v6123_v30 = vmul.f32 %v9950_v7, %v6122_v58  ;;  %9955 = vpow2.f32 %v9278_v15  ;;  %v7004_v10 = vmul.f32 0.1, %v6701_v19  ;;  %v6511_v61 = vld [vmem:[#allocation2 + $0xb0] sm:$0xff] }
 0x53f   : > { %v6147_v51 = vor.u32 1.1754944e-38, %v6146_v60  ;;  %v5338_v25 = vadd.f32 %v5280_v39, %v5026_v33  ;;  %v17205_v58 = vld [vmem:[#allocation43_spill] sm:$0xff]  ;;  %9314 = vmatmul.msk.f32.gmra.mxu1 %vm1949_vm4, %v6511_v61  ;;  %vm6962_vm0 = vcmp.gt.f32.partialorder %v6701_v19, 0.0 }
 0x540   : > { %6473 = vst.msk [vmem:[#allocation2 + $0xb8] sm:$0xff] %vm1949_vm4, %v6437_v8  ;;  %v6124_v40 = vadd.f32 %v9950_v7, %v6123_v30  ;;  %v4538_v15 = vadd.f32 %v17205_v58, %v14599_v43  ;;  %v7046_v5 = vsel %vm6962_vm0, %v6701_v19, %v7004_v10  ;;  %v15254_v12 = vpop.f32.mrf.mxu0  ;;  %v10219_v33 = vld [vmem:[#allocation2 + $0xd0] sm:$0xff] }
 0x542   : > { %v6128_v28 = vsel %vm6127_vm12, %v9950_v7, %v6124_v40  ;;  %9426 = vmatmul.msk.f32.gmra.mxu0 %vm1949_vm4, %v7046_v5 }
 0x543   : > { %v9954_v13 = vpop.eup %9953  ;;  %v6133_v54 = vsel %vm6130_vm7, %v6132_v44, %v6128_v28  ;;  %v17207_v44 = vld [vmem:[#allocation48_spill] sm:$0xff]  ;;  %v6703_v28 = vpop.f32.mrf.mxu1 }
 0x544   : > { %v9956_v55 = vpop.eup %9955  ;;  %v6366_v31 = vmul.f32 %v6133_v54, %v15141_v59  ;;  %v6136_v22 = vmul.f32 %v9954_v13, %v15198_v41  ;;  %9345 = vmatmul.msk.f32.gmra.mxu2 %vm17202_vm5, %v10214_v47  ;;  %v6144_v59 = vand.u32 2147483647, %v15198_v41  ;;  %vm6141_vm3 = vweird.f32 %v9954_v13  ;;  %v4971_v54 = vpop.f32.mrf.mxu2 }
 0x545   : > { %v15226_v35 = vadd.f32 1.0, %v9956_v55  ;;  %vm6142_vm15 = vmor %vm6140_vm1, %vm6141_vm3  ;;  %v15246_v41 = vadd.f32 %v15201_v37, %v5338_v25  ;;  %v4851_v37 = vadd.f32 %v17207_v44, %v4538_v15  ;;  %v6704_v26 = vadd.f32 %v15163_v46, %v6703_v28  ;;  %v5283_v21 = vpop.f32.mrf.mxu3 }
 0x546   : > { %v6402_v32 = vadd.f32 %v10215_v42, %v6366_v31  ;;  %v6137_v16 = vsub.f32 1.0, %v6136_v22  ;;  %vm6145_vm6 = vcmp.eq.f32.partialorder %v6144_v59, 8.507059e+37 }
 0x547   : > { %9957 = vrcp.f32 %v15226_v35  ;;  %v9280_v29 = vmul.f32 -1.442695, %v15246_v41  ;;  %v6159_v11 = vand.u32 2147483647, %v15226_v35  ;;  %v5027_v55 = vadd.f32 %v4971_v54, %v4851_v37  ;;  %v6512_v31 = vld [vmem:[#allocation2 + $0xb8] sm:$0xff] }
 0x548   : > { %v6438_v36 = vmul.f32 %v6402_v32, %v17204_v14  ;;  %v6138_v7 = vmul.f32 %v9954_v13, %v6137_v16  ;;  %9959 = vpow2.f32 %v9279_v9  ;;  %vm6155_vm11 = vweird.f32 %v15226_v35  ;;  %9315 = vmatmul.msk.f32.gmra.mxu1 %vm1949_vm4, %v6512_v31  ;;  %v10218_v9 = vld [vmem:[%s10386_s20 + $0x68] sm:$0xff]  ;;  %v17210_v16 = vld [vmem:[#allocation44_spill] sm:$0xff]  ;;  %v15279_v19 = vpop.f32.mrf.mxu0 }
 0x549   : > { %v7005_v47 = vmul.f32 0.1, %v6704_v26  ;;  %vm6963_vm13 = vcmp.gt.f32.partialorder %v6704_v26, 0.0  ;;  %v5339_v32 = vadd.f32 %v5283_v21, %v5027_v55  ;;  %v4539_v6 = vadd.f32 %v17210_v16, %v14608_v52  ;;  %v10222_v16 = vld [vmem:[%s10386_s20 + $0x78] sm:$0xff] }
 0x54a   : > { %6474 = vst.msk [vmem:[#allocation2 + $0xc0] sm:$0xff] %vm1949_vm4, %v6438_v36  ;;  %v6139_v2 = vadd.f32 %v9954_v13, %v6138_v7  ;;  %vm6160_vm12 = vcmp.eq.f32.partialorder %v6159_v11, 8.507059e+37 }
 0x54b   : > { %v7047_v60 = vsel %vm6963_vm13, %v6704_v26, %v7005_v47  ;;  %v6706_v52 = vpop.f32.mrf.mxu1  ;;  %v10221_v47 = vld [vmem:[#allocation2 + $0xd8] sm:$0xff] }
 0x54c   : > { %v6143_v34 = vsel %vm6142_vm15, %v9954_v13, %v6139_v2  ;;  %9346 = vmatmul.msk.f32.gmra.mxu2 %vm17206_vm8, %v10216_v49  ;;  %9427 = vmatmul.msk.f32.gmra.mxu0 %vm1949_vm4, %v7047_v60  ;;  %v4974_v61 = vpop.f32.mrf.mxu2  ;;  %v17217_v60 = vld [vmem:[#allocation33_spill] sm:$0xff] }
 0x54d   : > { %v9958_v0 = vpop.eup %9957  ;;  %v6148_v20 = vsel %vm6145_vm6, %v6147_v51, %v6143_v34  ;;  %v17211_v51 = vld [vmem:[#allocation47_spill] sm:$0xff]  ;;  %v5286_v58 = vpop.f32.mrf.mxu3  ;;  %v17212_v34 = vld [vmem:[#allocation25_spill] sm:$0xff]  ;;  %vm17216_vm6 = vmmov %vm17209_vm2 }
 0x54e   : > { %v9960_v8 = vpop.eup %9959  ;;  %v6367_v30 = vmul.f32 %v6148_v20, %v15169_v57  ;;  %v6151_v38 = vmul.f32 %v9958_v0, %v15226_v35  ;;  %vm6156_vm10 = vweird.f32 %v9958_v0  ;;  %v6161_v57 = vand.u32 2147483648, %v15226_v35 }
 0x54f   : > { %v15250_v43 = vadd.f32 1.0, %v9960_v8  ;;  %vm6157_vm9 = vmor %vm6155_vm11, %vm6156_vm10  ;;  %v15271_v35 = vadd.f32 %v15229_v24, %v5339_v32  ;;  %v6707_v24 = vadd.f32 %v15163_v46, %v6706_v52  ;;  %v4852_v10 = vadd.f32 %v17211_v51, %v4539_v6  ;;  %v10220_v8 = vld [vmem:[%s10386_s20 + $0x70] sm:$0xff] }
 0x550   : > { %v6403_v3 = vadd.f32 %v10217_v23, %v6367_v30  ;;  %v6152_v40 = vsub.f32 1.0, %v6151_v38  ;;  %v6162_v42 = vor.u32 1.1754944e-38, %v6161_v57  ;;  %v17214_v38 = vld [vmem:[#allocation71_spill] sm:$0xff] }
 0x551   : > { %9961 = vrcp.f32 %v15250_v43  ;;  %v9281_v45 = vmul.f32 -1.442695, %v15271_v35  ;;  %v6176_v25 = vand.u32 2147483648, %v15250_v43  ;;  %v6513_v15 = vld [vmem:[#allocation2 + $0xc0] sm:$0xff]  ;;  %v7006_v20 = vmul.f32 0.1, %v6707_v24 }
 0x552   : > { %v6439_v13 = vmul.f32 %v6403_v3, %v17208_v17  ;;  %v6153_v63 = vmul.f32 %v9958_v0, %v6152_v40  ;;  %9963 = vpow2.f32 %v9280_v29  ;;  %9316 = vmatmul.msk.f32.gmra.mxu1 %vm1949_vm4, %v6513_v15  ;;  %v5028_v30 = vadd.f32 %v4974_v61, %v4852_v10 }
 0x553   : > { %vm6964_vm5 = vcmp.gt.f32.partialorder %v6707_v24, 0.0  ;;  %v4540_v5 = vadd.f32 %v17214_v38, %v14617_v56  ;;  %vm6170_vm3 = vweird.f32 %v15250_v43  ;;  %v6177_v3 = vor.u32 1.1754944e-38, %v6176_v25  ;;  %v6709_v56 = vpop.f32.mrf.mxu1 }
 0x554   : > { %6475 = vst.msk [vmem:[#allocation2 + $0xc8] sm:$0xff] %vm1949_vm4, %v6439_v13  ;;  %v6154_v22 = vadd.f32 %v9958_v0, %v6153_v63  ;;  %9347 = vmatmul.msk.f32.gmra.mxu2 %vm17209_vm2, %v10218_v9  ;;  %v7048_v23 = vsel %vm6964_vm5, %v6707_v24, %v7006_v20  ;;  %v5340_v40 = vadd.f32 %v5286_v58, %v5028_v30  ;;  %v17215_v63 = vld [vmem:[#allocation156_spill] sm:$0xff]  ;;  %v4977_v55 = vpop.f32.mrf.mxu2  ;;  %v17222_v20 = vld [vmem:[#allocation91_spill] sm:$0xff] }
 0x555   : > { %9428 = vmatmul.msk.f32.gmra.mxu0 %vm1949_vm4, %v7048_v23  ;;  %v6710_v13 = vadd.f32 %v15163_v46, %v6709_v56  ;;  %v4853_v26 = vadd.f32 %v17215_v63, %v4540_v5  ;;  %v5289_v31 = vpop.f32.mrf.mxu3  ;;  %v10223_v5 = vld [vmem:[%s10386_s20 + $0x80] sm:$0xff] }
 0x556   : > { %v6158_v59 = vsel %vm6157_vm9, %v9958_v0, %v6154_v22  ;;  %v15297_v57 = vadd.f32 %v15254_v12, %v5340_v40  ;;  %v15306_v12 = vpop.f32.mrf.mxu0 }
 0x557   : > { %v9962_v18 = vpop.eup %9961  ;;  %v6163_v4 = vsel %vm6160_vm12, %v6162_v42, %v6158_v59  ;;  %v5029_v32 = vadd.f32 %v4977_v55, %v4853_v26  ;;  %vm6965_vm8 = vcmp.gt.f32.partialorder %v6710_v13, 0.0 }
 0x558   : > { %v9964_v14 = vpop.eup %9963  ;;  %v6368_v36 = vmul.f32 %v6163_v4, %v15196_v50  ;;  %v6166_v7 = vmul.f32 %v9962_v18, %v15250_v43  ;;  %vm6171_vm7 = vweird.f32 %v9962_v18  ;;  %v6174_v50 = vand.u32 2147483647, %v15250_v43 }
 0x559   : > { %v15276_v48 = vadd.f32 1.0, %v9964_v14  ;;  %vm6172_vm1 = vmor %vm6170_vm3, %vm6171_vm7  ;;  %v9282_v21 = vmul.f32 -1.442695, %v15297_v57  ;;  %v5341_v14 = vadd.f32 %v5289_v31, %v5029_v32 }
 0x55a   : > { %v6404_v39 = vadd.f32 %v10219_v33, %v6368_v36  ;;  %v6167_v2 = vsub.f32 1.0, %v6166_v7  ;;  %vm6175_vm15 = vcmp.eq.f32.partialorder %v6174_v50, 8.507059e+37  ;;  %v17218_v36 = vld [vmem:[#allocation57_spill] sm:$0xff]  ;;  %v17219_v7 = vld [vmem:[#allocation79_spill] sm:$0xff]  ;;  %vm17227_vm3 = vmmov %vm17209_vm2 }
 0x55b   : > { %9965 = vrcp.f32 %v15276_v48  ;;  %v6514_v22 = vld [vmem:[#allocation2 + $0xc8] sm:$0xff]  ;;  %v6189_v6 = vand.u32 2147483647, %v15276_v48  ;;  %v6191_v59 = vand.u32 2147483648, %v15276_v48  ;;  %vm6185_vm10 = vweird.f32 %v15276_v48  ;;  %v6712_v24 = vpop.f32.mrf.mxu1 }
 0x55c   : > { %v6440_v49 = vmul.f32 %v6404_v39, %v17212_v34  ;;  %v6168_v0 = vmul.f32 %v9962_v18, %v6167_v2  ;;  %9967 = vpow2.f32 %v9281_v45  ;;  %9348 = vmatmul.msk.f32.gmra.mxu2 %vm17213_vm14, %v10220_v8  ;;  %9317 = vmatmul.msk.f32.gmra.mxu1 %vm1949_vm4, %v6514_v22  ;;  %v4541_v45 = vadd.f32 %v17219_v7, %v17218_v36 }
 0x55d   : > { %v15320_v33 = vadd.f32 %v15279_v19, %v5341_v14  ;;  %v6192_v2 = vor.u32 1.1754944e-38, %v6191_v59  ;;  %vm6190_vm13 = vcmp.eq.f32.partialorder %v6189_v6, 8.507059e+37  ;;  %v6713_v50 = vadd.f32 %v15163_v46, %v6712_v24  ;;  %v4980_v19 = vpop.f32.mrf.mxu2  ;;  %v5292_v15 = vpop.f32.mrf.mxu3 }
 0x55e   : > { %6476 = vst.msk [vmem:[#allocation2 + $0xd0] sm:$0xff] %vm1949_vm4, %v6440_v49  ;;  %v6169_v29 = vadd.f32 %v9962_v18, %v6168_v0  ;;  %v17221_v0 = vld [vmem:[#allocation167_spill] sm:$0xff]  ;;  %v5607_v40 = vpop.f32.mrf.mxu0 }
 0x55f   : > { %v9283_v10 = vmul.f32 -1.442695, %v15320_v33  ;;  %v4542_v8 = vadd.f32 %v17222_v20, %v17221_v0  ;;  %v7008_v23 = vmul.f32 0.1, %v6713_v50  ;;  %vm6966_vm9 = vcmp.gt.f32.partialorder %v6713_v50, 0.0 }
 0x560   : > { %v6173_v44 = vsel %vm6172_vm1, %v9962_v18, %v6169_v29 }
 0x561   : > { %v9966_v37 = vpop.eup %9965  ;;  %v6178_v11 = vsel %vm6175_vm15, %v6177_v3, %v6173_v44  ;;  %v10224_v44 = vld [vmem:[#allocation2 + $0xe0] sm:$0xff]  ;;  %v7050_v63 = vsel %vm6966_vm9, %v6713_v50, %v7008_v23 }
 0x562   : > { %v9968_v28 = vpop.eup %9967  ;;  %v6369_v17 = vmul.f32 %v6178_v11, %v15219_v1  ;;  %v6181_v43 = vmul.f32 %v9966_v37, %v15276_v48  ;;  %v7007_v1 = vmul.f32 0.1, %v6710_v13  ;;  %vm6186_vm0 = vweird.f32 %v9966_v37  ;;  %v17220_v48 = vld [vmem:[#allocation56_spill] sm:$0xff]  ;;  %v17233_v23 = vld [vmem:[#allocation53_spill] sm:$0xff] }
 0x563   : > { %v15303_v54 = vadd.f32 1.0, %v9968_v28  ;;  %vm6187_vm11 = vmor %vm6185_vm10, %vm6186_vm0  ;;  %v4854_v58 = vadd.f32 %v17220_v48, %v4541_v45  ;;  %v17223_v28 = vld [vmem:[#allocation32_spill] sm:$0xff]  ;;  %v6715_v26 = vpop.f32.mrf.mxu1 }
 0x564   : > { %v6405_v9 = vadd.f32 %v10221_v47, %v6369_v17  ;;  %v6182_v42 = vsub.f32 1.0, %v6181_v43  ;;  %9349 = vmatmul.msk.f32.gmra.mxu2 %vm17216_vm6, %v10222_v16  ;;  %v7049_v39 = vsel %vm6965_vm8, %v6710_v13, %v7007_v1  ;;  %vm17236_vm8 = vmmov %vm17209_vm2 }
 0x565   : > { %9969 = vrcp.f32 %v15303_v54  ;;  %9429 = vmatmul.msk.f32.gmra.mxu0 %vm1949_vm4, %v7049_v39  ;;  %v6515_v34 = vld [vmem:[#allocation2 + $0xd0] sm:$0xff]  ;;  %v5030_v3 = vadd.f32 %v4980_v19, %v4854_v58  ;;  %v6206_v56 = vand.u32 2147483648, %v15303_v54  ;;  %vm6200_vm7 = vweird.f32 %v15303_v54  ;;  %v4983_v16 = vpop.f32.mrf.mxu2  ;;  %v5295_v6 = vpop.f32.mrf.mxu3  ;;  %v17229_v39 = vld [vmem:[#allocation92_spill] sm:$0xff] }
 0x566   : > { %v6441_v18 = vmul.f32 %v6405_v9, %v17217_v60  ;;  %v6183_v4 = vmul.f32 %v9966_v37, %v6182_v42  ;;  %9971 = vpow2.f32 %v9282_v21  ;;  %9318 = vmatmul.msk.f32.gmra.mxu1 %vm1949_vm4, %v6515_v34  ;;  %v17224_v21 = vld [vmem:[#allocation161_spill] sm:$0xff]  ;;  %v6716_v9 = vadd.f32 %v15163_v46, %v6715_v26 }
 0x567   : > { %9973 = vpow2.f32 %v9283_v10  ;;  %v5342_v13 = vadd.f32 %v5292_v15, %v5030_v3  ;;  %v4855_v55 = vadd.f32 %v17224_v21, %v4542_v8  ;;  %v6207_v1 = vor.u32 1.1754944e-38, %v6206_v56  ;;  %v10226_v10 = vld [vmem:[#allocation2 + $0xe8] sm:$0xff]  ;;  %v17230_v15 = vld [vmem:[#allocation28_spill] sm:$0xff] }
 0x568   : > { %6477 = vst.msk [vmem:[#allocation2 + $0xd8] sm:$0xff] %vm1949_vm4, %v6441_v18  ;;  %v6184_v52 = vadd.f32 %v9966_v37, %v6183_v4  ;;  %v7009_v60 = vmul.f32 0.1, %v6716_v9  ;;  %v10225_v4 = vld [vmem:[%s10386_s20 + $0x88] sm:$0xff]  ;;  %vm6967_vm1 = vcmp.gt.f32.partialorder %v6716_v9, 0.0 }
 0x569   : > { %v15345_v47 = vadd.f32 %v15306_v12, %v5342_v13  ;;  %v5031_v18 = vadd.f32 %v4983_v16, %v4855_v55  ;;  %v17231_v8 = vld [vmem:[#allocation58_spill] sm:$0xff] }
 0x56a   : > { %v6188_v51 = vsel %vm6187_vm11, %v9966_v37, %v6184_v52  ;;  %v17228_v52 = vld [vmem:[#allocation67_spill] sm:$0xff]  ;;  %v7051_v48 = vsel %vm6967_vm1, %v6716_v9, %v7009_v60 }
 0x56b   : > { %v9970_v25 = vpop.eup %9969  ;;  %v6193_v61 = vsel %vm6190_vm13, %v6192_v2, %v6188_v51  ;;  %v9284_v12 = vmul.f32 -1.442695, %v15345_v47  ;;  %v4543_v2 = vadd.f32 %v17229_v39, %v17228_v52  ;;  %v5343_v24 = vadd.f32 %v5295_v6, %v5031_v18  ;;  %v5610_v51 = vpop.f32.mrf.mxu0  ;;  %v17237_v6 = vld [vmem:[#allocation109_spill] sm:$0xff]  ;;  %v10228_v18 = vld [vmem:[#allocation2 + $0xf0] sm:$0xff]  ;;  %v17240_v52 = vld [vmem:[#allocation60_spill] sm:$0xff] }
 0x56c   : > { %v9972_v49 = vpop.eup %9971  ;;  %v6370_v30 = vmul.f32 %v6193_v61, %v15246_v41  ;;  %v6196_v38 = vmul.f32 %v9970_v25, %v15303_v54  ;;  %9350 = vmatmul.msk.f32.gmra.mxu2 %vm17209_vm2, %v10223_v5  ;;  %vm6201_vm12 = vweird.f32 %v9970_v25  ;;  %v6204_v41 = vand.u32 2147483647, %v15303_v54 }
 0x56d   : > { %v15334_v29 = vadd.f32 1.0, %v9972_v49  ;;  %9430 = vmatmul.msk.f32.gmra.mxu0 %vm1949_vm4, %v7050_v63  ;;  %v9974_v31 = vpop.eup %9973  ;;  %vm15349_vm14 = vmor %vm6200_vm7, %vm6201_vm12  ;;  %v15368_v19 = vadd.f32 %v5607_v40, %v5343_v24  ;;  %v4856_v3 = vadd.f32 %v17233_v23, %v4543_v2  ;;  %v4986_v40 = vpop.f32.mrf.mxu2 }
 0x56e   : > { %v6406_v37 = vadd.f32 %v10224_v44, %v6370_v30  ;;  %v6197_v11 = vsub.f32 1.0, %v6196_v38  ;;  %vm6205_vm5 = vcmp.eq.f32.partialorder %v6204_v41, 8.507059e+37  ;;  %v15353_v32 = vadd.f32 1.0, %v9974_v31  ;;  %v17232_v30 = vld [vmem:[#allocation107_spill] sm:$0xff]  ;;  %v5298_v44 = vpop.f32.mrf.mxu3  ;;  %vm17242_vm7 = vmmov %vm17227_vm3 }
 0x56f   : > { %9975 = vrcp.f32 %v15334_v29  ;;  %v6516_v59 = vld [vmem:[#allocation2 + $0xd8] sm:$0xff]  ;;  %v6219_v61 = vand.u32 2147483647, %v15334_v29  ;;  %v6221_v58 = vand.u32 2147483648, %v15334_v29  ;;  %v4544_v38 = vadd.f32 %v17232_v30, %v17231_v8  ;;  %vm17246_vm1 = vmmov %vm17242_vm7 }
 0x570   : > { %v6442_v17 = vmul.f32 %v6406_v37, %v17223_v28  ;;  %v6198_v43 = vmul.f32 %v9970_v25, %v6197_v11  ;;  %9319 = vmatmul.msk.f32.gmra.mxu1 %vm1949_vm4, %v6516_v59  ;;  %9977 = vrcp.f32 %v15353_v32  ;;  %vm6215_vm6 = vweird.f32 %v15334_v29 }
 0x571   : > { %9979 = vpow2.f32 %v9284_v12  ;;  %v9285_v5 = vmul.f32 -1.442695, %v15368_v19  ;;  %vm15379_vm0 = vcmp.eq.f32.partialorder %v6219_v61, 8.507059e+37  ;;  %v6222_v13 = vor.u32 1.1754944e-38, %v6221_v58 }
 0x572   : > { %6478 = vst.msk [vmem:[#allocation2 + $0xe0] sm:$0xff] %vm1949_vm4, %v6442_v17  ;;  %v6199_v22 = vadd.f32 %v9970_v25, %v6198_v43  ;;  %v10227_v17 = vld [vmem:[%s10386_s20 + $0x90] sm:$0xff]  ;;  %v5032_v63 = vadd.f32 %v4986_v40, %v4856_v3  ;;  %v6234_v9 = vand.u32 2147483647, %v15353_v32  ;;  %v6236_v42 = vand.u32 2147483648, %v15353_v32  ;;  %v17243_v3 = vld [vmem:[#allocation164_spill] sm:$0xff] }
 0x573   : > { %9981 = vpow2.f32 %v9285_v5  ;;  %v4545_v59 = vadd.f32 %v17237_v6, %v14671_v62  ;;  %v5613_v60 = vpop.f32.mrf.mxu0  ;;  %vm6230_vm2 = vweird.f32 %v15353_v32  ;;  %v4857_v39 = vadd.f32 %v17240_v52, %v4544_v38  ;;  %v17247_v52 = vld [vmem:[#allocation64_spill] sm:$0xff] }
 0x574   : > { %v6203_v54 = vsel %vm15349_vm14, %v9970_v25, %v6199_v22  ;;  %9351 = vmatmul.msk.f32.gmra.mxu2 %vm17227_vm3, %v10225_v4  ;;  %vm6235_vm12 = vcmp.eq.f32.partialorder %v6234_v9, 8.507059e+37  ;;  %v6237_v62 = vor.u32 1.1754944e-38, %v6236_v42 }
 0x575   : > { %v9976_v14 = vpop.eup %9975  ;;  %v6208_v36 = vsel %vm6205_vm5, %v6207_v1, %v6203_v54  ;;  %9431 = vmatmul.msk.f32.gmra.mxu0 %vm1949_vm4, %v7051_v48  ;;  %v5344_v1 = vadd.f32 %v5298_v44, %v5032_v63  ;;  %v4989_v2 = vpop.f32.mrf.mxu2  ;;  %v10229_v48 = vld [vmem:[%s10386_s20 + $0x98] sm:$0xff]  ;;  %v4858_v40 = vadd.f32 %v17243_v3, %v4545_v59  ;;  %v17244_v44 = vld [vmem:[#allocation34_spill] sm:$0xff] }
 0x576   : > { %v6371_v7 = vmul.f32 %v6208_v36, %v15271_v35  ;;  %v6211_v45 = vmul.f32 %v9976_v14, %v15334_v29  ;;  %v6718_v35 = vpop.f32.mrf.mxu1  ;;  %vm6216_vm15 = vweird.f32 %v9976_v14  ;;  %v9978_v20 = vpop.eup %9977 }
 0x577   : > { %v6719_v0 = vadd.f32 %v15163_v46, %v6718_v35  ;;  %v6226_v56 = vmul.f32 %v9978_v20, %v15353_v32  ;;  %v9980_v43 = vpop.eup %9979  ;;  %vm6217_vm10 = vmor %vm6215_vm6, %vm6216_vm15  ;;  %vm6231_vm13 = vweird.f32 %v9978_v20  ;;  %v15400_v54 = vadd.f32 %v5610_v51, %v5344_v1  ;;  %v5301_v24 = vpop.f32.mrf.mxu3  ;;  %v10231_v1 = vld [vmem:[%s10386_s20 + $0xa0] sm:$0xff] }
 0x578   : > { %v6407_v50 = vadd.f32 %v10226_v10, %v6371_v7  ;;  %v6212_v25 = vsub.f32 1.0, %v6211_v45  ;;  %v15390_v55 = vadd.f32 1.0, %v9980_v43  ;;  %vm15405_vm9 = vmor %vm6230_vm2, %vm6231_vm13  ;;  %v17241_v10 = vld [vmem:[#allocation35_spill] sm:$0xff]  ;;  %v5033_v35 = vadd.f32 %v4989_v2, %v4857_v39 }
 0x579   : > { %v6517_v37 = vld [vmem:[#allocation2 + $0xe0] sm:$0xff]  ;;  %v7010_v28 = vmul.f32 0.1, %v6719_v0  ;;  %vm6968_vm11 = vcmp.gt.f32.partialorder %v6719_v0, 0.0  ;;  %v6227_v21 = vsub.f32 1.0, %v6226_v56  ;;  %v9982_v36 = vpop.eup %9981  ;;  %vm17250_vm2 = vmmov %vm17246_vm1 }
 0x57a   : > { %v6443_v34 = vmul.f32 %v6407_v50, %v17230_v15  ;;  %v6213_v49 = vmul.f32 %v9976_v14, %v6212_v25  ;;  %9320 = vmatmul.msk.f32.gmra.mxu1 %vm1949_vm4, %v6517_v37  ;;  %9983 = vrcp.f32 %v15390_v55  ;;  %v9286_v45 = vmul.f32 -1.442695, %v15400_v54 }
 0x57b   : > { %v7052_v31 = vsel %vm6968_vm11, %v6719_v0, %v7010_v28  ;;  %v6228_v16 = vmul.f32 %v9978_v20, %v6227_v21  ;;  %v15414_v25 = vadd.f32 1.0, %v9982_v36  ;;  %v5345_v0 = vadd.f32 %v5301_v24, %v5033_v35  ;;  %v17245_v28 = vld [vmem:[#allocation118_spill] sm:$0xff]  ;;  %v10232_v24 = vld [vmem:[#allocation2 + $0x100] sm:$0xff] }
 0x57c   : > { %6479 = vst.msk [vmem:[#allocation2 + $0xe8] sm:$0xff] %vm1949_vm4, %v6443_v34  ;;  %v6214_v11 = vadd.f32 %v9976_v14, %v6213_v49  ;;  %9352 = vmatmul.msk.f32.gmra.mxu2 %vm17236_vm8, %v10227_v17  ;;  %9985 = vpow2.f32 %v9286_v45  ;;  %v4546_v17 = vadd.f32 %v17245_v28, %v14681_v27  ;;  %vm6245_vm15 = vweird.f32 %v15390_v55 }
 0x57d   : > { %9432 = vmatmul.msk.f32.gmra.mxu0 %vm1949_vm4, %v7052_v31  ;;  %9987 = vrcp.f32 %v15414_v25  ;;  %v15423_v5 = vadd.f32 %v5613_v60, %v5345_v0  ;;  %v4992_v63 = vpop.f32.mrf.mxu2  ;;  %v5616_v31 = vpop.f32.mrf.mxu0  ;;  %v6264_v59 = vand.u32 2147483647, %v15414_v25  ;;  %v17251_v0 = vld [vmem:[#allocation31_spill] sm:$0xff] }
 0x57e   : > { %v6218_v26 = vsel %vm6217_vm10, %v9976_v14, %v6214_v11  ;;  %v6721_v12 = vpop.f32.mrf.mxu1  ;;  %v6229_v14 = vadd.f32 %v9978_v20, %v6228_v16  ;;  %v6251_v11 = vand.u32 2147483648, %v15390_v55  ;;  %v5034_v42 = vadd.f32 %v4992_v63, %v4858_v40  ;;  %v17253_v63 = vld [vmem:[#allocation61_spill] sm:$0xff] }
 0x57f   : > { %v6223_v22 = vsel %vm15379_vm0, %v6222_v13, %v6218_v26  ;;  %v9287_v13 = vmul.f32 -1.442695, %v15423_v5  ;;  %v5304_v26 = vpop.f32.mrf.mxu3  ;;  %vm6260_vm10 = vweird.f32 %v15414_v25  ;;  %v4859_v39 = vadd.f32 %v17247_v52, %v4546_v17 }
 0x580   : > { %v6372_v29 = vmul.f32 %v6223_v22, %v15297_v57  ;;  %v6722_v57 = vadd.f32 %v15163_v46, %v6721_v12  ;;  %v6233_v32 = vsel %vm15405_vm9, %v9978_v20, %v6229_v14  ;;  %v9984_v15 = vpop.eup %9983  ;;  %v10230_v20 = vld [vmem:[#allocation2 + $0xf8] sm:$0xff]  ;;  %v6252_v6 = vor.u32 1.1754944e-38, %v6251_v11 }
 0x581   : > { %v6238_v58 = vsel %vm6235_vm12, %v6237_v62, %v6233_v32  ;;  %v6241_v49 = vmul.f32 %v9984_v15, %v15390_v55  ;;  %vm6246_vm5 = vweird.f32 %v9984_v15  ;;  %9989 = vpow2.f32 %v9287_v13 }
 0x582   : > { %v6408_v4 = vadd.f32 %v10228_v18, %v6372_v29  ;;  %v7011_v61 = vmul.f32 0.1, %v6722_v57  ;;  %vm6969_vm14 = vcmp.gt.f32.partialorder %v6722_v57, 0.0  ;;  %v6373_v34 = vmul.f32 %v6238_v58, %v15320_v33  ;;  %v9986_v56 = vpop.eup %9985  ;;  %vm6247_vm6 = vmor %vm6245_vm15, %vm6246_vm5 }
 0x583   : > { %v6518_v51 = vld [vmem:[#allocation2 + $0xe8] sm:$0xff]  ;;  %v6242_v38 = vsub.f32 1.0, %v6241_v49  ;;  %v6249_v33 = vand.u32 2147483647, %v15390_v55  ;;  %v9988_v21 = vpop.eup %9987  ;;  %v15435_v22 = vadd.f32 1.0, %v9986_v56  ;;  %v5346_v18 = vadd.f32 %v5304_v26, %v5034_v42 }
 0x584   : > { %v6444_v50 = vmul.f32 %v6408_v4, %v17241_v10  ;;  %9321 = vmatmul.msk.f32.gmra.mxu1 %vm1949_vm4, %v6518_v51  ;;  %9353 = vmatmul.msk.f32.gmra.mxu2 %vm17242_vm7, %v10229_v48  ;;  %v6409_v8 = vadd.f32 %v10230_v20, %v6373_v34  ;;  %v7053_v30 = vsel %vm6969_vm14, %v6722_v57, %v7011_v61  ;;  %v6266_v14 = vand.u32 2147483648, %v15414_v25  ;;  %v10233_v49 = vld [vmem:[%s10386_s20 + $0xa8] sm:$0xff] }
 0x585   : > { %9433 = vmatmul.msk.f32.gmra.mxu0 %vm1949_vm4, %v7053_v30  ;;  %v6243_v43 = vmul.f32 %v9984_v15, %v6242_v38  ;;  %v6256_v27 = vmul.f32 %v9988_v21, %v15414_v25  ;;  %vm6250_vm0 = vcmp.eq.f32.partialorder %v6249_v33, 8.507059e+37  ;;  %9991 = vrcp.f32 %v15435_v22  ;;  %v4995_v32 = vpop.f32.mrf.mxu2  ;;  %v5619_v38 = vpop.f32.mrf.mxu0  ;;  %v10234_v56 = vld [vmem:[#allocation2 + $0x108] sm:$0xff] }
 0x586   : > { %6480 = vst.msk [vmem:[#allocation2 + $0xf0] sm:$0xff] %vm1949_vm4, %v6444_v50  ;;  %v6724_v23 = vpop.f32.mrf.mxu1  ;;  %v6445_v37 = vmul.f32 %v6409_v8, %v17244_v44  ;;  %vm6261_vm8 = vweird.f32 %v9988_v21  ;;  %v15448_v7 = vadd.f32 %v5616_v31, %v5346_v18  ;;  %vm15454_vm11 = vcmp.eq.f32.partialorder %v6264_v59, 8.507059e+37  ;;  %v10235_v59 = vld [vmem:[%s10386_s20 + $0xb0] sm:$0xff] }
 0x587   : > { %v6725_v41 = vadd.f32 %v15163_v46, %v6724_v23  ;;  %v6244_v29 = vadd.f32 %v9984_v15, %v6243_v43  ;;  %v6257_v60 = vsub.f32 1.0, %v6256_v27  ;;  %v9990_v2 = vpop.eup %9989  ;;  %v5307_v61 = vpop.f32.mrf.mxu3  ;;  %vm6262_vm13 = vmor %vm6260_vm10, %vm6261_vm8  ;;  %v6267_v25 = vor.u32 1.1754944e-38, %v6266_v14  ;;  %v17252_v23 = vld [vmem:[#allocation124_spill] sm:$0xff] }
 0x588   : > { %6481 = vst.msk [vmem:[#allocation2 + $0xf8] sm:$0xff] %vm1949_vm4, %v6445_v37  ;;  %v9288_v50 = vmul.f32 -1.442695, %v15448_v7  ;;  %v15460_v35 = vadd.f32 1.0, %v9990_v2  ;;  %v5035_v34 = vadd.f32 %v4995_v32, %v4859_v39  ;;  %v4547_v3 = vadd.f32 %v17252_v23, %v14688_v53  ;;  %v10236_v2 = vld [vmem:[#allocation2 + $0x110] sm:$0xff]  ;;  %vm17257_vm10 = vmmov %vm17250_vm2 }
 0x589   : > { %v7012_v9 = vmul.f32 0.1, %v6725_v41  ;;  %vm6970_vm3 = vcmp.gt.f32.partialorder %v6725_v41, 0.0  ;;  %v6248_v12 = vsel %vm6247_vm6, %v9984_v15, %v6244_v29  ;;  %v6258_v36 = vmul.f32 %v9988_v21, %v6257_v60  ;;  %v15508_v32 = vld [vmem:[%s16291_s11] ss:$0 sm:$0xff] }
 0x58a   : > { %v6253_v55 = vsel %vm6250_vm0, %v6252_v6, %v6248_v12  ;;  %9993 = vrcp.f32 %v15460_v35  ;;  %v6281_v33 = vand.u32 2147483648, %v15435_v22  ;;  %v5347_v11 = vadd.f32 %v5307_v61, %v5035_v34  ;;  %v17256_v61 = vld [vmem:[#allocation38_spill] sm:$0xff] }
 0x58b   : > { %v7054_v4 = vsel %vm6970_vm3, %v6725_v41, %v7012_v9  ;;  %v6374_v57 = vmul.f32 %v6253_v55, %v15345_v47  ;;  %v6259_v10 = vadd.f32 %v9988_v21, %v6258_v36  ;;  %v9992_v58 = vpop.eup %9991  ;;  %9995 = vpow2.f32 %v9288_v50  ;;  %vm17255_vm3 = vmmov %vm17246_vm1  ;;  %v15502_v47 = vld [vmem:[%s16289_s9] ss:$0 sm:$0xff] }
 0x58c   : > { %9354 = vmatmul.msk.f32.gmra.mxu2 %vm17246_vm1, %v10231_v1  ;;  %v6271_v30 = vmul.f32 %v9992_v58, %v15435_v22  ;;  %vm6276_vm12 = vweird.f32 %v9992_v58  ;;  %v6279_v17 = vand.u32 2147483647, %v15435_v22  ;;  %v15477_v13 = vadd.f32 %v5619_v38, %v5347_v11 }
 0x58d   : > { %v6519_v16 = vld [vmem:[#allocation2 + $0xf0] sm:$0xff]  ;;  %9434 = vmatmul.msk.f32.gmra.mxu0 %vm1949_vm4, %v7054_v4  ;;  %v6410_v51 = vadd.f32 %v10232_v24, %v6374_v57  ;;  %v6263_v8 = vsel %vm6262_vm13, %v9988_v21, %v6259_v10  ;;  %v4860_v26 = vadd.f32 %v17253_v63, %v4547_v3  ;;  %v17254_v21 = vld [vmem:[#allocation36_spill] sm:$0xff]  ;;  %vm6275_vm7 = vweird.f32 %v15435_v22  ;;  %v4998_v1 = vpop.f32.mrf.mxu2 }
 0x58e   : > { %9322 = vmatmul.msk.f32.gmra.mxu1 %vm1949_vm4, %v6519_v16  ;;  %v6727_v62 = vpop.f32.mrf.mxu1  ;;  %v6268_v40 = vsel %vm15454_vm11, %v6267_v25, %v6263_v8  ;;  %v6272_v37 = vsub.f32 1.0, %v6271_v30  ;;  %v6282_v42 = vor.u32 1.1754944e-38, %v6281_v33  ;;  %vm6277_vm14 = vmor %vm6275_vm7, %vm6276_vm12  ;;  %v9289_v27 = vmul.f32 -1.442695, %v15477_v13  ;;  %v10238_v30 = vld [vmem:[%s10386_s20 + $0xb8] sm:$0xff] }
 0x58f   : > { %v6728_v45 = vadd.f32 %v15163_v46, %v6727_v62  ;;  %v6520_v48 = vld [vmem:[#allocation2 + $0xf8] sm:$0xff]  ;;  %v6446_v20 = vmul.f32 %v6410_v51, %v17251_v0  ;;  %v6375_v44 = vmul.f32 %v6268_v40, %v15368_v19  ;;  %v5036_v6 = vadd.f32 %v4998_v1, %v4860_v26  ;;  %v5310_v22 = vpop.f32.mrf.mxu3 }
 0x590   : > { %v6273_v53 = vmul.f32 %v9992_v58, %v6272_v37  ;;  %v9994_v29 = vpop.eup %9993  ;;  %vm6280_vm1 = vcmp.eq.f32.partialorder %v6279_v17, 8.507059e+37  ;;  %9997 = vpow2.f32 %v9289_v27  ;;  %v6294_v52 = vand.u32 2147483647, %v15460_v35  ;;  %v10240_v27 = vld [vmem:[%s10386_s20 + $0xc0] sm:$0xff] }
 0x591   : > { %v7013_v15 = vmul.f32 0.1, %v6728_v45  ;;  %vm6971_vm9 = vcmp.gt.f32.partialorder %v6728_v45, 0.0  ;;  %6482 = vst.msk [vmem:[#allocation2 + $0x100] sm:$0xff] %vm1949_vm4, %v6446_v20  ;;  %v6411_v28 = vadd.f32 %v10234_v56, %v6375_v44  ;;  %v6286_v60 = vmul.f32 %v9994_v29, %v15460_v35 }
 0x592   : > { %v6274_v9 = vadd.f32 %v9992_v58, %v6273_v53  ;;  %v5348_v55 = vadd.f32 %v5310_v22, %v5036_v6  ;;  %v6296_v39 = vand.u32 2147483648, %v15460_v35  ;;  %vm6291_vm15 = vweird.f32 %v9994_v29 }
 0x593   : > { %v7055_v41 = vsel %vm6971_vm9, %v6728_v45, %v7013_v15  ;;  %v6447_v31 = vmul.f32 %v6411_v28, %v17254_v21  ;;  %v6287_v36 = vsub.f32 1.0, %v6286_v60  ;;  %v5622_v45 = vpop.f32.mrf.mxu0  ;;  %vm6290_vm6 = vweird.f32 %v15460_v35  ;;  %vm17259_vm9 = vmmov %vm17255_vm3 }
 0x594   : > { %9355 = vmatmul.msk.f32.gmra.mxu2 %vm17250_vm2, %v10233_v49  ;;  %v6278_v12 = vsel %vm6277_vm14, %v9992_v58, %v6274_v9  ;;  %v15496_v10 = vadd.f32 %v5622_v45, %v5348_v55  ;;  %vm6292_vm0 = vmor %vm6290_vm6, %vm6291_vm15  ;;  %v6297_v49 = vor.u32 1.1754944e-38, %v6296_v39  ;;  %vm6295_vm11 = vcmp.eq.f32.partialorder %v6294_v52, 8.507059e+37  ;;  %v10241_v39 = vld [vmem:[#allocation2 + $0x120] sm:$0xff] }
 0x595   : > { %9435 = vmatmul.msk.f32.gmra.mxu0 %vm1949_vm4, %v7055_v41  ;;  %6483 = vst.msk [vmem:[#allocation2 + $0x108] sm:$0xff] %vm1949_vm4, %v6447_v31  ;;  %v6283_v18 = vsel %vm6280_vm1, %v6282_v42, %v6278_v12  ;;  %v6288_v51 = vmul.f32 %v9994_v29, %v6287_v36  ;;  %v6830_v15 = vpop.f32.mrf.mxu2  ;;  %v10239_v41 = vld [vmem:[#allocation2 + $0x118] sm:$0xff] }
 0x596   : > { %9323 = vmatmul.msk.f32.gmra.mxu1 %vm1949_vm4, %v6520_v48  ;;  %v6730_v43 = vpop.f32.mrf.mxu1  ;;  %v6376_v57 = vmul.f32 %v6283_v18, %v15400_v54  ;;  %v9290_v25 = vmul.f32 -1.442695, %v15496_v10  ;;  %v6831_v20 = vadd.f32 %v15508_v32, %v6830_v15 }
 0x597   : > { %v6731_v19 = vadd.f32 %v15163_v46, %v6730_v43  ;;  %v9996_v46 = vpop.eup %9995  ;;  %v6289_v58 = vadd.f32 %v9994_v29, %v6288_v51 }
 0x598   : > { %v15488_v4 = vadd.f32 1.0, %v9996_v46  ;;  %v6521_v14 = vld [vmem:[#allocation2 + $0x100] sm:$0xff]  ;;  %v6412_v24 = vadd.f32 %v10236_v2, %v6376_v57  ;;  %v9998_v34 = vpop.eup %9997  ;;  %vm7082_vm13 = vcmp.gt.f32.partialorder %v6831_v20, 0.0  ;;  %v7124_v40 = vmul.f32 0.1, %v6831_v20 }
 0x599   : > { %v7014_v16 = vmul.f32 0.1, %v6731_v19  ;;  %vm6972_vm5 = vcmp.gt.f32.partialorder %v6731_v19, 0.0  ;;  %v6293_v38 = vsel %vm6292_vm0, %v9994_v29, %v6289_v58  ;;  %v15517_v23 = vadd.f32 1.0, %v9998_v34  ;;  %vm17260_vm0 = vmmov %vm17259_vm9  ;;  %v17261_v58 = vld [vmem:[#allocation39_spill] sm:$0xff] }
 0x59a   : > { %9999 = vrcp.f32 %v15488_v4  ;;  %v6448_v48 = vmul.f32 %v6412_v24, %v17256_v61  ;;  %v6298_v3 = vsel %vm6295_vm11, %v6297_v49, %v6293_v38  ;;  %v7166_v11 = vsel %vm7082_vm13, %v6831_v20, %v7124_v40 }
 0x59b   : > { %v7056_v62 = vsel %vm6972_vm5, %v6731_v19, %v7014_v16  ;;  %10001 = vpow2.f32 %v9290_v25  ;;  %v6377_v37 = vmul.f32 %v6298_v3, %v15423_v5  ;;  %9377 = vmatmul.msk.f32.vlgmr.msrb.gmra.mxu3 %vm1949_vm4, %v7166_v11  ;;  %v6311_v17 = vand.u32 2147483648, %v15488_v4  ;;  %v17258_v19 = vld [vmem:[#allocation37_spill] sm:$0xff] }
 0x59c   : > { %9356 = vmatmul.msk.f32.gmra.mxu2 %vm17255_vm3, %v10235_v59  ;;  %v6522_v8 = vld [vmem:[#allocation2 + $0x108] sm:$0xff]  ;;  %6484 = vst.msk [vmem:[#allocation2 + $0x110] sm:$0xff] %vm1949_vm4, %v6448_v48  ;;  %10003 = vrcp.f32 %v15517_v23  ;;  %v6309_v21 = vand.u32 2147483647, %v15488_v4  ;;  %vm6305_vm12 = vweird.f32 %v15488_v4  ;;  %v6326_v57 = vand.u32 2147483648, %v15517_v23 }
 0x59d   : > { %9436 = vmatmul.msk.f32.gmra.mxu0 %vm1949_vm4, %v7056_v62  ;;  %v6413_v56 = vadd.f32 %v10239_v41, %v6377_v37  ;;  %v6833_v31 = vpop.f32.mrf.mxu2  ;;  %v6312_v59 = vor.u32 1.1754944e-38, %v6311_v17  ;;  %vm6320_vm15 = vweird.f32 %v15517_v23  ;;  %v10242_v48 = vld [vmem:[%s10386_s20 + $0xc8] sm:$0xff] }
 0x59e   : > { %9324 = vmatmul.msk.f32.gmra.mxu1 %vm1949_vm4, %v6521_v14  ;;  %v6733_v54 = vpop.f32.mrf.mxu1  ;;  %v6834_v1 = vadd.f32 %v15508_v32, %v6833_v31  ;;  %vm6310_vm5 = vcmp.eq.f32.partialorder %v6309_v21, 8.507059e+37  ;;  %v6327_v15 = vor.u32 1.1754944e-38, %v6326_v57  ;;  %v10243_v37 = vld [vmem:[#allocation2 + $0x128] sm:$0xff] }
 0x59f   : > { %v6734_v50 = vadd.f32 %v15502_v47, %v6733_v54  ;;  %v6449_v63 = vmul.f32 %v6413_v56, %v17258_v19 }
 0x5a0   : > { %v10000_v35 = vpop.eup %9999  ;;  %v7125_v60 = vmul.f32 0.1, %v6834_v1  ;;  %vm7083_vm3 = vcmp.gt.f32.partialorder %v6834_v1, 0.0 }
 0x5a1   : > { %v7015_v0 = vmul.f32 0.1, %v6734_v50  ;;  %vm6973_vm8 = vcmp.gt.f32.partialorder %v6734_v50, 0.0  ;;  %v6301_v33 = vmul.f32 %v10000_v35, %v15488_v4  ;;  %v10002_v43 = vpop.eup %10001  ;;  %vm6306_vm2 = vweird.f32 %v10000_v35  ;;  %6485 = vst.msk [vmem:[#allocation2 + $0x118] sm:$0xff] %vm1949_vm4, %v6449_v63 }
 0x5a2   : > { %v15529_v9 = vadd.f32 1.0, %v10002_v43  ;;  %v10004_v16 = vpop.eup %10003  ;;  %vm6307_vm14 = vmor %vm6305_vm12, %vm6306_vm2  ;;  %v6324_v4 = vand.u32 2147483647, %v15517_v23  ;;  %v7167_v62 = vsel %vm7083_vm3, %v6834_v1, %v7125_v60  ;;  %v10244_v43 = vld [vmem:[%s10386_s20 + $0xd0] sm:$0xff] }
 0x5a3   : > { %v7057_v44 = vsel %vm6973_vm8, %v6734_v50, %v7015_v0  ;;  %v6302_v28 = vsub.f32 1.0, %v6301_v33  ;;  %v6523_v29 = vld [vmem:[#allocation2 + $0x110] sm:$0xff]  ;;  %v6316_v46 = vmul.f32 %v10004_v16, %v15517_v23  ;;  %vm6321_vm1 = vweird.f32 %v10004_v16  ;;  %9378 = vmatmul.msk.f32.gmra.mxu3 %vm1949_vm4, %v7167_v62 }
 0x5a4   : > { %9357 = vmatmul.msk.f32.gmra.mxu2 %vm17257_vm10, %v10238_v30  ;;  %10005 = vrcp.f32 %v15529_v9  ;;  %vm6322_vm8 = vmor %vm6320_vm15, %vm6321_vm1  ;;  %vm6325_vm10 = vcmp.eq.f32.partialorder %v6324_v4, 8.507059e+37  ;;  %v6341_v38 = vand.u32 2147483648, %v15529_v9  ;;  %v6339_v40 = vand.u32 2147483647, %v15529_v9  ;;  %v10245_v1 = vld [vmem:[#allocation2 + $0x130] sm:$0xff] }
 0x5a5   : > { %9437 = vmatmul.msk.f32.gmra.mxu0 %vm1949_vm4, %v7057_v44  ;;  %v6303_v26 = vmul.f32 %v10000_v35, %v6302_v28  ;;  %v6317_v18 = vsub.f32 1.0, %v6316_v46  ;;  %vm6335_vm2 = vweird.f32 %v15529_v9  ;;  %v17262_v28 = vld [vmem:[#allocation40_spill] sm:$0xff]  ;;  %vm17265_vm1 = vmmov %vm17260_vm0 }
 0x5a6   : > { %9325 = vmatmul.msk.f32.gmra.mxu1 %vm1949_vm4, %v6522_v8  ;;  %v6736_v53 = vpop.f32.mrf.mxu1  ;;  %v6342_v56 = vor.u32 1.1754944e-38, %v6341_v38 }
 0x5a7   : > { %v6737_v5 = vadd.f32 %v15502_v47, %v6736_v53  ;;  %v6304_v6 = vadd.f32 %v10000_v35, %v6303_v26  ;;  %v6318_v45 = vmul.f32 %v10004_v16, %v6317_v18 }
 0x5a8   : > { %v6524_v61 = vld [vmem:[#allocation2 + $0x118] sm:$0xff] }
 0x5a9   : > { %v7016_v42 = vmul.f32 0.1, %v6737_v5  ;;  %vm6974_vm7 = vcmp.gt.f32.partialorder %v6737_v5, 0.0  ;;  %v6308_v12 = vsel %vm6307_vm14, %v10000_v35, %v6304_v6  ;;  %v6319_v51 = vadd.f32 %v10004_v16, %v6318_v45  ;;  %v17264_v6 = vld [vmem:[#allocation41_spill] sm:$0xff] }
 0x5aa   : > { %v6313_v22 = vsel %vm6310_vm5, %v6312_v59, %v6308_v12  ;;  %v10006_v24 = vpop.eup %10005  ;;  %vm6340_vm14 = vcmp.eq.f32.partialorder %v6339_v40, 8.507059e+37  ;;  %v15572_v12 = vpop.f32.mrf.mxu0  ;;  %v10249_v40 = vld [vmem:[%s10386_s20 + $0xf0] sm:$0xff] }
 0x5ab   : > { %v7058_v55 = vsel %vm6974_vm7, %v6737_v5, %v7016_v42  ;;  %v6378_v14 = vmul.f32 %v6313_v22, %v15448_v7  ;;  %v6836_v7 = vpop.f32.mrf.mxu2  ;;  %v6331_v34 = vmul.f32 %v10006_v24, %v15529_v9  ;;  %v6323_v49 = vsel %vm6322_vm8, %v10004_v16, %v6319_v51  ;;  %vm17263_vm7 = vmmov %vm17260_vm0  ;;  %v10246_v22 = vld [vmem:[%s10386_s20 + $0xd8] sm:$0xff] }
 0x5ac   : > { %9358 = vmatmul.msk.f32.gmra.mxu2 %vm17259_vm9, %v10240_v27  ;;  %v6837_v50 = vadd.f32 %v15508_v32, %v6836_v7  ;;  %v6328_v8 = vsel %vm6325_vm10, %v6327_v15, %v6323_v49  ;;  %vm6336_vm13 = vweird.f32 %v10006_v24  ;;  %v10248_v15 = vld [vmem:[%s10386_s20 + $0xe8] sm:$0xff]  ;;  %v6528_v49 = vld [vmem:[#allocation2 + $0x138] sm:$0xff] }
 0x5ad   : > { %9438 = vmatmul.msk.f32.gmra.mxu0 %vm1949_vm4, %v7058_v55  ;;  %v6414_v2 = vadd.f32 %v10241_v39, %v6378_v14  ;;  %v6332_v30 = vsub.f32 1.0, %v6331_v34  ;;  %v6379_v23 = vmul.f32 %v6328_v8, %v15477_v13  ;;  %vm6337_vm9 = vmor %vm6335_vm2, %vm6336_vm13 }
 0x5ae   : > { %9326 = vmatmul.msk.f32.gmra.mxu1 %vm1949_vm4, %v6523_v29  ;;  %v6739_v36 = vpop.f32.mrf.mxu1  ;;  %v7126_v0 = vmul.f32 0.1, %v6837_v50  ;;  %vm7084_vm11 = vcmp.gt.f32.partialorder %v6837_v50, 0.0 }
 0x5af   : > { %v6740_v52 = vadd.f32 %v15502_v47, %v6739_v36  ;;  %v6450_v25 = vmul.f32 %v6414_v2, %v17261_v58  ;;  %v6333_v3 = vmul.f32 %v10006_v24, %v6332_v30  ;;  %v6415_v33 = vadd.f32 %v10243_v37, %v6379_v23  ;;  %v10247_v2 = vld [vmem:[%s10386_s20 + $0xe0] sm:$0xff] }
 0x5b0   : > { %v7168_v35 = vsel %vm7084_vm11, %v6837_v50, %v7126_v0  ;;  %vm17266_vm11 = vmmov %vm17260_vm0  ;;  %v6529_v37 = vld [vmem:[#allocation2 + $0x140] sm:$0xff] }
 0x5b1   : > { %vm6975_vm6 = vcmp.gt.f32.partialorder %v6740_v52, 0.0  ;;  %v7017_v54 = vmul.f32 0.1, %v6740_v52  ;;  %6486 = vst.msk [vmem:[#allocation2 + $0x120] sm:$0xff] %vm1949_vm4, %v6450_v25  ;;  %9379 = vmatmul.msk.f32.gmra.mxu3 %vm1949_vm4, %v7168_v35  ;;  %v6334_v41 = vadd.f32 %v10006_v24, %v6333_v3  ;;  %v6451_v53 = vmul.f32 %v6415_v33, %v17262_v28 }
 0x5b2   : > { %v15585_v7 = vpop.f32.mrf.mxu0 }
 0x5b3   : > { %v7059_v20 = vsel %vm6975_vm6, %v6740_v52, %v7017_v54  ;;  %v6839_v13 = vpop.f32.mrf.mxu2  ;;  %v6338_v19 = vsel %vm6337_vm9, %v10006_v24, %v6334_v41  ;;  %6487 = vst.msk [vmem:[#allocation2 + $0x128] sm:$0xff] %vm1949_vm4, %v6451_v53  ;;  %vm17267_vm9 = vmmov %vm17260_vm0 }
 0x5b4   : > { %9359 = vmatmul.msk.f32.gmra.mxu2 %vm17260_vm0, %v10242_v48  ;;  %v6840_v5 = vadd.f32 %v15508_v32, %v6839_v13  ;;  %v6343_v63 = vsel %vm6340_vm14, %v6342_v56, %v6338_v19  ;;  %vm17268_vm14 = vmmov %vm17260_vm0  ;;  %v6530_v19 = vld [vmem:[#allocation2 + $0x148] sm:$0xff] }
 0x5b5   : > { %9439 = vmatmul.msk.f32.gmra.mxu0 %vm1949_vm4, %v7059_v20  ;;  %v6380_v9 = vmul.f32 %v6343_v63, %v15496_v10 }
 0x5b6   : > { %9327 = vmatmul.msk.f32.gmra.mxu1 %vm1949_vm4, %v6524_v61  ;;  %v6742_v44 = vpop.f32.mrf.mxu1  ;;  %v7127_v26 = vmul.f32 0.1, %v6840_v5  ;;  %vm7085_vm5 = vcmp.gt.f32.partialorder %v6840_v5, 0.0 }
 0x5b7   : > { %v6743_v11 = vadd.f32 %v15502_v47, %v6742_v44  ;;  %v6416_v29 = vadd.f32 %v10245_v1, %v6380_v9 }
 0x5b8   : > { %v6525_v21 = vld [vmem:[#allocation2 + $0x120] sm:$0xff]  ;;  %v7169_v42 = vsel %vm7085_vm5, %v6840_v5, %v7127_v26  ;;  %v10250_v5 = vld [vmem:[%s10386_s20 + $0xf8] sm:$0xff] }
 0x5b9   : > { %vm6976_vm12 = vcmp.gt.f32.partialorder %v6743_v11, 0.0  ;;  %v7018_v17 = vmul.f32 0.1, %v6743_v11  ;;  %9380 = vmatmul.msk.f32.gmra.mxu3 %vm1949_vm4, %v7169_v42  ;;  %v6452_v59 = vmul.f32 %v6416_v29, %v17264_v6 }
 0x5ba   : > { %v6526_v18 = vld [vmem:[#allocation2 + $0x128] sm:$0xff]  ;;  %v15595_v20 = vpop.f32.mrf.mxu0 }
 0x5bb   : > { %v7060_v31 = vsel %vm6976_vm12, %v6743_v11, %v7018_v17  ;;  %v6842_v46 = vpop.f32.mrf.mxu2  ;;  %6488 = vst.msk [vmem:[#allocation2 + $0x130] sm:$0xff] %vm1949_vm4, %v6452_v59 }
 0x5bc   : > { %9360 = vmatmul.msk.f32.gmra.mxu2 %vm17263_vm7, %v10244_v43  ;;  %v6843_v10 = vadd.f32 %v15508_v32, %v6842_v46 }
 0x5bd   : > { %9440 = vmatmul.msk.f32.gmra.mxu0 %vm1949_vm4, %v7060_v31 }
 0x5be   : > { %9328 = vmatmul.msk.f32.gmra.mxu1 %vm1949_vm4, %v6525_v21  ;;  %v6745_v27 = vpop.f32.mrf.mxu1  ;;  %v7128_v55 = vmul.f32 0.1, %v6843_v10  ;;  %vm7086_vm15 = vcmp.gt.f32.partialorder %v6843_v10, 0.0 }
 0x5bf   : > { %v6746_v16 = vadd.f32 %v15502_v47, %v6745_v27  ;;  %v10251_v27 = vld [vmem:[%s10386_s20 + $0x100] sm:$0xff] }
 0x5c0   : > { %v7170_v4 = vsel %vm7086_vm15, %v6843_v10, %v7128_v55 }
 0x5c1   : > { %vm6977_vm3 = vcmp.gt.f32.partialorder %v6746_v16, 0.0  ;;  %v7019_v60 = vmul.f32 0.1, %v6746_v16  ;;  %9381 = vmatmul.msk.f32.gmra.mxu3 %vm1949_vm4, %v7170_v4 }
 0x5c2   : > { %v6527_v39 = vld [vmem:[#allocation2 + $0x130] sm:$0xff]  ;;  %v15604_v11 = vpop.f32.mrf.mxu0 }
 0x5c3   : > { %v7061_v14 = vsel %vm6977_vm3, %v6746_v16, %v7019_v60  ;;  %v6845_v62 = vpop.f32.mrf.mxu2 }
 0x5c4   : > { %9361 = vmatmul.msk.f32.gmra.mxu2 %vm17265_vm1, %v10246_v22  ;;  %v6846_v52 = vadd.f32 %v15508_v32, %v6845_v62  ;;  %vm17269_vm1 = vmmov %vm17260_vm0 }
 0x5c5   : > { %9441 = vmatmul.msk.f32.gmra.mxu0 %vm1949_vm4, %v7061_v14  ;;  %v10252_v14 = vld [vmem:[%s10386_s20 + $0x108] sm:$0xff] }
 0x5c6   : > { %9329 = vmatmul.msk.f32.gmra.mxu1 %vm1949_vm4, %v6526_v18  ;;  %v6748_v57 = vpop.f32.mrf.mxu1  ;;  %v7129_v24 = vmul.f32 0.1, %v6846_v52  ;;  %vm7087_vm8 = vcmp.gt.f32.partialorder %v6846_v52, 0.0 }
 0x5c7   : > { %v6749_v36 = vadd.f32 %v15502_v47, %v6748_v57 }
 0x5c8   : > { %v7171_v54 = vsel %vm7087_vm8, %v6846_v52, %v7129_v24  ;;  %v10253_v24 = vld [vmem:[%s10386_s20 + $0x110] sm:$0xff] }
 0x5c9   : > { %vm6978_vm6 = vcmp.gt.f32.partialorder %v6749_v36, 0.0  ;;  %v7020_v45 = vmul.f32 0.1, %v6749_v36  ;;  %9382 = vmatmul.msk.f32.gmra.mxu3 %vm1949_vm4, %v7171_v54 }
 0x5ca   : > { %v15614_v31 = vpop.f32.mrf.mxu0 }
 0x5cb   : > { %v7062_v51 = vsel %vm6978_vm6, %v6749_v36, %v7020_v45  ;;  %v6848_v48 = vpop.f32.mrf.mxu2 }
 0x5cc   : > { %9362 = vmatmul.msk.f32.gmra.mxu2 %vm17260_vm0, %v10247_v2  ;;  %v6849_v25 = vadd.f32 %v15508_v32, %v6848_v48 }
 0x5cd   : > { %9442 = vmatmul.msk.f32.gmra.mxu0 %vm1949_vm4, %v7062_v51 }
 0x5ce   : > { %9330 = vmatmul.msk.f32.gmra.mxu1 %vm1949_vm4, %v6527_v39  ;;  %v6751_v50 = vpop.f32.mrf.mxu1  ;;  %v7130_v34 = vmul.f32 0.1, %v6849_v25  ;;  %vm7088_vm13 = vcmp.gt.f32.partialorder %v6849_v25, 0.0 }
 0x5cf   : > { %v6752_v61 = vadd.f32 %v15502_v47, %v6751_v50 }
 0x5d0   : > { %v7172_v8 = vsel %vm7088_vm13, %v6849_v25, %v7130_v34 }
 0x5d1   : > { %vm6979_vm10 = vcmp.gt.f32.partialorder %v6752_v61, 0.0  ;;  %v7021_v58 = vmul.f32 0.1, %v6752_v61  ;;  %9383 = vmatmul.msk.f32.gmra.mxu3 %vm1949_vm4, %v7172_v8 }
 0x5d2   : > { %v15624_v22 = vpop.f32.mrf.mxu0 }
 0x5d3   : > { %v7063_v0 = vsel %vm6979_vm10, %v6752_v61, %v7021_v58  ;;  %v6851_v23 = vpop.f32.mrf.mxu2 }
 0x5d4   : > { %9363 = vmatmul.msk.f32.gmra.mxu2 %vm17266_vm11, %v10248_v15  ;;  %v6852_v3 = vadd.f32 %v15508_v32, %v6851_v23  ;;  %vm17270_vm11 = vmmov %vm17260_vm0 }
 0x5d5   : > { %9443 = vmatmul.msk.f32.gmra.mxu0 %vm1949_vm4, %v7063_v0 }
 0x5d6   : > { %9331 = vmatmul.msk.f32.gmra.mxu1 %vm1949_vm4, %v6528_v49  ;;  %v6754_v30 = vpop.f32.mrf.mxu1  ;;  %v7131_v44 = vmul.f32 0.1, %v6852_v3  ;;  %vm7089_vm12 = vcmp.gt.f32.partialorder %v6852_v3, 0.0  ;;  %v10254_v49 = vld [vmem:[%s10386_s20 + $0x118] sm:$0xff] }
 0x5d7   : > { %v6755_v38 = vadd.f32 %v15502_v47, %v6754_v30 }
 0x5d8   : > { %v7173_v41 = vsel %vm7089_vm12, %v6852_v3, %v7131_v44  ;;  %v10255_v44 = vld [vmem:[%s10386_s20 + $0x120] sm:$0xff] }
 0x5d9   : > { %vm6980_vm2 = vcmp.gt.f32.partialorder %v6755_v38, 0.0  ;;  %v7022_v35 = vmul.f32 0.1, %v6755_v38  ;;  %9384 = vmatmul.msk.f32.gmra.mxu3 %vm1949_vm4, %v7173_v41 }
 0x5da   : > { %v15635_v51 = vpop.f32.mrf.mxu0 }
 0x5db   : > { %v7064_v33 = vsel %vm6980_vm2, %v6755_v38, %v7022_v35  ;;  %v6854_v28 = vpop.f32.mrf.mxu2 }
 0x5dc   : > { %9364 = vmatmul.msk.f32.gmra.mxu2 %vm17267_vm9, %v10249_v40  ;;  %v6855_v17 = vadd.f32 %v15508_v32, %v6854_v28  ;;  %vm17271_vm9 = vmmov %vm17260_vm0 }
 0x5dd   : > { %9444 = vmatmul.msk.f32.gmra.mxu0 %vm1949_vm4, %v7064_v33 }
 0x5de   : > { %9332 = vmatmul.msk.f32.gmra.mxu1 %vm1949_vm4, %v6529_v37  ;;  %v6757_v56 = vpop.f32.mrf.mxu1  ;;  %v7132_v43 = vmul.f32 0.1, %v6855_v17  ;;  %vm7090_vm5 = vcmp.gt.f32.partialorder %v6855_v17, 0.0 }
 0x5df   : > { %v6758_v13 = vadd.f32 %v15502_v47, %v6757_v56 }
 0x5e0   : > { %v7174_v26 = vsel %vm7090_vm5, %v6855_v17, %v7132_v43  ;;  %v10256_v43 = vld [vmem:[%s10386_s20 + $0x128] sm:$0xff] }
 0x5e1   : > { %vm6981_vm7 = vcmp.gt.f32.partialorder %v6758_v13, 0.0  ;;  %v7023_v53 = vmul.f32 0.1, %v6758_v13  ;;  %9385 = vmatmul.msk.f32.gmra.mxu3 %vm1949_vm4, %v7174_v26 }
 0x5e2   : > { %v15643_v30 = vpop.f32.mrf.mxu0 }
 0x5e3   : > { %v7065_v63 = vsel %vm6981_vm7, %v6758_v13, %v7023_v53  ;;  %v6857_v42 = vpop.f32.mrf.mxu2  ;;  %vm17272_vm7 = vmmov %vm17260_vm0 }
 0x5e4   : > { %9365 = vmatmul.msk.f32.gmra.mxu2 %vm17268_vm14, %v10250_v5  ;;  %v6858_v29 = vadd.f32 %v15508_v32, %v6857_v42 }
 0x5e5   : > { %9445 = vmatmul.msk.f32.gmra.mxu0 %vm1949_vm4, %v7065_v63 }
 0x5e6   : > { %9333 = vmatmul.msk.f32.gmra.mxu1 %vm1949_vm4, %v6530_v19  ;;  %v6760_v21 = vpop.f32.mrf.mxu1  ;;  %v7133_v16 = vmul.f32 0.1, %v6858_v29  ;;  %vm7091_vm15 = vcmp.gt.f32.partialorder %v6858_v29, 0.0 }
 0x5e7   : > { %v6761_v9 = vadd.f32 %v15502_v47, %v6760_v21 }
 0x5e8   : > { %v7175_v59 = vsel %vm7091_vm15, %v6858_v29, %v7133_v16 }
 0x5e9   : > { %vm6982_vm3 = vcmp.gt.f32.partialorder %v6761_v9, 0.0  ;;  %v7024_v1 = vmul.f32 0.1, %v6761_v9  ;;  %9386 = vmatmul.msk.f32.gmra.mxu3 %vm1949_vm4, %v7175_v59 }
 0x5ea   : > { %v15652_v13 = vpop.f32.mrf.mxu0 }
 0x5eb   : > { %v7066_v6 = vsel %vm6982_vm3, %v6761_v9, %v7024_v1  ;;  %v6860_v10 = vpop.f32.mrf.mxu2  ;;  %vm17273_vm3 = vmmov %vm17260_vm0 }
 0x5ec   : > { %9366 = vmatmul.msk.f32.gmra.mxu2 %vm17269_vm1, %v10251_v27  ;;  %v6861_v55 = vadd.f32 %v15508_v32, %v6860_v10  ;;  %v10257_v27 = vld [vmem:[%s10386_s20 + $0x130] sm:$0xff] }
 0x5ed   : > { %9446 = vmatmul.msk.f32.gmra.mxu0 %vm1949_vm4, %v7066_v6 }
 0x5ee   : > { %v6763_v46 = vpop.f32.mrf.mxu1  ;;  %v7134_v4 = vmul.f32 0.1, %v6861_v55  ;;  %vm7092_vm8 = vcmp.gt.f32.partialorder %v6861_v55, 0.0 }
 0x5ef   : > { %v6764_v60 = vadd.f32 %v15502_v47, %v6763_v46 }
 0x5f0   : > { %v7176_v36 = vsel %vm7092_vm8, %v6861_v55, %v7134_v4 }
 0x5f1   : > { %vm6983_vm6 = vcmp.gt.f32.partialorder %v6764_v60, 0.0  ;;  %v7025_v18 = vmul.f32 0.1, %v6764_v60  ;;  %9387 = vmatmul.msk.f32.gmra.mxu3 %vm1949_vm4, %v7176_v36 }
 0x5f2   : > { %v15661_v42 = vpop.f32.mrf.mxu0 }
 0x5f3   : > { %v7067_v57 = vsel %vm6983_vm6, %v6764_v60, %v7025_v18  ;;  %v6863_v52 = vpop.f32.mrf.mxu2  ;;  %vm17274_vm6 = vmmov %vm17260_vm0 }
 0x5f4   : > { %9367 = vmatmul.msk.f32.gmra.mxu2 %vm17260_vm0, %v10252_v14  ;;  %v6864_v2 = vadd.f32 %v15508_v32, %v6863_v52  ;;  %v10258_v14 = vld [vmem:[%s10386_s20 + $0x138] sm:$0xff] }
 0x5f5   : > { %9447 = vmatmul.msk.f32.gmra.mxu0 %vm1949_vm4, %v7067_v57 }
 0x5f6   : > { %v7135_v54 = vmul.f32 0.1, %v6864_v2  ;;  %vm7093_vm13 = vcmp.gt.f32.partialorder %v6864_v2, 0.0 }
 0x5f7   : > { %v6766_v62 = vpop.f32.mrf.mxu1 }
 0x5f8   : > { %v6767_v45 = vadd.f32 %v15502_v47, %v6766_v62  ;;  %v7177_v61 = vsel %vm7093_vm13, %v6864_v2, %v7135_v54  ;;  %v15680_v2 = vld [vmem:[%s16294_s14] ss:$0 sm:$0xff] }
 0x5f9   : > { %9388 = vmatmul.msk.f32.gmra.mxu3 %vm1949_vm4, %v7177_v61  ;;  %v10259_v61 = vld [vmem:[%s10386_s20 + $0x140] sm:$0xff] }
 0x5fa   : > { %vm6984_vm10 = vcmp.gt.f32.partialorder %v6767_v45, 0.0  ;;  %v7026_v39 = vmul.f32 0.1, %v6767_v45  ;;  %v15673_v57 = vpop.f32.mrf.mxu0 }
 0x5fb   : > { %v6866_v25 = vpop.f32.mrf.mxu2 }
 0x5fc   : > { %9368 = vmatmul.msk.f32.gmra.mxu2 %vm17270_vm11, %v10253_v24  ;;  %v7068_v50 = vsel %vm6984_vm10, %v6767_v45, %v7026_v39  ;;  %v6867_v34 = vadd.f32 %v15508_v32, %v6866_v25  ;;  %vm17275_vm10 = vmmov %vm17273_vm3 }
 0x5fd   : > { %9448 = vmatmul.msk.f32.gmra.mxu0 %vm1949_vm4, %v7068_v50 }
 0x5fe   : > { %v7136_v0 = vmul.f32 0.1, %v6867_v34  ;;  %vm7094_vm12 = vcmp.gt.f32.partialorder %v6867_v34, 0.0 }
 0x600   : > { %v7178_v38 = vsel %vm7094_vm12, %v6867_v34, %v7136_v0 }
 0x601   : > { %v6769_v48 = vpop.f32.mrf.mxu1  ;;  %9389 = vmatmul.msk.f32.gmra.mxu3 %vm1949_vm4, %v7178_v38 }
 0x602   : > { %v6770_v58 = vadd.f32 %v15502_v47, %v6769_v48 }
 0x603   : > { %v6869_v35 = vpop.f32.mrf.mxu2 }
 0x604   : > { %vm6985_vm2 = vcmp.gt.f32.partialorder %v6770_v58, 0.0  ;;  %v7027_v15 = vmul.f32 0.1, %v6770_v58  ;;  %9369 = vmatmul.msk.f32.gmra.mxu2 %vm17271_vm9, %v10254_v49  ;;  %v6870_v40 = vadd.f32 %v15508_v32, %v6869_v35  ;;  %v15690_v49 = vpop.f32.mrf.mxu0 }
 0x606   : > { %v7069_v8 = vsel %vm6985_vm2, %v6770_v58, %v7027_v15  ;;  %v7137_v33 = vmul.f32 0.1, %v6870_v40  ;;  %vm7095_vm5 = vcmp.gt.f32.partialorder %v6870_v40, 0.0  ;;  %vm17276_vm2 = vmmov %vm17273_vm3 }
 0x607   : > { %9449 = vmatmul.msk.f32.gmra.mxu0 %vm1949_vm4, %v7069_v8 }
 0x608   : > { %v7179_v56 = vsel %vm7095_vm5, %v6870_v40, %v7137_v33 }
 0x609   : > { %9390 = vmatmul.msk.f32.gmra.mxu3 %vm1949_vm4, %v7179_v56 }
 0x60b   : > { %v6772_v23 = vpop.f32.mrf.mxu1  ;;  %v6872_v53 = vpop.f32.mrf.mxu2 }
 0x60c   : > { %v6773_v3 = vadd.f32 %v15502_v47, %v6772_v23  ;;  %9370 = vmatmul.msk.f32.gmra.mxu2 %vm17272_vm7, %v10255_v44  ;;  %v6873_v5 = vadd.f32 %v15508_v32, %v6872_v53  ;;  %vm17277_vm7 = vmmov %vm17276_vm2 }
 0x60e   : > { %vm6986_vm14 = vcmp.gt.f32.partialorder %v6773_v3, 0.0  ;;  %v7028_v37 = vmul.f32 0.1, %v6773_v3  ;;  %v7138_v63 = vmul.f32 0.1, %v6873_v5  ;;  %vm7096_vm15 = vcmp.gt.f32.partialorder %v6873_v5, 0.0 }
 0x610   : > { %v7070_v41 = vsel %vm6986_vm14, %v6773_v3, %v7028_v37  ;;  %v7180_v21 = vsel %vm7096_vm15, %v6873_v5, %v7138_v63  ;;  %v10260_v3 = vld [vmem:[%s10386_s20 + $0x148] sm:$0xff]  ;;  %v15703_v5 = vpop.f32.mrf.mxu0 }
 0x611   : > { %9450 = vmatmul.msk.f32.gmra.mxu0 %vm1949_vm4, %v7070_v41  ;;  %9391 = vmatmul.msk.f32.gmra.mxu3 %vm1949_vm4, %v7180_v21 }
 0x613   : > { %v6775_v28 = vpop.f32.mrf.mxu1  ;;  %v6875_v9 = vpop.f32.mrf.mxu2 }
 0x614   : > { %v6776_v17 = vadd.f32 %v15502_v47, %v6775_v28  ;;  %9371 = vmatmul.msk.f32.gmra.mxu2 %vm17273_vm3, %v10256_v43  ;;  %v6876_v29 = vadd.f32 %v15508_v32, %v6875_v9 }
 0x616   : > { %vm6987_vm1 = vcmp.gt.f32.partialorder %v6776_v17, 0.0  ;;  %v7029_v19 = vmul.f32 0.1, %v6776_v17  ;;  %v7139_v6 = vmul.f32 0.1, %v6876_v29  ;;  %vm7097_vm0 = vcmp.gt.f32.partialorder %v6876_v29, 0.0 }
 0x618   : > { %v7071_v26 = vsel %vm6987_vm1, %v6776_v17, %v7029_v19  ;;  %v7181_v46 = vsel %vm7097_vm0, %v6876_v29, %v7139_v6 }
 0x619   : > { %9451 = vmatmul.msk.f32.gmra.mxu0 %vm1949_vm4, %v7071_v26  ;;  %9392 = vmatmul.msk.f32.gmra.mxu3 %vm1949_vm4, %v7181_v46 }
 0x61b   : > { %v6778_v1 = vpop.f32.mrf.mxu1  ;;  %v6878_v10 = vpop.f32.mrf.mxu2 }
 0x61c   : > { %9372 = vmatmul.msk.f32.gmra.mxu2 %vm17274_vm6, %v10257_v27  ;;  %v6779_v16 = vadd.f32 %v15502_v47, %v6778_v1  ;;  %v6879_v55 = vadd.f32 %v15508_v32, %v6878_v10 }
 0x61e   : > { %vm6988_vm8 = vcmp.gt.f32.partialorder %v6779_v16, 0.0  ;;  %v7030_v59 = vmul.f32 0.1, %v6779_v16  ;;  %v7140_v36 = vmul.f32 0.1, %v6879_v55  ;;  %vm7098_vm11 = vcmp.gt.f32.partialorder %v6879_v55, 0.0  ;;  %v7356_v50 = vpop.f32.mrf.mxu3 }
 0x61f   : > { %v7629_v58 = vadd.f32 %v15572_v12, %v7356_v50 }
 0x620   : > { %v7072_v60 = vsel %vm6988_vm8, %v6779_v16, %v7030_v59  ;;  %v7182_v45 = vsel %vm7098_vm11, %v6879_v55, %v7140_v36 }
 0x621   : > { %9452 = vmatmul.msk.f32.gmra.mxu0 %vm1949_vm4, %v7072_v60  ;;  %9393 = vmatmul.msk.f32.gmra.mxu3 %vm1949_vm4, %v7182_v45  ;;  %v15688_v34 = vadd.f32 %v15680_v2, %v7629_v58 }
 0x623   : > { %v6781_v18 = vpop.f32.mrf.mxu1  ;;  %v6881_v39 = vpop.f32.mrf.mxu2  ;;  %v9462_v8 = vmul.f32 -1.442695, %v15688_v34 }
 0x624   : > { %9373 = vmatmul.msk.f32.gmra.mxu2 %vm17275_vm10, %v10258_v14  ;;  %v6782_v4 = vadd.f32 %v15502_v47, %v6781_v18  ;;  %v6882_v54 = vadd.f32 %v15508_v32, %v6881_v39 }
 0x625   : > { %10007 = vpow2.f32 %v9462_v8 }
 0x626   : > { %vm6989_vm13 = vcmp.gt.f32.partialorder %v6782_v4, 0.0  ;;  %v7031_v62 = vmul.f32 0.1, %v6782_v4  ;;  %v7141_v25 = vmul.f32 0.1, %v6882_v54  ;;  %vm7099_vm9 = vcmp.gt.f32.partialorder %v6882_v54, 0.0  ;;  %v7359_v44 = vpop.f32.mrf.mxu3 }
 0x627   : > { %v7632_v33 = vadd.f32 %v15585_v7, %v7359_v44 }
 0x628   : > { %v7073_v52 = vsel %vm6989_vm13, %v6782_v4, %v7031_v62  ;;  %v7183_v0 = vsel %vm7099_vm9, %v6882_v54, %v7141_v25  ;;  %vm17278_vm13 = vmmov %vm17276_vm2 }
 0x629   : > { %9453 = vmatmul.msk.f32.gmra.mxu0 %vm1949_vm4, %v7073_v52  ;;  %9394 = vmatmul.msk.f32.gmra.mxu3 %vm1949_vm4, %v7183_v0  ;;  %v15701_v56 = vadd.f32 %v15680_v2, %v7632_v33 }
 0x62b   : > { %v6784_v24 = vpop.f32.mrf.mxu1  ;;  %v6884_v12 = vpop.f32.mrf.mxu2  ;;  %v9463_v19 = vmul.f32 -1.442695, %v15701_v56 }
 0x62c   : > { %9374 = vmatmul.msk.f32.gmra.mxu2 %vm17276_vm2, %v10259_v61  ;;  %v6785_v48 = vadd.f32 %v15502_v47, %v6784_v24  ;;  %v6885_v35 = vadd.f32 %v15508_v32, %v6884_v12  ;;  %v10008_v53 = vpop.eup %10007 }
 0x62d   : > { %v7926_v43 = vadd.f32 1.0, %v10008_v53 }
 0x62e   : > { %vm6990_vm12 = vcmp.gt.f32.partialorder %v6785_v48, 0.0  ;;  %v7032_v15 = vmul.f32 0.1, %v6785_v48  ;;  %vm7100_vm14 = vcmp.gt.f32.partialorder %v6885_v35, 0.0  ;;  %v7142_v37 = vmul.f32 0.1, %v6885_v35 }
 0x62f   : > { %10009 = vrcp.f32 %v7926_v43  ;;  %v7977_v39 = vand.u32 2147483647, %v7926_v43  ;;  %v7979_v24 = vand.u32 2147483648, %v7926_v43  ;;  %vm7973_vm8 = vweird.f32 %v7926_v43 }
 0x630   : > { %v7074_v38 = vsel %vm6990_vm12, %v6785_v48, %v7032_v15  ;;  %v7184_v28 = vsel %vm7100_vm14, %v6885_v35, %v7142_v37  ;;  %10011 = vpow2.f32 %v9463_v19 }
 0x631   : > { %9454 = vmatmul.msk.f32.gmra.mxu0 %vm1949_vm4, %v7074_v38  ;;  %9395 = vmatmul.msk.f32.gmra.mxu3 %vm1949_vm4, %v7184_v28  ;;  %v7980_v0 = vor.u32 1.1754944e-38, %v7979_v24  ;;  %vm7978_vm11 = vcmp.eq.f32.partialorder %v7977_v39, 8.507059e+37 }
 0x633   : > { %v6787_v23 = vpop.f32.mrf.mxu1  ;;  %v6887_v63 = vpop.f32.mrf.mxu2 }
 0x634   : > { %9375 = vmatmul.msk.f32.gmra.mxu2 %vm17277_vm7, %v10260_v3  ;;  %v6788_v40 = vadd.f32 %v15502_v47, %v6787_v23  ;;  %v6888_v21 = vadd.f32 %v15508_v32, %v6887_v63  ;;  %v7362_v9 = vpop.f32.mrf.mxu3 }
 0x635   : > { %v7635_v1 = vadd.f32 %v15595_v20, %v7362_v9  ;;  %v10010_v46 = vpop.eup %10009  ;;  %v15717_v20 = vpop.f32.mrf.mxu0 }
 0x636   : > { %vm6991_vm5 = vcmp.gt.f32.partialorder %v6788_v40, 0.0  ;;  %v7033_v41 = vmul.f32 0.1, %v6788_v40  ;;  %vm7101_vm1 = vcmp.gt.f32.partialorder %v6888_v21, 0.0  ;;  %v7143_v27 = vmul.f32 0.1, %v6888_v21  ;;  %v10012_v10 = vpop.eup %10011 }
 0x637   : > { %v15712_v16 = vadd.f32 %v15680_v2, %v7635_v1  ;;  %v7969_v18 = vmul.f32 %v10010_v46, %v7926_v43  ;;  %v15719_v14 = vadd.f32 1.0, %v10012_v10  ;;  %vm7974_vm15 = vweird.f32 %v10010_v46 }
 0x638   : > { %v7075_v17 = vsel %vm6991_vm5, %v6788_v40, %v7033_v41  ;;  %v7185_v59 = vsel %vm7101_vm1, %v6888_v21, %v7143_v27  ;;  %vm7975_vm10 = vmor %vm7973_vm8, %vm7974_vm15 }
 0x639   : > { %9455 = vmatmul.msk.f32.gmra.mxu0 %vm1949_vm4, %v7075_v17  ;;  %v9464_v60 = vmul.f32 -1.442695, %v15712_v16  ;;  %9396 = vmatmul.msk.f32.gmra.mxu3 %vm1949_vm4, %v7185_v59  ;;  %v7970_v62 = vsub.f32 1.0, %v7969_v18  ;;  %v7992_v63 = vand.u32 2147483647, %v15719_v14  ;;  %vm7988_vm7 = vweird.f32 %v15719_v14 }
 0x63b   : > { %v6790_v7 = vpop.f32.mrf.mxu1  ;;  %v6890_v55 = vpop.f32.mrf.mxu2  ;;  %10013 = vpow2.f32 %v9464_v60  ;;  %v7971_v54 = vmul.f32 %v10010_v46, %v7970_v62  ;;  %vm7993_vm5 = vcmp.eq.f32.partialorder %v7992_v63, 8.507059e+37 }
 0x63c   : > { %v6791_v26 = vadd.f32 %v15502_v47, %v6790_v7  ;;  %v6891_v36 = vadd.f32 %v15508_v32, %v6890_v55  ;;  %v7365_v52 = vpop.f32.mrf.mxu3  ;;  %10015 = vrcp.f32 %v15719_v14 }
 0x63d   : > { %v7638_v48 = vadd.f32 %v15604_v11, %v7365_v52  ;;  %v7972_v58 = vadd.f32 %v10010_v46, %v7971_v54  ;;  %v15744_v53 = vpop.f32.mrf.mxu0 }
 0x63e   : > { %vm6992_vm3 = vcmp.gt.f32.partialorder %v6791_v26, 0.0  ;;  %v7034_v29 = vmul.f32 0.1, %v6791_v26  ;;  %vm7102_vm0 = vcmp.gt.f32.partialorder %v6891_v36, 0.0  ;;  %v7144_v61 = vmul.f32 0.1, %v6891_v36 }
 0x63f   : > { %v15726_v8 = vadd.f32 %v15680_v2, %v7638_v48  ;;  %v7976_v12 = vsel %vm7975_vm10, %v10010_v46, %v7972_v58 }
 0x640   : > { %v7076_v6 = vsel %vm6992_vm3, %v6791_v26, %v7034_v29  ;;  %v7186_v38 = vsel %vm7102_vm0, %v6891_v36, %v7144_v61  ;;  %v7981_v3 = vsel %vm7978_vm11, %v7980_v0, %v7976_v12 }
 0x641   : > { %9456 = vmatmul.msk.f32.gmra.mxu0 %vm1949_vm4, %v7076_v6  ;;  %v10014_v15 = vpop.eup %10013  ;;  %9397 = vmatmul.msk.f32.gmra.mxu3 %vm1949_vm4, %v7186_v38  ;;  %v9465_v40 = vmul.f32 -1.442695, %v15726_v8  ;;  %v8598_v33 = vmul.f32 %v7981_v3, %v15688_v34  ;;  %v7994_v34 = vand.u32 2147483648, %v15719_v14 }
 0x642   : > { %v15729_v23 = vadd.f32 1.0, %v10014_v15  ;;  %v10016_v35 = vpop.eup %10015 }
 0x643   : > { %v6793_v4 = vpop.f32.mrf.mxu1  ;;  %v6893_v11 = vpop.f32.mrf.mxu2  ;;  %v7984_v41 = vmul.f32 %v10016_v35, %v15719_v14  ;;  %8640 = vst.msk [vmem:[%s15737_s22] sm:$0xff] %vm17278_vm13, %v8598_v33  ;;  %vm7989_vm9 = vweird.f32 %v10016_v35  ;;  %v7995_v60 = vor.u32 1.1754944e-38, %v7994_v34 }
 0x644   : > { %v6794_v45 = vadd.f32 %v15502_v47, %v6793_v4  ;;  %v6894_v37 = vadd.f32 %v15508_v32, %v6893_v11  ;;  %10017 = vrcp.f32 %v15729_v23  ;;  %v7368_v28 = vpop.f32.mrf.mxu3  ;;  %vm7990_vm14 = vmor %vm7988_vm7, %vm7989_vm9  ;;  %v8007_v39 = vand.u32 2147483647, %v15729_v23 }
 0x645   : > { %10019 = vpow2.f32 %v9465_v40  ;;  %v7985_v17 = vsub.f32 1.0, %v7984_v41  ;;  %v7641_v7 = vadd.f32 %v15614_v31, %v7368_v28  ;;  %v8009_v54 = vand.u32 2147483648, %v15729_v23 }
 0x646   : > { %vm6993_vm6 = vcmp.gt.f32.partialorder %v6794_v45, 0.0  ;;  %v7035_v50 = vmul.f32 0.1, %v6794_v45  ;;  %vm7103_vm2 = vcmp.gt.f32.partialorder %v6894_v37, 0.0  ;;  %v7145_v19 = vmul.f32 0.1, %v6894_v37 }
 0x647   : > { %v7986_v26 = vmul.f32 %v10016_v35, %v7985_v17  ;;  %v15753_v1 = vadd.f32 %v15680_v2, %v7641_v7  ;;  %vm8003_vm0 = vweird.f32 %v15729_v23  ;;  %v8010_v0 = vor.u32 1.1754944e-38, %v8009_v54 }
 0x648   : > { %v7077_v25 = vsel %vm6993_vm6, %v6794_v45, %v7035_v50  ;;  %v7187_v9 = vsel %vm7103_vm2, %v6894_v37, %v7145_v19  ;;  %v15769_v50 = vpop.f32.mrf.mxu0  ;;  %vm17279_vm6 = vmmov %vm17278_vm13  ;;  %vm8008_vm10 = vcmp.eq.f32.partialorder %v8007_v39, 8.507059e+37 }
 0x649   : > { %9457 = vmatmul.msk.f32.gmra.mxu0 %vm1949_vm4, %v7077_v25  ;;  %v7987_v27 = vadd.f32 %v10016_v35, %v7986_v26  ;;  %9398 = vmatmul.msk.f32.gmra.mxu3 %vm1949_vm4, %v7187_v9  ;;  %v9466_v10 = vmul.f32 -1.442695, %v15753_v1  ;;  %vm17280_vm13 = vmmov %vm17279_vm6 }
 0x64a   : > { %v10018_v29 = vpop.eup %10017 }
 0x64b   : > { %v6796_v44 = vpop.f32.mrf.mxu1  ;;  %v6896_v59 = vpop.f32.mrf.mxu2  ;;  %v7999_v31 = vmul.f32 %v10018_v29, %v15729_v23  ;;  %v7991_v4 = vsel %vm7990_vm14, %v10016_v35, %v7987_v27  ;;  %10021 = vpow2.f32 %v9466_v10  ;;  %vm8004_vm3 = vweird.f32 %v10018_v29 }
 0x64c   : > { %v6797_v43 = vadd.f32 %v15502_v47, %v6796_v44  ;;  %v10020_v46 = vpop.eup %10019  ;;  %v6897_v55 = vadd.f32 %v15508_v32, %v6896_v59  ;;  %v7371_v62 = vpop.f32.mrf.mxu3  ;;  %v7996_v45 = vsel %vm7993_vm5, %v7995_v60, %v7991_v4  ;;  %vm8005_vm8 = vmor %vm8003_vm0, %vm8004_vm3 }
 0x64d   : > { %v15762_v14 = vadd.f32 1.0, %v10020_v46  ;;  %v8000_v52 = vsub.f32 1.0, %v7999_v31  ;;  %v8599_v24 = vmul.f32 %v7996_v45, %v15701_v56  ;;  %v7644_v25 = vadd.f32 %v15624_v22, %v7371_v62 }
 0x64e   : > { %vm6994_vm12 = vcmp.gt.f32.partialorder %v6797_v43, 0.0  ;;  %v7036_v21 = vmul.f32 0.1, %v6797_v43  ;;  %vm7104_vm15 = vcmp.gt.f32.partialorder %v6897_v55, 0.0  ;;  %v7146_v58 = vmul.f32 0.1, %v6897_v55 }
 0x64f   : > { %10023 = vrcp.f32 %v15762_v14  ;;  %v8001_v61 = vmul.f32 %v10018_v29, %v8000_v52  ;;  %8641 = vst.msk [vmem:[%s15737_s22 + $0x8] sm:$0xff] %vm17279_vm6, %v8599_v24  ;;  %v15776_v38 = vadd.f32 %v15680_v2, %v7644_v25  ;;  %v8024_v63 = vand.u32 2147483648, %v15762_v14 }
 0x650   : > { %v7078_v6 = vsel %vm6994_vm12, %v6797_v43, %v7036_v21  ;;  %v7188_v12 = vsel %vm7104_vm15, %v6897_v55, %v7146_v58  ;;  %vm8018_vm12 = vweird.f32 %v15762_v14  ;;  %vm17281_vm15 = vmmov %vm17279_vm6 }
 0x651   : > { %9458 = vmatmul.msk.f32.gmra.mxu0 %vm1949_vm4, %v7078_v6  ;;  %v8002_v15 = vadd.f32 %v10018_v29, %v8001_v61  ;;  %v10022_v35 = vpop.eup %10021  ;;  %9399 = vmatmul.msk.f32.gmra.mxu3 %vm1949_vm4, %v7188_v12  ;;  %v9467_v33 = vmul.f32 -1.442695, %v15776_v38  ;;  %v8025_v31 = vor.u32 1.1754944e-38, %v8024_v63 }
 0x652   : > { %v15781_v37 = vadd.f32 1.0, %v10022_v35 }
 0x653   : > { %v6799_v18 = vpop.f32.mrf.mxu1  ;;  %v6899_v11 = vpop.f32.mrf.mxu2  ;;  %v8006_v3 = vsel %vm8005_vm8, %v10018_v29, %v8002_v15 }
 0x654   : > { %v6800_v36 = vadd.f32 %v15502_v47, %v6799_v18  ;;  %v6900_v22 = vadd.f32 %v15508_v32, %v6899_v11  ;;  %v8011_v44 = vsel %vm8008_vm10, %v8010_v0, %v8006_v3  ;;  %v7374_v28 = vpop.f32.mrf.mxu3  ;;  %10025 = vrcp.f32 %v15781_v37  ;;  %v10262_v18 = vld [vmem:[%s16289_s9] ss:$0 sm:$0xff] }
 0x655   : > { %v10024_v23 = vpop.eup %10023  ;;  %v8600_v17 = vmul.f32 %v8011_v44, %v15712_v16  ;;  %10027 = vpow2.f32 %v9467_v33  ;;  %v7647_v7 = vadd.f32 %v15635_v51, %v7374_v28  ;;  %v8022_v16 = vand.u32 2147483647, %v15762_v14  ;;  %v15804_v51 = vld [vmem:[%s16291_s11] ss:$0 sm:$0xff] }
 0x656   : > { %vm6995_vm1 = vcmp.gt.f32.partialorder %v6800_v36, 0.0  ;;  %v7037_v48 = vmul.f32 0.1, %v6800_v36  ;;  %v8014_v43 = vmul.f32 %v10024_v23, %v15762_v14  ;;  %vm7105_vm11 = vcmp.gt.f32.partialorder %v6900_v22, 0.0 }
 0x657   : > { %8642 = vst.msk [vmem:[%s15737_s22 + $0x10] sm:$0xff] %vm17280_vm13, %v8600_v17  ;;  %v7147_v34 = vmul.f32 0.1, %v6900_v22  ;;  %vm8019_vm9 = vweird.f32 %v10024_v23  ;;  %v15796_v9 = vadd.f32 %v15680_v2, %v7647_v7  ;;  %vm8023_vm14 = vcmp.eq.f32.partialorder %v8022_v16, 8.507059e+37 }
 0x658   : > { %v7079_v56 = vsel %vm6995_vm1, %v6800_v36, %v7037_v48  ;;  %v8015_v19 = vsub.f32 1.0, %v8014_v43  ;;  %vm8020_vm7 = vmor %vm8018_vm12, %vm8019_vm9  ;;  %v8037_v48 = vand.u32 2147483647, %v15781_v37  ;;  %v8039_v58 = vand.u32 2147483648, %v15781_v37 }
 0x659   : > { %9459 = vmatmul.msk.f32.gmra.mxu0 %vm1949_vm4, %v7079_v56  ;;  %v7189_v29 = vsel %vm7105_vm11, %v6900_v22, %v7147_v34  ;;  %v9468_v10 = vmul.f32 -1.442695, %v15796_v9  ;;  %vm8033_vm6 = vweird.f32 %v15781_v37  ;;  %vm17282_vm11 = vmmov %vm17280_vm13 }
 0x65a   : > { %v8016_v26 = vmul.f32 %v10024_v23, %v8015_v19  ;;  %9400 = vmatmul.msk.f32.gmra.mxu3 %vm1949_vm4, %v7189_v29  ;;  %v10026_v60 = vpop.eup %10025  ;;  %vm8038_vm8 = vcmp.eq.f32.partialorder %v8037_v48, 8.507059e+37 }
 0x65b   : > { %v6802_v40 = vpop.f32.mrf.mxu1  ;;  %v6902_v27 = vpop.f32.mrf.mxu2  ;;  %v8029_v62 = vmul.f32 %v10026_v60, %v15781_v37  ;;  %10029 = vpow2.f32 %v9468_v10  ;;  %vm8034_vm1 = vweird.f32 %v10026_v60 }
 0x65c   : > { %v6803_v41 = vadd.f32 %v15502_v47, %v6802_v40  ;;  %v15792_v47 = vpop.f32.mrf.mxu0  ;;  %v8017_v6 = vadd.f32 %v10024_v23, %v8016_v26  ;;  %v6903_v46 = vadd.f32 %v15804_v51, %v6902_v27  ;;  %v7377_v4 = vpop.f32.mrf.mxu3  ;;  %vm8035_vm0 = vmor %vm8033_vm6, %vm8034_vm1 }
 0x65d   : > { %v10028_v14 = vpop.eup %10027  ;;  %v8030_v24 = vsub.f32 1.0, %v8029_v62  ;;  %v7650_v15 = vadd.f32 %v15643_v30, %v7377_v4  ;;  %v8040_v30 = vor.u32 1.1754944e-38, %v8039_v58 }
 0x65e   : > { %vm6996_vm2 = vcmp.gt.f32.partialorder %v6803_v41, 0.0  ;;  %v7038_v32 = vmul.f32 0.1, %v6803_v41  ;;  %v8021_v36 = vsel %vm8020_vm7, %v10024_v23, %v8017_v6  ;;  %vm7106_vm5 = vcmp.gt.f32.partialorder %v6903_v46, 0.0 }
 0x65f   : > { %v8026_v45 = vsel %vm8023_vm14, %v8025_v31, %v8021_v36  ;;  %v15812_v52 = vadd.f32 1.0, %v10028_v14  ;;  %v7148_v61 = vmul.f32 0.1, %v6903_v46  ;;  %v8031_v25 = vmul.f32 %v10026_v60, %v8030_v24 }
 0x660   : > { %v7080_v21 = vsel %vm6996_vm2, %v6803_v41, %v7038_v32  ;;  %v8601_v39 = vmul.f32 %v8026_v45, %v15726_v8  ;;  %v15826_v35 = vadd.f32 %v15680_v2, %v7650_v15 }
 0x661   : > { %9460 = vmatmul.msk.f32.gmra.mxu0 %vm1949_vm4, %v7080_v21  ;;  %10031 = vrcp.f32 %v15812_v52  ;;  %v7190_v0 = vsel %vm7106_vm5, %v6903_v46, %v7148_v61  ;;  %v8032_v11 = vadd.f32 %v10026_v60, %v8031_v25  ;;  %v10030_v40 = vpop.eup %10029  ;;  %v8052_v7 = vand.u32 2147483647, %v15812_v52  ;;  %vm17283_vm5 = vmmov %vm17282_vm11 }
 0x662   : > { %8643 = vst.msk [vmem:[%s15737_s22 + $0x18] sm:$0xff] %vm17281_vm15, %v8601_v39  ;;  %9401 = vmatmul.msk.f32.gmra.mxu3 %vm1949_vm4, %v7190_v0  ;;  %v15832_v44 = vadd.f32 1.0, %v10030_v40  ;;  %v9469_v37 = vmul.f32 -1.442695, %v15826_v35  ;;  %v8054_v26 = vand.u32 2147483648, %v15812_v52  ;;  %vm8048_vm2 = vweird.f32 %v15812_v52 }
 0x663   : > { %v6805_v59 = vpop.f32.mrf.mxu1  ;;  %v6905_v12 = vpop.f32.mrf.mxu2  ;;  %v8036_v23 = vsel %vm8035_vm0, %v10026_v60, %v8032_v11  ;;  %vm8053_vm7 = vcmp.eq.f32.partialorder %v8052_v7, 8.507059e+37  ;;  %vm17284_vm0 = vmmov %vm17283_vm5 }
 0x664   : > { %v6806_v55 = vadd.f32 %v10262_v18, %v6805_v59  ;;  %v15822_v8 = vpop.f32.mrf.mxu0  ;;  %v6906_v3 = vadd.f32 %v15804_v51, %v6905_v12  ;;  %v7380_v22 = vpop.f32.mrf.mxu3  ;;  %v8041_v41 = vsel %vm8038_vm8, %v8040_v30, %v8036_v23  ;;  %10033 = vrcp.f32 %v15832_v44 }
 0x665   : > { %v7653_v17 = vadd.f32 %v15652_v13, %v7380_v22  ;;  %v8602_v43 = vmul.f32 %v8041_v41, %v15753_v1  ;;  %10035 = vpow2.f32 %v9469_v37  ;;  %v8055_v60 = vor.u32 1.1754944e-38, %v8054_v26 }
 0x666   : > { %vm6997_vm3 = vcmp.gt.f32.partialorder %v6806_v55, 0.0  ;;  %v7039_v54 = vmul.f32 0.1, %v6806_v55  ;;  %vm7107_vm10 = vcmp.gt.f32.partialorder %v6906_v3, 0.0  ;;  %v7149_v28 = vmul.f32 0.1, %v6906_v3 }
 0x667   : > { %v10032_v33 = vpop.eup %10031  ;;  %8644 = vst.msk [vmem:[%s15737_s22 + $0x20] sm:$0xff] %vm17282_vm11, %v8602_v43  ;;  %v15842_v63 = vadd.f32 %v15680_v2, %v7653_v17  ;;  %v8067_v24 = vand.u32 2147483647, %v15832_v44 }
 0x668   : > { %v7081_v56 = vsel %vm6997_vm3, %v6806_v55, %v7039_v54  ;;  %v8044_v19 = vmul.f32 %v10032_v33, %v15812_v52  ;;  %v7191_v34 = vsel %vm7107_vm10, %v6906_v3, %v7149_v28  ;;  %vm8049_vm13 = vweird.f32 %v10032_v33 }
 0x669   : > { %9461 = vmatmul.msk.f32.gmra.mxu0 %vm1949_vm4, %v7081_v56  ;;  %v9470_v1 = vmul.f32 -1.442695, %v15842_v63  ;;  %vm8050_vm12 = vmor %vm8048_vm2, %vm8049_vm13  ;;  %v8069_v52 = vand.u32 2147483648, %v15832_v44  ;;  %vm8063_vm3 = vweird.f32 %v15832_v44  ;;  %vm8068_vm6 = vcmp.eq.f32.partialorder %v8067_v24, 8.507059e+37 }
 0x66a   : > { %v8045_v32 = vsub.f32 1.0, %v8044_v19  ;;  %9402 = vmatmul.msk.f32.gmra.mxu3 %vm1949_vm4, %v7191_v34  ;;  %v10034_v27 = vpop.eup %10033 }
 0x66b   : > { %v6908_v16 = vpop.f32.mrf.mxu2  ;;  %10037 = vpow2.f32 %v9470_v1  ;;  %v10036_v46 = vpop.eup %10035  ;;  %v8059_v31 = vmul.f32 %v10034_v27, %v15832_v44  ;;  %vm8064_vm14 = vweird.f32 %v10034_v27  ;;  %v8070_v15 = vor.u32 1.1754944e-38, %v8069_v52 }
 0x66c   : > { %v8046_v13 = vmul.f32 %v10032_v33, %v8045_v32  ;;  %v6909_v21 = vadd.f32 %v15804_v51, %v6908_v16  ;;  %v7383_v29 = vpop.f32.mrf.mxu3  ;;  %v7933_v55 = vadd.f32 1.0, %v10036_v46  ;;  %vm8065_vm1 = vmor %vm8063_vm3, %vm8064_vm14 }
 0x66d   : > { %v7656_v10 = vadd.f32 %v15661_v42, %v7383_v29  ;;  %v8060_v14 = vsub.f32 1.0, %v8059_v31 }
 0x66e   : > { %v8047_v6 = vadd.f32 %v10032_v33, %v8046_v13  ;;  %vm7108_vm9 = vcmp.gt.f32.partialorder %v6909_v21, 0.0  ;;  %v7150_v59 = vmul.f32 0.1, %v6909_v21  ;;  %10039 = vrcp.f32 %v7933_v55 }
 0x66f   : > { %v15853_v36 = vadd.f32 %v15680_v2, %v7656_v10  ;;  %v8061_v39 = vmul.f32 %v10034_v27, %v8060_v14  ;;  %v8084_v28 = vand.u32 2147483648, %v7933_v55  ;;  %vm8078_vm10 = vweird.f32 %v7933_v55 }
 0x670   : > { %v8051_v18 = vsel %vm8050_vm12, %v10032_v33, %v8047_v6  ;;  %v7192_v62 = vsel %vm7108_vm9, %v6909_v21, %v7150_v59 }
 0x671   : > { %v8056_v4 = vsel %vm8053_vm7, %v8055_v60, %v8051_v18  ;;  %v9471_v42 = vmul.f32 -1.442695, %v15853_v36  ;;  %v10038_v61 = vpop.eup %10037  ;;  %v8062_v58 = vadd.f32 %v10034_v27, %v8061_v39  ;;  %v8085_v26 = vor.u32 1.1754944e-38, %v8084_v28  ;;  %vm17285_vm7 = vmmov %vm17284_vm0 }
 0x672   : > { %v8603_v45 = vmul.f32 %v8056_v4, %v15776_v38  ;;  %9403 = vmatmul.msk.f32.gmra.mxu3 %vm1949_vm4, %v7192_v62  ;;  %v15864_v38 = vadd.f32 1.0, %v10038_v61 }
 0x673   : > { %v6911_v54 = vpop.f32.mrf.mxu2  ;;  %10041 = vpow2.f32 %v9471_v42  ;;  %v8066_v12 = vsel %vm8065_vm1, %v10034_v27, %v8062_v58 }
 0x674   : > { %8645 = vst.msk [vmem:[%s15737_s22 + $0x28] sm:$0xff] %vm17283_vm5, %v8603_v45  ;;  %v6912_v48 = vadd.f32 %v15804_v51, %v6911_v54  ;;  %v7386_v25 = vpop.f32.mrf.mxu3  ;;  %10043 = vrcp.f32 %v15864_v38  ;;  %v10040_v11 = vpop.eup %10039  ;;  %v8071_v3 = vsel %vm8068_vm6, %v8070_v15, %v8066_v12  ;;  %v8097_v29 = vand.u32 2147483647, %v15864_v38 }
 0x675   : > { %v7659_v0 = vadd.f32 %v15673_v57, %v7386_v25  ;;  %v8604_v30 = vmul.f32 %v8071_v3, %v15796_v9  ;;  %v8074_v22 = vmul.f32 %v10040_v11, %v7933_v55  ;;  %v8082_v57 = vand.u32 2147483647, %v7933_v55 }
 0x676   : > { %vm7109_vm15 = vcmp.gt.f32.partialorder %v6912_v48, 0.0  ;;  %v7151_v56 = vmul.f32 0.1, %v6912_v48  ;;  %vm8079_vm8 = vweird.f32 %v10040_v11  ;;  %v8099_v27 = vand.u32 2147483648, %v15864_v38 }
 0x677   : > { %v15869_v40 = vadd.f32 %v15680_v2, %v7659_v0  ;;  %8646 = vst.msk [vmem:[%s15737_s22 + $0x30] sm:$0xff] %vm17284_vm0, %v8604_v30  ;;  %v8075_v33 = vsub.f32 1.0, %v8074_v22  ;;  %vm8083_vm11 = vcmp.eq.f32.partialorder %v8082_v57, 8.507059e+37  ;;  %vm8080_vm2 = vmor %vm8078_vm10, %vm8079_vm8  ;;  %vm8093_vm12 = vweird.f32 %v15864_v38 }
 0x678   : > { %v7193_v23 = vsel %vm7109_vm15, %v6912_v48, %v7151_v56  ;;  %v8100_v45 = vor.u32 1.1754944e-38, %v8099_v27  ;;  %vm8098_vm5 = vcmp.eq.f32.partialorder %v8097_v29, 8.507059e+37  ;;  %vm17286_vm15 = vmmov %vm17284_vm0 }
 0x679   : > { %v9472_v44 = vmul.f32 -1.442695, %v15869_v40  ;;  %v10042_v37 = vpop.eup %10041  ;;  %v8076_v9 = vmul.f32 %v10040_v11, %v8075_v33 }
 0x67a   : > { %v15875_v17 = vadd.f32 1.0, %v10042_v37  ;;  %9404 = vmatmul.msk.f32.gmra.mxu3 %vm1949_vm4, %v7193_v23  ;;  %v10044_v19 = vpop.eup %10043 }
 0x67b   : > { %v6914_v41 = vpop.f32.mrf.mxu2  ;;  %10045 = vpow2.f32 %v9472_v44  ;;  %v8089_v34 = vmul.f32 %v10044_v19, %v15864_v38  ;;  %v8077_v7 = vadd.f32 %v10040_v11, %v8076_v9  ;;  %vm8094_vm9 = vweird.f32 %v10044_v19  ;;  %v15902_v38 = vpop.f32.mrf.mxu0 }
 0x67c   : > { %v6915_v43 = vadd.f32 %v15804_v51, %v6914_v41  ;;  %v7389_v32 = vpop.f32.mrf.mxu3  ;;  %10047 = vrcp.f32 %v15875_v17  ;;  %vm8095_vm14 = vmor %vm8093_vm12, %vm8094_vm9  ;;  %v8114_v48 = vand.u32 2147483648, %v15875_v17  ;;  %v8112_v15 = vand.u32 2147483647, %v15875_v17 }
 0x67d   : > { %v8090_v16 = vsub.f32 1.0, %v8089_v34  ;;  %v7662_v1 = vadd.f32 %v15690_v49, %v7389_v32  ;;  %v8081_v21 = vsel %vm8080_vm2, %v10040_v11, %v8077_v7  ;;  %vm8108_vm6 = vweird.f32 %v15875_v17 }
 0x67e   : > { %vm7110_vm13 = vcmp.gt.f32.partialorder %v6915_v43, 0.0  ;;  %v7152_v13 = vmul.f32 0.1, %v6915_v43  ;;  %v8086_v59 = vsel %vm8083_vm11, %v8085_v26, %v8081_v21  ;;  %vm8113_vm8 = vcmp.eq.f32.partialorder %v8112_v15, 8.507059e+37 }
 0x67f   : > { %v8091_v46 = vmul.f32 %v10044_v19, %v8090_v16  ;;  %v15885_v60 = vadd.f32 %v15680_v2, %v7662_v1  ;;  %v8605_v10 = vmul.f32 %v8086_v59, %v15826_v35 }
 0x680   : > { %v7194_v31 = vsel %vm7110_vm13, %v6915_v43, %v7152_v13  ;;  %vm17287_vm13 = vmmov %vm17285_vm7 }
 0x681   : > { %v10046_v6 = vpop.eup %10045  ;;  %v8092_v4 = vadd.f32 %v10044_v19, %v8091_v46  ;;  %v9473_v14 = vmul.f32 -1.442695, %v15885_v60  ;;  %8647 = vst.msk [vmem:[%s15737_s22 + $0x38] sm:$0xff] %vm17285_vm7, %v8605_v10 }
 0x682   : > { %v15888_v18 = vadd.f32 1.0, %v10046_v6  ;;  %v10048_v49 = vpop.eup %10047  ;;  %9405 = vmatmul.msk.f32.gmra.mxu3 %vm1949_vm4, %v7194_v31 }
 0x683   : > { %v6917_v55 = vpop.f32.mrf.mxu2  ;;  %v8104_v35 = vmul.f32 %v10048_v49, %v15875_v17  ;;  %v8096_v39 = vsel %vm8095_vm14, %v10044_v19, %v8092_v4  ;;  %vm8109_vm1 = vweird.f32 %v10048_v49 }
 0x684   : > { %v6918_v62 = vadd.f32 %v15804_v51, %v6917_v55  ;;  %10049 = vrcp.f32 %v15888_v18  ;;  %v7392_v52 = vpop.f32.mrf.mxu3  ;;  %v8101_v24 = vsel %vm8098_vm5, %v8100_v45, %v8096_v39  ;;  %vm8110_vm0 = vmor %vm8108_vm6, %vm8109_vm1  ;;  %v8127_v28 = vand.u32 2147483647, %v15888_v18 }
 0x685   : > { %10051 = vpow2.f32 %v9473_v14  ;;  %v8105_v42 = vsub.f32 1.0, %v8104_v35  ;;  %v8606_v61 = vmul.f32 %v8101_v24, %v15842_v63  ;;  %v7665_v58 = vadd.f32 %v15703_v5, %v7392_v52 }
 0x686   : > { %vm7111_vm3 = vcmp.gt.f32.partialorder %v6918_v62, 0.0  ;;  %v7153_v54 = vmul.f32 0.1, %v6918_v62  ;;  %v8115_v5 = vor.u32 1.1754944e-38, %v8114_v48  ;;  %v8129_v43 = vand.u32 2147483648, %v15888_v18 }
 0x687   : > { %v8106_v25 = vmul.f32 %v10048_v49, %v8105_v42  ;;  %8648 = vst.msk [vmem:[%s15737_s22 + $0x40] sm:$0xff] %vm17286_vm15, %v8606_v61  ;;  %v15908_v0 = vadd.f32 %v15680_v2, %v7665_v58  ;;  %vm8123_vm2 = vweird.f32 %v15888_v18  ;;  %vm8128_vm12 = vcmp.eq.f32.partialorder %v8127_v28, 8.507059e+37 }
 0x688   : > { %v7195_v56 = vsel %vm7111_vm3, %v6918_v62, %v7153_v54  ;;  %v8130_v16 = vor.u32 1.1754944e-38, %v8129_v43 }
 0x689   : > { %v8107_v11 = vadd.f32 %v10048_v49, %v8106_v25  ;;  %v9474_v22 = vmul.f32 -1.442695, %v15908_v0 }
 0x68a   : > { %v10050_v12 = vpop.eup %10049  ;;  %9406 = vmatmul.msk.f32.gmra.mxu3 %vm1949_vm4, %v7195_v56 }
 0x68b   : > { %v6920_v63 = vpop.f32.mrf.mxu2  ;;  %v10052_v3 = vpop.eup %10051  ;;  %v8119_v30 = vmul.f32 %v10050_v12, %v15888_v18  ;;  %v8111_v44 = vsel %vm8110_vm0, %v10048_v49, %v8107_v11  ;;  %10053 = vpow2.f32 %v9474_v22  ;;  %vm8124_vm11 = vweird.f32 %v10050_v12  ;;  %vm17288_vm0 = vmmov %vm17285_vm7 }
 0x68c   : > { %v6921_v23 = vadd.f32 %v15804_v51, %v6920_v63  ;;  %v15915_v37 = vadd.f32 1.0, %v10052_v3  ;;  %v7395_v33 = vpop.f32.mrf.mxu3  ;;  %v8116_v57 = vsel %vm8113_vm8, %v8115_v5, %v8111_v44  ;;  %vm8125_vm9 = vmor %vm8123_vm2, %vm8124_vm11 }
 0x68d   : > { %v8120_v41 = vsub.f32 1.0, %v8119_v30  ;;  %v8607_v17 = vmul.f32 %v8116_v57, %v15853_v36  ;;  %v7668_v32 = vadd.f32 %v15717_v20, %v7395_v33  ;;  %v15928_v36 = vpop.f32.mrf.mxu0 }
 0x68e   : > { %10055 = vrcp.f32 %v15915_v37  ;;  %vm7112_vm10 = vcmp.gt.f32.partialorder %v6921_v23, 0.0  ;;  %v7154_v9 = vmul.f32 0.1, %v6921_v23  ;;  %v8142_v4 = vand.u32 2147483647, %v15915_v37 }
 0x68f   : > { %v8121_v19 = vmul.f32 %v10050_v12, %v8120_v41  ;;  %8649 = vst.msk [vmem:[%s15737_s22 + $0x48] sm:$0xff] %vm17287_vm13, %v8607_v17  ;;  %v15926_v7 = vadd.f32 %v15680_v2, %v7668_v32  ;;  %v8144_v14 = vand.u32 2147483648, %v15915_v37  ;;  %vm8138_vm3 = vweird.f32 %v15915_v37 }
 0x690   : > { %v7196_v26 = vsel %vm7112_vm10, %v6921_v23, %v7154_v9  ;;  %vm8143_vm15 = vcmp.eq.f32.partialorder %v8142_v4, 8.507059e+37 }
 0x691   : > { %v8122_v34 = vadd.f32 %v10050_v12, %v8121_v19  ;;  %v10054_v1 = vpop.eup %10053  ;;  %v9475_v20 = vmul.f32 -1.442695, %v15926_v7  ;;  %v8145_v61 = vor.u32 1.1754944e-38, %v8144_v14 }
 0x692   : > { %9407 = vmatmul.msk.f32.gmra.mxu3 %vm1949_vm4, %v7196_v26  ;;  %v7938_v59 = vadd.f32 1.0, %v10054_v1 }
 0x693   : > { %v6923_v13 = vpop.f32.mrf.mxu2  ;;  %v8126_v21 = vsel %vm8125_vm9, %v10050_v12, %v8122_v34  ;;  %10057 = vpow2.f32 %v9475_v20  ;;  %vm17289_vm9 = vmmov %vm17288_vm0 }
 0x694   : > { %v6924_v29 = vadd.f32 %v15804_v51, %v6923_v13  ;;  %v10056_v27 = vpop.eup %10055  ;;  %v8131_v6 = vsel %vm8128_vm12, %v8130_v16, %v8126_v21  ;;  %v7398_v46 = vpop.f32.mrf.mxu3  ;;  %10059 = vrcp.f32 %v7938_v59  ;;  %v8159_v63 = vand.u32 2147483648, %v7938_v59 }
 0x695   : > { %v8608_v31 = vmul.f32 %v8131_v6, %v15869_v40  ;;  %v8134_v10 = vmul.f32 %v10056_v27, %v15915_v37  ;;  %v7671_v49 = vadd.f32 %v15744_v53, %v7398_v46  ;;  %vm8139_vm5 = vweird.f32 %v10056_v27  ;;  %v15947_v54 = vpop.f32.mrf.mxu0 }
 0x696   : > { %vm7113_vm14 = vcmp.gt.f32.partialorder %v6924_v29, 0.0  ;;  %v7155_v55 = vmul.f32 0.1, %v6924_v29  ;;  %vm8140_vm1 = vmor %vm8138_vm3, %vm8139_vm5  ;;  %v8157_v22 = vand.u32 2147483647, %v7938_v59  ;;  %vm8153_vm10 = vweird.f32 %v7938_v59 }
 0x697   : > { %8650 = vst.msk [vmem:[%s15737_s22 + $0x50] sm:$0xff] %vm17285_vm7, %v8608_v31  ;;  %v8135_v18 = vsub.f32 1.0, %v8134_v10  ;;  %v15941_v45 = vadd.f32 %v15680_v2, %v7671_v49 }
 0x698   : > { %v7197_v40 = vsel %vm7113_vm14, %v6924_v29, %v7155_v55  ;;  %vm8158_vm13 = vcmp.eq.f32.partialorder %v8157_v22, 8.507059e+37 }
 0x699   : > { %v8136_v62 = vmul.f32 %v10056_v27, %v8135_v18  ;;  %v10058_v52 = vpop.eup %10057  ;;  %v9476_v24 = vmul.f32 -1.442695, %v15941_v45 }
 0x69a   : > { %9408 = vmatmul.msk.f32.gmra.mxu3 %vm1949_vm4, %v7197_v40  ;;  %v10060_v42 = vpop.eup %10059  ;;  %v15949_v48 = vadd.f32 1.0, %v10058_v52 }
 0x69b   : > { %v6926_v35 = vpop.f32.mrf.mxu2  ;;  %v8137_v39 = vadd.f32 %v10056_v27, %v8136_v62  ;;  %v8149_v15 = vmul.f32 %v10060_v42, %v7938_v59  ;;  %10061 = vpow2.f32 %v9476_v24  ;;  %vm8154_vm8 = vweird.f32 %v10060_v42 }
 0x69c   : > { %v6927_v53 = vadd.f32 %v15804_v51, %v6926_v35  ;;  %v7401_v58 = vpop.f32.mrf.mxu3  ;;  %10063 = vrcp.f32 %v15949_v48  ;;  %vm8155_vm11 = vmor %vm8153_vm10, %vm8154_vm8  ;;  %v8174_v13 = vand.u32 2147483648, %v15949_v48  ;;  %v8172_v29 = vand.u32 2147483647, %v15949_v48 }
 0x69d   : > { %v8141_v25 = vsel %vm8140_vm1, %v10056_v27, %v8137_v39  ;;  %v8150_v11 = vsub.f32 1.0, %v8149_v15  ;;  %v7674_v5 = vadd.f32 %v15769_v50, %v7401_v58  ;;  %v8160_v50 = vor.u32 1.1754944e-38, %v8159_v63  ;;  %v15965_v32 = vpop.f32.mrf.mxu0  ;;  %vm17290_vm1 = vmmov %vm17288_vm0 }
 0x69e   : > { %v8146_v56 = vsel %vm8143_vm15, %v8145_v61, %v8141_v25  ;;  %vm7114_vm6 = vcmp.gt.f32.partialorder %v6927_v53, 0.0  ;;  %v7156_v3 = vmul.f32 0.1, %v6927_v53  ;;  %vm8168_vm7 = vweird.f32 %v15949_v48  ;;  %v15996_v61 = vld [vmem:[%s16294_s14] ss:$0 sm:$0xff] }
 0x69f   : > { %v8609_v12 = vmul.f32 %v8146_v56, %v15885_v60  ;;  %v8151_v30 = vmul.f32 %v10060_v42, %v8150_v11  ;;  %v15957_v23 = vadd.f32 %v15680_v2, %v7674_v5  ;;  %vm8173_vm5 = vcmp.eq.f32.partialorder %v8172_v29, 8.507059e+37 }
 0x6a0   : > { %v7198_v44 = vsel %vm7114_vm6, %v6927_v53, %v7156_v3 }
 0x6a1   : > { %8651 = vst.msk [vmem:[%s15737_s22 + $0x58] sm:$0xff] %vm17288_vm0, %v8609_v12  ;;  %v10062_v33 = vpop.eup %10061  ;;  %v8152_v57 = vadd.f32 %v10060_v42, %v8151_v30  ;;  %v9477_v17 = vmul.f32 -1.442695, %v15957_v23 }
 0x6a2   : > { %9409 = vmatmul.msk.f32.gmra.mxu3 %vm1949_vm4, %v7198_v44  ;;  %v10064_v41 = vpop.eup %10063  ;;  %v15961_v28 = vadd.f32 1.0, %v10062_v33 }
 0x6a3   : > { %v6929_v37 = vpop.f32.mrf.mxu2  ;;  %v8156_v19 = vsel %vm8155_vm11, %v10060_v42, %v8152_v57  ;;  %v8164_v9 = vmul.f32 %v10064_v41, %v15949_v48  ;;  %vm8169_vm12 = vweird.f32 %v10064_v41  ;;  %vm17291_vm11 = vmmov %vm17290_vm1 }
 0x6a4   : > { %v6930_v60 = vadd.f32 %v15804_v51, %v6929_v37  ;;  %v7404_v43 = vpop.f32.mrf.mxu3  ;;  %v8161_v34 = vsel %vm8158_vm13, %v8160_v50, %v8156_v19  ;;  %10065 = vrcp.f32 %v15961_v28  ;;  %vm8170_vm14 = vmor %vm8168_vm7, %vm8169_vm12  ;;  %v8187_v24 = vand.u32 2147483647, %v15961_v28 }
 0x6a5   : > { %v8610_v26 = vmul.f32 %v8161_v34, %v15908_v0  ;;  %v8165_v16 = vsub.f32 1.0, %v8164_v9  ;;  %10067 = vpow2.f32 %v9477_v17  ;;  %v7677_v21 = vadd.f32 %v15792_v47, %v7404_v43  ;;  %v15986_v39 = vpop.f32.mrf.mxu0 }
 0x6a6   : > { %vm7115_vm2 = vcmp.gt.f32.partialorder %v6930_v60, 0.0  ;;  %v7157_v1 = vmul.f32 0.1, %v6930_v60  ;;  %v8175_v47 = vor.u32 1.1754944e-38, %v8174_v13  ;;  %v8189_v53 = vand.u32 2147483648, %v15961_v28 }
 0x6a7   : > { %8652 = vst.msk [vmem:[%s15737_s22 + $0x60] sm:$0xff] %vm17289_vm9, %v8610_v26  ;;  %v8166_v20 = vmul.f32 %v10064_v41, %v8165_v16  ;;  %v15975_v27 = vadd.f32 %v15680_v2, %v7677_v21  ;;  %vm8183_vm6 = vweird.f32 %v15961_v28  ;;  %vm8188_vm8 = vcmp.eq.f32.partialorder %v8187_v24, 8.507059e+37 }
 0x6a8   : > { %v7199_v6 = vsel %vm7115_vm2, %v6930_v60, %v7157_v1  ;;  %v8190_v12 = vor.u32 1.1754944e-38, %v8189_v53 }
 0x6a9   : > { %v8167_v0 = vadd.f32 %v10064_v41, %v8166_v20  ;;  %v9478_v10 = vmul.f32 -1.442695, %v15975_v27 }
 0x6aa   : > { %9410 = vmatmul.msk.f32.gmra.mxu3 %vm1949_vm4, %v7199_v6  ;;  %v10066_v31 = vpop.eup %10065 }
 0x6ab   : > { %v6932_v59 = vpop.f32.mrf.mxu2  ;;  %v10068_v55 = vpop.eup %10067  ;;  %v8171_v49 = vsel %vm8170_vm14, %v10064_v41, %v8167_v0  ;;  %v8179_v2 = vmul.f32 %v10066_v31, %v15961_v28  ;;  %10069 = vpow2.f32 %v9478_v10  ;;  %vm8184_vm15 = vweird.f32 %v10066_v31 }
 0x6ac   : > { %v6933_v46 = vadd.f32 %v15804_v51, %v6932_v59  ;;  %v7407_v18 = vpop.f32.mrf.mxu3  ;;  %v8176_v4 = vsel %vm8173_vm5, %v8175_v47, %v8171_v49  ;;  %v15982_v14 = vadd.f32 1.0, %v10068_v55  ;;  %vm8185_vm0 = vmor %vm8183_vm6, %vm8184_vm15 }
 0x6ad   : > { %v8611_v40 = vmul.f32 %v8176_v4, %v15926_v7  ;;  %v8180_v35 = vsub.f32 1.0, %v8179_v2  ;;  %v7680_v52 = vadd.f32 %v15822_v8, %v7407_v18  ;;  %v16017_v50 = vpop.f32.mrf.mxu0  ;;  %vm17292_vm5 = vmmov %vm17290_vm1 }
 0x6ae   : > { %vm7116_vm3 = vcmp.gt.f32.partialorder %v6933_v46, 0.0  ;;  %v7158_v62 = vmul.f32 0.1, %v6933_v46  ;;  %10071 = vrcp.f32 %v15982_v14  ;;  %v8204_v28 = vand.u32 2147483648, %v15982_v14 }
 0x6af   : > { %8653 = vst.msk [vmem:[%s15737_s22 + $0x68] sm:$0xff] %vm17290_vm1, %v8611_v40  ;;  %v8181_v42 = vmul.f32 %v10066_v31, %v8180_v35  ;;  %v15999_v7 = vadd.f32 %v15996_v61, %v7680_v52  ;;  %v8202_v19 = vand.u32 2147483647, %v15982_v14  ;;  %vm8198_vm2 = vweird.f32 %v15982_v14 }
 0x6b0   : > { %v7200_v8 = vsel %vm7116_vm3, %v6933_v46, %v7158_v62  ;;  %v8205_v20 = vor.u32 1.1754944e-38, %v8204_v28 }
 0x6b1   : > { %v8182_v58 = vadd.f32 %v10066_v31, %v8181_v42  ;;  %v9479_v25 = vmul.f32 -1.442695, %v15999_v7  ;;  %v10070_v56 = vpop.eup %10069  ;;  %vm8203_vm7 = vcmp.eq.f32.partialorder %v8202_v19, 8.507059e+37 }
 0x6b2   : > { %9411 = vmatmul.msk.f32.gmra.mxu3 %vm1949_vm4, %v7200_v8  ;;  %v16006_v3 = vadd.f32 1.0, %v10070_v56 }
 0x6b3   : > { %v6935_v48 = vpop.f32.mrf.mxu2  ;;  %v8186_v63 = vsel %vm8185_vm0, %v10066_v31, %v8182_v58  ;;  %10073 = vpow2.f32 %v9479_v25 }
 0x6b4   : > { %v6936_v15 = vadd.f32 %v15804_v51, %v6935_v48  ;;  %v7410_v11 = vpop.f32.mrf.mxu3  ;;  %v10072_v5 = vpop.eup %10071  ;;  %v8191_v30 = vsel %vm8188_vm8, %v8190_v12, %v8186_v63  ;;  %10075 = vrcp.f32 %v16006_v3  ;;  %v8219_v10 = vand.u32 2147483648, %v16006_v3  ;;  %vm17293_vm8 = vmmov %vm17292_vm5 }
 0x6b5   : > { %v7683_v44 = vadd.f32 %v15902_v38, %v7410_v11  ;;  %v8612_v37 = vmul.f32 %v8191_v30, %v15941_v45  ;;  %v8194_v33 = vmul.f32 %v10072_v5, %v15982_v14  ;;  %vm8199_vm13 = vweird.f32 %v10072_v5  ;;  %v16043_v62 = vpop.f32.mrf.mxu0 }
 0x6b6   : > { %vm7117_vm10 = vcmp.gt.f32.partialorder %v6936_v15, 0.0  ;;  %v7159_v22 = vmul.f32 0.1, %v6936_v15  ;;  %vm8200_vm12 = vmor %vm8198_vm2, %vm8199_vm13  ;;  %v8217_v49 = vand.u32 2147483647, %v16006_v3  ;;  %vm8213_vm3 = vweird.f32 %v16006_v3 }
 0x6b7   : > { %v16013_v57 = vadd.f32 %v15996_v61, %v7683_v44  ;;  %8654 = vst.msk [vmem:[%s15737_s22 + $0x70] sm:$0xff] %vm17291_vm11, %v8612_v37  ;;  %v8195_v60 = vsub.f32 1.0, %v8194_v33  ;;  %v8220_v35 = vor.u32 1.1754944e-38, %v8219_v10 }
 0x6b8   : > { %v7201_v41 = vsel %vm7117_vm10, %v6936_v15, %v7159_v22  ;;  %vm8218_vm15 = vcmp.eq.f32.partialorder %v8217_v49, 8.507059e+37 }
 0x6b9   : > { %v9480_v17 = vmul.f32 -1.442695, %v16013_v57  ;;  %v10074_v43 = vpop.eup %10073  ;;  %v8196_v45 = vmul.f32 %v10072_v5, %v8195_v60 }
 0x6ba   : > { %9412 = vmatmul.msk.f32.gmra.mxu3 %vm1949_vm4, %v7201_v41  ;;  %v16025_v34 = vadd.f32 1.0, %v10074_v43  ;;  %v10076_v16 = vpop.eup %10075 }
 0x6bb   : > { %v6938_v38 = vpop.f32.mrf.mxu2  ;;  %10077 = vpow2.f32 %v9480_v17  ;;  %v8197_v13 = vadd.f32 %v10072_v5, %v8196_v45  ;;  %v8209_v29 = vmul.f32 %v10076_v16, %v16006_v3  ;;  %vm8214_vm14 = vweird.f32 %v10076_v16 }
 0x6bc   : > { %v6939_v9 = vadd.f32 %v15804_v51, %v6938_v38  ;;  %v7413_v26 = vpop.f32.mrf.mxu3  ;;  %10079 = vrcp.f32 %v16025_v34  ;;  %vm8215_vm1 = vmor %vm8213_vm3, %vm8214_vm14  ;;  %v8232_v15 = vand.u32 2147483647, %v16025_v34  ;;  %v8234_v56 = vand.u32 2147483648, %v16025_v34 }
 0x6bd   : > { %v7686_v21 = vadd.f32 %v15928_v36, %v7413_v26  ;;  %v8201_v6 = vsel %vm8200_vm12, %v10072_v5, %v8197_v13  ;;  %v8210_v46 = vsub.f32 1.0, %v8209_v29  ;;  %vm8228_vm10 = vweird.f32 %v16025_v34  ;;  %v16065_v28 = vpop.f32.mrf.mxu0  ;;  %vm17294_vm12 = vmmov %vm17292_vm5 }
 0x6be   : > { %vm7118_vm9 = vcmp.gt.f32.partialorder %v6939_v9, 0.0  ;;  %v7160_v1 = vmul.f32 0.1, %v6939_v9  ;;  %v8206_v0 = vsel %vm8203_vm7, %v8205_v20, %v8201_v6  ;;  %v8235_v37 = vor.u32 1.1754944e-38, %v8234_v56 }
 0x6bf   : > { %v16031_v59 = vadd.f32 %v15996_v61, %v7686_v21  ;;  %v8613_v47 = vmul.f32 %v8206_v0, %v15957_v23  ;;  %v8211_v55 = vmul.f32 %v10076_v16, %v8210_v46  ;;  %vm8233_vm13 = vcmp.eq.f32.partialorder %v8232_v15, 8.507059e+37 }
 0x6c0   : > { %v7202_v31 = vsel %vm7118_vm9, %v6939_v9, %v7160_v1 }
 0x6c1   : > { %v9481_v36 = vmul.f32 -1.442695, %v16031_v59  ;;  %v10078_v18 = vpop.eup %10077  ;;  %8655 = vst.msk [vmem:[%s15737_s22 + $0x78] sm:$0xff] %vm17292_vm5, %v8613_v47  ;;  %v8212_v40 = vadd.f32 %v10076_v16, %v8211_v55 }
 0x6c2   : > { %v16039_v4 = vadd.f32 1.0, %v10078_v18  ;;  %9413 = vmatmul.msk.f32.gmra.mxu3 %vm1949_vm4, %v7202_v31  ;;  %v10080_v23 = vpop.eup %10079 }
 0x6c3   : > { %v6941_v2 = vpop.f32.mrf.mxu2  ;;  %10081 = vpow2.f32 %v9481_v36  ;;  %v8224_v52 = vmul.f32 %v10080_v23, %v16025_v34  ;;  %v8216_v53 = vsel %vm8215_vm1, %v10076_v16, %v8212_v40  ;;  %vm8229_vm0 = vweird.f32 %v10080_v23 }
 0x6c4   : > { %v6942_v14 = vadd.f32 %v15804_v51, %v6941_v2  ;;  %10083 = vrcp.f32 %v16039_v4  ;;  %v7416_v24 = vpop.f32.mrf.mxu3  ;;  %v8221_v42 = vsel %vm8218_vm15, %v8220_v35, %v8216_v53  ;;  %vm8230_vm11 = vmor %vm8228_vm10, %vm8229_vm0  ;;  %v8249_v19 = vand.u32 2147483648, %v16039_v4 }
 0x6c5   : > { %v8225_v8 = vsub.f32 1.0, %v8224_v52  ;;  %v7689_v58 = vadd.f32 %v15947_v54, %v7416_v24  ;;  %v8614_v25 = vmul.f32 %v8221_v42, %v15975_v27  ;;  %v8247_v26 = vand.u32 2147483647, %v16039_v4  ;;  %vm17295_vm15 = vmmov %vm17293_vm8 }
 0x6c6   : > { %vm7119_vm6 = vcmp.gt.f32.partialorder %v6942_v14, 0.0  ;;  %v7161_v48 = vmul.f32 0.1, %v6942_v14  ;;  %vm8243_vm7 = vweird.f32 %v16039_v4  ;;  %v8250_v29 = vor.u32 1.1754944e-38, %v8249_v19  ;;  %vm17296_vm10 = vmmov %vm17294_vm12 }
 0x6c7   : > { %v8226_v11 = vmul.f32 %v10080_v23, %v8225_v8  ;;  %v16053_v63 = vadd.f32 %v15996_v61, %v7689_v58  ;;  %8656 = vst.msk [vmem:[%s15737_s22 + $0x80] sm:$0xff] %vm17293_vm8, %v8614_v25  ;;  %vm8248_vm5 = vcmp.eq.f32.partialorder %v8247_v26, 8.507059e+37 }
 0x6c8   : > { %v7203_v3 = vsel %vm7119_vm6, %v6942_v14, %v7161_v48 }
 0x6c9   : > { %v10082_v12 = vpop.eup %10081  ;;  %v8227_v54 = vadd.f32 %v10080_v23, %v8226_v11  ;;  %v9482_v27 = vmul.f32 -1.442695, %v16053_v63 }
 0x6ca   : > { %v16057_v5 = vadd.f32 1.0, %v10082_v12  ;;  %v10084_v22 = vpop.eup %10083  ;;  %9414 = vmatmul.msk.f32.gmra.mxu3 %vm1949_vm4, %v7203_v3 }
 0x6cb   : > { %v6944_v30 = vpop.f32.mrf.mxu2  ;;  %v8239_v33 = vmul.f32 %v10084_v22, %v16039_v4  ;;  %v8231_v60 = vsel %vm8230_vm11, %v10080_v23, %v8227_v54  ;;  %vm8244_vm9 = vweird.f32 %v10084_v22  ;;  %v16088_v23 = vpop.f32.mrf.mxu0 }
 0x6cc   : > { %v6945_v44 = vadd.f32 %v15804_v51, %v6944_v30  ;;  %10085 = vrcp.f32 %v16057_v5  ;;  %v7419_v41 = vpop.f32.mrf.mxu3  ;;  %v8236_v17 = vsel %vm8233_vm13, %v8235_v37, %v8231_v60  ;;  %vm8245_vm14 = vmor %vm8243_vm7, %vm8244_vm9  ;;  %v8262_v36 = vand.u32 2147483647, %v16057_v5 }
 0x6cd   : > { %10087 = vpow2.f32 %v9482_v27  ;;  %v8240_v38 = vsub.f32 1.0, %v8239_v33  ;;  %v8615_v45 = vmul.f32 %v8236_v17, %v15999_v7  ;;  %v7692_v9 = vadd.f32 %v15965_v32, %v7419_v41 }
 0x6ce   : > { %vm7120_vm2 = vcmp.gt.f32.partialorder %v6945_v44, 0.0  ;;  %v7162_v43 = vmul.f32 0.1, %v6945_v44  ;;  %v8264_v55 = vand.u32 2147483648, %v16057_v5  ;;  %vm8258_vm6 = vweird.f32 %v16057_v5 }
 0x6cf   : > { %v8241_v34 = vmul.f32 %v10084_v22, %v8240_v38  ;;  %8657 = vst.msk [vmem:[%s15737_s22 + $0x88] sm:$0xff] %vm17294_vm12, %v8615_v45  ;;  %v16074_v13 = vadd.f32 %v15996_v61, %v7692_v9  ;;  %vm8263_vm8 = vcmp.eq.f32.partialorder %v8262_v36, 8.507059e+37 }
 0x6d0   : > { %v7204_v16 = vsel %vm7120_vm2, %v6945_v44, %v7162_v43  ;;  %v8265_v52 = vor.u32 1.1754944e-38, %v8264_v55 }
 0x6d1   : > { %v8242_v21 = vadd.f32 %v10084_v22, %v8241_v34  ;;  %v9483_v6 = vmul.f32 -1.442695, %v16074_v13 }
 0x6d2   : > { %v10086_v1 = vpop.eup %10085  ;;  %9415 = vmatmul.msk.f32.gmra.mxu3 %vm1949_vm4, %v7204_v16 }
 0x6d3   : > { %v6947_v20 = vpop.f32.mrf.mxu2  ;;  %v10088_v7 = vpop.eup %10087  ;;  %v8254_v32 = vmul.f32 %v10086_v1, %v16057_v5  ;;  %v8246_v46 = vsel %vm8245_vm14, %v10084_v22, %v8242_v21  ;;  %10089 = vpow2.f32 %v9483_v6  ;;  %vm8259_vm1 = vweird.f32 %v10086_v1  ;;  %vm17297_vm14 = vmmov %vm17296_vm10 }
 0x6d4   : > { %v6948_v0 = vadd.f32 %v15804_v51, %v6947_v20  ;;  %v16081_v31 = vadd.f32 1.0, %v10088_v7  ;;  %v8251_v47 = vsel %vm8248_vm5, %v8250_v29, %v8246_v46  ;;  %v7422_v49 = vpop.f32.mrf.mxu3  ;;  %vm8260_vm0 = vmor %vm8258_vm6, %vm8259_vm1  ;;  %v16109_v27 = vpop.f32.mrf.mxu0 }
 0x6d5   : > { %v8255_v10 = vsub.f32 1.0, %v8254_v32  ;;  %v8616_v18 = vmul.f32 %v8251_v47, %v16013_v57  ;;  %v7695_v14 = vadd.f32 %v15986_v39, %v7422_v49 }
 0x6d6   : > { %10091 = vrcp.f32 %v16081_v31  ;;  %vm7121_vm3 = vcmp.gt.f32.partialorder %v6948_v0, 0.0  ;;  %v7163_v4 = vmul.f32 0.1, %v6948_v0  ;;  %v8277_v30 = vand.u32 2147483647, %v16081_v31 }
 0x6d7   : > { %v8256_v2 = vmul.f32 %v10086_v1, %v8255_v10  ;;  %8658 = vst.msk [vmem:[%s15737_s22 + $0x90] sm:$0xff] %vm17295_vm15, %v8616_v18  ;;  %v16094_v57 = vadd.f32 %v15996_v61, %v7695_v14  ;;  %vm8273_vm2 = vweird.f32 %v16081_v31 }
 0x6d8   : > { %v7205_v35 = vsel %vm7121_vm3, %v6948_v0, %v7163_v4  ;;  %vm8278_vm12 = vcmp.eq.f32.partialorder %v8277_v30, 8.507059e+37 }
 0x6d9   : > { %v8257_v40 = vadd.f32 %v10086_v1, %v8256_v2  ;;  %v10090_v53 = vpop.eup %10089  ;;  %v9484_v39 = vmul.f32 -1.442695, %v16094_v57 }
 0x6da   : > { %9416 = vmatmul.msk.f32.gmra.mxu3 %vm1949_vm4, %v7205_v35  ;;  %v7947_v25 = vadd.f32 1.0, %v10090_v53 }
 0x6db   : > { %v6950_v24 = vpop.f32.mrf.mxu2  ;;  %v8261_v42 = vsel %vm8260_vm0, %v10086_v1, %v8257_v40  ;;  %10093 = vpow2.f32 %v9484_v39 }
 0x6dc   : > { %v6951_v8 = vadd.f32 %v15804_v51, %v6950_v24  ;;  %v10092_v48 = vpop.eup %10091  ;;  %v8266_v58 = vsel %vm8263_vm8, %v8265_v52, %v8261_v42  ;;  %10095 = vrcp.f32 %v7947_v25  ;;  %v8279_v51 = vand.u32 2147483648, %v16081_v31 }
 0x6dd   : > { %v8617_v15 = vmul.f32 %v8266_v58, %v16031_v59  ;;  %v8269_v56 = vmul.f32 %v10092_v48, %v16081_v31  ;;  %v7425_v12 = vpop.f32.mrf.mxu3  ;;  %vm8274_vm13 = vweird.f32 %v10092_v48  ;;  %v8294_v1 = vand.u32 2147483648, %v7947_v25  ;;  %v16125_v31 = vpop.f32.mrf.mxu0 }
 0x6de   : > { %vm7122_vm11 = vcmp.gt.f32.partialorder %v6951_v8, 0.0  ;;  %v7164_v3 = vmul.f32 0.1, %v6951_v8  ;;  %v7698_v5 = vadd.f32 %v16017_v50, %v7425_v12  ;;  %v10264_v50 = vld [vmem:[%s16291_s11] ss:$0 sm:$0xff]  ;;  %vm8275_vm9 = vmor %vm8273_vm2, %vm8274_vm13  ;;  %v8280_v38 = vor.u32 1.1754944e-38, %v8279_v51 }
 0x6df   : > { %8659 = vst.msk [vmem:[%s15737_s22 + $0x98] sm:$0xff] %vm17296_vm10, %v8617_v15  ;;  %v8270_v11 = vsub.f32 1.0, %v8269_v56  ;;  %v8292_v29 = vand.u32 2147483647, %v7947_v25  ;;  %vm8288_vm3 = vweird.f32 %v7947_v25 }
 0x6e0   : > { %v16107_v59 = vadd.f32 %v15996_v61, %v7698_v5  ;;  %v7206_v54 = vsel %vm7122_vm11, %v6951_v8, %v7164_v3 }
 0x6e1   : > { %v8271_v22 = vmul.f32 %v10092_v48, %v8270_v11  ;;  %v10094_v37 = vpop.eup %10093  ;;  %vm8293_vm15 = vcmp.eq.f32.partialorder %v8292_v29, 8.507059e+37 }
 0x6e2   : > { %v9485_v60 = vmul.f32 -1.442695, %v16107_v59  ;;  %9417 = vmatmul.msk.f32.gmra.mxu3 %vm1949_vm4, %v7206_v54  ;;  %v10096_v17 = vpop.eup %10095  ;;  %v7948_v43 = vadd.f32 1.0, %v10094_v37 }
 0x6e3   : > { %v6953_v44 = vpop.f32.mrf.mxu2  ;;  %v8272_v33 = vadd.f32 %v10092_v48, %v8271_v22  ;;  %v8284_v19 = vmul.f32 %v10096_v17, %v7947_v25  ;;  %vm8289_vm5 = vweird.f32 %v10096_v17 }
 0x6e4   : > { %v6954_v41 = vadd.f32 %v10264_v50, %v6953_v44  ;;  %10097 = vpow2.f32 %v9485_v60  ;;  %vm8290_vm1 = vmor %vm8288_vm3, %vm8289_vm5  ;;  %v8309_v14 = vand.u32 2147483648, %v7948_v43  ;;  %v8307_v52 = vand.u32 2147483647, %v7948_v43 }
 0x6e5   : > { %v8276_v45 = vsel %vm8275_vm9, %v10092_v48, %v8272_v33  ;;  %10099 = vrcp.f32 %v7948_v43  ;;  %v7428_v34 = vpop.f32.mrf.mxu3  ;;  %v8285_v16 = vsub.f32 1.0, %v8284_v19  ;;  %vm8303_vm0 = vweird.f32 %v7948_v43  ;;  %v16136_v58 = vpop.f32.mrf.mxu0 }
 0x6e6   : > { %v8281_v9 = vsel %vm8278_vm12, %v8280_v38, %v8276_v45  ;;  %vm7123_vm7 = vcmp.gt.f32.partialorder %v6954_v41, 0.0  ;;  %v7165_v21 = vmul.f32 0.1, %v6954_v41  ;;  %v7701_v20 = vadd.f32 %v16043_v62, %v7428_v34 }
 0x6e7   : > { %v8618_v26 = vmul.f32 %v8281_v9, %v16053_v63  ;;  %v8286_v7 = vmul.f32 %v10096_v17, %v8285_v16  ;;  %v8295_v62 = vor.u32 1.1754944e-38, %v8294_v1  ;;  %v8310_v39 = vor.u32 1.1754944e-38, %v8309_v14 }
 0x6e8   : > { %v16122_v32 = vadd.f32 %v15996_v61, %v7701_v20  ;;  %v7207_v6 = vsel %vm7123_vm7, %v6954_v41, %v7165_v21 }
 0x6e9   : > { %8660 = vst.msk [vmem:[%s15737_s22 + $0xa0] sm:$0xff] %vm17297_vm14, %v8618_v26  ;;  %v8287_v46 = vadd.f32 %v10096_v17, %v8286_v7 }
 0x6ea   : > { %v10098_v0 = vpop.eup %10097  ;;  %9418 = vmatmul.msk.f32.gmra.mxu3 %vm1949_vm4, %v7207_v6  ;;  %v9486_v10 = vmul.f32 -1.442695, %v16122_v32  ;;  %vm17298_vm4 = vmmov %vm17296_vm10  ;;  %vm8308_vm10 = vcmp.eq.f32.partialorder %v8307_v52, 8.507059e+37 }
 0x6eb   : > { %v10100_v63 = vpop.eup %10099  ;;  %v7949_v47 = vadd.f32 1.0, %v10098_v0  ;;  %v8291_v36 = vsel %vm8290_vm1, %v10096_v17, %v8287_v46  ;;  %vm17299_vm11 = vmmov %vm17298_vm4 }
 0x6ec   : > { %v8299_v18 = vmul.f32 %v10100_v63, %v7948_v43  ;;  %v8296_v55 = vsel %vm8293_vm15, %v8295_v62, %v8291_v36  ;;  %vm8304_vm6 = vweird.f32 %v10100_v63  ;;  %vm17300_vm7 = vmmov %vm17298_vm4 }
 0x6ed   : > { %10101 = vrcp.f32 %v7949_v47  ;;  %v7431_v49 = vpop.f32.mrf.mxu3  ;;  %v8619_v2 = vmul.f32 %v8296_v55, %v16074_v13  ;;  %vm8305_vm8 = vmor %vm8303_vm0, %vm8304_vm6  ;;  %v8324_v5 = vand.u32 2147483648, %v7949_v47  ;;  %v8322_v51 = vand.u32 2147483647, %v7949_v47  ;;  %v16147_v43 = vpop.f32.mrf.mxu0 }
 0x6ee   : > { %v8300_v4 = vsub.f32 1.0, %v8299_v18  ;;  %10103 = vpow2.f32 %v9486_v10  ;;  %v7704_v40 = vadd.f32 %v16065_v28, %v7431_v49  ;;  %vm8318_vm2 = vweird.f32 %v7949_v47 }
 0x6ef   : > { %8661 = vst.msk [vmem:[%s15737_s22 + $0xa8] sm:$0xff] %vm17298_vm4, %v8619_v2  ;;  %vm8323_vm12 = vcmp.eq.f32.partialorder %v8322_v51, 8.507059e+37 }
 0x6f0   : > { %v8301_v35 = vmul.f32 %v10100_v63, %v8300_v4  ;;  %v16133_v24 = vadd.f32 %v15996_v61, %v7704_v40 }
 0x6f2   : > { %v8302_v53 = vadd.f32 %v10100_v63, %v8301_v35  ;;  %v9487_v13 = vmul.f32 -1.442695, %v16133_v24 }
 0x6f3   : > { %v10102_v42 = vpop.eup %10101 }
 0x6f4   : > { %v10104_v8 = vpop.eup %10103  ;;  %v8306_v48 = vsel %vm8305_vm8, %v10100_v63, %v8302_v53  ;;  %v8314_v28 = vmul.f32 %v10102_v42, %v7949_v47  ;;  %10105 = vpow2.f32 %v9487_v13  ;;  %vm8319_vm13 = vweird.f32 %v10102_v42 }
 0x6f5   : > { %v8311_v25 = vsel %vm8308_vm10, %v8310_v39, %v8306_v48  ;;  %v7950_v15 = vadd.f32 1.0, %v10104_v8  ;;  %v7434_v56 = vpop.f32.mrf.mxu3  ;;  %vm8320_vm9 = vmor %vm8318_vm2, %vm8319_vm13  ;;  %v16158_v36 = vpop.f32.mrf.mxu0 }
 0x6f6   : > { %v8620_v12 = vmul.f32 %v8311_v25, %v16094_v57  ;;  %v8315_v11 = vsub.f32 1.0, %v8314_v28  ;;  %v7707_v3 = vadd.f32 %v16088_v23, %v7434_v56  ;;  %v8325_v57 = vor.u32 1.1754944e-38, %v8324_v5 }
 0x6f7   : > { %10107 = vrcp.f32 %v7950_v15  ;;  %v8339_v9 = vand.u32 2147483648, %v7950_v15  ;;  %v8337_v1 = vand.u32 2147483647, %v7950_v15  ;;  %vm8333_vm5 = vweird.f32 %v7950_v15 }
 0x6f8   : > { %8662 = vst.msk [vmem:[%s15737_s22 + $0xb0] sm:$0xff] %vm17299_vm11, %v8620_v12  ;;  %v8316_v30 = vmul.f32 %v10102_v42, %v8315_v11  ;;  %v16143_v22 = vadd.f32 %v15996_v61, %v7707_v3  ;;  %vm17301_vm11 = vmmov %vm17298_vm4 }
 0x6f9   : > { %v8340_v29 = vor.u32 1.1754944e-38, %v8339_v9  ;;  %vm8338_vm1 = vcmp.eq.f32.partialorder %v8337_v1, 8.507059e+37 }
 0x6fa   : > { %v8317_v54 = vadd.f32 %v10102_v42, %v8316_v30  ;;  %v9488_v44 = vmul.f32 -1.442695, %v16143_v22  ;;  %v10106_v37 = vpop.eup %10105 }
 0x6fb   : > { %v7951_v23 = vadd.f32 1.0, %v10106_v37 }
 0x6fc   : > { %v8321_v33 = vsel %vm8320_vm9, %v10102_v42, %v8317_v54  ;;  %10109 = vpow2.f32 %v9488_v44 }
 0x6fd   : > { %v10108_v60 = vpop.eup %10107  ;;  %v8326_v50 = vsel %vm8323_vm12, %v8325_v57, %v8321_v33  ;;  %v7437_v41 = vpop.f32.mrf.mxu3  ;;  %10111 = vrcp.f32 %v7951_v23  ;;  %v8354_v10 = vand.u32 2147483648, %v7951_v23  ;;  %v8352_v55 = vand.u32 2147483647, %v7951_v23  ;;  %vm17302_vm12 = vmmov %vm17298_vm4 }
 0x6fe   : > { %v8621_v17 = vmul.f32 %v8326_v50, %v16107_v59  ;;  %v8329_v38 = vmul.f32 %v10108_v60, %v7950_v15  ;;  %v7710_v45 = vadd.f32 %v16109_v27, %v7437_v41  ;;  %vm8334_vm14 = vweird.f32 %v10108_v60  ;;  %v7724_v3 = vpop.f32.mrf.mxu0 }
 0x6ff   : > { %vm8335_vm3 = vmor %vm8333_vm5, %vm8334_vm14  ;;  %vm8348_vm6 = vweird.f32 %v7951_v23  ;;  %vm8353_vm8 = vcmp.eq.f32.partialorder %v8352_v55, 8.507059e+37 }
 0x700   : > { %8663 = vst.msk [vmem:[%s15737_s22 + $0xb8] sm:$0xff] %vm17300_vm7, %v8621_v17  ;;  %v8330_v19 = vsub.f32 1.0, %v8329_v38  ;;  %v16153_v34 = vadd.f32 %v15996_v61, %v7710_v45 }
 0x702   : > { %v10110_v26 = vpop.eup %10109  ;;  %v8331_v16 = vmul.f32 %v10108_v60, %v8330_v19  ;;  %v9489_v59 = vmul.f32 -1.442695, %v16153_v34 }
 0x703   : > { %v7952_v21 = vadd.f32 1.0, %v10110_v26  ;;  %v10112_v20 = vpop.eup %10111 }
 0x704   : > { %v8332_v7 = vadd.f32 %v10108_v60, %v8331_v16  ;;  %v8344_v27 = vmul.f32 %v10112_v20, %v7951_v23  ;;  %vm8349_vm15 = vweird.f32 %v10112_v20 }
 0x705   : > { %10113 = vrcp.f32 %v7952_v21  ;;  %v7440_v6 = vpop.f32.mrf.mxu3  ;;  %vm8350_vm0 = vmor %vm8348_vm6, %vm8349_vm15  ;;  %v8369_v48 = vand.u32 2147483648, %v7952_v21  ;;  %v8367_v25 = vand.u32 2147483647, %v7952_v21  ;;  %vm8363_vm13 = vweird.f32 %v7952_v21 }
 0x706   : > { %v8336_v0 = vsel %vm8335_vm3, %v10108_v60, %v8332_v7  ;;  %10115 = vpow2.f32 %v9489_v59  ;;  %v8345_v63 = vsub.f32 1.0, %v8344_v27  ;;  %v7713_v62 = vadd.f32 %v16125_v31, %v7440_v6  ;;  %v7727_v9 = vpop.f32.mrf.mxu0  ;;  %vm17303_vm15 = vmmov %vm17298_vm4 }
 0x707   : > { %v8341_v46 = vsel %vm8338_vm1, %v8340_v29, %v8336_v0  ;;  %v8355_v31 = vor.u32 1.1754944e-38, %v8354_v10  ;;  %vm8368_vm9 = vcmp.eq.f32.partialorder %v8367_v25, 8.507059e+37 }
 0x708   : > { %v8622_v47 = vmul.f32 %v8341_v46, %v16122_v32  ;;  %v8346_v18 = vmul.f32 %v10112_v20, %v8345_v63  ;;  %v16161_v49 = vadd.f32 %v15996_v61, %v7713_v62 }
 0x70a   : > { %8664 = vst.msk [vmem:[%s15737_s22 + $0xc0] sm:$0xff] %vm17298_vm4, %v8622_v47  ;;  %v8347_v4 = vadd.f32 %v10112_v20, %v8346_v18  ;;  %v9490_v14 = vmul.f32 -1.442695, %v16161_v49 }
 0x70b   : > { %v10114_v2 = vpop.eup %10113 }
 0x70c   : > { %v10116_v40 = vpop.eup %10115  ;;  %v8359_v32 = vmul.f32 %v10114_v2, %v7952_v21  ;;  %v8351_v35 = vsel %vm8350_vm0, %v10112_v20, %v8347_v4  ;;  %10117 = vpow2.f32 %v9490_v14  ;;  %vm8364_vm10 = vweird.f32 %v10114_v2 }
 0x70d   : > { %v7953_v52 = vadd.f32 1.0, %v10116_v40  ;;  %v7443_v53 = vpop.f32.mrf.mxu3  ;;  %v8356_v42 = vsel %vm8353_vm8, %v8355_v31, %v8351_v35  ;;  %vm8365_vm2 = vmor %vm8363_vm13, %vm8364_vm10 }
 0x70e   : > { %v8360_v39 = vsub.f32 1.0, %v8359_v32  ;;  %v7716_v13 = vadd.f32 %v16136_v58, %v7443_v53  ;;  %v8623_v8 = vmul.f32 %v8356_v42, %v16133_v24  ;;  %v8370_v58 = vor.u32 1.1754944e-38, %v8369_v48  ;;  %v7730_v40 = vpop.f32.mrf.mxu0  ;;  %vm17304_vm10 = vmmov %vm17301_vm11 }
 0x70f   : > { %10119 = vrcp.f32 %v7953_v52  ;;  %v8384_v23 = vand.u32 2147483648, %v7953_v52  ;;  %v8382_v17 = vand.u32 2147483647, %v7953_v52  ;;  %vm8378_vm14 = vweird.f32 %v7953_v52 }
 0x710   : > { %v8361_v28 = vmul.f32 %v10114_v2, %v8360_v39  ;;  %v16169_v15 = vadd.f32 %v15996_v61, %v7716_v13  ;;  %8665 = vst.msk [vmem:[%s15737_s22 + $0xc8] sm:$0xff] %vm17301_vm11, %v8623_v8 }
 0x711   : > { %vm8383_vm3 = vcmp.eq.f32.partialorder %v8382_v17, 8.507059e+37 }
 0x712   : > { %v8362_v56 = vadd.f32 %v10114_v2, %v8361_v28  ;;  %v9491_v12 = vmul.f32 -1.442695, %v16169_v15  ;;  %v10118_v11 = vpop.eup %10117 }
 0x713   : > { %v7954_v5 = vadd.f32 1.0, %v10118_v11 }
 0x714   : > { %v8366_v24 = vsel %vm8365_vm2, %v10114_v2, %v8362_v56  ;;  %10121 = vpow2.f32 %v9491_v12 }
 0x715   : > { %v10120_v30 = vpop.eup %10119  ;;  %v8371_v51 = vsel %vm8368_vm9, %v8370_v58, %v8366_v24  ;;  %v7446_v54 = vpop.f32.mrf.mxu3  ;;  %10123 = vrcp.f32 %v7954_v5  ;;  %v8399_v29 = vand.u32 2147483648, %v7954_v5  ;;  %v8397_v6 = vand.u32 2147483647, %v7954_v5  ;;  %vm17305_vm9 = vmmov %vm17304_vm10 }
 0x716   : > { %v8624_v44 = vmul.f32 %v8371_v51, %v16143_v22  ;;  %v8374_v37 = vmul.f32 %v10120_v30, %v7953_v52  ;;  %v7719_v57 = vadd.f32 %v16147_v43, %v7446_v54  ;;  %vm8379_vm7 = vweird.f32 %v10120_v30  ;;  %v7733_v24 = vpop.f32.mrf.mxu0 }
 0x717   : > { %vm8380_vm5 = vmor %vm8378_vm14, %vm8379_vm7  ;;  %v8385_v43 = vor.u32 1.1754944e-38, %v8384_v23  ;;  %vm8393_vm4 = vweird.f32 %v7954_v5  ;;  %v8400_v10 = vor.u32 1.1754944e-38, %v8399_v29  ;;  %vm8398_vm0 = vcmp.eq.f32.partialorder %v8397_v6, 8.507059e+37 }
 0x718   : > { %8666 = vst.msk [vmem:[%s15737_s22 + $0xd0] sm:$0xff] %vm17302_vm12, %v8624_v44  ;;  %v8375_v33 = vsub.f32 1.0, %v8374_v37  ;;  %v16179_v60 = vadd.f32 %v15996_v61, %v7719_v57 }
 0x71a   : > { %v10122_v50 = vpop.eup %10121  ;;  %v8376_v41 = vmul.f32 %v10120_v30, %v8375_v33  ;;  %v9492_v45 = vmul.f32 -1.442695, %v16179_v60 }
 0x71b   : > { %v7955_v38 = vadd.f32 1.0, %v10122_v50  ;;  %v10124_v19 = vpop.eup %10123 }
 0x71c   : > { %v8377_v22 = vadd.f32 %v10120_v30, %v8376_v41  ;;  %v8389_v26 = vmul.f32 %v10124_v19, %v7954_v5  ;;  %vm8394_vm1 = vweird.f32 %v10124_v19 }
 0x71d   : > { %10125 = vrcp.f32 %v7955_v38  ;;  %v7449_v16 = vpop.f32.mrf.mxu3  ;;  %vm8395_vm6 = vmor %vm8393_vm4, %vm8394_vm1  ;;  %v8414_v32 = vand.u32 2147483648, %v7955_v38  ;;  %v8412_v52 = vand.u32 2147483647, %v7955_v38  ;;  %vm8408_vm11 = vweird.f32 %v7955_v38 }
 0x71e   : > { %v8381_v1 = vsel %vm8380_vm5, %v10120_v30, %v8377_v22  ;;  %10127 = vpow2.f32 %v9492_v45  ;;  %v8390_v59 = vsub.f32 1.0, %v8389_v26  ;;  %v7722_v20 = vadd.f32 %v16158_v36, %v7449_v16  ;;  %vm17306_vm1 = vmmov %vm17305_vm9 }
 0x71f   : > { %v8386_v21 = vsel %vm8383_vm3, %v8385_v43, %v8381_v1  ;;  %v8415_v8 = vor.u32 1.1754944e-38, %v8414_v32  ;;  %vm8413_vm2 = vcmp.eq.f32.partialorder %v8412_v52, 8.507059e+37 }
 0x720   : > { %v8625_v7 = vmul.f32 %v8386_v21, %v16153_v34  ;;  %v8391_v27 = vmul.f32 %v10124_v19, %v8390_v59  ;;  %v16185_v0 = vadd.f32 %v15996_v61, %v7722_v20  ;;  %v7736_v21 = vpop.f32.mrf.mxu0 }
 0x722   : > { %8667 = vst.msk [vmem:[%s15737_s22 + $0xd8] sm:$0xff] %vm17303_vm15, %v8625_v7  ;;  %v8392_v63 = vadd.f32 %v10124_v19, %v8391_v27  ;;  %v9493_v62 = vmul.f32 -1.442695, %v16185_v0 }
 0x723   : > { %v10126_v46 = vpop.eup %10125 }
 0x724   : > { %v10128_v47 = vpop.eup %10127  ;;  %v8404_v36 = vmul.f32 %v10126_v46, %v7955_v38  ;;  %v8396_v18 = vsel %vm8395_vm6, %v10124_v19, %v8392_v63  ;;  %10129 = vpow2.f32 %v9493_v62  ;;  %vm8409_vm8 = vweird.f32 %v10126_v46 }
 0x725   : > { %v7956_v34 = vadd.f32 1.0, %v10128_v47  ;;  %v7452_v55 = vpop.f32.mrf.mxu3  ;;  %v8401_v2 = vsel %vm8398_vm0, %v8400_v10, %v8396_v18  ;;  %vm8410_vm13 = vmor %vm8408_vm11, %vm8409_vm8 }
 0x726   : > { %v8405_v4 = vsub.f32 1.0, %v8404_v36  ;;  %v7725_v14 = vadd.f32 %v7724_v3, %v7452_v55  ;;  %v8626_v31 = vmul.f32 %v8401_v2, %v16161_v49  ;;  %vm17307_vm8 = vmmov %vm17306_vm1 }
 0x727   : > { %10131 = vrcp.f32 %v7956_v34  ;;  %v8429_v5 = vand.u32 2147483648, %v7956_v34  ;;  %v8427_v44 = vand.u32 2147483647, %v7956_v34  ;;  %vm8423_vm7 = vweird.f32 %v7956_v34 }
 0x728   : > { %v8406_v35 = vmul.f32 %v10126_v46, %v8405_v4  ;;  %v16192_v53 = vadd.f32 %v15996_v61, %v7725_v14  ;;  %8668 = vst.msk [vmem:[%s15737_s22 + $0xe0] sm:$0xff] %vm17304_vm10, %v8626_v31 }
 0x729   : > { %v8430_v23 = vor.u32 1.1754944e-38, %v8429_v5  ;;  %vm8428_vm5 = vcmp.eq.f32.partialorder %v8427_v44, 8.507059e+37 }
 0x72a   : > { %v8407_v42 = vadd.f32 %v10126_v46, %v8406_v35  ;;  %v9494_v39 = vmul.f32 -1.442695, %v16192_v53  ;;  %v10130_v13 = vpop.eup %10129  ;;  %v7739_v35 = vpop.f32.mrf.mxu0 }
 0x72b   : > { %v7957_v49 = vadd.f32 1.0, %v10130_v13 }
 0x72c   : > { %v8411_v48 = vsel %vm8410_vm13, %v10126_v46, %v8407_v42  ;;  %10133 = vpow2.f32 %v9494_v39 }
 0x72d   : > { %v10132_v28 = vpop.eup %10131  ;;  %v8416_v25 = vsel %vm8413_vm2, %v8415_v8, %v8411_v48  ;;  %v7455_v56 = vpop.f32.mrf.mxu3  ;;  %10135 = vrcp.f32 %v7957_v49  ;;  %v8442_v26 = vand.u32 2147483647, %v7957_v49  ;;  %vm8438_vm15 = vweird.f32 %v7957_v49  ;;  %vm17308_vm2 = vmmov %vm17306_vm1 }
 0x72e   : > { %v8627_v12 = vmul.f32 %v8416_v25, %v16169_v15  ;;  %v8419_v11 = vmul.f32 %v10132_v28, %v7956_v34  ;;  %v7728_v3 = vadd.f32 %v7727_v9, %v7455_v56  ;;  %vm8424_vm12 = vweird.f32 %v10132_v28 }
 0x72f   : > { %vm8425_vm14 = vmor %vm8423_vm7, %vm8424_vm12  ;;  %v8444_v9 = vand.u32 2147483648, %v7957_v49  ;;  %vm8443_vm6 = vcmp.eq.f32.partialorder %v8442_v26, 8.507059e+37 }
 0x730   : > { %8669 = vst.msk [vmem:[%s15737_s22 + $0xe8] sm:$0xff] %vm17305_vm9, %v8627_v12  ;;  %v8420_v58 = vsub.f32 1.0, %v8419_v11  ;;  %v16201_v30 = vadd.f32 %v15996_v61, %v7728_v3 }
 0x731   : > { %v8445_v29 = vor.u32 1.1754944e-38, %v8444_v9 }
 0x732   : > { %v10134_v51 = vpop.eup %10133  ;;  %v8421_v54 = vmul.f32 %v10132_v28, %v8420_v58  ;;  %v9495_v57 = vmul.f32 -1.442695, %v16201_v30  ;;  %v7742_v44 = vpop.f32.mrf.mxu0 }
 0x733   : > { %v7958_v37 = vadd.f32 1.0, %v10134_v51  ;;  %v10136_v33 = vpop.eup %10135 }
 0x734   : > { %v8422_v15 = vadd.f32 %v10132_v28, %v8421_v54  ;;  %v8434_v50 = vmul.f32 %v10136_v33, %v7957_v49  ;;  %vm8439_vm3 = vweird.f32 %v10136_v33  ;;  %v16224_v49 = vld [vmem:[%s16294_s14] ss:$0 sm:$0xff] }
 0x735   : > { %10137 = vrcp.f32 %v7958_v37  ;;  %v7458_v41 = vpop.f32.mrf.mxu3  ;;  %vm8440_vm4 = vmor %vm8438_vm15, %vm8439_vm3  ;;  %v8459_v36 = vand.u32 2147483648, %v7958_v37  ;;  %v8457_v34 = vand.u32 2147483647, %v7958_v37  ;;  %vm8453_vm10 = vweird.f32 %v7958_v37 }
 0x736   : > { %v8426_v17 = vsel %vm8425_vm14, %v10132_v28, %v8422_v15  ;;  %10139 = vpow2.f32 %v9495_v57  ;;  %v8435_v45 = vsub.f32 1.0, %v8434_v50  ;;  %v7731_v19 = vadd.f32 %v7730_v40, %v7458_v41  ;;  %vm17309_vm3 = vmmov %vm17306_vm1 }
 0x737   : > { %v8431_v38 = vsel %vm8428_vm5, %v8430_v23, %v8426_v17  ;;  %v8460_v40 = vor.u32 1.1754944e-38, %v8459_v36  ;;  %vm8458_vm13 = vcmp.eq.f32.partialorder %v8457_v34, 8.507059e+37 }
 0x738   : > { %v8628_v22 = vmul.f32 %v8431_v38, %v16179_v60  ;;  %v8436_v43 = vmul.f32 %v10136_v33, %v8435_v45  ;;  %v16206_v16 = vadd.f32 %v15996_v61, %v7731_v19 }
 0x73a   : > { %8670 = vst.msk [vmem:[%s15737_s22 + $0xf0] sm:$0xff] %vm17306_vm1, %v8628_v22  ;;  %v8437_v59 = vadd.f32 %v10136_v33, %v8436_v43  ;;  %v9496_v20 = vmul.f32 -1.442695, %v16206_v16 }
 0x73b   : > { %v10138_v1 = vpop.eup %10137 }
 0x73c   : > { %v10140_v7 = vpop.eup %10139  ;;  %v8449_v27 = vmul.f32 %v10138_v1, %v7958_v37  ;;  %v8441_v60 = vsel %vm8440_vm4, %v10136_v33, %v8437_v59  ;;  %10141 = vpow2.f32 %v9496_v20  ;;  %vm8454_vm0 = vweird.f32 %v10138_v1 }
 0x73d   : > { %v7959_v6 = vadd.f32 1.0, %v10140_v7  ;;  %v7461_v46 = vpop.f32.mrf.mxu3  ;;  %v8446_v63 = vsel %vm8443_vm6, %v8445_v29, %v8441_v60  ;;  %vm8455_vm11 = vmor %vm8453_vm10, %vm8454_vm0 }
 0x73e   : > { %v8450_v62 = vsub.f32 1.0, %v8449_v27  ;;  %v7734_v47 = vadd.f32 %v7733_v24, %v7461_v46  ;;  %v8629_v10 = vmul.f32 %v8446_v63, %v16185_v0  ;;  %v7745_v46 = vpop.f32.mrf.mxu0  ;;  %vm17310_vm0 = vmmov %vm17308_vm2 }
 0x73f   : > { %10143 = vrcp.f32 %v7959_v6  ;;  %v8474_v48 = vand.u32 2147483648, %v7959_v6  ;;  %v8472_v12 = vand.u32 2147483647, %v7959_v6  ;;  %vm8468_vm12 = vweird.f32 %v7959_v6 }
 0x740   : > { %v8451_v18 = vmul.f32 %v10138_v1, %v8450_v62  ;;  %v16213_v55 = vadd.f32 %v15996_v61, %v7734_v47  ;;  %8671 = vst.msk [vmem:[%s15737_s22 + $0xf8] sm:$0xff] %vm17307_vm8, %v8629_v10 }
 0x741   : > { %v8475_v24 = vor.u32 1.1754944e-38, %v8474_v48  ;;  %vm8473_vm14 = vcmp.eq.f32.partialorder %v8472_v12, 8.507059e+37 }
 0x742   : > { %v8452_v2 = vadd.f32 %v10138_v1, %v8451_v18  ;;  %v9497_v4 = vmul.f32 -1.442695, %v16213_v55  ;;  %v10142_v14 = vpop.eup %10141 }
 0x743   : > { %v7960_v0 = vadd.f32 1.0, %v10142_v14 }
 0x744   : > { %v8456_v31 = vsel %vm8455_vm11, %v10138_v1, %v8452_v2  ;;  %10145 = vpow2.f32 %v9497_v4 }
 0x745   : > { %v10144_v32 = vpop.eup %10143  ;;  %v8461_v52 = vsel %vm8458_vm13, %v8460_v40, %v8456_v31  ;;  %v7464_v42 = vpop.f32.mrf.mxu3  ;;  %10147 = vrcp.f32 %v7960_v0  ;;  %v8489_v23 = vand.u32 2147483648, %v7960_v0  ;;  %v8487_v41 = vand.u32 2147483647, %v7960_v0  ;;  %vm17311_vm13 = vmmov %vm17310_vm0 }
 0x746   : > { %v8630_v61 = vmul.f32 %v8461_v52, %v16192_v53  ;;  %v8464_v39 = vmul.f32 %v10144_v32, %v7959_v6  ;;  %v7737_v13 = vadd.f32 %v7736_v21, %v7464_v42  ;;  %vm8469_vm9 = vweird.f32 %v10144_v32 }
 0x747   : > { %vm8470_vm7 = vmor %vm8468_vm12, %vm8469_vm9  ;;  %vm8483_vm1 = vweird.f32 %v7960_v0  ;;  %v8490_v9 = vor.u32 1.1754944e-38, %v8489_v23  ;;  %vm8488_vm4 = vcmp.eq.f32.partialorder %v8487_v41, 8.507059e+37 }
 0x748   : > { %8672 = vst.msk [vmem:[%s15737_s22 + $0x100] sm:$0xff] %vm17308_vm2, %v8630_v61  ;;  %v8465_v8 = vsub.f32 1.0, %v8464_v39  ;;  %v16227_v28 = vadd.f32 %v16224_v49, %v7737_v13  ;;  %v7748_v61 = vpop.f32.mrf.mxu0 }
 0x74a   : > { %v10146_v25 = vpop.eup %10145  ;;  %v8466_v56 = vmul.f32 %v10144_v32, %v8465_v8  ;;  %v9498_v11 = vmul.f32 -1.442695, %v16227_v28 }
 0x74b   : > { %v7961_v53 = vadd.f32 1.0, %v10146_v25  ;;  %v10148_v3 = vpop.eup %10147 }
 0x74c   : > { %v8467_v58 = vadd.f32 %v10144_v32, %v8466_v56  ;;  %v8479_v5 = vmul.f32 %v10148_v3, %v7960_v0  ;;  %vm8484_vm5 = vweird.f32 %v10148_v3 }
 0x74d   : > { %10149 = vrcp.f32 %v7961_v53  ;;  %v7467_v51 = vpop.f32.mrf.mxu3  ;;  %vm8485_vm15 = vmor %vm8483_vm1, %vm8484_vm5  ;;  %v8504_v29 = vand.u32 2147483648, %v7961_v53  ;;  %v8502_v60 = vand.u32 2147483647, %v7961_v53  ;;  %vm8498_vm8 = vweird.f32 %v7961_v53 }
 0x74e   : > { %v8471_v54 = vsel %vm8470_vm7, %v10144_v32, %v8467_v58  ;;  %10151 = vpow2.f32 %v9498_v11  ;;  %v8480_v57 = vsub.f32 1.0, %v8479_v5  ;;  %v7740_v33 = vadd.f32 %v7739_v35, %v7467_v51  ;;  %vm17312_vm5 = vmmov %vm17310_vm0 }
 0x74f   : > { %v8476_v37 = vsel %vm8473_vm14, %v8475_v24, %v8471_v54  ;;  %v8505_v10 = vor.u32 1.1754944e-38, %v8504_v29  ;;  %vm8503_vm11 = vcmp.eq.f32.partialorder %v8502_v60, 8.507059e+37 }
 0x750   : > { %v8631_v15 = vmul.f32 %v8476_v37, %v16201_v30  ;;  %v8481_v50 = vmul.f32 %v10148_v3, %v8480_v57  ;;  %v16232_v17 = vadd.f32 %v16224_v49, %v7740_v33 }
 0x752   : > { %8673 = vst.msk [vmem:[%s15737_s22 + $0x108] sm:$0xff] %vm17309_vm3, %v8631_v15  ;;  %v8482_v45 = vadd.f32 %v10148_v3, %v8481_v50  ;;  %v9499_v19 = vmul.f32 -1.442695, %v16232_v17  ;;  %v7751_v50 = vpop.f32.mrf.mxu0 }
 0x753   : > { %v10150_v38 = vpop.eup %10149 }
 0x754   : > { %v10152_v22 = vpop.eup %10151  ;;  %v8494_v43 = vmul.f32 %v10150_v38, %v7961_v53  ;;  %v8486_v26 = vsel %vm8485_vm15, %v10148_v3, %v8482_v45  ;;  %10153 = vpow2.f32 %v9499_v19  ;;  %vm8499_vm6 = vweird.f32 %v10150_v38 }
 0x755   : > { %v7962_v30 = vadd.f32 1.0, %v10152_v22  ;;  %v7470_v1 = vpop.f32.mrf.mxu3  ;;  %v8491_v21 = vsel %vm8488_vm4, %v8490_v9, %v8486_v26  ;;  %vm8500_vm10 = vmor %vm8498_vm8, %vm8499_vm6 }
 0x756   : > { %v8495_v59 = vsub.f32 1.0, %v8494_v43  ;;  %v7743_v20 = vadd.f32 %v7742_v44, %v7470_v1  ;;  %v8632_v7 = vmul.f32 %v8491_v21, %v16206_v16  ;;  %vm17313_vm6 = vmmov %vm17310_vm0 }
 0x757   : > { %10155 = vrcp.f32 %v7962_v30  ;;  %v8519_v0 = vand.u32 2147483648, %v7962_v30  ;;  %v8517_v42 = vand.u32 2147483647, %v7962_v30  ;;  %vm8513_vm9 = vweird.f32 %v7962_v30 }
 0x758   : > { %v8496_v27 = vmul.f32 %v10150_v38, %v8495_v59  ;;  %v16239_v6 = vadd.f32 %v16224_v49, %v7743_v20  ;;  %8674 = vst.msk [vmem:[%s15737_s22 + $0x110] sm:$0xff] %vm17310_vm0, %v8632_v7 }
 0x759   : > { %v8520_v48 = vor.u32 1.1754944e-38, %v8519_v0  ;;  %vm8518_vm7 = vcmp.eq.f32.partialorder %v8517_v42, 8.507059e+37 }
 0x75a   : > { %v8497_v63 = vadd.f32 %v10150_v38, %v8496_v27  ;;  %v9500_v62 = vmul.f32 -1.442695, %v16239_v6  ;;  %v10154_v47 = vpop.eup %10153 }
 0x75b   : > { %v7963_v36 = vadd.f32 1.0, %v10154_v47 }
 0x75c   : > { %v8501_v16 = vsel %vm8500_vm10, %v10150_v38, %v8497_v63  ;;  %10157 = vpow2.f32 %v9500_v62 }
 0x75d   : > { %v10156_v18 = vpop.eup %10155  ;;  %v8506_v34 = vsel %vm8503_vm11, %v8505_v10, %v8501_v16  ;;  %v7473_v2 = vpop.f32.mrf.mxu3  ;;  %10159 = vrcp.f32 %v7963_v36  ;;  %v8534_v24 = vand.u32 2147483648, %v7963_v36  ;;  %v8532_v51 = vand.u32 2147483647, %v7963_v36  ;;  %vm17314_vm11 = vmmov %vm17312_vm5 }
 0x75e   : > { %v8633_v4 = vmul.f32 %v8506_v34, %v16213_v55  ;;  %v8509_v14 = vmul.f32 %v10156_v18, %v7962_v30  ;;  %v7746_v40 = vadd.f32 %v7745_v46, %v7473_v2  ;;  %vm8514_vm2 = vweird.f32 %v10156_v18 }
 0x75f   : > { %vm8515_vm12 = vmor %vm8513_vm9, %vm8514_vm2  ;;  %vm8528_vm3 = vweird.f32 %v7963_v36  ;;  %v8535_v15 = vor.u32 1.1754944e-38, %v8534_v24  ;;  %vm8533_vm15 = vcmp.eq.f32.partialorder %v8532_v51, 8.507059e+37 }
 0x760   : > { %8675 = vst.msk [vmem:[%s15737_s22 + $0x118] sm:$0xff] %vm17311_vm13, %v8633_v4  ;;  %v8510_v31 = vsub.f32 1.0, %v8509_v14  ;;  %v16248_v32 = vadd.f32 %v16224_v49, %v7746_v40 }
 0x762   : > { %v10158_v35 = vpop.eup %10157  ;;  %v8511_v52 = vmul.f32 %v10156_v18, %v8510_v31  ;;  %v9501_v13 = vmul.f32 -1.442695, %v16248_v32 }
 0x763   : > { %v7964_v39 = vadd.f32 1.0, %v10158_v35  ;;  %v10160_v8 = vpop.eup %10159 }
 0x764   : > { %v8512_v55 = vadd.f32 %v10156_v18, %v8511_v52  ;;  %v8524_v25 = vmul.f32 %v10160_v8, %v7963_v36  ;;  %vm8529_vm14 = vweird.f32 %v10160_v8 }
 0x765   : > { %10161 = vrcp.f32 %v7964_v39  ;;  %v7476_v56 = vpop.f32.mrf.mxu3  ;;  %vm8530_vm1 = vmor %vm8528_vm3, %vm8529_vm14  ;;  %v8549_v43 = vand.u32 2147483648, %v7964_v39  ;;  %v8547_v30 = vand.u32 2147483647, %v7964_v39  ;;  %vm8543_vm0 = vweird.f32 %v7964_v39 }
 0x766   : > { %v8516_v12 = vsel %vm8515_vm12, %v10156_v18, %v8512_v55  ;;  %10163 = vpow2.f32 %v9501_v13  ;;  %v8525_v11 = vsub.f32 1.0, %v8524_v25  ;;  %v7749_v3 = vadd.f32 %v7748_v61, %v7476_v56  ;;  %vm17315_vm14 = vmmov %vm17312_vm5 }
 0x767   : > { %v8521_v53 = vsel %vm8518_vm7, %v8520_v48, %v8516_v12  ;;  %v8550_v7 = vor.u32 1.1754944e-38, %v8549_v43  ;;  %vm8548_vm10 = vcmp.eq.f32.partialorder %v8547_v30, 8.507059e+37 }
 0x768   : > { %v8634_v58 = vmul.f32 %v8521_v53, %v16227_v28  ;;  %v8526_v5 = vmul.f32 %v10160_v8, %v8525_v11  ;;  %v16253_v54 = vadd.f32 %v16224_v49, %v7749_v3 }
 0x76a   : > { %8676 = vst.msk [vmem:[%s15737_s22 + $0x120] sm:$0xff] %vm17312_vm5, %v8634_v58  ;;  %v8527_v37 = vadd.f32 %v10160_v8, %v8526_v5  ;;  %v9502_v57 = vmul.f32 -1.442695, %v16253_v54 }
 0x76b   : > { %v10162_v44 = vpop.eup %10161 }
 0x76c   : > { %v10164_v33 = vpop.eup %10163  ;;  %v8539_v23 = vmul.f32 %v10162_v44, %v7964_v39  ;;  %v8531_v28 = vsel %vm8530_vm1, %v10160_v8, %v8527_v37  ;;  %10165 = vpow2.f32 %v9502_v57  ;;  %vm8544_vm4 = vweird.f32 %v10162_v44 }
 0x76d   : > { %v7965_v41 = vadd.f32 1.0, %v10164_v33  ;;  %v7479_v38 = vpop.f32.mrf.mxu3  ;;  %v8536_v45 = vsel %vm8533_vm15, %v8535_v15, %v8531_v28  ;;  %vm8545_vm8 = vmor %vm8543_vm0, %vm8544_vm4 }
 0x76e   : > { %v8540_v19 = vsub.f32 1.0, %v8539_v23  ;;  %v7752_v22 = vadd.f32 %v7751_v50, %v7479_v38  ;;  %v8635_v9 = vmul.f32 %v8536_v45, %v16232_v17  ;;  %vm17316_vm4 = vmmov %vm17313_vm6 }
 0x76f   : > { %10167 = vrcp.f32 %v7965_v41  ;;  %v8564_v62 = vand.u32 2147483648, %v7965_v41  ;;  %v8562_v16 = vand.u32 2147483647, %v7965_v41  ;;  %vm8558_vm2 = vweird.f32 %v7965_v41 }
 0x770   : > { %v8541_v26 = vmul.f32 %v10162_v44, %v8540_v19  ;;  %v16260_v1 = vadd.f32 %v16224_v49, %v7752_v22  ;;  %8677 = vst.msk [vmem:[%s15737_s22 + $0x128] sm:$0xff] %vm17313_vm6, %v8635_v9 }
 0x771   : > { %v8565_v2 = vor.u32 1.1754944e-38, %v8564_v62  ;;  %vm8563_vm12 = vcmp.eq.f32.partialorder %v8562_v16, 8.507059e+37 }
 0x772   : > { %v8542_v21 = vadd.f32 %v10162_v44, %v8541_v26  ;;  %v9503_v59 = vmul.f32 -1.442695, %v16260_v1  ;;  %v10166_v20 = vpop.eup %10165 }
 0x773   : > { %v7966_v17 = vadd.f32 1.0, %v10166_v20 }
 0x774   : > { %v8546_v29 = vsel %vm8545_vm8, %v10162_v44, %v8542_v21  ;;  %10169 = vpow2.f32 %v9503_v59 }
 0x775   : > { %v10168_v27 = vpop.eup %10167  ;;  %v8551_v60 = vsel %vm8548_vm10, %v8550_v7, %v8546_v29  ;;  %10171 = vrcp.f32 %v7966_v17  ;;  %v8579_v0 = vand.u32 2147483648, %v7966_v17  ;;  %v8577_v52 = vand.u32 2147483647, %v7966_v17  ;;  %vm17317_vm10 = vmmov %vm17316_vm4 }
 0x776   : > { %v8636_v46 = vmul.f32 %v8551_v60, %v16239_v6  ;;  %v8554_v49 = vmul.f32 %v10168_v27, %v7965_v41  ;;  %vm8559_vm13 = vweird.f32 %v10168_v27  ;;  %vm8573_vm5 = vweird.f32 %v7966_v17 }
 0x777   : > { %vm8560_vm9 = vmor %vm8558_vm2, %vm8559_vm13  ;;  %v8580_v39 = vor.u32 1.1754944e-38, %v8579_v0  ;;  %vm8578_vm1 = vcmp.eq.f32.partialorder %v8577_v52, 8.507059e+37 }
 0x778   : > { %8678 = vst.msk [vmem:[%s15737_s22 + $0x130] sm:$0xff] %vm17314_vm11, %v8636_v46  ;;  %v8555_v63 = vsub.f32 1.0, %v8554_v49 }
 0x77a   : > { %v10170_v47 = vpop.eup %10169  ;;  %v8556_v10 = vmul.f32 %v10168_v27, %v8555_v63 }
 0x77b   : > { %v7967_v36 = vadd.f32 1.0, %v10170_v47  ;;  %v10172_v18 = vpop.eup %10171 }
 0x77c   : > { %v8557_v34 = vadd.f32 %v10168_v27, %v8556_v10  ;;  %v8569_v4 = vmul.f32 %v10172_v18, %v7966_v17  ;;  %vm8574_vm7 = vweird.f32 %v10172_v18 }
 0x77d   : > { %10173 = vrcp.f32 %v7967_v36  ;;  %vm8575_vm3 = vmor %vm8573_vm5, %vm8574_vm7  ;;  %v8594_v25 = vand.u32 2147483648, %v7967_v36  ;;  %v8592_v12 = vand.u32 2147483647, %v7967_v36  ;;  %vm8588_vm6 = vweird.f32 %v7967_v36 }
 0x77e   : > { %v8561_v6 = vsel %vm8560_vm9, %v10168_v27, %v8557_v34  ;;  %v8570_v40 = vsub.f32 1.0, %v8569_v4 }
 0x77f   : > { %v8566_v14 = vsel %vm8563_vm12, %v8565_v2, %v8561_v6  ;;  %v8595_v11 = vor.u32 1.1754944e-38, %v8594_v25  ;;  %vm8593_vm8 = vcmp.eq.f32.partialorder %v8592_v12, 8.507059e+37 }
 0x780   : > { %v8637_v31 = vmul.f32 %v8566_v14, %v16248_v32  ;;  %v8571_v35 = vmul.f32 %v10172_v18, %v8570_v40 }
 0x782   : > { %8679 = vst.msk [vmem:[%s15737_s22 + $0x138] sm:$0xff] %vm17315_vm14, %v8637_v31  ;;  %v8572_v61 = vadd.f32 %v10172_v18, %v8571_v35 }
 0x783   : > { %v10174_v42 = vpop.eup %10173 }
 0x784   : > { %v8584_v13 = vmul.f32 %v10174_v42, %v7967_v36  ;;  %v8576_v8 = vsel %vm8575_vm3, %v10172_v18, %v8572_v61  ;;  %vm8589_vm15 = vweird.f32 %v10174_v42 }
 0x785   : > { %v8581_v55 = vsel %vm8578_vm1, %v8580_v39, %v8576_v8  ;;  %vm8590_vm0 = vmor %vm8588_vm6, %vm8589_vm15 }
 0x786   : > { %v8585_v48 = vsub.f32 1.0, %v8584_v13  ;;  %v8638_v32 = vmul.f32 %v8581_v55, %v16253_v54 }
 0x788   : > { %v8586_v56 = vmul.f32 %v10174_v42, %v8585_v48  ;;  %8680 = vst.msk [vmem:[%s15737_s22 + $0x140] sm:$0xff] %vm17316_vm4, %v8638_v32 }
 0x78a   : > { %v8587_v53 = vadd.f32 %v10174_v42, %v8586_v56 }
 0x78c   : > { %v8591_v3 = vsel %vm8590_vm0, %v10174_v42, %v8587_v53 }
 0x78d   : > { %v8596_v58 = vsel %vm8593_vm8, %v8595_v11, %v8591_v3 }
 0x78e   : > { %v8639_v24 = vmul.f32 %v8596_v58, %v16260_v1 }
 0x790   : > { %8681 = vst.msk [vmem:[%s15737_s22 + $0x148] sm:$0xff] %vm17317_vm10, %v8639_v24 }
 0x791 PF: > { %s25_s18 = sadd.s32 1, %s10272_s18  }
 0x792   : > { %p22_p4 = scmp.ge.s32.totalorder %s25_s18, 4  }
 0x794   :  { %24 = sbr.rel (!%p22_p4) target bundleno = 1 (0x1), region = 118 }

</bundles_post_ra>
